<compile_context>
chip_gen: v6e
topology: v6e:2x2x1
jax: 0.10.0
libtpu: 0.0.40
codegen_flags: <defaults>
</compile_context>

<pallas_src>
import math
import functools
from collections import namedtuple

import numpy as np
import jax
import jax.numpy as jnp
from jax import lax
from jax.experimental import pallas as pl
from jax.experimental.pallas import tpu as pltpu

CSCDVTVParams = namedtuple(
    "CSC_DVTV_epsParams", ["deg", "n_channels", "n_filters", "kernel_size", "K", "w"]
)

_EPS = 1e-8


# ----------------------------------------------------------------------------- #
# Shared compile-time helpers
# ----------------------------------------------------------------------------- #

def dct_matrix(C):
    """Orthonormal DCT-II decorrelating channel transform (row 0 = luminance)."""
    n = np.arange(C)
    mat = np.sqrt(2.0 / C) * np.cos(np.pi / C * (n[None, :] + 0.5) * n[:, None])
    mat[0] *= 1.0 / np.sqrt(2.0)
    return mat.astype(np.float32)


def calc_max_singular_P_np(filters, grid=64):
    """Spectral norm of the stacked circular-conv operator of the P filters."""
    P, k, _ = filters.shape
    f = np.zeros((P, grid, grid), np.float32)
    f[:, :k, :k] = filters
    fhat = np.fft.fft2(f)
    return float(np.sqrt(np.max(np.sum(np.abs(fhat) ** 2, axis=0))))


# ----------------------------------------------------------------------------- #
# Fused Pallas kernel: the entire K-step primal-dual iteration for one sample
# ----------------------------------------------------------------------------- #

def _cscdvtv_kernel(
    # scalar-prefetch operands (SMEM)
    b_sm, lam1_sm, lam2_sm, gam1_sm, gam2_sm, gam3_sm,
    # tensor inputs (VMEM blocks, one batch sample each)
    z_ref, mask_ref, a0_ref,
    # output
    o_ref,
    # VMEM scratch (state, persists across the in-kernel K loop)
    x_scr, y1v_scr, y1h_scr, y2_scr, a_scr, r_scr, pw_scr,
    *, P, C, k, M, N, K, w, epsilon, Cmat,
):
    plo = k // 2                       # low-side zero pad ('same' correlation)

    # ---------------- loop-invariant values (hoisted out of the K loop) --------
    z_v = z_ref[0]                     # (C, M, N) observed data
    mask_v = mask_ref[0]               # (C, M, N) inpainting operator (self-adjoint)
    row_lt = lax.broadcasted_iota(jnp.int32, (C, M, N), 1) < (M - 1)
    col_lt = lax.broadcasted_iota(jnp.int32, (C, M, N), 2) < (N - 1)
    is_lum = lax.broadcasted_iota(jnp.int32, (C, M, N), 0) == 0

    # ---------------- per-sample state init (scratch persists across grid) -----
    x_scr[...] = z_v
    y1v_scr[...] = jnp.zeros_like(y1v_scr)
    y1h_scr[...] = jnp.zeros_like(y1h_scr)
    y2_scr[...] = jnp.zeros_like(y2_scr)
    a_scr[...] = jnp.zeros_like(a_scr)                        # zero halo stays zero
    a_scr[:, :, plo:plo + M, plo:plo + N] = a0_ref[0]
    r_scr[...] = jnp.zeros_like(r_scr)                        # zero halo stays zero
    pw_scr[...] = jnp.zeros_like(pw_scr)                      # zero halo stays zero

    # ---------------- in-kernel helpers (values only, static shapes) -----------
    def apply_Cmat(mat, u):            # out[d] = sum_c mat[d, c] * u[c]
        rows = []
        for d in range(C):
            acc = float(mat[d, 0]) * u[0]
            for c in range(1, C):
                acc = acc + float(mat[d, c]) * u[c]
            rows.append(acc)
        return jnp.stack(rows, axis=0)

    def D_op(u):                       # forward differences, Neumann boundary
        pw_scr[:, 1:1 + M, 1:1 + N] = u
        u_dn = pw_scr[:, 2:2 + M, 1:1 + N]
        u_rt = pw_scr[:, 1:1 + M, 2:2 + N]
        dv = jnp.where(row_lt, u_dn - u, 0.0)
        dh = jnp.where(col_lt, u_rt - u, 0.0)
        return dv, dh

    def Dt_op(pv, ph):                 # adjoint of D_op
        pvm = jnp.where(row_lt, pv, 0.0)
        pw_scr[:, 1:1 + M, 1:1 + N] = pvm
        dtv = pw_scr[:, 0:M, 1:1 + N] - pvm          # shift-down(pvm) - pvm
        phm = jnp.where(col_lt, ph, 0.0)
        pw_scr[:, 1:1 + M, 1:1 + N] = phm
        dth = pw_scr[:, 1:1 + M, 0:N] - phm          # shift-right(phm) - phm
        return dtv + dth

    def prox_dvtv(yv, yh, tau):        # per-pixel block soft threshold (DVTV)
        nl = jnp.sqrt(yv[0] * yv[0] + yh[0] * yh[0])
        sl = jnp.maximum(1.0 - tau / (nl + 1e-12), 0.0)
        if C > 1:
            nc = jnp.sqrt(jnp.sum(yv[1:] * yv[1:] + yh[1:] * yh[1:], axis=0))
            sc = jnp.maximum(1.0 - (w * tau) / (nc + 1e-12), 0.0)
            scale = jnp.where(is_lum, sl[None], sc[None])
        else:
            scale = sl[None]
        return yv * scale, yh * scale

    def proj_l2_ball(v):               # projection onto {u : ||u - z||_2 <= epsilon}
        d = v - z_v
        r = jnp.sqrt(jnp.sum(d * d, axis=(0, 1, 2), keepdims=True))
        s = jnp.where(r > epsilon, epsilon / jnp.maximum(r, 1e-12), 1.0)
        return z_v + d * s

    # ---------------- fused K-step primal-dual loop (all state VMEM resident) ---
    @pl.loop(0, K)
    def _iteration(kk):
        g1 = gam1_sm[kk]
        g2 = gam2_sm[kk]
        g3 = gam3_sm[kk]
        l1 = lam1_sm[kk]
        l2 = lam2_sm[kk]

        x_old = x_scr[...]
        y1v_old = y1v_scr[...]
        y1h_old = y1h_scr[...]
        y2_old = y2_scr[...]

        # ---- Ba = conv_CSC(a_old, B): shift-and-accumulate over padded a ------
        Ba_rows = []
        for c in range(C):
            acc = None
            for p in range(P):
                base = (p * C + c) * (k * k)
                for dy in range(k):
                    for dx in range(k):
                        tap = b_sm[base + dy * k + dx] * a_scr[p, c, dy:dy + M, dx:dx + N]
                        acc = tap if acc is None else acc + tap
            Ba_rows.append(acc)
        Ba = jnp.stack(Ba_rows, axis=0)                       # (C, M, N)

        r = x_old - Ba                                        # residual x - B a
        r_scr[:, plo:plo + M, plo:plo + N] = r                # padded copy for convT

        # ---- x update + box prox ----------------------------------------------
        ct_dt_y1 = apply_Cmat(Cmat.T, Dt_op(y1v_old, y1h_old))
        x_aft = jnp.clip(x_old - g1 * (r + ct_dt_y1 + mask_v * y2_old), 0.0, 1.0)

        # ---- a update (convT_CSC) fused with ProxL1 soft threshold ------------
        thr = g2 * l1
        for c in range(C):
            # hoist the k*k shifted residual slices; reused by all P filters
            shifts = [r_scr[c, dy:dy + M, dx:dx + N]
                      for dy in range(k) for dx in range(k)]
            for p in range(P):
                base = (p * C + c) * (k * k)
                acc = None
                for dy in range(k):
                    for dx in range(k):
                        # flipped taps == adjoint correlation
                        tap = (b_sm[base + (k - 1 - dy) * k + (k - 1 - dx)]
                               * shifts[dy * k + dx])
                        acc = tap if acc is None else acc + tap
                v = a_scr[p, c, plo:plo + M, plo:plo + N] + g2 * acc
                a_scr[p, c, plo:plo + M, plo:plo + N] = v - jnp.clip(v, -thr, thr)

        # ---- dual updates ------------------------------------------------------
        t2 = 2.0 * x_aft - x_old
        dv, dh = D_op(apply_Cmat(Cmat, t2))
        y1v = y1v_old + g3 * dv
        y1h = y1h_old + g3 * dh
        pxv, pxh = prox_dvtv(y1v / (g3 + _EPS), y1h / (g3 + _EPS), l2 / (g3 + _EPS))
        y2 = y2_old + g3 * (mask_v * t2)
        y2_new = y2 - g3 * proj_l2_ball(y2 / (g3 + _EPS))

        x_scr[...] = x_aft
        y1v_scr[...] = y1v - g3 * pxv
        y1h_scr[...] = y1h - g3 * pxh
        y2_scr[...] = y2_new

    o_ref[0] = x_scr[...]


# ----------------------------------------------------------------------------- #
# Wrapper
# ----------------------------------------------------------------------------- #

def cscdvtv_forward(z, mask, B, lam1, lam2, gam1, gam2, gam3, a_init, *,
                    K, w, alpha=0.02):
    """Single fused pallas_call running all K primal-dual iterations on-chip."""
    mb, C, M, N = z.shape
    P, _, k, _ = B.shape
    Mp, Np = M + k - 1, N + k - 1
    Cmat = dct_matrix(C)
    epsilon = float(alpha) * math.sqrt(C * M * N)

    mask_b = jnp.broadcast_to(mask.astype(jnp.float32), z.shape)
    b_flat = B.reshape(-1).astype(jnp.float32)

    kernel = functools.partial(
        _cscdvtv_kernel, P=P, C=C, k=k, M=M, N=N, K=int(K),
        w=float(w), epsilon=epsilon, Cmat=Cmat)

    return pl.pallas_call(
        kernel,
        out_shape=jax.ShapeDtypeStruct((mb, C, M, N), jnp.float32),
        grid_spec=pltpu.PrefetchScalarGridSpec(
            num_scalar_prefetch=6,
            grid=(mb,),
            in_specs=[
                pl.BlockSpec((1, C, M, N), lambda b, *_: (b, 0, 0, 0)),        # z
                pl.BlockSpec((1, C, M, N), lambda b, *_: (b, 0, 0, 0)),        # mask
                pl.BlockSpec((1, P, C, M, N), lambda b, *_: (b, 0, 0, 0, 0)),  # a_init
            ],
            out_specs=pl.BlockSpec((1, C, M, N), lambda b, *_: (b, 0, 0, 0)),
            scratch_shapes=[
                pltpu.VMEM((C, M, N), jnp.float32),        # x
                pltpu.VMEM((C, M, N), jnp.float32),        # y1 (vertical component)
                pltpu.VMEM((C, M, N), jnp.float32),        # y1 (horizontal component)
                pltpu.VMEM((C, M, N), jnp.float32),        # y2
                pltpu.VMEM((P, C, Mp, Np), jnp.float32),   # padded sparse code a
                pltpu.VMEM((C, Mp, Np), jnp.float32),      # padded residual x - Ba
                pltpu.VMEM((C, M + 2, N + 2), jnp.float32),  # padded workspace (D/Dt)
            ],
        ),
        compiler_params=pltpu.CompilerParams(dimension_semantics=("parallel",)),
    )(b_flat,
      lam1.astype(jnp.float32), lam2.astype(jnp.float32),
      gam1.astype(jnp.float32), gam2.astype(jnp.float32), gam3.astype(jnp.float32),
      z.astype(jnp.float32), mask_b, a_init.astype(jnp.float32))


# ----------------------------------------------------------------------------- #
# Deterministic parameter init (matches the PyTorch __init__)
# ----------------------------------------------------------------------------- #

def init_params(key, p: CSCDVTVParams):
    B = 0.01 * jax.random.normal(
        key, (p.n_filters, p.n_channels, p.kernel_size, p.kernel_size), jnp.float32)
    Bnp = np.asarray(B)
    op2 = sum(calc_max_singular_P_np(Bnp[:, c]) ** 2 for c in range(p.n_channels))
    op_norm_B = math.sqrt(op2)
    lam1 = jnp.ones((p.K,), jnp.float32) * 0.0005
    lam2 = jnp.ones((p.K,), jnp.float32) * 0.0005
    beta = 1.0 + 2.0 * op_norm_B + op_norm_B ** 2
    gam1_s = 2.0 / beta * 0.9
    gam3_s = 1.0 / (1.0 + 4.0 * 2.0 + p.w * 4.0 * 2.0) * (1.0 / gam1_s - beta / 2.0)
    gam1 = jnp.ones((p.K,), jnp.float32) * gam1_s
    gam2 = jnp.ones((p.K,), jnp.float32) * gam1_s
    gam3 = jnp.ones((p.K,), jnp.float32) * gam3_s
    return B, lam1, lam2, gam1, gam2, gam3


# ----------------------------------------------------------------------------- #
# Pure-JAX reference (same math, no Pallas) used only for self-checking
# ----------------------------------------------------------------------------- #

def reference_forward(z, mask, B, lam1, lam2, gam1, gam2, gam3, a_init, *,
                      K, w, alpha=0.02):
    eps = 1e-8
    mb, C, M, N = z.shape
    P, _, k, _ = B.shape
    plo = k // 2
    Cmat = jnp.asarray(dct_matrix(C))
    epsilon = alpha * math.sqrt(C * M * N)

    def pad_sp(u):
        widths = ((0, 0),) * (u.ndim - 2) + ((plo, k - 1 - plo), (plo, k - 1 - plo))
        return jnp.pad(u, widths)

    def conv_csc(a):
        ap = pad_sp(a)
        chans = []
        for c in range(C):
            acc = jnp.zeros((mb, M, N), jnp.float32)
            for p in range(P):
                for dy in range(k):
                    for dx in range(k):
                        acc = acc + B[p, c, dy, dx] * ap[:, p, c, dy:dy + M, dx:dx + N]
            chans.append(acc)
        return jnp.stack(chans, axis=1)

    def convT_csc(x):
        xp = pad_sp(x)
        filts = []
        for p in range(P):
            chans = []
            for c in range(C):
                acc = jnp.zeros((mb, M, N), jnp.float32)
                for dy in range(k):
                    for dx in range(k):
                        acc = acc + B[p, c, k - 1 - dy, k - 1 - dx] * xp[:, c, dy:dy + M, dx:dx + N]
                chans.append(acc)
            filts.append(jnp.stack(chans, axis=1))
        return jnp.stack(filts, axis=1)

    def apply_C(u):
        return jnp.einsum("dc,bcmn->bdmn", Cmat, u)

    def apply_Ct(u):
        return jnp.einsum("dc,bdmn->bcmn", Cmat, u)

    def D_op(u):
        dv = jnp.concatenate([u[..., 1:, :] - u[..., :-1, :],
                              jnp.zeros_like(u[..., :1, :])], axis=-2)
        dh = jnp.concatenate([u[..., :, 1:] - u[..., :, :-1],
                              jnp.zeros_like(u[..., :, :1])], axis=-1)
        return jnp.stack([dv, dh], axis=1)

    def Dt_op(y):
        pv, ph = y[:, 0], y[:, 1]
        pvm = pv.at[..., -1, :].set(0.0)
        dtv = jnp.concatenate([jnp.zeros_like(pvm[..., :1, :]), pvm[..., :-1, :]], axis=-2) - pvm
        phm = ph.at[..., :, -1].set(0.0)
        dth = jnp.concatenate([jnp.zeros_like(phm[..., :, :1]), phm[..., :, :-1]], axis=-1) - phm
        return dtv + dth

    def prox_dvtv(y, tau):
        lum, chro = y[:, :, :1], y[:, :, 1:]
        nl = jnp.sqrt(jnp.sum(lum * lum, axis=(1, 2), keepdims=True))
        lo = lum * jnp.maximum(1.0 - tau / (nl + 1e-12), 0.0)
        nc = jnp.sqrt(jnp.sum(chro * chro, axis=(1, 2), keepdims=True))
        co = chro * jnp.maximum(1.0 - (w * tau) / (nc + 1e-12), 0.0)
        return jnp.concatenate([lo, co], axis=2)

    def proj_l2(v):
        d = v - z
        r = jnp.sqrt(jnp.sum(d * d, axis=(1, 2, 3), keepdims=True))
        s = jnp.where(r > epsilon, epsilon / jnp.maximum(r, 1e-12), 1.0)
        return z + d * s

    maskb = jnp.broadcast_to(mask.astype(jnp.float32), z.shape)
    x_bef, a_bef = z, a_init
    y1_bef = jnp.zeros((mb, 2, C, M, N), jnp.float32)
    y2_bef = jnp.zeros((mb, C, M, N), jnp.float32)
    x_aft = x_bef
    for kk in range(K):
        Ba = conv_csc(a_bef)
        x = x_bef - gam1[kk] * (x_bef - Ba + apply_Ct(Dt_op(y1_bef)) + maskb * y2_bef)
        x_aft = jnp.clip(x, 0.0, 1.0)
        a = a_bef + gam2[kk] * convT_csc(x_bef - Ba)
        thr = gam2[kk] * lam1[kk]
        a_aft = a - jnp.clip(a, -thr, thr)
        y1 = y1_bef + gam3[kk] * D_op(apply_C(2.0 * x_aft - x_bef))
        y1_aft = y1 - gam3[kk] * prox_dvtv(y1 / (gam3[kk] + eps), lam2[kk] / (gam3[kk] + eps))
        y2 = y2_bef + gam3[kk] * (maskb * (2.0 * x_aft - x_bef))
        y2_aft = y2 - gam3[kk] * proj_l2(y2 / (gam3[kk] + eps))
        x_bef, a_bef, y1_bef, y2_bef = x_aft, a_aft, y1_aft, y2_aft
    return x_aft


# ----------------------------------------------------------------------------- #
if __name__ == "__main__":
    params = CSCDVTVParams(deg="inpainting", n_channels=3, n_filters=4,
                           kernel_size=3, K=4, w=0.5)
    assert params.deg == "inpainting"

    mb, M, N = 2, 16, 16
    key = jax.random.PRNGKey(0)
    kB, ka, kz, km = jax.random.split(key, 4)

    B, lam1, lam2, gam1, gam2, gam3 = init_params(kB, params)

    clean = jax.random.uniform(kz, (mb, params.n_channels, M, N), jnp.float32)
    mask = (jax.random.uniform(km, (mb, 1, M, N)) > 0.4).astype(jnp.float32)
    z = clean * mask                                      # observed (inpainting)
    # torch.normal(...) inside forward -> deterministic init passed in explicitly
    a_init = 0.01 * jax.random.normal(
        ka, (mb, params.n_filters, params.n_channels, M, N), jnp.float32)

    fwd = jax.jit(functools.partial(cscdvtv_forward, K=params.K, w=params.w, alpha=0.02))
    out = fwd(z, mask, B, lam1, lam2, gam1, gam2, gam3, a_init)
    jax.block_until_ready(out)
    assert out.shape == (mb, params.n_channels, M, N)
    assert bool(jnp.all(jnp.isfinite(out)))

    ref = reference_forward(z, mask, B, lam1, lam2, gam1, gam2, gam3, a_init,
                            K=params.K, w=params.w, alpha=0.02)
    err = float(jnp.max(jnp.abs(out - ref)))
    assert err < 1e-3, f"mismatch vs pure-JAX reference: {err}"
    print("KERNEL_OK")
</pallas_src>

<mosaic_0001>
module attributes {stable_mosaic.version = 11 : i64} {
  func.func @_cscdvtv_kernel(%arg0: i32, %arg1: memref<108xf32, #tpu.memory_space<smem>>, %arg2: memref<4xf32, #tpu.memory_space<smem>>, %arg3: memref<4xf32, #tpu.memory_space<smem>>, %arg4: memref<4xf32, #tpu.memory_space<smem>>, %arg5: memref<4xf32, #tpu.memory_space<smem>>, %arg6: memref<4xf32, #tpu.memory_space<smem>>, %arg7: memref<1x3x16x16xf32, #tpu.memory_space<vmem>>, %arg8: memref<1x3x16x16xf32, #tpu.memory_space<vmem>>, %arg9: memref<1x4x3x16x16xf32, #tpu.memory_space<vmem>>, %arg10: memref<1x3x16x16xf32, #tpu.memory_space<vmem>>, %arg11: memref<3x16x16xf32, #tpu.memory_space<vmem>>, %arg12: memref<3x16x16xf32, #tpu.memory_space<vmem>>, %arg13: memref<3x16x16xf32, #tpu.memory_space<vmem>>, %arg14: memref<3x16x16xf32, #tpu.memory_space<vmem>>, %arg15: memref<4x3x18x18xf32, #tpu.memory_space<vmem>>, %arg16: memref<3x18x18xf32, #tpu.memory_space<vmem>>, %arg17: memref<3x18x18xf32, #tpu.memory_space<vmem>>) attributes {dimension_semantics = [#tpu.dimension_semantics<parallel>], iteration_bounds = array<i64: 2>, scalar_prefetch = 6 : i64, scratch_operands = 7 : i64, tpu.core_type = #tpu.core_type<tc>, window_params = [{transform_indices = @transform_0, window_bounds = array<i64: 1, 3, 16, 16>}, {transform_indices = @transform_1, window_bounds = array<i64: 1, 3, 16, 16>}, {transform_indices = @transform_2, window_bounds = array<i64: 1, 4, 3, 16, 16>}, {transform_indices = @transform_3, window_bounds = array<i64: 1, 3, 16, 16>}]} {
    %c0 = arith.constant 0 : index
    %c0_0 = arith.constant 0 : index
    %c0_1 = arith.constant 0 : index
    %c0_2 = arith.constant 0 : index
    %0 = vector.load %arg7[%c0, %c0_0, %c0_1, %c0_2] : memref<1x3x16x16xf32, #tpu.memory_space<vmem>>, vector<1x3x16x16xf32>
    %1 = vector.shape_cast %0 : vector<1x3x16x16xf32> to vector<3x16x16xf32>
    %c0_3 = arith.constant 0 : index
    %c0_4 = arith.constant 0 : index
    %c0_5 = arith.constant 0 : index
    %c0_6 = arith.constant 0 : index
    %2 = vector.load %arg8[%c0_3, %c0_4, %c0_5, %c0_6] : memref<1x3x16x16xf32, #tpu.memory_space<vmem>>, vector<1x3x16x16xf32>
    %3 = vector.shape_cast %2 : vector<1x3x16x16xf32> to vector<3x16x16xf32>
    %4 = tpu.iota {dimensions = array<i32: 1>} : vector<3x16x16xi32>
    %c15_i32 = arith.constant 15 : i32
    %5 = vector.broadcast %c15_i32 : i32 to vector<3x16x16xi32>
    %6 = arith.cmpi slt, %4, %5 : vector<3x16x16xi32>
    %7 = tpu.iota {dimensions = array<i32: 2>} : vector<3x16x16xi32>
    %c15_i32_7 = arith.constant 15 : i32
    %8 = vector.broadcast %c15_i32_7 : i32 to vector<3x16x16xi32>
    %9 = arith.cmpi slt, %7, %8 : vector<3x16x16xi32>
    %10 = tpu.iota {dimensions = array<i32: 0>} : vector<3x16x16xi32>
    %c0_i32 = arith.constant 0 : i32
    %11 = vector.broadcast %c0_i32 : i32 to vector<3x16x16xi32>
    %12 = arith.cmpi eq, %10, %11 : vector<3x16x16xi32>
    %c0_8 = arith.constant 0 : index
    %c0_9 = arith.constant 0 : index
    %c0_10 = arith.constant 0 : index
    %13 = vector.load %arg11[%c0_8, %c0_9, %c0_10] : memref<3x16x16xf32, #tpu.memory_space<vmem>>, vector<3x16x16xf32>
    tpu.vector_store %arg11[%c0_8, %c0_9, %c0_10], %1 {strides = array<i32>} : memref<3x16x16xf32, #tpu.memory_space<vmem>>, vector<3x16x16xf32>,
    %cst = arith.constant 0.000000e+00 : f32
    %14 = vector.broadcast %cst : f32 to vector<3x16x16xf32>
    %c0_11 = arith.constant 0 : index
    %c0_12 = arith.constant 0 : index
    %c0_13 = arith.constant 0 : index
    %15 = vector.load %arg12[%c0_11, %c0_12, %c0_13] : memref<3x16x16xf32, #tpu.memory_space<vmem>>, vector<3x16x16xf32>
    tpu.vector_store %arg12[%c0_11, %c0_12, %c0_13], %14 {strides = array<i32>} : memref<3x16x16xf32, #tpu.memory_space<vmem>>, vector<3x16x16xf32>,
    %cst_14 = arith.constant 0.000000e+00 : f32
    %16 = vector.broadcast %cst_14 : f32 to vector<3x16x16xf32>
    %c0_15 = arith.constant 0 : index
    %c0_16 = arith.constant 0 : index
    %c0_17 = arith.constant 0 : index
    %17 = vector.load %arg13[%c0_15, %c0_16, %c0_17] : memref<3x16x16xf32, #tpu.memory_space<vmem>>, vector<3x16x16xf32>
    tpu.vector_store %arg13[%c0_15, %c0_16, %c0_17], %16 {strides = array<i32>} : memref<3x16x16xf32, #tpu.memory_space<vmem>>, vector<3x16x16xf32>,
    %cst_18 = arith.constant 0.000000e+00 : f32
    %18 = vector.broadcast %cst_18 : f32 to vector<3x16x16xf32>
    %c0_19 = arith.constant 0 : index
    %c0_20 = arith.constant 0 : index
    %c0_21 = arith.constant 0 : index
    %19 = vector.load %arg14[%c0_19, %c0_20, %c0_21] : memref<3x16x16xf32, #tpu.memory_space<vmem>>, vector<3x16x16xf32>
    tpu.vector_store %arg14[%c0_19, %c0_20, %c0_21], %18 {strides = array<i32>} : memref<3x16x16xf32, #tpu.memory_space<vmem>>, vector<3x16x16xf32>,
    %cst_22 = arith.constant 0.000000e+00 : f32
    %20 = vector.broadcast %cst_22 : f32 to vector<4x3x18x18xf32>
    %c0_23 = arith.constant 0 : index
    %c0_24 = arith.constant 0 : index
    %c0_25 = arith.constant 0 : index
    %c0_26 = arith.constant 0 : index
    %21 = vector.load %arg15[%c0_23, %c0_24, %c0_25, %c0_26] : memref<4x3x18x18xf32, #tpu.memory_space<vmem>>, vector<4x3x18x18xf32>
    tpu.vector_store %arg15[%c0_23, %c0_24, %c0_25, %c0_26], %20 {strides = array<i32>} : memref<4x3x18x18xf32, #tpu.memory_space<vmem>>, vector<4x3x18x18xf32>,
    %c0_27 = arith.constant 0 : index
    %c0_28 = arith.constant 0 : index
    %c0_29 = arith.constant 0 : index
    %c0_30 = arith.constant 0 : index
    %c0_31 = arith.constant 0 : index
    %22 = vector.load %arg9[%c0_27, %c0_28, %c0_29, %c0_30, %c0_31] : memref<1x4x3x16x16xf32, #tpu.memory_space<vmem>>, vector<1x4x3x16x16xf32>
    %23 = vector.shape_cast %22 : vector<1x4x3x16x16xf32> to vector<4x3x16x16xf32>
    %c0_32 = arith.constant 0 : index
    %c0_33 = arith.constant 0 : index
    %c1 = arith.constant 1 : index
    %c1_34 = arith.constant 1 : index
    %24 = vector.load %arg15[%c0_32, %c0_33, %c1, %c1_34] : memref<4x3x18x18xf32, #tpu.memory_space<vmem>>, vector<4x3x16x16xf32>
    tpu.vector_store %arg15[%c0_32, %c0_33, %c1, %c1_34], %23 {strides = array<i32>} : memref<4x3x18x18xf32, #tpu.memory_space<vmem>>, vector<4x3x16x16xf32>,
    %cst_35 = arith.constant 0.000000e+00 : f32
    %25 = vector.broadcast %cst_35 : f32 to vector<3x18x18xf32>
    %c0_36 = arith.constant 0 : index
    %c0_37 = arith.constant 0 : index
    %c0_38 = arith.constant 0 : index
    %26 = vector.load %arg16[%c0_36, %c0_37, %c0_38] : memref<3x18x18xf32, #tpu.memory_space<vmem>>, vector<3x18x18xf32>
    tpu.vector_store %arg16[%c0_36, %c0_37, %c0_38], %25 {strides = array<i32>} : memref<3x18x18xf32, #tpu.memory_space<vmem>>, vector<3x18x18xf32>,
    %cst_39 = arith.constant 0.000000e+00 : f32
    %27 = vector.broadcast %cst_39 : f32 to vector<3x18x18xf32>
    %c0_40 = arith.constant 0 : index
    %c0_41 = arith.constant 0 : index
    %c0_42 = arith.constant 0 : index
    %28 = vector.load %arg17[%c0_40, %c0_41, %c0_42] : memref<3x18x18xf32, #tpu.memory_space<vmem>>, vector<3x18x18xf32>
    tpu.vector_store %arg17[%c0_40, %c0_41, %c0_42], %27 {strides = array<i32>} : memref<3x18x18xf32, #tpu.memory_space<vmem>>, vector<3x18x18xf32>,
    %c0_i32_43 = arith.constant 0 : i32
    %c4_i32 = arith.constant 4 : i32
    %29 = arith.addi %c0_i32_43, %c4_i32 : i32
    %c1_i32 = arith.constant 1 : i32
    scf.for %arg18 = %c0_i32_43 to %29 step %c1_i32  : i32 {
      %c1_i32_52 = arith.constant 1 : i32
      %34 = arith.muli %arg18, %c1_i32_52 : i32
      %c0_i32_53 = arith.constant 0 : i32
      %35 = arith.addi %c0_i32_53, %34 : i32
      %36 = arith.index_cast %35 : i32 to index
      %37 = memref.load %arg4[%36] : memref<4xf32, #tpu.memory_space<smem>>
      %38 = arith.index_cast %35 : i32 to index
      %39 = memref.load %arg5[%38] : memref<4xf32, #tpu.memory_space<smem>>
      %40 = arith.index_cast %35 : i32 to index
      %41 = memref.load %arg6[%40] : memref<4xf32, #tpu.memory_space<smem>>
      %42 = arith.index_cast %35 : i32 to index
      %43 = memref.load %arg2[%42] : memref<4xf32, #tpu.memory_space<smem>>
      %44 = arith.index_cast %35 : i32 to index
      %45 = memref.load %arg3[%44] : memref<4xf32, #tpu.memory_space<smem>>
      %c0_54 = arith.constant 0 : index
      %c0_55 = arith.constant 0 : index
      %c0_56 = arith.constant 0 : index
      %46 = vector.load %arg11[%c0_54, %c0_55, %c0_56] : memref<3x16x16xf32, #tpu.memory_space<vmem>>, vector<3x16x16xf32>
      %c0_57 = arith.constant 0 : index
      %c0_58 = arith.constant 0 : index
      %c0_59 = arith.constant 0 : index
      %47 = vector.load %arg12[%c0_57, %c0_58, %c0_59] : memref<3x16x16xf32, #tpu.memory_space<vmem>>, vector<3x16x16xf32>
      %c0_60 = arith.constant 0 : index
      %c0_61 = arith.constant 0 : index
      %c0_62 = arith.constant 0 : index
      %48 = vector.load %arg13[%c0_60, %c0_61, %c0_62] : memref<3x16x16xf32, #tpu.memory_space<vmem>>, vector<3x16x16xf32>
      %c0_63 = arith.constant 0 : index
      %c0_64 = arith.constant 0 : index
      %c0_65 = arith.constant 0 : index
      %49 = vector.load %arg14[%c0_63, %c0_64, %c0_65] : memref<3x16x16xf32, #tpu.memory_space<vmem>>, vector<3x16x16xf32>
      %c0_66 = arith.constant 0 : index
      %50 = memref.load %arg1[%c0_66] : memref<108xf32, #tpu.memory_space<smem>>
      %c0_67 = arith.constant 0 : index
      %c0_68 = arith.constant 0 : index
      %c0_69 = arith.constant 0 : index
      %c0_70 = arith.constant 0 : index
      %51 = vector.load %arg15[%c0_67, %c0_68, %c0_69, %c0_70] : memref<4x3x18x18xf32, #tpu.memory_space<vmem>>, vector<1x1x16x16xf32>
      %52 = vector.shape_cast %51 : vector<1x1x16x16xf32> to vector<16x16xf32>
      %53 = vector.broadcast %50 : f32 to vector<16x16xf32>
      %54 = arith.mulf %53, %52 : vector<16x16xf32>
      %c1_71 = arith.constant 1 : index
      %55 = memref.load %arg1[%c1_71] : memref<108xf32, #tpu.memory_space<smem>>
      %c0_72 = arith.constant 0 : index
      %c0_73 = arith.constant 0 : index
      %c0_74 = arith.constant 0 : index
      %c1_75 = arith.constant 1 : index
      %56 = vector.load %arg15[%c0_72, %c0_73, %c0_74, %c1_75] : memref<4x3x18x18xf32, #tpu.memory_space<vmem>>, vector<1x1x16x16xf32>
      %57 = vector.shape_cast %56 : vector<1x1x16x16xf32> to vector<16x16xf32>
      %58 = vector.broadcast %55 : f32 to vector<16x16xf32>
      %59 = arith.mulf %58, %57 : vector<16x16xf32>
      %60 = arith.addf %54, %59 : vector<16x16xf32>
      %c2 = arith.constant 2 : index
      %61 = memref.load %arg1[%c2] : memref<108xf32, #tpu.memory_space<smem>>
      %c0_76 = arith.constant 0 : index
      %c0_77 = arith.constant 0 : index
      %c0_78 = arith.constant 0 : index
      %c2_79 = arith.constant 2 : index
      %62 = vector.load %arg15[%c0_76, %c0_77, %c0_78, %c2_79] : memref<4x3x18x18xf32, #tpu.memory_space<vmem>>, vector<1x1x16x16xf32>
      %63 = vector.shape_cast %62 : vector<1x1x16x16xf32> to vector<16x16xf32>
      %64 = vector.broadcast %61 : f32 to vector<16x16xf32>
      %65 = arith.mulf %64, %63 : vector<16x16xf32>
      %66 = arith.addf %60, %65 : vector<16x16xf32>
      %c3 = arith.constant 3 : index
      %67 = memref.load %arg1[%c3] : memref<108xf32, #tpu.memory_space<smem>>
      %c0_80 = arith.constant 0 : index
      %c0_81 = arith.constant 0 : index
      %c1_82 = arith.constant 1 : index
      %c0_83 = arith.constant 0 : index
      %68 = vector.load %arg15[%c0_80, %c0_81, %c1_82, %c0_83] : memref<4x3x18x18xf32, #tpu.memory_space<vmem>>, vector<1x1x16x16xf32>
      %69 = vector.shape_cast %68 : vector<1x1x16x16xf32> to vector<16x16xf32>
      %70 = vector.broadcast %67 : f32 to vector<16x16xf32>
      %71 = arith.mulf %70, %69 : vector<16x16xf32>
      %72 = arith.addf %66, %71 : vector<16x16xf32>
      %c4 = arith.constant 4 : index
      %73 = memref.load %arg1[%c4] : memref<108xf32, #tpu.memory_space<smem>>
      %c0_84 = arith.constant 0 : index
      %c0_85 = arith.constant 0 : index
      %c1_86 = arith.constant 1 : index
      %c1_87 = arith.constant 1 : index
      %74 = vector.load %arg15[%c0_84, %c0_85, %c1_86, %c1_87] : memref<4x3x18x18xf32, #tpu.memory_space<vmem>>, vector<1x1x16x16xf32>
      %75 = vector.shape_cast %74 : vector<1x1x16x16xf32> to vector<16x16xf32>
      %76 = vector.broadcast %73 : f32 to vector<16x16xf32>
      %77 = arith.mulf %76, %75 : vector<16x16xf32>
      %78 = arith.addf %72, %77 : vector<16x16xf32>
      %c5 = arith.constant 5 : index
      %79 = memref.load %arg1[%c5] : memref<108xf32, #tpu.memory_space<smem>>
      %c0_88 = arith.constant 0 : index
      %c0_89 = arith.constant 0 : index
      %c1_90 = arith.constant 1 : index
      %c2_91 = arith.constant 2 : index
      %80 = vector.load %arg15[%c0_88, %c0_89, %c1_90, %c2_91] : memref<4x3x18x18xf32, #tpu.memory_space<vmem>>, vector<1x1x16x16xf32>
      %81 = vector.shape_cast %80 : vector<1x1x16x16xf32> to vector<16x16xf32>
      %82 = vector.broadcast %79 : f32 to vector<16x16xf32>
      %83 = arith.mulf %82, %81 : vector<16x16xf32>
      %84 = arith.addf %78, %83 : vector<16x16xf32>
      %c6 = arith.constant 6 : index
      %85 = memref.load %arg1[%c6] : memref<108xf32, #tpu.memory_space<smem>>
      %c0_92 = arith.constant 0 : index
      %c0_93 = arith.constant 0 : index
      %c2_94 = arith.constant 2 : index
      %c0_95 = arith.constant 0 : index
      %86 = vector.load %arg15[%c0_92, %c0_93, %c2_94, %c0_95] : memref<4x3x18x18xf32, #tpu.memory_space<vmem>>, vector<1x1x16x16xf32>
      %87 = vector.shape_cast %86 : vector<1x1x16x16xf32> to vector<16x16xf32>
      %88 = vector.broadcast %85 : f32 to vector<16x16xf32>
      %89 = arith.mulf %88, %87 : vector<16x16xf32>
      %90 = arith.addf %84, %89 : vector<16x16xf32>
      %c7 = arith.constant 7 : index
      %91 = memref.load %arg1[%c7] : memref<108xf32, #tpu.memory_space<smem>>
      %c0_96 = arith.constant 0 : index
      %c0_97 = arith.constant 0 : index
      %c2_98 = arith.constant 2 : index
      %c1_99 = arith.constant 1 : index
      %92 = vector.load %arg15[%c0_96, %c0_97, %c2_98, %c1_99] : memref<4x3x18x18xf32, #tpu.memory_space<vmem>>, vector<1x1x16x16xf32>
      %93 = vector.shape_cast %92 : vector<1x1x16x16xf32> to vector<16x16xf32>
      %94 = vector.broadcast %91 : f32 to vector<16x16xf32>
      %95 = arith.mulf %94, %93 : vector<16x16xf32>
      %96 = arith.addf %90, %95 : vector<16x16xf32>
      %c8 = arith.constant 8 : index
      %97 = memref.load %arg1[%c8] : memref<108xf32, #tpu.memory_space<smem>>
      %c0_100 = arith.constant 0 : index
      %c0_101 = arith.constant 0 : index
      %c2_102 = arith.constant 2 : index
      %c2_103 = arith.constant 2 : index
      %98 = vector.load %arg15[%c0_100, %c0_101, %c2_102, %c2_103] : memref<4x3x18x18xf32, #tpu.memory_space<vmem>>, vector<1x1x16x16xf32>
      %99 = vector.shape_cast %98 : vector<1x1x16x16xf32> to vector<16x16xf32>
      %100 = vector.broadcast %97 : f32 to vector<16x16xf32>
      %101 = arith.mulf %100, %99 : vector<16x16xf32>
      %102 = arith.addf %96, %101 : vector<16x16xf32>
      %c27 = arith.constant 27 : index
      %103 = memref.load %arg1[%c27] : memref<108xf32, #tpu.memory_space<smem>>
      %c1_104 = arith.constant 1 : index
      %c0_105 = arith.constant 0 : index
      %c0_106 = arith.constant 0 : index
      %c0_107 = arith.constant 0 : index
      %104 = vector.load %arg15[%c1_104, %c0_105, %c0_106, %c0_107] : memref<4x3x18x18xf32, #tpu.memory_space<vmem>>, vector<1x1x16x16xf32>
      %105 = vector.shape_cast %104 : vector<1x1x16x16xf32> to vector<16x16xf32>
      %106 = vector.broadcast %103 : f32 to vector<16x16xf32>
      %107 = arith.mulf %106, %105 : vector<16x16xf32>
      %108 = arith.addf %102, %107 : vector<16x16xf32>
      %c28 = arith.constant 28 : index
      %109 = memref.load %arg1[%c28] : memref<108xf32, #tpu.memory_space<smem>>
      %c1_108 = arith.constant 1 : index
      %c0_109 = arith.constant 0 : index
      %c0_110 = arith.constant 0 : index
      %c1_111 = arith.constant 1 : index
      %110 = vector.load %arg15[%c1_108, %c0_109, %c0_110, %c1_111] : memref<4x3x18x18xf32, #tpu.memory_space<vmem>>, vector<1x1x16x16xf32>
      %111 = vector.shape_cast %110 : vector<1x1x16x16xf32> to vector<16x16xf32>
      %112 = vector.broadcast %109 : f32 to vector<16x16xf32>
      %113 = arith.mulf %112, %111 : vector<16x16xf32>
      %114 = arith.addf %108, %113 : vector<16x16xf32>
      %c29 = arith.constant 29 : index
      %115 = memref.load %arg1[%c29] : memref<108xf32, #tpu.memory_space<smem>>
      %c1_112 = arith.constant 1 : index
      %c0_113 = arith.constant 0 : index
      %c0_114 = arith.constant 0 : index
      %c2_115 = arith.constant 2 : index
      %116 = vector.load %arg15[%c1_112, %c0_113, %c0_114, %c2_115] : memref<4x3x18x18xf32, #tpu.memory_space<vmem>>, vector<1x1x16x16xf32>
      %117 = vector.shape_cast %116 : vector<1x1x16x16xf32> to vector<16x16xf32>
      %118 = vector.broadcast %115 : f32 to vector<16x16xf32>
      %119 = arith.mulf %118, %117 : vector<16x16xf32>
      %120 = arith.addf %114, %119 : vector<16x16xf32>
      %c30 = arith.constant 30 : index
      %121 = memref.load %arg1[%c30] : memref<108xf32, #tpu.memory_space<smem>>
      %c1_116 = arith.constant 1 : index
      %c0_117 = arith.constant 0 : index
      %c1_118 = arith.constant 1 : index
      %c0_119 = arith.constant 0 : index
      %122 = vector.load %arg15[%c1_116, %c0_117, %c1_118, %c0_119] : memref<4x3x18x18xf32, #tpu.memory_space<vmem>>, vector<1x1x16x16xf32>
      %123 = vector.shape_cast %122 : vector<1x1x16x16xf32> to vector<16x16xf32>
      %124 = vector.broadcast %121 : f32 to vector<16x16xf32>
      %125 = arith.mulf %124, %123 : vector<16x16xf32>
      %126 = arith.addf %120, %125 : vector<16x16xf32>
      %c31 = arith.constant 31 : index
      %127 = memref.load %arg1[%c31] : memref<108xf32, #tpu.memory_space<smem>>
      %c1_120 = arith.constant 1 : index
      %c0_121 = arith.constant 0 : index
      %c1_122 = arith.constant 1 : index
      %c1_123 = arith.constant 1 : index
      %128 = vector.load %arg15[%c1_120, %c0_121, %c1_122, %c1_123] : memref<4x3x18x18xf32, #tpu.memory_space<vmem>>, vector<1x1x16x16xf32>
      %129 = vector.shape_cast %128 : vector<1x1x16x16xf32> to vector<16x16xf32>
      %130 = vector.broadcast %127 : f32 to vector<16x16xf32>
      %131 = arith.mulf %130, %129 : vector<16x16xf32>
      %132 = arith.addf %126, %131 : vector<16x16xf32>
      %c32 = arith.constant 32 : index
      %133 = memref.load %arg1[%c32] : memref<108xf32, #tpu.memory_space<smem>>
      %c1_124 = arith.constant 1 : index
      %c0_125 = arith.constant 0 : index
      %c1_126 = arith.constant 1 : index
      %c2_127 = arith.constant 2 : index
      %134 = vector.load %arg15[%c1_124, %c0_125, %c1_126, %c2_127] : memref<4x3x18x18xf32, #tpu.memory_space<vmem>>, vector<1x1x16x16xf32>
      %135 = vector.shape_cast %134 : vector<1x1x16x16xf32> to vector<16x16xf32>
      %136 = vector.broadcast %133 : f32 to vector<16x16xf32>
      %137 = arith.mulf %136, %135 : vector<16x16xf32>
      %138 = arith.addf %132, %137 : vector<16x16xf32>
      %c33 = arith.constant 33 : index
      %139 = memref.load %arg1[%c33] : memref<108xf32, #tpu.memory_space<smem>>
      %c1_128 = arith.constant 1 : index
      %c0_129 = arith.constant 0 : index
      %c2_130 = arith.constant 2 : index
      %c0_131 = arith.constant 0 : index
      %140 = vector.load %arg15[%c1_128, %c0_129, %c2_130, %c0_131] : memref<4x3x18x18xf32, #tpu.memory_space<vmem>>, vector<1x1x16x16xf32>
      %141 = vector.shape_cast %140 : vector<1x1x16x16xf32> to vector<16x16xf32>
      %142 = vector.broadcast %139 : f32 to vector<16x16xf32>
      %143 = arith.mulf %142, %141 : vector<16x16xf32>
      %144 = arith.addf %138, %143 : vector<16x16xf32>
      %c34 = arith.constant 34 : index
      %145 = memref.load %arg1[%c34] : memref<108xf32, #tpu.memory_space<smem>>
      %c1_132 = arith.constant 1 : index
      %c0_133 = arith.constant 0 : index
      %c2_134 = arith.constant 2 : index
      %c1_135 = arith.constant 1 : index
      %146 = vector.load %arg15[%c1_132, %c0_133, %c2_134, %c1_135] : memref<4x3x18x18xf32, #tpu.memory_space<vmem>>, vector<1x1x16x16xf32>
      %147 = vector.shape_cast %146 : vector<1x1x16x16xf32> to vector<16x16xf32>
      %148 = vector.broadcast %145 : f32 to vector<16x16xf32>
      %149 = arith.mulf %148, %147 : vector<16x16xf32>
      %150 = arith.addf %144, %149 : vector<16x16xf32>
      %c35 = arith.constant 35 : index
      %151 = memref.load %arg1[%c35] : memref<108xf32, #tpu.memory_space<smem>>
      %c1_136 = arith.constant 1 : index
      %c0_137 = arith.constant 0 : index
      %c2_138 = arith.constant 2 : index
      %c2_139 = arith.constant 2 : index
      %152 = vector.load %arg15[%c1_136, %c0_137, %c2_138, %c2_139] : memref<4x3x18x18xf32, #tpu.memory_space<vmem>>, vector<1x1x16x16xf32>
      %153 = vector.shape_cast %152 : vector<1x1x16x16xf32> to vector<16x16xf32>
      %154 = vector.broadcast %151 : f32 to vector<16x16xf32>
      %155 = arith.mulf %154, %153 : vector<16x16xf32>
      %156 = arith.addf %150, %155 : vector<16x16xf32>
      %c54 = arith.constant 54 : index
      %157 = memref.load %arg1[%c54] : memref<108xf32, #tpu.memory_space<smem>>
      %c2_140 = arith.constant 2 : index
      %c0_141 = arith.constant 0 : index
      %c0_142 = arith.constant 0 : index
      %c0_143 = arith.constant 0 : index
      %158 = vector.load %arg15[%c2_140, %c0_141, %c0_142, %c0_143] : memref<4x3x18x18xf32, #tpu.memory_space<vmem>>, vector<1x1x16x16xf32>
      %159 = vector.shape_cast %158 : vector<1x1x16x16xf32> to vector<16x16xf32>
      %160 = vector.broadcast %157 : f32 to vector<16x16xf32>
      %161 = arith.mulf %160, %159 : vector<16x16xf32>
      %162 = arith.addf %156, %161 : vector<16x16xf32>
      %c55 = arith.constant 55 : index
      %163 = memref.load %arg1[%c55] : memref<108xf32, #tpu.memory_space<smem>>
      %c2_144 = arith.constant 2 : index
      %c0_145 = arith.constant 0 : index
      %c0_146 = arith.constant 0 : index
      %c1_147 = arith.constant 1 : index
      %164 = vector.load %arg15[%c2_144, %c0_145, %c0_146, %c1_147] : memref<4x3x18x18xf32, #tpu.memory_space<vmem>>, vector<1x1x16x16xf32>
      %165 = vector.shape_cast %164 : vector<1x1x16x16xf32> to vector<16x16xf32>
      %166 = vector.broadcast %163 : f32 to vector<16x16xf32>
      %167 = arith.mulf %166, %165 : vector<16x16xf32>
      %168 = arith.addf %162, %167 : vector<16x16xf32>
      %c56 = arith.constant 56 : index
      %169 = memref.load %arg1[%c56] : memref<108xf32, #tpu.memory_space<smem>>
      %c2_148 = arith.constant 2 : index
      %c0_149 = arith.constant 0 : index
      %c0_150 = arith.constant 0 : index
      %c2_151 = arith.constant 2 : index
      %170 = vector.load %arg15[%c2_148, %c0_149, %c0_150, %c2_151] : memref<4x3x18x18xf32, #tpu.memory_space<vmem>>, vector<1x1x16x16xf32>
      %171 = vector.shape_cast %170 : vector<1x1x16x16xf32> to vector<16x16xf32>
      %172 = vector.broadcast %169 : f32 to vector<16x16xf32>
      %173 = arith.mulf %172, %171 : vector<16x16xf32>
      %174 = arith.addf %168, %173 : vector<16x16xf32>
      %c57 = arith.constant 57 : index
      %175 = memref.load %arg1[%c57] : memref<108xf32, #tpu.memory_space<smem>>
      %c2_152 = arith.constant 2 : index
      %c0_153 = arith.constant 0 : index
      %c1_154 = arith.constant 1 : index
      %c0_155 = arith.constant 0 : index
      %176 = vector.load %arg15[%c2_152, %c0_153, %c1_154, %c0_155] : memref<4x3x18x18xf32, #tpu.memory_space<vmem>>, vector<1x1x16x16xf32>
      %177 = vector.shape_cast %176 : vector<1x1x16x16xf32> to vector<16x16xf32>
      %178 = vector.broadcast %175 : f32 to vector<16x16xf32>
      %179 = arith.mulf %178, %177 : vector<16x16xf32>
      %180 = arith.addf %174, %179 : vector<16x16xf32>
      %c58 = arith.constant 58 : index
      %181 = memref.load %arg1[%c58] : memref<108xf32, #tpu.memory_space<smem>>
      %c2_156 = arith.constant 2 : index
      %c0_157 = arith.constant 0 : index
      %c1_158 = arith.constant 1 : index
      %c1_159 = arith.constant 1 : index
      %182 = vector.load %arg15[%c2_156, %c0_157, %c1_158, %c1_159] : memref<4x3x18x18xf32, #tpu.memory_space<vmem>>, vector<1x1x16x16xf32>
      %183 = vector.shape_cast %182 : vector<1x1x16x16xf32> to vector<16x16xf32>
      %184 = vector.broadcast %181 : f32 to vector<16x16xf32>
      %185 = arith.mulf %184, %183 : vector<16x16xf32>
      %186 = arith.addf %180, %185 : vector<16x16xf32>
      %c59 = arith.constant 59 : index
      %187 = memref.load %arg1[%c59] : memref<108xf32, #tpu.memory_space<smem>>
      %c2_160 = arith.constant 2 : index
      %c0_161 = arith.constant 0 : index
      %c1_162 = arith.constant 1 : index
      %c2_163 = arith.constant 2 : index
      %188 = vector.load %arg15[%c2_160, %c0_161, %c1_162, %c2_163] : memref<4x3x18x18xf32, #tpu.memory_space<vmem>>, vector<1x1x16x16xf32>
      %189 = vector.shape_cast %188 : vector<1x1x16x16xf32> to vector<16x16xf32>
      %190 = vector.broadcast %187 : f32 to vector<16x16xf32>
      %191 = arith.mulf %190, %189 : vector<16x16xf32>
      %192 = arith.addf %186, %191 : vector<16x16xf32>
      %c60 = arith.constant 60 : index
      %193 = memref.load %arg1[%c60] : memref<108xf32, #tpu.memory_space<smem>>
      %c2_164 = arith.constant 2 : index
      %c0_165 = arith.constant 0 : index
      %c2_166 = arith.constant 2 : index
      %c0_167 = arith.constant 0 : index
      %194 = vector.load %arg15[%c2_164, %c0_165, %c2_166, %c0_167] : memref<4x3x18x18xf32, #tpu.memory_space<vmem>>, vector<1x1x16x16xf32>
      %195 = vector.shape_cast %194 : vector<1x1x16x16xf32> to vector<16x16xf32>
      %196 = vector.broadcast %193 : f32 to vector<16x16xf32>
      %197 = arith.mulf %196, %195 : vector<16x16xf32>
      %198 = arith.addf %192, %197 : vector<16x16xf32>
      %c61 = arith.constant 61 : index
      %199 = memref.load %arg1[%c61] : memref<108xf32, #tpu.memory_space<smem>>
      %c2_168 = arith.constant 2 : index
      %c0_169 = arith.constant 0 : index
      %c2_170 = arith.constant 2 : index
      %c1_171 = arith.constant 1 : index
      %200 = vector.load %arg15[%c2_168, %c0_169, %c2_170, %c1_171] : memref<4x3x18x18xf32, #tpu.memory_space<vmem>>, vector<1x1x16x16xf32>
      %201 = vector.shape_cast %200 : vector<1x1x16x16xf32> to vector<16x16xf32>
      %202 = vector.broadcast %199 : f32 to vector<16x16xf32>
      %203 = arith.mulf %202, %201 : vector<16x16xf32>
      %204 = arith.addf %198, %203 : vector<16x16xf32>
      %c62 = arith.constant 62 : index
      %205 = memref.load %arg1[%c62] : memref<108xf32, #tpu.memory_space<smem>>
      %c2_172 = arith.constant 2 : index
      %c0_173 = arith.constant 0 : index
      %c2_174 = arith.constant 2 : index
      %c2_175 = arith.constant 2 : index
      %206 = vector.load %arg15[%c2_172, %c0_173, %c2_174, %c2_175] : memref<4x3x18x18xf32, #tpu.memory_space<vmem>>, vector<1x1x16x16xf32>
      %207 = vector.shape_cast %206 : vector<1x1x16x16xf32> to vector<16x16xf32>
      %208 = vector.broadcast %205 : f32 to vector<16x16xf32>
      %209 = arith.mulf %208, %207 : vector<16x16xf32>
      %210 = arith.addf %204, %209 : vector<16x16xf32>
      %c81 = arith.constant 81 : index
      %211 = memref.load %arg1[%c81] : memref<108xf32, #tpu.memory_space<smem>>
      %c3_176 = arith.constant 3 : index
      %c0_177 = arith.constant 0 : index
      %c0_178 = arith.constant 0 : index
      %c0_179 = arith.constant 0 : index
      %212 = vector.load %arg15[%c3_176, %c0_177, %c0_178, %c0_179] : memref<4x3x18x18xf32, #tpu.memory_space<vmem>>, vector<1x1x16x16xf32>
      %213 = vector.shape_cast %212 : vector<1x1x16x16xf32> to vector<16x16xf32>
      %214 = vector.broadcast %211 : f32 to vector<16x16xf32>
      %215 = arith.mulf %214, %213 : vector<16x16xf32>
      %216 = arith.addf %210, %215 : vector<16x16xf32>
      %c82 = arith.constant 82 : index
      %217 = memref.load %arg1[%c82] : memref<108xf32, #tpu.memory_space<smem>>
      %c3_180 = arith.constant 3 : index
      %c0_181 = arith.constant 0 : index
      %c0_182 = arith.constant 0 : index
      %c1_183 = arith.constant 1 : index
      %218 = vector.load %arg15[%c3_180, %c0_181, %c0_182, %c1_183] : memref<4x3x18x18xf32, #tpu.memory_space<vmem>>, vector<1x1x16x16xf32>
      %219 = vector.shape_cast %218 : vector<1x1x16x16xf32> to vector<16x16xf32>
      %220 = vector.broadcast %217 : f32 to vector<16x16xf32>
      %221 = arith.mulf %220, %219 : vector<16x16xf32>
      %222 = arith.addf %216, %221 : vector<16x16xf32>
      %c83 = arith.constant 83 : index
      %223 = memref.load %arg1[%c83] : memref<108xf32, #tpu.memory_space<smem>>
      %c3_184 = arith.constant 3 : index
      %c0_185 = arith.constant 0 : index
      %c0_186 = arith.constant 0 : index
      %c2_187 = arith.constant 2 : index
      %224 = vector.load %arg15[%c3_184, %c0_185, %c0_186, %c2_187] : memref<4x3x18x18xf32, #tpu.memory_space<vmem>>, vector<1x1x16x16xf32>
      %225 = vector.shape_cast %224 : vector<1x1x16x16xf32> to vector<16x16xf32>
      %226 = vector.broadcast %223 : f32 to vector<16x16xf32>
      %227 = arith.mulf %226, %225 : vector<16x16xf32>
      %228 = arith.addf %222, %227 : vector<16x16xf32>
      %c84 = arith.constant 84 : index
      %229 = memref.load %arg1[%c84] : memref<108xf32, #tpu.memory_space<smem>>
      %c3_188 = arith.constant 3 : index
      %c0_189 = arith.constant 0 : index
      %c1_190 = arith.constant 1 : index
      %c0_191 = arith.constant 0 : index
      %230 = vector.load %arg15[%c3_188, %c0_189, %c1_190, %c0_191] : memref<4x3x18x18xf32, #tpu.memory_space<vmem>>, vector<1x1x16x16xf32>
      %231 = vector.shape_cast %230 : vector<1x1x16x16xf32> to vector<16x16xf32>
      %232 = vector.broadcast %229 : f32 to vector<16x16xf32>
      %233 = arith.mulf %232, %231 : vector<16x16xf32>
      %234 = arith.addf %228, %233 : vector<16x16xf32>
      %c85 = arith.constant 85 : index
      %235 = memref.load %arg1[%c85] : memref<108xf32, #tpu.memory_space<smem>>
      %c3_192 = arith.constant 3 : index
      %c0_193 = arith.constant 0 : index
      %c1_194 = arith.constant 1 : index
      %c1_195 = arith.constant 1 : index
      %236 = vector.load %arg15[%c3_192, %c0_193, %c1_194, %c1_195] : memref<4x3x18x18xf32, #tpu.memory_space<vmem>>, vector<1x1x16x16xf32>
      %237 = vector.shape_cast %236 : vector<1x1x16x16xf32> to vector<16x16xf32>
      %238 = vector.broadcast %235 : f32 to vector<16x16xf32>
      %239 = arith.mulf %238, %237 : vector<16x16xf32>
      %240 = arith.addf %234, %239 : vector<16x16xf32>
      %c86 = arith.constant 86 : index
      %241 = memref.load %arg1[%c86] : memref<108xf32, #tpu.memory_space<smem>>
      %c3_196 = arith.constant 3 : index
      %c0_197 = arith.constant 0 : index
      %c1_198 = arith.constant 1 : index
      %c2_199 = arith.constant 2 : index
      %242 = vector.load %arg15[%c3_196, %c0_197, %c1_198, %c2_199] : memref<4x3x18x18xf32, #tpu.memory_space<vmem>>, vector<1x1x16x16xf32>
      %243 = vector.shape_cast %242 : vector<1x1x16x16xf32> to vector<16x16xf32>
      %244 = vector.broadcast %241 : f32 to vector<16x16xf32>
      %245 = arith.mulf %244, %243 : vector<16x16xf32>
      %246 = arith.addf %240, %245 : vector<16x16xf32>
      %c87 = arith.constant 87 : index
      %247 = memref.load %arg1[%c87] : memref<108xf32, #tpu.memory_space<smem>>
      %c3_200 = arith.constant 3 : index
      %c0_201 = arith.constant 0 : index
      %c2_202 = arith.constant 2 : index
      %c0_203 = arith.constant 0 : index
      %248 = vector.load %arg15[%c3_200, %c0_201, %c2_202, %c0_203] : memref<4x3x18x18xf32, #tpu.memory_space<vmem>>, vector<1x1x16x16xf32>
      %249 = vector.shape_cast %248 : vector<1x1x16x16xf32> to vector<16x16xf32>
      %250 = vector.broadcast %247 : f32 to vector<16x16xf32>
      %251 = arith.mulf %250, %249 : vector<16x16xf32>
      %252 = arith.addf %246, %251 : vector<16x16xf32>
      %c88 = arith.constant 88 : index
      %253 = memref.load %arg1[%c88] : memref<108xf32, #tpu.memory_space<smem>>
      %c3_204 = arith.constant 3 : index
      %c0_205 = arith.constant 0 : index
      %c2_206 = arith.constant 2 : index
      %c1_207 = arith.constant 1 : index
      %254 = vector.load %arg15[%c3_204, %c0_205, %c2_206, %c1_207] : memref<4x3x18x18xf32, #tpu.memory_space<vmem>>, vector<1x1x16x16xf32>
      %255 = vector.shape_cast %254 : vector<1x1x16x16xf32> to vector<16x16xf32>
      %256 = vector.broadcast %253 : f32 to vector<16x16xf32>
      %257 = arith.mulf %256, %255 : vector<16x16xf32>
      %258 = arith.addf %252, %257 : vector<16x16xf32>
      %c89 = arith.constant 89 : index
      %259 = memref.load %arg1[%c89] : memref<108xf32, #tpu.memory_space<smem>>
      %c3_208 = arith.constant 3 : index
      %c0_209 = arith.constant 0 : index
      %c2_210 = arith.constant 2 : index
      %c2_211 = arith.constant 2 : index
      %260 = vector.load %arg15[%c3_208, %c0_209, %c2_210, %c2_211] : memref<4x3x18x18xf32, #tpu.memory_space<vmem>>, vector<1x1x16x16xf32>
      %261 = vector.shape_cast %260 : vector<1x1x16x16xf32> to vector<16x16xf32>
      %262 = vector.broadcast %259 : f32 to vector<16x16xf32>
      %263 = arith.mulf %262, %261 : vector<16x16xf32>
      %264 = arith.addf %258, %263 : vector<16x16xf32>
      %c9 = arith.constant 9 : index
      %265 = memref.load %arg1[%c9] : memref<108xf32, #tpu.memory_space<smem>>
      %c0_212 = arith.constant 0 : index
      %c1_213 = arith.constant 1 : index
      %c0_214 = arith.constant 0 : index
      %c0_215 = arith.constant 0 : index
      %266 = vector.load %arg15[%c0_212, %c1_213, %c0_214, %c0_215] : memref<4x3x18x18xf32, #tpu.memory_space<vmem>>, vector<1x1x16x16xf32>
      %267 = vector.shape_cast %266 : vector<1x1x16x16xf32> to vector<16x16xf32>
      %268 = vector.broadcast %265 : f32 to vector<16x16xf32>
      %269 = arith.mulf %268, %267 : vector<16x16xf32>
      %c10 = arith.constant 10 : index
      %270 = memref.load %arg1[%c10] : memref<108xf32, #tpu.memory_space<smem>>
      %c0_216 = arith.constant 0 : index
      %c1_217 = arith.constant 1 : index
      %c0_218 = arith.constant 0 : index
      %c1_219 = arith.constant 1 : index
      %271 = vector.load %arg15[%c0_216, %c1_217, %c0_218, %c1_219] : memref<4x3x18x18xf32, #tpu.memory_space<vmem>>, vector<1x1x16x16xf32>
      %272 = vector.shape_cast %271 : vector<1x1x16x16xf32> to vector<16x16xf32>
      %273 = vector.broadcast %270 : f32 to vector<16x16xf32>
      %274 = arith.mulf %273, %272 : vector<16x16xf32>
      %275 = arith.addf %269, %274 : vector<16x16xf32>
      %c11 = arith.constant 11 : index
      %276 = memref.load %arg1[%c11] : memref<108xf32, #tpu.memory_space<smem>>
      %c0_220 = arith.constant 0 : index
      %c1_221 = arith.constant 1 : index
      %c0_222 = arith.constant 0 : index
      %c2_223 = arith.constant 2 : index
      %277 = vector.load %arg15[%c0_220, %c1_221, %c0_222, %c2_223] : memref<4x3x18x18xf32, #tpu.memory_space<vmem>>, vector<1x1x16x16xf32>
      %278 = vector.shape_cast %277 : vector<1x1x16x16xf32> to vector<16x16xf32>
      %279 = vector.broadcast %276 : f32 to vector<16x16xf32>
      %280 = arith.mulf %279, %278 : vector<16x16xf32>
      %281 = arith.addf %275, %280 : vector<16x16xf32>
      %c12 = arith.constant 12 : index
      %282 = memref.load %arg1[%c12] : memref<108xf32, #tpu.memory_space<smem>>
      %c0_224 = arith.constant 0 : index
      %c1_225 = arith.constant 1 : index
      %c1_226 = arith.constant 1 : index
      %c0_227 = arith.constant 0 : index
      %283 = vector.load %arg15[%c0_224, %c1_225, %c1_226, %c0_227] : memref<4x3x18x18xf32, #tpu.memory_space<vmem>>, vector<1x1x16x16xf32>
      %284 = vector.shape_cast %283 : vector<1x1x16x16xf32> to vector<16x16xf32>
      %285 = vector.broadcast %282 : f32 to vector<16x16xf32>
      %286 = arith.mulf %285, %284 : vector<16x16xf32>
      %287 = arith.addf %281, %286 : vector<16x16xf32>
      %c13 = arith.constant 13 : index
      %288 = memref.load %arg1[%c13] : memref<108xf32, #tpu.memory_space<smem>>
      %c0_228 = arith.constant 0 : index
      %c1_229 = arith.constant 1 : index
      %c1_230 = arith.constant 1 : index
      %c1_231 = arith.constant 1 : index
      %289 = vector.load %arg15[%c0_228, %c1_229, %c1_230, %c1_231] : memref<4x3x18x18xf32, #tpu.memory_space<vmem>>, vector<1x1x16x16xf32>
      %290 = vector.shape_cast %289 : vector<1x1x16x16xf32> to vector<16x16xf32>
      %291 = vector.broadcast %288 : f32 to vector<16x16xf32>
      %292 = arith.mulf %291, %290 : vector<16x16xf32>
      %293 = arith.addf %287, %292 : vector<16x16xf32>
      %c14 = arith.constant 14 : index
      %294 = memref.load %arg1[%c14] : memref<108xf32, #tpu.memory_space<smem>>
      %c0_232 = arith.constant 0 : index
      %c1_233 = arith.constant 1 : index
      %c1_234 = arith.constant 1 : index
      %c2_235 = arith.constant 2 : index
      %295 = vector.load %arg15[%c0_232, %c1_233, %c1_234, %c2_235] : memref<4x3x18x18xf32, #tpu.memory_space<vmem>>, vector<1x1x16x16xf32>
      %296 = vector.shape_cast %295 : vector<1x1x16x16xf32> to vector<16x16xf32>
      %297 = vector.broadcast %294 : f32 to vector<16x16xf32>
      %298 = arith.mulf %297, %296 : vector<16x16xf32>
      %299 = arith.addf %293, %298 : vector<16x16xf32>
      %c15 = arith.constant 15 : index
      %300 = memref.load %arg1[%c15] : memref<108xf32, #tpu.memory_space<smem>>
      %c0_236 = arith.constant 0 : index
      %c1_237 = arith.constant 1 : index
      %c2_238 = arith.constant 2 : index
      %c0_239 = arith.constant 0 : index
      %301 = vector.load %arg15[%c0_236, %c1_237, %c2_238, %c0_239] : memref<4x3x18x18xf32, #tpu.memory_space<vmem>>, vector<1x1x16x16xf32>
      %302 = vector.shape_cast %301 : vector<1x1x16x16xf32> to vector<16x16xf32>
      %303 = vector.broadcast %300 : f32 to vector<16x16xf32>
      %304 = arith.mulf %303, %302 : vector<16x16xf32>
      %305 = arith.addf %299, %304 : vector<16x16xf32>
      %c16 = arith.constant 16 : index
      %306 = memref.load %arg1[%c16] : memref<108xf32, #tpu.memory_space<smem>>
      %c0_240 = arith.constant 0 : index
      %c1_241 = arith.constant 1 : index
      %c2_242 = arith.constant 2 : index
      %c1_243 = arith.constant 1 : index
      %307 = vector.load %arg15[%c0_240, %c1_241, %c2_242, %c1_243] : memref<4x3x18x18xf32, #tpu.memory_space<vmem>>, vector<1x1x16x16xf32>
      %308 = vector.shape_cast %307 : vector<1x1x16x16xf32> to vector<16x16xf32>
      %309 = vector.broadcast %306 : f32 to vector<16x16xf32>
      %310 = arith.mulf %309, %308 : vector<16x16xf32>
      %311 = arith.addf %305, %310 : vector<16x16xf32>
      %c17 = arith.constant 17 : index
      %312 = memref.load %arg1[%c17] : memref<108xf32, #tpu.memory_space<smem>>
      %c0_244 = arith.constant 0 : index
      %c1_245 = arith.constant 1 : index
      %c2_246 = arith.constant 2 : index
      %c2_247 = arith.constant 2 : index
      %313 = vector.load %arg15[%c0_244, %c1_245, %c2_246, %c2_247] : memref<4x3x18x18xf32, #tpu.memory_space<vmem>>, vector<1x1x16x16xf32>
      %314 = vector.shape_cast %313 : vector<1x1x16x16xf32> to vector<16x16xf32>
      %315 = vector.broadcast %312 : f32 to vector<16x16xf32>
      %316 = arith.mulf %315, %314 : vector<16x16xf32>
      %317 = arith.addf %311, %316 : vector<16x16xf32>
      %c36 = arith.constant 36 : index
      %318 = memref.load %arg1[%c36] : memref<108xf32, #tpu.memory_space<smem>>
      %c1_248 = arith.constant 1 : index
      %c1_249 = arith.constant 1 : index
      %c0_250 = arith.constant 0 : index
      %c0_251 = arith.constant 0 : index
      %319 = vector.load %arg15[%c1_248, %c1_249, %c0_250, %c0_251] : memref<4x3x18x18xf32, #tpu.memory_space<vmem>>, vector<1x1x16x16xf32>
      %320 = vector.shape_cast %319 : vector<1x1x16x16xf32> to vector<16x16xf32>
      %321 = vector.broadcast %318 : f32 to vector<16x16xf32>
      %322 = arith.mulf %321, %320 : vector<16x16xf32>
      %323 = arith.addf %317, %322 : vector<16x16xf32>
      %c37 = arith.constant 37 : index
      %324 = memref.load %arg1[%c37] : memref<108xf32, #tpu.memory_space<smem>>
      %c1_252 = arith.constant 1 : index
      %c1_253 = arith.constant 1 : index
      %c0_254 = arith.constant 0 : index
      %c1_255 = arith.constant 1 : index
      %325 = vector.load %arg15[%c1_252, %c1_253, %c0_254, %c1_255] : memref<4x3x18x18xf32, #tpu.memory_space<vmem>>, vector<1x1x16x16xf32>
      %326 = vector.shape_cast %325 : vector<1x1x16x16xf32> to vector<16x16xf32>
      %327 = vector.broadcast %324 : f32 to vector<16x16xf32>
      %328 = arith.mulf %327, %326 : vector<16x16xf32>
      %329 = arith.addf %323, %328 : vector<16x16xf32>
      %c38 = arith.constant 38 : index
      %330 = memref.load %arg1[%c38] : memref<108xf32, #tpu.memory_space<smem>>
      %c1_256 = arith.constant 1 : index
      %c1_257 = arith.constant 1 : index
      %c0_258 = arith.constant 0 : index
      %c2_259 = arith.constant 2 : index
      %331 = vector.load %arg15[%c1_256, %c1_257, %c0_258, %c2_259] : memref<4x3x18x18xf32, #tpu.memory_space<vmem>>, vector<1x1x16x16xf32>
      %332 = vector.shape_cast %331 : vector<1x1x16x16xf32> to vector<16x16xf32>
      %333 = vector.broadcast %330 : f32 to vector<16x16xf32>
      %334 = arith.mulf %333, %332 : vector<16x16xf32>
      %335 = arith.addf %329, %334 : vector<16x16xf32>
      %c39 = arith.constant 39 : index
      %336 = memref.load %arg1[%c39] : memref<108xf32, #tpu.memory_space<smem>>
      %c1_260 = arith.constant 1 : index
      %c1_261 = arith.constant 1 : index
      %c1_262 = arith.constant 1 : index
      %c0_263 = arith.constant 0 : index
      %337 = vector.load %arg15[%c1_260, %c1_261, %c1_262, %c0_263] : memref<4x3x18x18xf32, #tpu.memory_space<vmem>>, vector<1x1x16x16xf32>
      %338 = vector.shape_cast %337 : vector<1x1x16x16xf32> to vector<16x16xf32>
      %339 = vector.broadcast %336 : f32 to vector<16x16xf32>
      %340 = arith.mulf %339, %338 : vector<16x16xf32>
      %341 = arith.addf %335, %340 : vector<16x16xf32>
      %c40 = arith.constant 40 : index
      %342 = memref.load %arg1[%c40] : memref<108xf32, #tpu.memory_space<smem>>
      %c1_264 = arith.constant 1 : index
      %c1_265 = arith.constant 1 : index
      %c1_266 = arith.constant 1 : index
      %c1_267 = arith.constant 1 : index
      %343 = vector.load %arg15[%c1_264, %c1_265, %c1_266, %c1_267] : memref<4x3x18x18xf32, #tpu.memory_space<vmem>>, vector<1x1x16x16xf32>
      %344 = vector.shape_cast %343 : vector<1x1x16x16xf32> to vector<16x16xf32>
      %345 = vector.broadcast %342 : f32 to vector<16x16xf32>
      %346 = arith.mulf %345, %344 : vector<16x16xf32>
      %347 = arith.addf %341, %346 : vector<16x16xf32>
      %c41 = arith.constant 41 : index
      %348 = memref.load %arg1[%c41] : memref<108xf32, #tpu.memory_space<smem>>
      %c1_268 = arith.constant 1 : index
      %c1_269 = arith.constant 1 : index
      %c1_270 = arith.constant 1 : index
      %c2_271 = arith.constant 2 : index
      %349 = vector.load %arg15[%c1_268, %c1_269, %c1_270, %c2_271] : memref<4x3x18x18xf32, #tpu.memory_space<vmem>>, vector<1x1x16x16xf32>
      %350 = vector.shape_cast %349 : vector<1x1x16x16xf32> to vector<16x16xf32>
      %351 = vector.broadcast %348 : f32 to vector<16x16xf32>
      %352 = arith.mulf %351, %350 : vector<16x16xf32>
      %353 = arith.addf %347, %352 : vector<16x16xf32>
      %c42 = arith.constant 42 : index
      %354 = memref.load %arg1[%c42] : memref<108xf32, #tpu.memory_space<smem>>
      %c1_272 = arith.constant 1 : index
      %c1_273 = arith.constant 1 : index
      %c2_274 = arith.constant 2 : index
      %c0_275 = arith.constant 0 : index
      %355 = vector.load %arg15[%c1_272, %c1_273, %c2_274, %c0_275] : memref<4x3x18x18xf32, #tpu.memory_space<vmem>>, vector<1x1x16x16xf32>
      %356 = vector.shape_cast %355 : vector<1x1x16x16xf32> to vector<16x16xf32>
      %357 = vector.broadcast %354 : f32 to vector<16x16xf32>
      %358 = arith.mulf %357, %356 : vector<16x16xf32>
      %359 = arith.addf %353, %358 : vector<16x16xf32>
      %c43 = arith.constant 43 : index
      %360 = memref.load %arg1[%c43] : memref<108xf32, #tpu.memory_space<smem>>
      %c1_276 = arith.constant 1 : index
      %c1_277 = arith.constant 1 : index
      %c2_278 = arith.constant 2 : index
      %c1_279 = arith.constant 1 : index
      %361 = vector.load %arg15[%c1_276, %c1_277, %c2_278, %c1_279] : memref<4x3x18x18xf32, #tpu.memory_space<vmem>>, vector<1x1x16x16xf32>
      %362 = vector.shape_cast %361 : vector<1x1x16x16xf32> to vector<16x16xf32>
      %363 = vector.broadcast %360 : f32 to vector<16x16xf32>
      %364 = arith.mulf %363, %362 : vector<16x16xf32>
      %365 = arith.addf %359, %364 : vector<16x16xf32>
      %c44 = arith.constant 44 : index
      %366 = memref.load %arg1[%c44] : memref<108xf32, #tpu.memory_space<smem>>
      %c1_280 = arith.constant 1 : index
      %c1_281 = arith.constant 1 : index
      %c2_282 = arith.constant 2 : index
      %c2_283 = arith.constant 2 : index
      %367 = vector.load %arg15[%c1_280, %c1_281, %c2_282, %c2_283] : memref<4x3x18x18xf32, #tpu.memory_space<vmem>>, vector<1x1x16x16xf32>
      %368 = vector.shape_cast %367 : vector<1x1x16x16xf32> to vector<16x16xf32>
      %369 = vector.broadcast %366 : f32 to vector<16x16xf32>
      %370 = arith.mulf %369, %368 : vector<16x16xf32>
      %371 = arith.addf %365, %370 : vector<16x16xf32>
      %c63 = arith.constant 63 : index
      %372 = memref.load %arg1[%c63] : memref<108xf32, #tpu.memory_space<smem>>
      %c2_284 = arith.constant 2 : index
      %c1_285 = arith.constant 1 : index
      %c0_286 = arith.constant 0 : index
      %c0_287 = arith.constant 0 : index
      %373 = vector.load %arg15[%c2_284, %c1_285, %c0_286, %c0_287] : memref<4x3x18x18xf32, #tpu.memory_space<vmem>>, vector<1x1x16x16xf32>
      %374 = vector.shape_cast %373 : vector<1x1x16x16xf32> to vector<16x16xf32>
      %375 = vector.broadcast %372 : f32 to vector<16x16xf32>
      %376 = arith.mulf %375, %374 : vector<16x16xf32>
      %377 = arith.addf %371, %376 : vector<16x16xf32>
      %c64 = arith.constant 64 : index
      %378 = memref.load %arg1[%c64] : memref<108xf32, #tpu.memory_space<smem>>
      %c2_288 = arith.constant 2 : index
      %c1_289 = arith.constant 1 : index
      %c0_290 = arith.constant 0 : index
      %c1_291 = arith.constant 1 : index
      %379 = vector.load %arg15[%c2_288, %c1_289, %c0_290, %c1_291] : memref<4x3x18x18xf32, #tpu.memory_space<vmem>>, vector<1x1x16x16xf32>
      %380 = vector.shape_cast %379 : vector<1x1x16x16xf32> to vector<16x16xf32>
      %381 = vector.broadcast %378 : f32 to vector<16x16xf32>
      %382 = arith.mulf %381, %380 : vector<16x16xf32>
      %383 = arith.addf %377, %382 : vector<16x16xf32>
      %c65 = arith.constant 65 : index
      %384 = memref.load %arg1[%c65] : memref<108xf32, #tpu.memory_space<smem>>
      %c2_292 = arith.constant 2 : index
      %c1_293 = arith.constant 1 : index
      %c0_294 = arith.constant 0 : index
      %c2_295 = arith.constant 2 : index
      %385 = vector.load %arg15[%c2_292, %c1_293, %c0_294, %c2_295] : memref<4x3x18x18xf32, #tpu.memory_space<vmem>>, vector<1x1x16x16xf32>
      %386 = vector.shape_cast %385 : vector<1x1x16x16xf32> to vector<16x16xf32>
      %387 = vector.broadcast %384 : f32 to vector<16x16xf32>
      %388 = arith.mulf %387, %386 : vector<16x16xf32>
      %389 = arith.addf %383, %388 : vector<16x16xf32>
      %c66 = arith.constant 66 : index
      %390 = memref.load %arg1[%c66] : memref<108xf32, #tpu.memory_space<smem>>
      %c2_296 = arith.constant 2 : index
      %c1_297 = arith.constant 1 : index
      %c1_298 = arith.constant 1 : index
      %c0_299 = arith.constant 0 : index
      %391 = vector.load %arg15[%c2_296, %c1_297, %c1_298, %c0_299] : memref<4x3x18x18xf32, #tpu.memory_space<vmem>>, vector<1x1x16x16xf32>
      %392 = vector.shape_cast %391 : vector<1x1x16x16xf32> to vector<16x16xf32>
      %393 = vector.broadcast %390 : f32 to vector<16x16xf32>
      %394 = arith.mulf %393, %392 : vector<16x16xf32>
      %395 = arith.addf %389, %394 : vector<16x16xf32>
      %c67 = arith.constant 67 : index
      %396 = memref.load %arg1[%c67] : memref<108xf32, #tpu.memory_space<smem>>
      %c2_300 = arith.constant 2 : index
      %c1_301 = arith.constant 1 : index
      %c1_302 = arith.constant 1 : index
      %c1_303 = arith.constant 1 : index
      %397 = vector.load %arg15[%c2_300, %c1_301, %c1_302, %c1_303] : memref<4x3x18x18xf32, #tpu.memory_space<vmem>>, vector<1x1x16x16xf32>
      %398 = vector.shape_cast %397 : vector<1x1x16x16xf32> to vector<16x16xf32>
      %399 = vector.broadcast %396 : f32 to vector<16x16xf32>
      %400 = arith.mulf %399, %398 : vector<16x16xf32>
      %401 = arith.addf %395, %400 : vector<16x16xf32>
      %c68 = arith.constant 68 : index
      %402 = memref.load %arg1[%c68] : memref<108xf32, #tpu.memory_space<smem>>
      %c2_304 = arith.constant 2 : index
      %c1_305 = arith.constant 1 : index
      %c1_306 = arith.constant 1 : index
      %c2_307 = arith.constant 2 : index
      %403 = vector.load %arg15[%c2_304, %c1_305, %c1_306, %c2_307] : memref<4x3x18x18xf32, #tpu.memory_space<vmem>>, vector<1x1x16x16xf32>
      %404 = vector.shape_cast %403 : vector<1x1x16x16xf32> to vector<16x16xf32>
      %405 = vector.broadcast %402 : f32 to vector<16x16xf32>
      %406 = arith.mulf %405, %404 : vector<16x16xf32>
      %407 = arith.addf %401, %406 : vector<16x16xf32>
      %c69 = arith.constant 69 : index
      %408 = memref.load %arg1[%c69] : memref<108xf32, #tpu.memory_space<smem>>
      %c2_308 = arith.constant 2 : index
      %c1_309 = arith.constant 1 : index
      %c2_310 = arith.constant 2 : index
      %c0_311 = arith.constant 0 : index
      %409 = vector.load %arg15[%c2_308, %c1_309, %c2_310, %c0_311] : memref<4x3x18x18xf32, #tpu.memory_space<vmem>>, vector<1x1x16x16xf32>
      %410 = vector.shape_cast %409 : vector<1x1x16x16xf32> to vector<16x16xf32>
      %411 = vector.broadcast %408 : f32 to vector<16x16xf32>
      %412 = arith.mulf %411, %410 : vector<16x16xf32>
      %413 = arith.addf %407, %412 : vector<16x16xf32>
      %c70 = arith.constant 70 : index
      %414 = memref.load %arg1[%c70] : memref<108xf32, #tpu.memory_space<smem>>
      %c2_312 = arith.constant 2 : index
      %c1_313 = arith.constant 1 : index
      %c2_314 = arith.constant 2 : index
      %c1_315 = arith.constant 1 : index
      %415 = vector.load %arg15[%c2_312, %c1_313, %c2_314, %c1_315] : memref<4x3x18x18xf32, #tpu.memory_space<vmem>>, vector<1x1x16x16xf32>
      %416 = vector.shape_cast %415 : vector<1x1x16x16xf32> to vector<16x16xf32>
      %417 = vector.broadcast %414 : f32 to vector<16x16xf32>
      %418 = arith.mulf %417, %416 : vector<16x16xf32>
      %419 = arith.addf %413, %418 : vector<16x16xf32>
      %c71 = arith.constant 71 : index
      %420 = memref.load %arg1[%c71] : memref<108xf32, #tpu.memory_space<smem>>
      %c2_316 = arith.constant 2 : index
      %c1_317 = arith.constant 1 : index
      %c2_318 = arith.constant 2 : index
      %c2_319 = arith.constant 2 : index
      %421 = vector.load %arg15[%c2_316, %c1_317, %c2_318, %c2_319] : memref<4x3x18x18xf32, #tpu.memory_space<vmem>>, vector<1x1x16x16xf32>
      %422 = vector.shape_cast %421 : vector<1x1x16x16xf32> to vector<16x16xf32>
      %423 = vector.broadcast %420 : f32 to vector<16x16xf32>
      %424 = arith.mulf %423, %422 : vector<16x16xf32>
      %425 = arith.addf %419, %424 : vector<16x16xf32>
      %c90 = arith.constant 90 : index
      %426 = memref.load %arg1[%c90] : memref<108xf32, #tpu.memory_space<smem>>
      %c3_320 = arith.constant 3 : index
      %c1_321 = arith.constant 1 : index
      %c0_322 = arith.constant 0 : index
      %c0_323 = arith.constant 0 : index
      %427 = vector.load %arg15[%c3_320, %c1_321, %c0_322, %c0_323] : memref<4x3x18x18xf32, #tpu.memory_space<vmem>>, vector<1x1x16x16xf32>
      %428 = vector.shape_cast %427 : vector<1x1x16x16xf32> to vector<16x16xf32>
      %429 = vector.broadcast %426 : f32 to vector<16x16xf32>
      %430 = arith.mulf %429, %428 : vector<16x16xf32>
      %431 = arith.addf %425, %430 : vector<16x16xf32>
      %c91 = arith.constant 91 : index
      %432 = memref.load %arg1[%c91] : memref<108xf32, #tpu.memory_space<smem>>
      %c3_324 = arith.constant 3 : index
      %c1_325 = arith.constant 1 : index
      %c0_326 = arith.constant 0 : index
      %c1_327 = arith.constant 1 : index
      %433 = vector.load %arg15[%c3_324, %c1_325, %c0_326, %c1_327] : memref<4x3x18x18xf32, #tpu.memory_space<vmem>>, vector<1x1x16x16xf32>
      %434 = vector.shape_cast %433 : vector<1x1x16x16xf32> to vector<16x16xf32>
      %435 = vector.broadcast %432 : f32 to vector<16x16xf32>
      %436 = arith.mulf %435, %434 : vector<16x16xf32>
      %437 = arith.addf %431, %436 : vector<16x16xf32>
      %c92 = arith.constant 92 : index
      %438 = memref.load %arg1[%c92] : memref<108xf32, #tpu.memory_space<smem>>
      %c3_328 = arith.constant 3 : index
      %c1_329 = arith.constant 1 : index
      %c0_330 = arith.constant 0 : index
      %c2_331 = arith.constant 2 : index
      %439 = vector.load %arg15[%c3_328, %c1_329, %c0_330, %c2_331] : memref<4x3x18x18xf32, #tpu.memory_space<vmem>>, vector<1x1x16x16xf32>
      %440 = vector.shape_cast %439 : vector<1x1x16x16xf32> to vector<16x16xf32>
      %441 = vector.broadcast %438 : f32 to vector<16x16xf32>
      %442 = arith.mulf %441, %440 : vector<16x16xf32>
      %443 = arith.addf %437, %442 : vector<16x16xf32>
      %c93 = arith.constant 93 : index
      %444 = memref.load %arg1[%c93] : memref<108xf32, #tpu.memory_space<smem>>
      %c3_332 = arith.constant 3 : index
      %c1_333 = arith.constant 1 : index
      %c1_334 = arith.constant 1 : index
      %c0_335 = arith.constant 0 : index
      %445 = vector.load %arg15[%c3_332, %c1_333, %c1_334, %c0_335] : memref<4x3x18x18xf32, #tpu.memory_space<vmem>>, vector<1x1x16x16xf32>
      %446 = vector.shape_cast %445 : vector<1x1x16x16xf32> to vector<16x16xf32>
      %447 = vector.broadcast %444 : f32 to vector<16x16xf32>
      %448 = arith.mulf %447, %446 : vector<16x16xf32>
      %449 = arith.addf %443, %448 : vector<16x16xf32>
      %c94 = arith.constant 94 : index
      %450 = memref.load %arg1[%c94] : memref<108xf32, #tpu.memory_space<smem>>
      %c3_336 = arith.constant 3 : index
      %c1_337 = arith.constant 1 : index
      %c1_338 = arith.constant 1 : index
      %c1_339 = arith.constant 1 : index
      %451 = vector.load %arg15[%c3_336, %c1_337, %c1_338, %c1_339] : memref<4x3x18x18xf32, #tpu.memory_space<vmem>>, vector<1x1x16x16xf32>
      %452 = vector.shape_cast %451 : vector<1x1x16x16xf32> to vector<16x16xf32>
      %453 = vector.broadcast %450 : f32 to vector<16x16xf32>
      %454 = arith.mulf %453, %452 : vector<16x16xf32>
      %455 = arith.addf %449, %454 : vector<16x16xf32>
      %c95 = arith.constant 95 : index
      %456 = memref.load %arg1[%c95] : memref<108xf32, #tpu.memory_space<smem>>
      %c3_340 = arith.constant 3 : index
      %c1_341 = arith.constant 1 : index
      %c1_342 = arith.constant 1 : index
      %c2_343 = arith.constant 2 : index
      %457 = vector.load %arg15[%c3_340, %c1_341, %c1_342, %c2_343] : memref<4x3x18x18xf32, #tpu.memory_space<vmem>>, vector<1x1x16x16xf32>
      %458 = vector.shape_cast %457 : vector<1x1x16x16xf32> to vector<16x16xf32>
      %459 = vector.broadcast %456 : f32 to vector<16x16xf32>
      %460 = arith.mulf %459, %458 : vector<16x16xf32>
      %461 = arith.addf %455, %460 : vector<16x16xf32>
      %c96 = arith.constant 96 : index
      %462 = memref.load %arg1[%c96] : memref<108xf32, #tpu.memory_space<smem>>
      %c3_344 = arith.constant 3 : index
      %c1_345 = arith.constant 1 : index
      %c2_346 = arith.constant 2 : index
      %c0_347 = arith.constant 0 : index
      %463 = vector.load %arg15[%c3_344, %c1_345, %c2_346, %c0_347] : memref<4x3x18x18xf32, #tpu.memory_space<vmem>>, vector<1x1x16x16xf32>
      %464 = vector.shape_cast %463 : vector<1x1x16x16xf32> to vector<16x16xf32>
      %465 = vector.broadcast %462 : f32 to vector<16x16xf32>
      %466 = arith.mulf %465, %464 : vector<16x16xf32>
      %467 = arith.addf %461, %466 : vector<16x16xf32>
      %c97 = arith.constant 97 : index
      %468 = memref.load %arg1[%c97] : memref<108xf32, #tpu.memory_space<smem>>
      %c3_348 = arith.constant 3 : index
      %c1_349 = arith.constant 1 : index
      %c2_350 = arith.constant 2 : index
      %c1_351 = arith.constant 1 : index
      %469 = vector.load %arg15[%c3_348, %c1_349, %c2_350, %c1_351] : memref<4x3x18x18xf32, #tpu.memory_space<vmem>>, vector<1x1x16x16xf32>
      %470 = vector.shape_cast %469 : vector<1x1x16x16xf32> to vector<16x16xf32>
      %471 = vector.broadcast %468 : f32 to vector<16x16xf32>
      %472 = arith.mulf %471, %470 : vector<16x16xf32>
      %473 = arith.addf %467, %472 : vector<16x16xf32>
      %c98 = arith.constant 98 : index
      %474 = memref.load %arg1[%c98] : memref<108xf32, #tpu.memory_space<smem>>
      %c3_352 = arith.constant 3 : index
      %c1_353 = arith.constant 1 : index
      %c2_354 = arith.constant 2 : index
      %c2_355 = arith.constant 2 : index
      %475 = vector.load %arg15[%c3_352, %c1_353, %c2_354, %c2_355] : memref<4x3x18x18xf32, #tpu.memory_space<vmem>>, vector<1x1x16x16xf32>
      %476 = vector.shape_cast %475 : vector<1x1x16x16xf32> to vector<16x16xf32>
      %477 = vector.broadcast %474 : f32 to vector<16x16xf32>
      %478 = arith.mulf %477, %476 : vector<16x16xf32>
      %479 = arith.addf %473, %478 : vector<16x16xf32>
      %c18 = arith.constant 18 : index
      %480 = memref.load %arg1[%c18] : memref<108xf32, #tpu.memory_space<smem>>
      %c0_356 = arith.constant 0 : index
      %c2_357 = arith.constant 2 : index
      %c0_358 = arith.constant 0 : index
      %c0_359 = arith.constant 0 : index
      %481 = vector.load %arg15[%c0_356, %c2_357, %c0_358, %c0_359] : memref<4x3x18x18xf32, #tpu.memory_space<vmem>>, vector<1x1x16x16xf32>
      %482 = vector.shape_cast %481 : vector<1x1x16x16xf32> to vector<16x16xf32>
      %483 = vector.broadcast %480 : f32 to vector<16x16xf32>
      %484 = arith.mulf %483, %482 : vector<16x16xf32>
      %c19 = arith.constant 19 : index
      %485 = memref.load %arg1[%c19] : memref<108xf32, #tpu.memory_space<smem>>
      %c0_360 = arith.constant 0 : index
      %c2_361 = arith.constant 2 : index
      %c0_362 = arith.constant 0 : index
      %c1_363 = arith.constant 1 : index
      %486 = vector.load %arg15[%c0_360, %c2_361, %c0_362, %c1_363] : memref<4x3x18x18xf32, #tpu.memory_space<vmem>>, vector<1x1x16x16xf32>
      %487 = vector.shape_cast %486 : vector<1x1x16x16xf32> to vector<16x16xf32>
      %488 = vector.broadcast %485 : f32 to vector<16x16xf32>
      %489 = arith.mulf %488, %487 : vector<16x16xf32>
      %490 = arith.addf %484, %489 : vector<16x16xf32>
      %c20 = arith.constant 20 : index
      %491 = memref.load %arg1[%c20] : memref<108xf32, #tpu.memory_space<smem>>
      %c0_364 = arith.constant 0 : index
      %c2_365 = arith.constant 2 : index
      %c0_366 = arith.constant 0 : index
      %c2_367 = arith.constant 2 : index
      %492 = vector.load %arg15[%c0_364, %c2_365, %c0_366, %c2_367] : memref<4x3x18x18xf32, #tpu.memory_space<vmem>>, vector<1x1x16x16xf32>
      %493 = vector.shape_cast %492 : vector<1x1x16x16xf32> to vector<16x16xf32>
      %494 = vector.broadcast %491 : f32 to vector<16x16xf32>
      %495 = arith.mulf %494, %493 : vector<16x16xf32>
      %496 = arith.addf %490, %495 : vector<16x16xf32>
      %c21 = arith.constant 21 : index
      %497 = memref.load %arg1[%c21] : memref<108xf32, #tpu.memory_space<smem>>
      %c0_368 = arith.constant 0 : index
      %c2_369 = arith.constant 2 : index
      %c1_370 = arith.constant 1 : index
      %c0_371 = arith.constant 0 : index
      %498 = vector.load %arg15[%c0_368, %c2_369, %c1_370, %c0_371] : memref<4x3x18x18xf32, #tpu.memory_space<vmem>>, vector<1x1x16x16xf32>
      %499 = vector.shape_cast %498 : vector<1x1x16x16xf32> to vector<16x16xf32>
      %500 = vector.broadcast %497 : f32 to vector<16x16xf32>
      %501 = arith.mulf %500, %499 : vector<16x16xf32>
      %502 = arith.addf %496, %501 : vector<16x16xf32>
      %c22 = arith.constant 22 : index
      %503 = memref.load %arg1[%c22] : memref<108xf32, #tpu.memory_space<smem>>
      %c0_372 = arith.constant 0 : index
      %c2_373 = arith.constant 2 : index
      %c1_374 = arith.constant 1 : index
      %c1_375 = arith.constant 1 : index
      %504 = vector.load %arg15[%c0_372, %c2_373, %c1_374, %c1_375] : memref<4x3x18x18xf32, #tpu.memory_space<vmem>>, vector<1x1x16x16xf32>
      %505 = vector.shape_cast %504 : vector<1x1x16x16xf32> to vector<16x16xf32>
      %506 = vector.broadcast %503 : f32 to vector<16x16xf32>
      %507 = arith.mulf %506, %505 : vector<16x16xf32>
      %508 = arith.addf %502, %507 : vector<16x16xf32>
      %c23 = arith.constant 23 : index
      %509 = memref.load %arg1[%c23] : memref<108xf32, #tpu.memory_space<smem>>
      %c0_376 = arith.constant 0 : index
      %c2_377 = arith.constant 2 : index
      %c1_378 = arith.constant 1 : index
      %c2_379 = arith.constant 2 : index
      %510 = vector.load %arg15[%c0_376, %c2_377, %c1_378, %c2_379] : memref<4x3x18x18xf32, #tpu.memory_space<vmem>>, vector<1x1x16x16xf32>
      %511 = vector.shape_cast %510 : vector<1x1x16x16xf32> to vector<16x16xf32>
      %512 = vector.broadcast %509 : f32 to vector<16x16xf32>
      %513 = arith.mulf %512, %511 : vector<16x16xf32>
      %514 = arith.addf %508, %513 : vector<16x16xf32>
      %c24 = arith.constant 24 : index
      %515 = memref.load %arg1[%c24] : memref<108xf32, #tpu.memory_space<smem>>
      %c0_380 = arith.constant 0 : index
      %c2_381 = arith.constant 2 : index
      %c2_382 = arith.constant 2 : index
      %c0_383 = arith.constant 0 : index
      %516 = vector.load %arg15[%c0_380, %c2_381, %c2_382, %c0_383] : memref<4x3x18x18xf32, #tpu.memory_space<vmem>>, vector<1x1x16x16xf32>
      %517 = vector.shape_cast %516 : vector<1x1x16x16xf32> to vector<16x16xf32>
      %518 = vector.broadcast %515 : f32 to vector<16x16xf32>
      %519 = arith.mulf %518, %517 : vector<16x16xf32>
      %520 = arith.addf %514, %519 : vector<16x16xf32>
      %c25 = arith.constant 25 : index
      %521 = memref.load %arg1[%c25] : memref<108xf32, #tpu.memory_space<smem>>
      %c0_384 = arith.constant 0 : index
      %c2_385 = arith.constant 2 : index
      %c2_386 = arith.constant 2 : index
      %c1_387 = arith.constant 1 : index
      %522 = vector.load %arg15[%c0_384, %c2_385, %c2_386, %c1_387] : memref<4x3x18x18xf32, #tpu.memory_space<vmem>>, vector<1x1x16x16xf32>
      %523 = vector.shape_cast %522 : vector<1x1x16x16xf32> to vector<16x16xf32>
      %524 = vector.broadcast %521 : f32 to vector<16x16xf32>
      %525 = arith.mulf %524, %523 : vector<16x16xf32>
      %526 = arith.addf %520, %525 : vector<16x16xf32>
      %c26 = arith.constant 26 : index
      %527 = memref.load %arg1[%c26] : memref<108xf32, #tpu.memory_space<smem>>
      %c0_388 = arith.constant 0 : index
      %c2_389 = arith.constant 2 : index
      %c2_390 = arith.constant 2 : index
      %c2_391 = arith.constant 2 : index
      %528 = vector.load %arg15[%c0_388, %c2_389, %c2_390, %c2_391] : memref<4x3x18x18xf32, #tpu.memory_space<vmem>>, vector<1x1x16x16xf32>
      %529 = vector.shape_cast %528 : vector<1x1x16x16xf32> to vector<16x16xf32>
      %530 = vector.broadcast %527 : f32 to vector<16x16xf32>
      %531 = arith.mulf %530, %529 : vector<16x16xf32>
      %532 = arith.addf %526, %531 : vector<16x16xf32>
      %c45 = arith.constant 45 : index
      %533 = memref.load %arg1[%c45] : memref<108xf32, #tpu.memory_space<smem>>
      %c1_392 = arith.constant 1 : index
      %c2_393 = arith.constant 2 : index
      %c0_394 = arith.constant 0 : index
      %c0_395 = arith.constant 0 : index
      %534 = vector.load %arg15[%c1_392, %c2_393, %c0_394, %c0_395] : memref<4x3x18x18xf32, #tpu.memory_space<vmem>>, vector<1x1x16x16xf32>
      %535 = vector.shape_cast %534 : vector<1x1x16x16xf32> to vector<16x16xf32>
      %536 = vector.broadcast %533 : f32 to vector<16x16xf32>
      %537 = arith.mulf %536, %535 : vector<16x16xf32>
      %538 = arith.addf %532, %537 : vector<16x16xf32>
      %c46 = arith.constant 46 : index
      %539 = memref.load %arg1[%c46] : memref<108xf32, #tpu.memory_space<smem>>
      %c1_396 = arith.constant 1 : index
      %c2_397 = arith.constant 2 : index
      %c0_398 = arith.constant 0 : index
      %c1_399 = arith.constant 1 : index
      %540 = vector.load %arg15[%c1_396, %c2_397, %c0_398, %c1_399] : memref<4x3x18x18xf32, #tpu.memory_space<vmem>>, vector<1x1x16x16xf32>
      %541 = vector.shape_cast %540 : vector<1x1x16x16xf32> to vector<16x16xf32>
      %542 = vector.broadcast %539 : f32 to vector<16x16xf32>
      %543 = arith.mulf %542, %541 : vector<16x16xf32>
      %544 = arith.addf %538, %543 : vector<16x16xf32>
      %c47 = arith.constant 47 : index
      %545 = memref.load %arg1[%c47] : memref<108xf32, #tpu.memory_space<smem>>
      %c1_400 = arith.constant 1 : index
      %c2_401 = arith.constant 2 : index
      %c0_402 = arith.constant 0 : index
      %c2_403 = arith.constant 2 : index
      %546 = vector.load %arg15[%c1_400, %c2_401, %c0_402, %c2_403] : memref<4x3x18x18xf32, #tpu.memory_space<vmem>>, vector<1x1x16x16xf32>
      %547 = vector.shape_cast %546 : vector<1x1x16x16xf32> to vector<16x16xf32>
      %548 = vector.broadcast %545 : f32 to vector<16x16xf32>
      %549 = arith.mulf %548, %547 : vector<16x16xf32>
      %550 = arith.addf %544, %549 : vector<16x16xf32>
      %c48 = arith.constant 48 : index
      %551 = memref.load %arg1[%c48] : memref<108xf32, #tpu.memory_space<smem>>
      %c1_404 = arith.constant 1 : index
      %c2_405 = arith.constant 2 : index
      %c1_406 = arith.constant 1 : index
      %c0_407 = arith.constant 0 : index
      %552 = vector.load %arg15[%c1_404, %c2_405, %c1_406, %c0_407] : memref<4x3x18x18xf32, #tpu.memory_space<vmem>>, vector<1x1x16x16xf32>
      %553 = vector.shape_cast %552 : vector<1x1x16x16xf32> to vector<16x16xf32>
      %554 = vector.broadcast %551 : f32 to vector<16x16xf32>
      %555 = arith.mulf %554, %553 : vector<16x16xf32>
      %556 = arith.addf %550, %555 : vector<16x16xf32>
      %c49 = arith.constant 49 : index
      %557 = memref.load %arg1[%c49] : memref<108xf32, #tpu.memory_space<smem>>
      %c1_408 = arith.constant 1 : index
      %c2_409 = arith.constant 2 : index
      %c1_410 = arith.constant 1 : index
      %c1_411 = arith.constant 1 : index
      %558 = vector.load %arg15[%c1_408, %c2_409, %c1_410, %c1_411] : memref<4x3x18x18xf32, #tpu.memory_space<vmem>>, vector<1x1x16x16xf32>
      %559 = vector.shape_cast %558 : vector<1x1x16x16xf32> to vector<16x16xf32>
      %560 = vector.broadcast %557 : f32 to vector<16x16xf32>
      %561 = arith.mulf %560, %559 : vector<16x16xf32>
      %562 = arith.addf %556, %561 : vector<16x16xf32>
      %c50 = arith.constant 50 : index
      %563 = memref.load %arg1[%c50] : memref<108xf32, #tpu.memory_space<smem>>
      %c1_412 = arith.constant 1 : index
      %c2_413 = arith.constant 2 : index
      %c1_414 = arith.constant 1 : index
      %c2_415 = arith.constant 2 : index
      %564 = vector.load %arg15[%c1_412, %c2_413, %c1_414, %c2_415] : memref<4x3x18x18xf32, #tpu.memory_space<vmem>>, vector<1x1x16x16xf32>
      %565 = vector.shape_cast %564 : vector<1x1x16x16xf32> to vector<16x16xf32>
      %566 = vector.broadcast %563 : f32 to vector<16x16xf32>
      %567 = arith.mulf %566, %565 : vector<16x16xf32>
      %568 = arith.addf %562, %567 : vector<16x16xf32>
      %c51 = arith.constant 51 : index
      %569 = memref.load %arg1[%c51] : memref<108xf32, #tpu.memory_space<smem>>
      %c1_416 = arith.constant 1 : index
      %c2_417 = arith.constant 2 : index
      %c2_418 = arith.constant 2 : index
      %c0_419 = arith.constant 0 : index
      %570 = vector.load %arg15[%c1_416, %c2_417, %c2_418, %c0_419] : memref<4x3x18x18xf32, #tpu.memory_space<vmem>>, vector<1x1x16x16xf32>
      %571 = vector.shape_cast %570 : vector<1x1x16x16xf32> to vector<16x16xf32>
      %572 = vector.broadcast %569 : f32 to vector<16x16xf32>
      %573 = arith.mulf %572, %571 : vector<16x16xf32>
      %574 = arith.addf %568, %573 : vector<16x16xf32>
      %c52 = arith.constant 52 : index
      %575 = memref.load %arg1[%c52] : memref<108xf32, #tpu.memory_space<smem>>
      %c1_420 = arith.constant 1 : index
      %c2_421 = arith.constant 2 : index
      %c2_422 = arith.constant 2 : index
      %c1_423 = arith.constant 1 : index
      %576 = vector.load %arg15[%c1_420, %c2_421, %c2_422, %c1_423] : memref<4x3x18x18xf32, #tpu.memory_space<vmem>>, vector<1x1x16x16xf32>
      %577 = vector.shape_cast %576 : vector<1x1x16x16xf32> to vector<16x16xf32>
      %578 = vector.broadcast %575 : f32 to vector<16x16xf32>
      %579 = arith.mulf %578, %577 : vector<16x16xf32>
      %580 = arith.addf %574, %579 : vector<16x16xf32>
      %c53 = arith.constant 53 : index
      %581 = memref.load %arg1[%c53] : memref<108xf32, #tpu.memory_space<smem>>
      %c1_424 = arith.constant 1 : index
      %c2_425 = arith.constant 2 : index
      %c2_426 = arith.constant 2 : index
      %c2_427 = arith.constant 2 : index
      %582 = vector.load %arg15[%c1_424, %c2_425, %c2_426, %c2_427] : memref<4x3x18x18xf32, #tpu.memory_space<vmem>>, vector<1x1x16x16xf32>
      %583 = vector.shape_cast %582 : vector<1x1x16x16xf32> to vector<16x16xf32>
      %584 = vector.broadcast %581 : f32 to vector<16x16xf32>
      %585 = arith.mulf %584, %583 : vector<16x16xf32>
      %586 = arith.addf %580, %585 : vector<16x16xf32>
      %c72 = arith.constant 72 : index
      %587 = memref.load %arg1[%c72] : memref<108xf32, #tpu.memory_space<smem>>
      %c2_428 = arith.constant 2 : index
      %c2_429 = arith.constant 2 : index
      %c0_430 = arith.constant 0 : index
      %c0_431 = arith.constant 0 : index
      %588 = vector.load %arg15[%c2_428, %c2_429, %c0_430, %c0_431] : memref<4x3x18x18xf32, #tpu.memory_space<vmem>>, vector<1x1x16x16xf32>
      %589 = vector.shape_cast %588 : vector<1x1x16x16xf32> to vector<16x16xf32>
      %590 = vector.broadcast %587 : f32 to vector<16x16xf32>
      %591 = arith.mulf %590, %589 : vector<16x16xf32>
      %592 = arith.addf %586, %591 : vector<16x16xf32>
      %c73 = arith.constant 73 : index
      %593 = memref.load %arg1[%c73] : memref<108xf32, #tpu.memory_space<smem>>
      %c2_432 = arith.constant 2 : index
      %c2_433 = arith.constant 2 : index
      %c0_434 = arith.constant 0 : index
      %c1_435 = arith.constant 1 : index
      %594 = vector.load %arg15[%c2_432, %c2_433, %c0_434, %c1_435] : memref<4x3x18x18xf32, #tpu.memory_space<vmem>>, vector<1x1x16x16xf32>
      %595 = vector.shape_cast %594 : vector<1x1x16x16xf32> to vector<16x16xf32>
      %596 = vector.broadcast %593 : f32 to vector<16x16xf32>
      %597 = arith.mulf %596, %595 : vector<16x16xf32>
      %598 = arith.addf %592, %597 : vector<16x16xf32>
      %c74 = arith.constant 74 : index
      %599 = memref.load %arg1[%c74] : memref<108xf32, #tpu.memory_space<smem>>
      %c2_436 = arith.constant 2 : index
      %c2_437 = arith.constant 2 : index
      %c0_438 = arith.constant 0 : index
      %c2_439 = arith.constant 2 : index
      %600 = vector.load %arg15[%c2_436, %c2_437, %c0_438, %c2_439] : memref<4x3x18x18xf32, #tpu.memory_space<vmem>>, vector<1x1x16x16xf32>
      %601 = vector.shape_cast %600 : vector<1x1x16x16xf32> to vector<16x16xf32>
      %602 = vector.broadcast %599 : f32 to vector<16x16xf32>
      %603 = arith.mulf %602, %601 : vector<16x16xf32>
      %604 = arith.addf %598, %603 : vector<16x16xf32>
      %c75 = arith.constant 75 : index
      %605 = memref.load %arg1[%c75] : memref<108xf32, #tpu.memory_space<smem>>
      %c2_440 = arith.constant 2 : index
      %c2_441 = arith.constant 2 : index
      %c1_442 = arith.constant 1 : index
      %c0_443 = arith.constant 0 : index
      %606 = vector.load %arg15[%c2_440, %c2_441, %c1_442, %c0_443] : memref<4x3x18x18xf32, #tpu.memory_space<vmem>>, vector<1x1x16x16xf32>
      %607 = vector.shape_cast %606 : vector<1x1x16x16xf32> to vector<16x16xf32>
      %608 = vector.broadcast %605 : f32 to vector<16x16xf32>
      %609 = arith.mulf %608, %607 : vector<16x16xf32>
      %610 = arith.addf %604, %609 : vector<16x16xf32>
      %c76 = arith.constant 76 : index
      %611 = memref.load %arg1[%c76] : memref<108xf32, #tpu.memory_space<smem>>
      %c2_444 = arith.constant 2 : index
      %c2_445 = arith.constant 2 : index
      %c1_446 = arith.constant 1 : index
      %c1_447 = arith.constant 1 : index
      %612 = vector.load %arg15[%c2_444, %c2_445, %c1_446, %c1_447] : memref<4x3x18x18xf32, #tpu.memory_space<vmem>>, vector<1x1x16x16xf32>
      %613 = vector.shape_cast %612 : vector<1x1x16x16xf32> to vector<16x16xf32>
      %614 = vector.broadcast %611 : f32 to vector<16x16xf32>
      %615 = arith.mulf %614, %613 : vector<16x16xf32>
      %616 = arith.addf %610, %615 : vector<16x16xf32>
      %c77 = arith.constant 77 : index
      %617 = memref.load %arg1[%c77] : memref<108xf32, #tpu.memory_space<smem>>
      %c2_448 = arith.constant 2 : index
      %c2_449 = arith.constant 2 : index
      %c1_450 = arith.constant 1 : index
      %c2_451 = arith.constant 2 : index
      %618 = vector.load %arg15[%c2_448, %c2_449, %c1_450, %c2_451] : memref<4x3x18x18xf32, #tpu.memory_space<vmem>>, vector<1x1x16x16xf32>
      %619 = vector.shape_cast %618 : vector<1x1x16x16xf32> to vector<16x16xf32>
      %620 = vector.broadcast %617 : f32 to vector<16x16xf32>
      %621 = arith.mulf %620, %619 : vector<16x16xf32>
      %622 = arith.addf %616, %621 : vector<16x16xf32>
      %c78 = arith.constant 78 : index
      %623 = memref.load %arg1[%c78] : memref<108xf32, #tpu.memory_space<smem>>
      %c2_452 = arith.constant 2 : index
      %c2_453 = arith.constant 2 : index
      %c2_454 = arith.constant 2 : index
      %c0_455 = arith.constant 0 : index
      %624 = vector.load %arg15[%c2_452, %c2_453, %c2_454, %c0_455] : memref<4x3x18x18xf32, #tpu.memory_space<vmem>>, vector<1x1x16x16xf32>
      %625 = vector.shape_cast %624 : vector<1x1x16x16xf32> to vector<16x16xf32>
      %626 = vector.broadcast %623 : f32 to vector<16x16xf32>
      %627 = arith.mulf %626, %625 : vector<16x16xf32>
      %628 = arith.addf %622, %627 : vector<16x16xf32>
      %c79 = arith.constant 79 : index
      %629 = memref.load %arg1[%c79] : memref<108xf32, #tpu.memory_space<smem>>
      %c2_456 = arith.constant 2 : index
      %c2_457 = arith.constant 2 : index
      %c2_458 = arith.constant 2 : index
      %c1_459 = arith.constant 1 : index
      %630 = vector.load %arg15[%c2_456, %c2_457, %c2_458, %c1_459] : memref<4x3x18x18xf32, #tpu.memory_space<vmem>>, vector<1x1x16x16xf32>
      %631 = vector.shape_cast %630 : vector<1x1x16x16xf32> to vector<16x16xf32>
      %632 = vector.broadcast %629 : f32 to vector<16x16xf32>
      %633 = arith.mulf %632, %631 : vector<16x16xf32>
      %634 = arith.addf %628, %633 : vector<16x16xf32>
      %c80 = arith.constant 80 : index
      %635 = memref.load %arg1[%c80] : memref<108xf32, #tpu.memory_space<smem>>
      %c2_460 = arith.constant 2 : index
      %c2_461 = arith.constant 2 : index
      %c2_462 = arith.constant 2 : index
      %c2_463 = arith.constant 2 : index
      %636 = vector.load %arg15[%c2_460, %c2_461, %c2_462, %c2_463] : memref<4x3x18x18xf32, #tpu.memory_space<vmem>>, vector<1x1x16x16xf32>
      %637 = vector.shape_cast %636 : vector<1x1x16x16xf32> to vector<16x16xf32>
      %638 = vector.broadcast %635 : f32 to vector<16x16xf32>
      %639 = arith.mulf %638, %637 : vector<16x16xf32>
      %640 = arith.addf %634, %639 : vector<16x16xf32>
      %c99 = arith.constant 99 : index
      %641 = memref.load %arg1[%c99] : memref<108xf32, #tpu.memory_space<smem>>
      %c3_464 = arith.constant 3 : index
      %c2_465 = arith.constant 2 : index
      %c0_466 = arith.constant 0 : index
      %c0_467 = arith.constant 0 : index
      %642 = vector.load %arg15[%c3_464, %c2_465, %c0_466, %c0_467] : memref<4x3x18x18xf32, #tpu.memory_space<vmem>>, vector<1x1x16x16xf32>
      %643 = vector.shape_cast %642 : vector<1x1x16x16xf32> to vector<16x16xf32>
      %644 = vector.broadcast %641 : f32 to vector<16x16xf32>
      %645 = arith.mulf %644, %643 : vector<16x16xf32>
      %646 = arith.addf %640, %645 : vector<16x16xf32>
      %c100 = arith.constant 100 : index
      %647 = memref.load %arg1[%c100] : memref<108xf32, #tpu.memory_space<smem>>
      %c3_468 = arith.constant 3 : index
      %c2_469 = arith.constant 2 : index
      %c0_470 = arith.constant 0 : index
      %c1_471 = arith.constant 1 : index
      %648 = vector.load %arg15[%c3_468, %c2_469, %c0_470, %c1_471] : memref<4x3x18x18xf32, #tpu.memory_space<vmem>>, vector<1x1x16x16xf32>
      %649 = vector.shape_cast %648 : vector<1x1x16x16xf32> to vector<16x16xf32>
      %650 = vector.broadcast %647 : f32 to vector<16x16xf32>
      %651 = arith.mulf %650, %649 : vector<16x16xf32>
      %652 = arith.addf %646, %651 : vector<16x16xf32>
      %c101 = arith.constant 101 : index
      %653 = memref.load %arg1[%c101] : memref<108xf32, #tpu.memory_space<smem>>
      %c3_472 = arith.constant 3 : index
      %c2_473 = arith.constant 2 : index
      %c0_474 = arith.constant 0 : index
      %c2_475 = arith.constant 2 : index
      %654 = vector.load %arg15[%c3_472, %c2_473, %c0_474, %c2_475] : memref<4x3x18x18xf32, #tpu.memory_space<vmem>>, vector<1x1x16x16xf32>
      %655 = vector.shape_cast %654 : vector<1x1x16x16xf32> to vector<16x16xf32>
      %656 = vector.broadcast %653 : f32 to vector<16x16xf32>
      %657 = arith.mulf %656, %655 : vector<16x16xf32>
      %658 = arith.addf %652, %657 : vector<16x16xf32>
      %c102 = arith.constant 102 : index
      %659 = memref.load %arg1[%c102] : memref<108xf32, #tpu.memory_space<smem>>
      %c3_476 = arith.constant 3 : index
      %c2_477 = arith.constant 2 : index
      %c1_478 = arith.constant 1 : index
      %c0_479 = arith.constant 0 : index
      %660 = vector.load %arg15[%c3_476, %c2_477, %c1_478, %c0_479] : memref<4x3x18x18xf32, #tpu.memory_space<vmem>>, vector<1x1x16x16xf32>
      %661 = vector.shape_cast %660 : vector<1x1x16x16xf32> to vector<16x16xf32>
      %662 = vector.broadcast %659 : f32 to vector<16x16xf32>
      %663 = arith.mulf %662, %661 : vector<16x16xf32>
      %664 = arith.addf %658, %663 : vector<16x16xf32>
      %c103 = arith.constant 103 : index
      %665 = memref.load %arg1[%c103] : memref<108xf32, #tpu.memory_space<smem>>
      %c3_480 = arith.constant 3 : index
      %c2_481 = arith.constant 2 : index
      %c1_482 = arith.constant 1 : index
      %c1_483 = arith.constant 1 : index
      %666 = vector.load %arg15[%c3_480, %c2_481, %c1_482, %c1_483] : memref<4x3x18x18xf32, #tpu.memory_space<vmem>>, vector<1x1x16x16xf32>
      %667 = vector.shape_cast %666 : vector<1x1x16x16xf32> to vector<16x16xf32>
      %668 = vector.broadcast %665 : f32 to vector<16x16xf32>
      %669 = arith.mulf %668, %667 : vector<16x16xf32>
      %670 = arith.addf %664, %669 : vector<16x16xf32>
      %c104 = arith.constant 104 : index
      %671 = memref.load %arg1[%c104] : memref<108xf32, #tpu.memory_space<smem>>
      %c3_484 = arith.constant 3 : index
      %c2_485 = arith.constant 2 : index
      %c1_486 = arith.constant 1 : index
      %c2_487 = arith.constant 2 : index
      %672 = vector.load %arg15[%c3_484, %c2_485, %c1_486, %c2_487] : memref<4x3x18x18xf32, #tpu.memory_space<vmem>>, vector<1x1x16x16xf32>
      %673 = vector.shape_cast %672 : vector<1x1x16x16xf32> to vector<16x16xf32>
      %674 = vector.broadcast %671 : f32 to vector<16x16xf32>
      %675 = arith.mulf %674, %673 : vector<16x16xf32>
      %676 = arith.addf %670, %675 : vector<16x16xf32>
      %c105 = arith.constant 105 : index
      %677 = memref.load %arg1[%c105] : memref<108xf32, #tpu.memory_space<smem>>
      %c3_488 = arith.constant 3 : index
      %c2_489 = arith.constant 2 : index
      %c2_490 = arith.constant 2 : index
      %c0_491 = arith.constant 0 : index
      %678 = vector.load %arg15[%c3_488, %c2_489, %c2_490, %c0_491] : memref<4x3x18x18xf32, #tpu.memory_space<vmem>>, vector<1x1x16x16xf32>
      %679 = vector.shape_cast %678 : vector<1x1x16x16xf32> to vector<16x16xf32>
      %680 = vector.broadcast %677 : f32 to vector<16x16xf32>
      %681 = arith.mulf %680, %679 : vector<16x16xf32>
      %682 = arith.addf %676, %681 : vector<16x16xf32>
      %c106 = arith.constant 106 : index
      %683 = memref.load %arg1[%c106] : memref<108xf32, #tpu.memory_space<smem>>
      %c3_492 = arith.constant 3 : index
      %c2_493 = arith.constant 2 : index
      %c2_494 = arith.constant 2 : index
      %c1_495 = arith.constant 1 : index
      %684 = vector.load %arg15[%c3_492, %c2_493, %c2_494, %c1_495] : memref<4x3x18x18xf32, #tpu.memory_space<vmem>>, vector<1x1x16x16xf32>
      %685 = vector.shape_cast %684 : vector<1x1x16x16xf32> to vector<16x16xf32>
      %686 = vector.broadcast %683 : f32 to vector<16x16xf32>
      %687 = arith.mulf %686, %685 : vector<16x16xf32>
      %688 = arith.addf %682, %687 : vector<16x16xf32>
      %c107 = arith.constant 107 : index
      %689 = memref.load %arg1[%c107] : memref<108xf32, #tpu.memory_space<smem>>
      %c3_496 = arith.constant 3 : index
      %c2_497 = arith.constant 2 : index
      %c2_498 = arith.constant 2 : index
      %c2_499 = arith.constant 2 : index
      %690 = vector.load %arg15[%c3_496, %c2_497, %c2_498, %c2_499] : memref<4x3x18x18xf32, #tpu.memory_space<vmem>>, vector<1x1x16x16xf32>
      %691 = vector.shape_cast %690 : vector<1x1x16x16xf32> to vector<16x16xf32>
      %692 = vector.broadcast %689 : f32 to vector<16x16xf32>
      %693 = arith.mulf %692, %691 : vector<16x16xf32>
      %694 = arith.addf %688, %693 : vector<16x16xf32>
      %695 = vector.shape_cast %264 : vector<16x16xf32> to vector<1x16x16xf32>
      %696 = vector.shape_cast %479 : vector<16x16xf32> to vector<1x16x16xf32>
      %697 = vector.shape_cast %694 : vector<16x16xf32> to vector<1x16x16xf32>
      %698 = tpu.concatenate %695, %696, %697 in 0 : vector<1x16x16xf32>, vector<1x16x16xf32>, vector<1x16x16xf32> -> vector<3x16x16xf32>
      %699 = arith.subf %46, %698 : vector<3x16x16xf32>
      %c0_500 = arith.constant 0 : index
      %c1_501 = arith.constant 1 : index
      %c1_502 = arith.constant 1 : index
      %700 = vector.load %arg16[%c0_500, %c1_501, %c1_502] : memref<3x18x18xf32, #tpu.memory_space<vmem>>, vector<3x16x16xf32>
      tpu.vector_store %arg16[%c0_500, %c1_501, %c1_502], %699 {strides = array<i32>} : memref<3x18x18xf32, #tpu.memory_space<vmem>>, vector<3x16x16xf32>,
      %cst_503 = arith.constant 0.000000e+00 : f32
      %701 = vector.broadcast %cst_503 : f32 to vector<3x16x16xf32>
      %702 = arith.select %6, %47, %701 : vector<3x16x16xi1>, vector<3x16x16xf32>
      %c0_504 = arith.constant 0 : index
      %c1_505 = arith.constant 1 : index
      %c1_506 = arith.constant 1 : index
      %703 = vector.load %arg17[%c0_504, %c1_505, %c1_506] : memref<3x18x18xf32, #tpu.memory_space<vmem>>, vector<3x16x16xf32>
      tpu.vector_store %arg17[%c0_504, %c1_505, %c1_506], %702 {strides = array<i32>} : memref<3x18x18xf32, #tpu.memory_space<vmem>>, vector<3x16x16xf32>,
      %c0_507 = arith.constant 0 : index
      %c0_508 = arith.constant 0 : index
      %c1_509 = arith.constant 1 : index
      %704 = vector.load %arg17[%c0_507, %c0_508, %c1_509] : memref<3x18x18xf32, #tpu.memory_space<vmem>>, vector<3x16x16xf32>
      %705 = arith.subf %704, %702 : vector<3x16x16xf32>
      %cst_510 = arith.constant 0.000000e+00 : f32
      %706 = vector.broadcast %cst_510 : f32 to vector<3x16x16xf32>
      %707 = arith.select %9, %48, %706 : vector<3x16x16xi1>, vector<3x16x16xf32>
      %c0_511 = arith.constant 0 : index
      %c1_512 = arith.constant 1 : index
      %c1_513 = arith.constant 1 : index
      %708 = vector.load %arg17[%c0_511, %c1_512, %c1_513] : memref<3x18x18xf32, #tpu.memory_space<vmem>>, vector<3x16x16xf32>
      tpu.vector_store %arg17[%c0_511, %c1_512, %c1_513], %707 {strides = array<i32>} : memref<3x18x18xf32, #tpu.memory_space<vmem>>, vector<3x16x16xf32>,
      %c0_514 = arith.constant 0 : index
      %c1_515 = arith.constant 1 : index
      %c0_516 = arith.constant 0 : index
      %709 = vector.load %arg17[%c0_514, %c1_515, %c0_516] : memref<3x18x18xf32, #tpu.memory_space<vmem>>, vector<3x16x16xf32>
      %710 = arith.subf %709, %707 : vector<3x16x16xf32>
      %711 = arith.addf %705, %710 : vector<3x16x16xf32>
      %712 = vector.extract_strided_slice %711 {offsets = [0, 0, 0], sizes = [1, 16, 16], strides = [1, 1, 1]} : vector<3x16x16xf32> to vector<1x16x16xf32>
      %713 = vector.shape_cast %712 : vector<1x16x16xf32> to vector<16x16xf32>
      %cst_517 = arith.constant 0.577350259 : f32
      %714 = vector.broadcast %cst_517 : f32 to vector<16x16xf32>
      %715 = arith.mulf %714, %713 : vector<16x16xf32>
      %716 = vector.extract_strided_slice %711 {offsets = [1, 0, 0], sizes = [1, 16, 16], strides = [1, 1, 1]} : vector<3x16x16xf32> to vector<1x16x16xf32>
      %717 = vector.shape_cast %716 : vector<1x16x16xf32> to vector<16x16xf32>
      %cst_518 = arith.constant 0.707106769 : f32
      %718 = vector.broadcast %cst_518 : f32 to vector<16x16xf32>
      %719 = arith.mulf %718, %717 : vector<16x16xf32>
      %720 = arith.addf %715, %719 : vector<16x16xf32>
      %721 = vector.extract_strided_slice %711 {offsets = [2, 0, 0], sizes = [1, 16, 16], strides = [1, 1, 1]} : vector<3x16x16xf32> to vector<1x16x16xf32>
      %722 = vector.shape_cast %721 : vector<1x16x16xf32> to vector<16x16xf32>
      %cst_519 = arith.constant 0.408248305 : f32
      %723 = vector.broadcast %cst_519 : f32 to vector<16x16xf32>
      %724 = arith.mulf %723, %722 : vector<16x16xf32>
      %725 = arith.addf %720, %724 : vector<16x16xf32>
      %726 = vector.extract_strided_slice %711 {offsets = [0, 0, 0], sizes = [1, 16, 16], strides = [1, 1, 1]} : vector<3x16x16xf32> to vector<1x16x16xf32>
      %727 = vector.shape_cast %726 : vector<1x16x16xf32> to vector<16x16xf32>
      %cst_520 = arith.constant 0.577350259 : f32
      %728 = vector.broadcast %cst_520 : f32 to vector<16x16xf32>
      %729 = arith.mulf %728, %727 : vector<16x16xf32>
      %730 = vector.extract_strided_slice %711 {offsets = [1, 0, 0], sizes = [1, 16, 16], strides = [1, 1, 1]} : vector<3x16x16xf32> to vector<1x16x16xf32>
      %731 = vector.shape_cast %730 : vector<1x16x16xf32> to vector<16x16xf32>
      %cst_521 = arith.constant 4.99959973E-17 : f32
      %732 = vector.broadcast %cst_521 : f32 to vector<16x16xf32>
      %733 = arith.mulf %732, %731 : vector<16x16xf32>
      %734 = arith.addf %729, %733 : vector<16x16xf32>
      %735 = vector.extract_strided_slice %711 {offsets = [2, 0, 0], sizes = [1, 16, 16], strides = [1, 1, 1]} : vector<3x16x16xf32> to vector<1x16x16xf32>
      %736 = vector.shape_cast %735 : vector<1x16x16xf32> to vector<16x16xf32>
      %cst_522 = arith.constant -0.816496611 : f32
      %737 = vector.broadcast %cst_522 : f32 to vector<16x16xf32>
      %738 = arith.mulf %737, %736 : vector<16x16xf32>
      %739 = arith.addf %734, %738 : vector<16x16xf32>
      %740 = vector.extract_strided_slice %711 {offsets = [0, 0, 0], sizes = [1, 16, 16], strides = [1, 1, 1]} : vector<3x16x16xf32> to vector<1x16x16xf32>
      %741 = vector.shape_cast %740 : vector<1x16x16xf32> to vector<16x16xf32>
      %cst_523 = arith.constant 0.577350259 : f32
      %742 = vector.broadcast %cst_523 : f32 to vector<16x16xf32>
      %743 = arith.mulf %742, %741 : vector<16x16xf32>
      %744 = vector.extract_strided_slice %711 {offsets = [1, 0, 0], sizes = [1, 16, 16], strides = [1, 1, 1]} : vector<3x16x16xf32> to vector<1x16x16xf32>
      %745 = vector.shape_cast %744 : vector<1x16x16xf32> to vector<16x16xf32>
      %cst_524 = arith.constant -0.707106769 : f32
      %746 = vector.broadcast %cst_524 : f32 to vector<16x16xf32>
      %747 = arith.mulf %746, %745 : vector<16x16xf32>
      %748 = arith.addf %743, %747 : vector<16x16xf32>
      %749 = vector.extract_strided_slice %711 {offsets = [2, 0, 0], sizes = [1, 16, 16], strides = [1, 1, 1]} : vector<3x16x16xf32> to vector<1x16x16xf32>
      %750 = vector.shape_cast %749 : vector<1x16x16xf32> to vector<16x16xf32>
      %cst_525 = arith.constant 0.408248305 : f32
      %751 = vector.broadcast %cst_525 : f32 to vector<16x16xf32>
      %752 = arith.mulf %751, %750 : vector<16x16xf32>
      %753 = arith.addf %748, %752 : vector<16x16xf32>
      %754 = vector.shape_cast %725 : vector<16x16xf32> to vector<1x16x16xf32>
      %755 = vector.shape_cast %739 : vector<16x16xf32> to vector<1x16x16xf32>
      %756 = vector.shape_cast %753 : vector<16x16xf32> to vector<1x16x16xf32>
      %757 = tpu.concatenate %754, %755, %756 in 0 : vector<1x16x16xf32>, vector<1x16x16xf32>, vector<1x16x16xf32> -> vector<3x16x16xf32>
      %758 = arith.addf %699, %757 : vector<3x16x16xf32>
      %759 = arith.mulf %3, %49 : vector<3x16x16xf32>
      %760 = arith.addf %758, %759 : vector<3x16x16xf32>
      %761 = vector.broadcast %37 : f32 to vector<3x16x16xf32>
      %762 = arith.mulf %761, %760 : vector<3x16x16xf32>
      %763 = arith.subf %46, %762 : vector<3x16x16xf32>
      %cst_526 = arith.constant 0.000000e+00 : f32
      %cst_527 = arith.constant 1.000000e+00 : f32
      %764 = vector.broadcast %cst_526 : f32 to vector<3x16x16xf32>
      %765 = arith.maximumf %764, %763 : vector<3x16x16xf32>
      %766 = vector.broadcast %cst_527 : f32 to vector<3x16x16xf32>
      %767 = arith.minimumf %766, %765 : vector<3x16x16xf32>
      %768 = arith.mulf %39, %43 : f32
      %c0_528 = arith.constant 0 : index
      %c0_529 = arith.constant 0 : index
      %c0_530 = arith.constant 0 : index
      %769 = vector.load %arg16[%c0_528, %c0_529, %c0_530] : memref<3x18x18xf32, #tpu.memory_space<vmem>>, vector<1x16x16xf32>
      %770 = vector.shape_cast %769 : vector<1x16x16xf32> to vector<16x16xf32>
      %c0_531 = arith.constant 0 : index
      %c0_532 = arith.constant 0 : index
      %c1_533 = arith.constant 1 : index
      %771 = vector.load %arg16[%c0_531, %c0_532, %c1_533] : memref<3x18x18xf32, #tpu.memory_space<vmem>>, vector<1x16x16xf32>
      %772 = vector.shape_cast %771 : vector<1x16x16xf32> to vector<16x16xf32>
      %c0_534 = arith.constant 0 : index
      %c0_535 = arith.constant 0 : index
      %c2_536 = arith.constant 2 : index
      %773 = vector.load %arg16[%c0_534, %c0_535, %c2_536] : memref<3x18x18xf32, #tpu.memory_space<vmem>>, vector<1x16x16xf32>
      %774 = vector.shape_cast %773 : vector<1x16x16xf32> to vector<16x16xf32>
      %c0_537 = arith.constant 0 : index
      %c1_538 = arith.constant 1 : index
      %c0_539 = arith.constant 0 : index
      %775 = vector.load %arg16[%c0_537, %c1_538, %c0_539] : memref<3x18x18xf32, #tpu.memory_space<vmem>>, vector<1x16x16xf32>
      %776 = vector.shape_cast %775 : vector<1x16x16xf32> to vector<16x16xf32>
      %c0_540 = arith.constant 0 : index
      %c1_541 = arith.constant 1 : index
      %c1_542 = arith.constant 1 : index
      %777 = vector.load %arg16[%c0_540, %c1_541, %c1_542] : memref<3x18x18xf32, #tpu.memory_space<vmem>>, vector<1x16x16xf32>
      %778 = vector.shape_cast %777 : vector<1x16x16xf32> to vector<16x16xf32>
      %c0_543 = arith.constant 0 : index
      %c1_544 = arith.constant 1 : index
      %c2_545 = arith.constant 2 : index
      %779 = vector.load %arg16[%c0_543, %c1_544, %c2_545] : memref<3x18x18xf32, #tpu.memory_space<vmem>>, vector<1x16x16xf32>
      %780 = vector.shape_cast %779 : vector<1x16x16xf32> to vector<16x16xf32>
      %c0_546 = arith.constant 0 : index
      %c2_547 = arith.constant 2 : index
      %c0_548 = arith.constant 0 : index
      %781 = vector.load %arg16[%c0_546, %c2_547, %c0_548] : memref<3x18x18xf32, #tpu.memory_space<vmem>>, vector<1x16x16xf32>
      %782 = vector.shape_cast %781 : vector<1x16x16xf32> to vector<16x16xf32>
      %c0_549 = arith.constant 0 : index
      %c2_550 = arith.constant 2 : index
      %c1_551 = arith.constant 1 : index
      %783 = vector.load %arg16[%c0_549, %c2_550, %c1_551] : memref<3x18x18xf32, #tpu.memory_space<vmem>>, vector<1x16x16xf32>
      %784 = vector.shape_cast %783 : vector<1x16x16xf32> to vector<16x16xf32>
      %c0_552 = arith.constant 0 : index
      %c2_553 = arith.constant 2 : index
      %c2_554 = arith.constant 2 : index
      %785 = vector.load %arg16[%c0_552, %c2_553, %c2_554] : memref<3x18x18xf32, #tpu.memory_space<vmem>>, vector<1x16x16xf32>
      %786 = vector.shape_cast %785 : vector<1x16x16xf32> to vector<16x16xf32>
      %c8_555 = arith.constant 8 : index
      %787 = memref.load %arg1[%c8_555] : memref<108xf32, #tpu.memory_space<smem>>
      %788 = vector.broadcast %787 : f32 to vector<16x16xf32>
      %789 = arith.mulf %788, %770 : vector<16x16xf32>
      %c7_556 = arith.constant 7 : index
      %790 = memref.load %arg1[%c7_556] : memref<108xf32, #tpu.memory_space<smem>>
      %791 = vector.broadcast %790 : f32 to vector<16x16xf32>
      %792 = arith.mulf %791, %772 : vector<16x16xf32>
      %793 = arith.addf %789, %792 : vector<16x16xf32>
      %c6_557 = arith.constant 6 : index
      %794 = memref.load %arg1[%c6_557] : memref<108xf32, #tpu.memory_space<smem>>
      %795 = vector.broadcast %794 : f32 to vector<16x16xf32>
      %796 = arith.mulf %795, %774 : vector<16x16xf32>
      %797 = arith.addf %793, %796 : vector<16x16xf32>
      %c5_558 = arith.constant 5 : index
      %798 = memref.load %arg1[%c5_558] : memref<108xf32, #tpu.memory_space<smem>>
      %799 = vector.broadcast %798 : f32 to vector<16x16xf32>
      %800 = arith.mulf %799, %776 : vector<16x16xf32>
      %801 = arith.addf %797, %800 : vector<16x16xf32>
      %c4_559 = arith.constant 4 : index
      %802 = memref.load %arg1[%c4_559] : memref<108xf32, #tpu.memory_space<smem>>
      %803 = vector.broadcast %802 : f32 to vector<16x16xf32>
      %804 = arith.mulf %803, %778 : vector<16x16xf32>
      %805 = arith.addf %801, %804 : vector<16x16xf32>
      %c3_560 = arith.constant 3 : index
      %806 = memref.load %arg1[%c3_560] : memref<108xf32, #tpu.memory_space<smem>>
      %807 = vector.broadcast %806 : f32 to vector<16x16xf32>
      %808 = arith.mulf %807, %780 : vector<16x16xf32>
      %809 = arith.addf %805, %808 : vector<16x16xf32>
      %c2_561 = arith.constant 2 : index
      %810 = memref.load %arg1[%c2_561] : memref<108xf32, #tpu.memory_space<smem>>
      %811 = vector.broadcast %810 : f32 to vector<16x16xf32>
      %812 = arith.mulf %811, %782 : vector<16x16xf32>
      %813 = arith.addf %809, %812 : vector<16x16xf32>
      %c1_562 = arith.constant 1 : index
      %814 = memref.load %arg1[%c1_562] : memref<108xf32, #tpu.memory_space<smem>>
      %815 = vector.broadcast %814 : f32 to vector<16x16xf32>
      %816 = arith.mulf %815, %784 : vector<16x16xf32>
      %817 = arith.addf %813, %816 : vector<16x16xf32>
      %c0_563 = arith.constant 0 : index
      %818 = memref.load %arg1[%c0_563] : memref<108xf32, #tpu.memory_space<smem>>
      %819 = vector.broadcast %818 : f32 to vector<16x16xf32>
      %820 = arith.mulf %819, %786 : vector<16x16xf32>
      %821 = arith.addf %817, %820 : vector<16x16xf32>
      %c0_564 = arith.constant 0 : index
      %c0_565 = arith.constant 0 : index
      %c1_566 = arith.constant 1 : index
      %c1_567 = arith.constant 1 : index
      %822 = vector.load %arg15[%c0_564, %c0_565, %c1_566, %c1_567] : memref<4x3x18x18xf32, #tpu.memory_space<vmem>>, vector<1x1x16x16xf32>
      %823 = vector.shape_cast %822 : vector<1x1x16x16xf32> to vector<16x16xf32>
      %824 = vector.broadcast %39 : f32 to vector<16x16xf32>
      %825 = arith.mulf %824, %821 : vector<16x16xf32>
      %826 = arith.addf %823, %825 : vector<16x16xf32>
      %cst_568 = arith.constant 0.000000e+00 : f32
      %827 = arith.subf %cst_568, %768 : f32
      %828 = vector.broadcast %827 : f32 to vector<16x16xf32>
      %829 = arith.maximumf %828, %826 : vector<16x16xf32>
      %830 = vector.broadcast %768 : f32 to vector<16x16xf32>
      %831 = arith.minimumf %830, %829 : vector<16x16xf32>
      %832 = arith.subf %826, %831 : vector<16x16xf32>
      %c0_569 = arith.constant 0 : index
      %c0_570 = arith.constant 0 : index
      %c1_571 = arith.constant 1 : index
      %c1_572 = arith.constant 1 : index
      %833 = vector.load %arg15[%c0_569, %c0_570, %c1_571, %c1_572] : memref<4x3x18x18xf32, #tpu.memory_space<vmem>>, vector<1x1x16x16xf32>
      %834 = vector.shape_cast %833 : vector<1x1x16x16xf32> to vector<16x16xf32>
      %835 = vector.shape_cast %832 : vector<16x16xf32> to vector<1x1x16x16xf32>
      tpu.vector_store %arg15[%c0_569, %c0_570, %c1_571, %c1_572], %835 {strides = array<i32>} : memref<4x3x18x18xf32, #tpu.memory_space<vmem>>, vector<1x1x16x16xf32>,
      %c35_573 = arith.constant 35 : index
      %836 = memref.load %arg1[%c35_573] : memref<108xf32, #tpu.memory_space<smem>>
      %837 = vector.broadcast %836 : f32 to vector<16x16xf32>
      %838 = arith.mulf %837, %770 : vector<16x16xf32>
      %c34_574 = arith.constant 34 : index
      %839 = memref.load %arg1[%c34_574] : memref<108xf32, #tpu.memory_space<smem>>
      %840 = vector.broadcast %839 : f32 to vector<16x16xf32>
      %841 = arith.mulf %840, %772 : vector<16x16xf32>
      %842 = arith.addf %838, %841 : vector<16x16xf32>
      %c33_575 = arith.constant 33 : index
      %843 = memref.load %arg1[%c33_575] : memref<108xf32, #tpu.memory_space<smem>>
      %844 = vector.broadcast %843 : f32 to vector<16x16xf32>
      %845 = arith.mulf %844, %774 : vector<16x16xf32>
      %846 = arith.addf %842, %845 : vector<16x16xf32>
      %c32_576 = arith.constant 32 : index
      %847 = memref.load %arg1[%c32_576] : memref<108xf32, #tpu.memory_space<smem>>
      %848 = vector.broadcast %847 : f32 to vector<16x16xf32>
      %849 = arith.mulf %848, %776 : vector<16x16xf32>
      %850 = arith.addf %846, %849 : vector<16x16xf32>
      %c31_577 = arith.constant 31 : index
      %851 = memref.load %arg1[%c31_577] : memref<108xf32, #tpu.memory_space<smem>>
      %852 = vector.broadcast %851 : f32 to vector<16x16xf32>
      %853 = arith.mulf %852, %778 : vector<16x16xf32>
      %854 = arith.addf %850, %853 : vector<16x16xf32>
      %c30_578 = arith.constant 30 : index
      %855 = memref.load %arg1[%c30_578] : memref<108xf32, #tpu.memory_space<smem>>
      %856 = vector.broadcast %855 : f32 to vector<16x16xf32>
      %857 = arith.mulf %856, %780 : vector<16x16xf32>
      %858 = arith.addf %854, %857 : vector<16x16xf32>
      %c29_579 = arith.constant 29 : index
      %859 = memref.load %arg1[%c29_579] : memref<108xf32, #tpu.memory_space<smem>>
      %860 = vector.broadcast %859 : f32 to vector<16x16xf32>
      %861 = arith.mulf %860, %782 : vector<16x16xf32>
      %862 = arith.addf %858, %861 : vector<16x16xf32>
      %c28_580 = arith.constant 28 : index
      %863 = memref.load %arg1[%c28_580] : memref<108xf32, #tpu.memory_space<smem>>
      %864 = vector.broadcast %863 : f32 to vector<16x16xf32>
      %865 = arith.mulf %864, %784 : vector<16x16xf32>
      %866 = arith.addf %862, %865 : vector<16x16xf32>
      %c27_581 = arith.constant 27 : index
      %867 = memref.load %arg1[%c27_581] : memref<108xf32, #tpu.memory_space<smem>>
      %868 = vector.broadcast %867 : f32 to vector<16x16xf32>
      %869 = arith.mulf %868, %786 : vector<16x16xf32>
      %870 = arith.addf %866, %869 : vector<16x16xf32>
      %c1_582 = arith.constant 1 : index
      %c0_583 = arith.constant 0 : index
      %c1_584 = arith.constant 1 : index
      %c1_585 = arith.constant 1 : index
      %871 = vector.load %arg15[%c1_582, %c0_583, %c1_584, %c1_585] : memref<4x3x18x18xf32, #tpu.memory_space<vmem>>, vector<1x1x16x16xf32>
      %872 = vector.shape_cast %871 : vector<1x1x16x16xf32> to vector<16x16xf32>
      %873 = vector.broadcast %39 : f32 to vector<16x16xf32>
      %874 = arith.mulf %873, %870 : vector<16x16xf32>
      %875 = arith.addf %872, %874 : vector<16x16xf32>
      %cst_586 = arith.constant 0.000000e+00 : f32
      %876 = arith.subf %cst_586, %768 : f32
      %877 = vector.broadcast %876 : f32 to vector<16x16xf32>
      %878 = arith.maximumf %877, %875 : vector<16x16xf32>
      %879 = vector.broadcast %768 : f32 to vector<16x16xf32>
      %880 = arith.minimumf %879, %878 : vector<16x16xf32>
      %881 = arith.subf %875, %880 : vector<16x16xf32>
      %c1_587 = arith.constant 1 : index
      %c0_588 = arith.constant 0 : index
      %c1_589 = arith.constant 1 : index
      %c1_590 = arith.constant 1 : index
      %882 = vector.load %arg15[%c1_587, %c0_588, %c1_589, %c1_590] : memref<4x3x18x18xf32, #tpu.memory_space<vmem>>, vector<1x1x16x16xf32>
      %883 = vector.shape_cast %882 : vector<1x1x16x16xf32> to vector<16x16xf32>
      %884 = vector.shape_cast %881 : vector<16x16xf32> to vector<1x1x16x16xf32>
      tpu.vector_store %arg15[%c1_587, %c0_588, %c1_589, %c1_590], %884 {strides = array<i32>} : memref<4x3x18x18xf32, #tpu.memory_space<vmem>>, vector<1x1x16x16xf32>,
      %c62_591 = arith.constant 62 : index
      %885 = memref.load %arg1[%c62_591] : memref<108xf32, #tpu.memory_space<smem>>
      %886 = vector.broadcast %885 : f32 to vector<16x16xf32>
      %887 = arith.mulf %886, %770 : vector<16x16xf32>
      %c61_592 = arith.constant 61 : index
      %888 = memref.load %arg1[%c61_592] : memref<108xf32, #tpu.memory_space<smem>>
      %889 = vector.broadcast %888 : f32 to vector<16x16xf32>
      %890 = arith.mulf %889, %772 : vector<16x16xf32>
      %891 = arith.addf %887, %890 : vector<16x16xf32>
      %c60_593 = arith.constant 60 : index
      %892 = memref.load %arg1[%c60_593] : memref<108xf32, #tpu.memory_space<smem>>
      %893 = vector.broadcast %892 : f32 to vector<16x16xf32>
      %894 = arith.mulf %893, %774 : vector<16x16xf32>
      %895 = arith.addf %891, %894 : vector<16x16xf32>
      %c59_594 = arith.constant 59 : index
      %896 = memref.load %arg1[%c59_594] : memref<108xf32, #tpu.memory_space<smem>>
      %897 = vector.broadcast %896 : f32 to vector<16x16xf32>
      %898 = arith.mulf %897, %776 : vector<16x16xf32>
      %899 = arith.addf %895, %898 : vector<16x16xf32>
      %c58_595 = arith.constant 58 : index
      %900 = memref.load %arg1[%c58_595] : memref<108xf32, #tpu.memory_space<smem>>
      %901 = vector.broadcast %900 : f32 to vector<16x16xf32>
      %902 = arith.mulf %901, %778 : vector<16x16xf32>
      %903 = arith.addf %899, %902 : vector<16x16xf32>
      %c57_596 = arith.constant 57 : index
      %904 = memref.load %arg1[%c57_596] : memref<108xf32, #tpu.memory_space<smem>>
      %905 = vector.broadcast %904 : f32 to vector<16x16xf32>
      %906 = arith.mulf %905, %780 : vector<16x16xf32>
      %907 = arith.addf %903, %906 : vector<16x16xf32>
      %c56_597 = arith.constant 56 : index
      %908 = memref.load %arg1[%c56_597] : memref<108xf32, #tpu.memory_space<smem>>
      %909 = vector.broadcast %908 : f32 to vector<16x16xf32>
      %910 = arith.mulf %909, %782 : vector<16x16xf32>
      %911 = arith.addf %907, %910 : vector<16x16xf32>
      %c55_598 = arith.constant 55 : index
      %912 = memref.load %arg1[%c55_598] : memref<108xf32, #tpu.memory_space<smem>>
      %913 = vector.broadcast %912 : f32 to vector<16x16xf32>
      %914 = arith.mulf %913, %784 : vector<16x16xf32>
      %915 = arith.addf %911, %914 : vector<16x16xf32>
      %c54_599 = arith.constant 54 : index
      %916 = memref.load %arg1[%c54_599] : memref<108xf32, #tpu.memory_space<smem>>
      %917 = vector.broadcast %916 : f32 to vector<16x16xf32>
      %918 = arith.mulf %917, %786 : vector<16x16xf32>
      %919 = arith.addf %915, %918 : vector<16x16xf32>
      %c2_600 = arith.constant 2 : index
      %c0_601 = arith.constant 0 : index
      %c1_602 = arith.constant 1 : index
      %c1_603 = arith.constant 1 : index
      %920 = vector.load %arg15[%c2_600, %c0_601, %c1_602, %c1_603] : memref<4x3x18x18xf32, #tpu.memory_space<vmem>>, vector<1x1x16x16xf32>
      %921 = vector.shape_cast %920 : vector<1x1x16x16xf32> to vector<16x16xf32>
      %922 = vector.broadcast %39 : f32 to vector<16x16xf32>
      %923 = arith.mulf %922, %919 : vector<16x16xf32>
      %924 = arith.addf %921, %923 : vector<16x16xf32>
      %cst_604 = arith.constant 0.000000e+00 : f32
      %925 = arith.subf %cst_604, %768 : f32
      %926 = vector.broadcast %925 : f32 to vector<16x16xf32>
      %927 = arith.maximumf %926, %924 : vector<16x16xf32>
      %928 = vector.broadcast %768 : f32 to vector<16x16xf32>
      %929 = arith.minimumf %928, %927 : vector<16x16xf32>
      %930 = arith.subf %924, %929 : vector<16x16xf32>
      %c2_605 = arith.constant 2 : index
      %c0_606 = arith.constant 0 : index
      %c1_607 = arith.constant 1 : index
      %c1_608 = arith.constant 1 : index
      %931 = vector.load %arg15[%c2_605, %c0_606, %c1_607, %c1_608] : memref<4x3x18x18xf32, #tpu.memory_space<vmem>>, vector<1x1x16x16xf32>
      %932 = vector.shape_cast %931 : vector<1x1x16x16xf32> to vector<16x16xf32>
      %933 = vector.shape_cast %930 : vector<16x16xf32> to vector<1x1x16x16xf32>
      tpu.vector_store %arg15[%c2_605, %c0_606, %c1_607, %c1_608], %933 {strides = array<i32>} : memref<4x3x18x18xf32, #tpu.memory_space<vmem>>, vector<1x1x16x16xf32>,
      %c89_609 = arith.constant 89 : index
      %934 = memref.load %arg1[%c89_609] : memref<108xf32, #tpu.memory_space<smem>>
      %935 = vector.broadcast %934 : f32 to vector<16x16xf32>
      %936 = arith.mulf %935, %770 : vector<16x16xf32>
      %c88_610 = arith.constant 88 : index
      %937 = memref.load %arg1[%c88_610] : memref<108xf32, #tpu.memory_space<smem>>
      %938 = vector.broadcast %937 : f32 to vector<16x16xf32>
      %939 = arith.mulf %938, %772 : vector<16x16xf32>
      %940 = arith.addf %936, %939 : vector<16x16xf32>
      %c87_611 = arith.constant 87 : index
      %941 = memref.load %arg1[%c87_611] : memref<108xf32, #tpu.memory_space<smem>>
      %942 = vector.broadcast %941 : f32 to vector<16x16xf32>
      %943 = arith.mulf %942, %774 : vector<16x16xf32>
      %944 = arith.addf %940, %943 : vector<16x16xf32>
      %c86_612 = arith.constant 86 : index
      %945 = memref.load %arg1[%c86_612] : memref<108xf32, #tpu.memory_space<smem>>
      %946 = vector.broadcast %945 : f32 to vector<16x16xf32>
      %947 = arith.mulf %946, %776 : vector<16x16xf32>
      %948 = arith.addf %944, %947 : vector<16x16xf32>
      %c85_613 = arith.constant 85 : index
      %949 = memref.load %arg1[%c85_613] : memref<108xf32, #tpu.memory_space<smem>>
      %950 = vector.broadcast %949 : f32 to vector<16x16xf32>
      %951 = arith.mulf %950, %778 : vector<16x16xf32>
      %952 = arith.addf %948, %951 : vector<16x16xf32>
      %c84_614 = arith.constant 84 : index
      %953 = memref.load %arg1[%c84_614] : memref<108xf32, #tpu.memory_space<smem>>
      %954 = vector.broadcast %953 : f32 to vector<16x16xf32>
      %955 = arith.mulf %954, %780 : vector<16x16xf32>
      %956 = arith.addf %952, %955 : vector<16x16xf32>
      %c83_615 = arith.constant 83 : index
      %957 = memref.load %arg1[%c83_615] : memref<108xf32, #tpu.memory_space<smem>>
      %958 = vector.broadcast %957 : f32 to vector<16x16xf32>
      %959 = arith.mulf %958, %782 : vector<16x16xf32>
      %960 = arith.addf %956, %959 : vector<16x16xf32>
      %c82_616 = arith.constant 82 : index
      %961 = memref.load %arg1[%c82_616] : memref<108xf32, #tpu.memory_space<smem>>
      %962 = vector.broadcast %961 : f32 to vector<16x16xf32>
      %963 = arith.mulf %962, %784 : vector<16x16xf32>
      %964 = arith.addf %960, %963 : vector<16x16xf32>
      %c81_617 = arith.constant 81 : index
      %965 = memref.load %arg1[%c81_617] : memref<108xf32, #tpu.memory_space<smem>>
      %966 = vector.broadcast %965 : f32 to vector<16x16xf32>
      %967 = arith.mulf %966, %786 : vector<16x16xf32>
      %968 = arith.addf %964, %967 : vector<16x16xf32>
      %c3_618 = arith.constant 3 : index
      %c0_619 = arith.constant 0 : index
      %c1_620 = arith.constant 1 : index
      %c1_621 = arith.constant 1 : index
      %969 = vector.load %arg15[%c3_618, %c0_619, %c1_620, %c1_621] : memref<4x3x18x18xf32, #tpu.memory_space<vmem>>, vector<1x1x16x16xf32>
      %970 = vector.shape_cast %969 : vector<1x1x16x16xf32> to vector<16x16xf32>
      %971 = vector.broadcast %39 : f32 to vector<16x16xf32>
      %972 = arith.mulf %971, %968 : vector<16x16xf32>
      %973 = arith.addf %970, %972 : vector<16x16xf32>
      %cst_622 = arith.constant 0.000000e+00 : f32
      %974 = arith.subf %cst_622, %768 : f32
      %975 = vector.broadcast %974 : f32 to vector<16x16xf32>
      %976 = arith.maximumf %975, %973 : vector<16x16xf32>
      %977 = vector.broadcast %768 : f32 to vector<16x16xf32>
      %978 = arith.minimumf %977, %976 : vector<16x16xf32>
      %979 = arith.subf %973, %978 : vector<16x16xf32>
      %c3_623 = arith.constant 3 : index
      %c0_624 = arith.constant 0 : index
      %c1_625 = arith.constant 1 : index
      %c1_626 = arith.constant 1 : index
      %980 = vector.load %arg15[%c3_623, %c0_624, %c1_625, %c1_626] : memref<4x3x18x18xf32, #tpu.memory_space<vmem>>, vector<1x1x16x16xf32>
      %981 = vector.shape_cast %980 : vector<1x1x16x16xf32> to vector<16x16xf32>
      %982 = vector.shape_cast %979 : vector<16x16xf32> to vector<1x1x16x16xf32>
      tpu.vector_store %arg15[%c3_623, %c0_624, %c1_625, %c1_626], %982 {strides = array<i32>} : memref<4x3x18x18xf32, #tpu.memory_space<vmem>>, vector<1x1x16x16xf32>,
      %c1_627 = arith.constant 1 : index
      %c0_628 = arith.constant 0 : index
      %c0_629 = arith.constant 0 : index
      %983 = vector.load %arg16[%c1_627, %c0_628, %c0_629] : memref<3x18x18xf32, #tpu.memory_space<vmem>>, vector<1x16x16xf32>
      %984 = vector.shape_cast %983 : vector<1x16x16xf32> to vector<16x16xf32>
      %c1_630 = arith.constant 1 : index
      %c0_631 = arith.constant 0 : index
      %c1_632 = arith.constant 1 : index
      %985 = vector.load %arg16[%c1_630, %c0_631, %c1_632] : memref<3x18x18xf32, #tpu.memory_space<vmem>>, vector<1x16x16xf32>
      %986 = vector.shape_cast %985 : vector<1x16x16xf32> to vector<16x16xf32>
      %c1_633 = arith.constant 1 : index
      %c0_634 = arith.constant 0 : index
      %c2_635 = arith.constant 2 : index
      %987 = vector.load %arg16[%c1_633, %c0_634, %c2_635] : memref<3x18x18xf32, #tpu.memory_space<vmem>>, vector<1x16x16xf32>
      %988 = vector.shape_cast %987 : vector<1x16x16xf32> to vector<16x16xf32>
      %c1_636 = arith.constant 1 : index
      %c1_637 = arith.constant 1 : index
      %c0_638 = arith.constant 0 : index
      %989 = vector.load %arg16[%c1_636, %c1_637, %c0_638] : memref<3x18x18xf32, #tpu.memory_space<vmem>>, vector<1x16x16xf32>
      %990 = vector.shape_cast %989 : vector<1x16x16xf32> to vector<16x16xf32>
      %c1_639 = arith.constant 1 : index
      %c1_640 = arith.constant 1 : index
      %c1_641 = arith.constant 1 : index
      %991 = vector.load %arg16[%c1_639, %c1_640, %c1_641] : memref<3x18x18xf32, #tpu.memory_space<vmem>>, vector<1x16x16xf32>
      %992 = vector.shape_cast %991 : vector<1x16x16xf32> to vector<16x16xf32>
      %c1_642 = arith.constant 1 : index
      %c1_643 = arith.constant 1 : index
      %c2_644 = arith.constant 2 : index
      %993 = vector.load %arg16[%c1_642, %c1_643, %c2_644] : memref<3x18x18xf32, #tpu.memory_space<vmem>>, vector<1x16x16xf32>
      %994 = vector.shape_cast %993 : vector<1x16x16xf32> to vector<16x16xf32>
      %c1_645 = arith.constant 1 : index
      %c2_646 = arith.constant 2 : index
      %c0_647 = arith.constant 0 : index
      %995 = vector.load %arg16[%c1_645, %c2_646, %c0_647] : memref<3x18x18xf32, #tpu.memory_space<vmem>>, vector<1x16x16xf32>
      %996 = vector.shape_cast %995 : vector<1x16x16xf32> to vector<16x16xf32>
      %c1_648 = arith.constant 1 : index
      %c2_649 = arith.constant 2 : index
      %c1_650 = arith.constant 1 : index
      %997 = vector.load %arg16[%c1_648, %c2_649, %c1_650] : memref<3x18x18xf32, #tpu.memory_space<vmem>>, vector<1x16x16xf32>
      %998 = vector.shape_cast %997 : vector<1x16x16xf32> to vector<16x16xf32>
      %c1_651 = arith.constant 1 : index
      %c2_652 = arith.constant 2 : index
      %c2_653 = arith.constant 2 : index
      %999 = vector.load %arg16[%c1_651, %c2_652, %c2_653] : memref<3x18x18xf32, #tpu.memory_space<vmem>>, vector<1x16x16xf32>
      %1000 = vector.shape_cast %999 : vector<1x16x16xf32> to vector<16x16xf32>
      %c17_654 = arith.constant 17 : index
      %1001 = memref.load %arg1[%c17_654] : memref<108xf32, #tpu.memory_space<smem>>
      %1002 = vector.broadcast %1001 : f32 to vector<16x16xf32>
      %1003 = arith.mulf %1002, %984 : vector<16x16xf32>
      %c16_655 = arith.constant 16 : index
      %1004 = memref.load %arg1[%c16_655] : memref<108xf32, #tpu.memory_space<smem>>
      %1005 = vector.broadcast %1004 : f32 to vector<16x16xf32>
      %1006 = arith.mulf %1005, %986 : vector<16x16xf32>
      %1007 = arith.addf %1003, %1006 : vector<16x16xf32>
      %c15_656 = arith.constant 15 : index
      %1008 = memref.load %arg1[%c15_656] : memref<108xf32, #tpu.memory_space<smem>>
      %1009 = vector.broadcast %1008 : f32 to vector<16x16xf32>
      %1010 = arith.mulf %1009, %988 : vector<16x16xf32>
      %1011 = arith.addf %1007, %1010 : vector<16x16xf32>
      %c14_657 = arith.constant 14 : index
      %1012 = memref.load %arg1[%c14_657] : memref<108xf32, #tpu.memory_space<smem>>
      %1013 = vector.broadcast %1012 : f32 to vector<16x16xf32>
      %1014 = arith.mulf %1013, %990 : vector<16x16xf32>
      %1015 = arith.addf %1011, %1014 : vector<16x16xf32>
      %c13_658 = arith.constant 13 : index
      %1016 = memref.load %arg1[%c13_658] : memref<108xf32, #tpu.memory_space<smem>>
      %1017 = vector.broadcast %1016 : f32 to vector<16x16xf32>
      %1018 = arith.mulf %1017, %992 : vector<16x16xf32>
      %1019 = arith.addf %1015, %1018 : vector<16x16xf32>
      %c12_659 = arith.constant 12 : index
      %1020 = memref.load %arg1[%c12_659] : memref<108xf32, #tpu.memory_space<smem>>
      %1021 = vector.broadcast %1020 : f32 to vector<16x16xf32>
      %1022 = arith.mulf %1021, %994 : vector<16x16xf32>
      %1023 = arith.addf %1019, %1022 : vector<16x16xf32>
      %c11_660 = arith.constant 11 : index
      %1024 = memref.load %arg1[%c11_660] : memref<108xf32, #tpu.memory_space<smem>>
      %1025 = vector.broadcast %1024 : f32 to vector<16x16xf32>
      %1026 = arith.mulf %1025, %996 : vector<16x16xf32>
      %1027 = arith.addf %1023, %1026 : vector<16x16xf32>
      %c10_661 = arith.constant 10 : index
      %1028 = memref.load %arg1[%c10_661] : memref<108xf32, #tpu.memory_space<smem>>
      %1029 = vector.broadcast %1028 : f32 to vector<16x16xf32>
      %1030 = arith.mulf %1029, %998 : vector<16x16xf32>
      %1031 = arith.addf %1027, %1030 : vector<16x16xf32>
      %c9_662 = arith.constant 9 : index
      %1032 = memref.load %arg1[%c9_662] : memref<108xf32, #tpu.memory_space<smem>>
      %1033 = vector.broadcast %1032 : f32 to vector<16x16xf32>
      %1034 = arith.mulf %1033, %1000 : vector<16x16xf32>
      %1035 = arith.addf %1031, %1034 : vector<16x16xf32>
      %c0_663 = arith.constant 0 : index
      %c1_664 = arith.constant 1 : index
      %c1_665 = arith.constant 1 : index
      %c1_666 = arith.constant 1 : index
      %1036 = vector.load %arg15[%c0_663, %c1_664, %c1_665, %c1_666] : memref<4x3x18x18xf32, #tpu.memory_space<vmem>>, vector<1x1x16x16xf32>
      %1037 = vector.shape_cast %1036 : vector<1x1x16x16xf32> to vector<16x16xf32>
      %1038 = vector.broadcast %39 : f32 to vector<16x16xf32>
      %1039 = arith.mulf %1038, %1035 : vector<16x16xf32>
      %1040 = arith.addf %1037, %1039 : vector<16x16xf32>
      %cst_667 = arith.constant 0.000000e+00 : f32
      %1041 = arith.subf %cst_667, %768 : f32
      %1042 = vector.broadcast %1041 : f32 to vector<16x16xf32>
      %1043 = arith.maximumf %1042, %1040 : vector<16x16xf32>
      %1044 = vector.broadcast %768 : f32 to vector<16x16xf32>
      %1045 = arith.minimumf %1044, %1043 : vector<16x16xf32>
      %1046 = arith.subf %1040, %1045 : vector<16x16xf32>
      %c0_668 = arith.constant 0 : index
      %c1_669 = arith.constant 1 : index
      %c1_670 = arith.constant 1 : index
      %c1_671 = arith.constant 1 : index
      %1047 = vector.load %arg15[%c0_668, %c1_669, %c1_670, %c1_671] : memref<4x3x18x18xf32, #tpu.memory_space<vmem>>, vector<1x1x16x16xf32>
      %1048 = vector.shape_cast %1047 : vector<1x1x16x16xf32> to vector<16x16xf32>
      %1049 = vector.shape_cast %1046 : vector<16x16xf32> to vector<1x1x16x16xf32>
      tpu.vector_store %arg15[%c0_668, %c1_669, %c1_670, %c1_671], %1049 {strides = array<i32>} : memref<4x3x18x18xf32, #tpu.memory_space<vmem>>, vector<1x1x16x16xf32>,
      %c44_672 = arith.constant 44 : index
      %1050 = memref.load %arg1[%c44_672] : memref<108xf32, #tpu.memory_space<smem>>
      %1051 = vector.broadcast %1050 : f32 to vector<16x16xf32>
      %1052 = arith.mulf %1051, %984 : vector<16x16xf32>
      %c43_673 = arith.constant 43 : index
      %1053 = memref.load %arg1[%c43_673] : memref<108xf32, #tpu.memory_space<smem>>
      %1054 = vector.broadcast %1053 : f32 to vector<16x16xf32>
      %1055 = arith.mulf %1054, %986 : vector<16x16xf32>
      %1056 = arith.addf %1052, %1055 : vector<16x16xf32>
      %c42_674 = arith.constant 42 : index
      %1057 = memref.load %arg1[%c42_674] : memref<108xf32, #tpu.memory_space<smem>>
      %1058 = vector.broadcast %1057 : f32 to vector<16x16xf32>
      %1059 = arith.mulf %1058, %988 : vector<16x16xf32>
      %1060 = arith.addf %1056, %1059 : vector<16x16xf32>
      %c41_675 = arith.constant 41 : index
      %1061 = memref.load %arg1[%c41_675] : memref<108xf32, #tpu.memory_space<smem>>
      %1062 = vector.broadcast %1061 : f32 to vector<16x16xf32>
      %1063 = arith.mulf %1062, %990 : vector<16x16xf32>
      %1064 = arith.addf %1060, %1063 : vector<16x16xf32>
      %c40_676 = arith.constant 40 : index
      %1065 = memref.load %arg1[%c40_676] : memref<108xf32, #tpu.memory_space<smem>>
      %1066 = vector.broadcast %1065 : f32 to vector<16x16xf32>
      %1067 = arith.mulf %1066, %992 : vector<16x16xf32>
      %1068 = arith.addf %1064, %1067 : vector<16x16xf32>
      %c39_677 = arith.constant 39 : index
      %1069 = memref.load %arg1[%c39_677] : memref<108xf32, #tpu.memory_space<smem>>
      %1070 = vector.broadcast %1069 : f32 to vector<16x16xf32>
      %1071 = arith.mulf %1070, %994 : vector<16x16xf32>
      %1072 = arith.addf %1068, %1071 : vector<16x16xf32>
      %c38_678 = arith.constant 38 : index
      %1073 = memref.load %arg1[%c38_678] : memref<108xf32, #tpu.memory_space<smem>>
      %1074 = vector.broadcast %1073 : f32 to vector<16x16xf32>
      %1075 = arith.mulf %1074, %996 : vector<16x16xf32>
      %1076 = arith.addf %1072, %1075 : vector<16x16xf32>
      %c37_679 = arith.constant 37 : index
      %1077 = memref.load %arg1[%c37_679] : memref<108xf32, #tpu.memory_space<smem>>
      %1078 = vector.broadcast %1077 : f32 to vector<16x16xf32>
      %1079 = arith.mulf %1078, %998 : vector<16x16xf32>
      %1080 = arith.addf %1076, %1079 : vector<16x16xf32>
      %c36_680 = arith.constant 36 : index
      %1081 = memref.load %arg1[%c36_680] : memref<108xf32, #tpu.memory_space<smem>>
      %1082 = vector.broadcast %1081 : f32 to vector<16x16xf32>
      %1083 = arith.mulf %1082, %1000 : vector<16x16xf32>
      %1084 = arith.addf %1080, %1083 : vector<16x16xf32>
      %c1_681 = arith.constant 1 : index
      %c1_682 = arith.constant 1 : index
      %c1_683 = arith.constant 1 : index
      %c1_684 = arith.constant 1 : index
      %1085 = vector.load %arg15[%c1_681, %c1_682, %c1_683, %c1_684] : memref<4x3x18x18xf32, #tpu.memory_space<vmem>>, vector<1x1x16x16xf32>
      %1086 = vector.shape_cast %1085 : vector<1x1x16x16xf32> to vector<16x16xf32>
      %1087 = vector.broadcast %39 : f32 to vector<16x16xf32>
      %1088 = arith.mulf %1087, %1084 : vector<16x16xf32>
      %1089 = arith.addf %1086, %1088 : vector<16x16xf32>
      %cst_685 = arith.constant 0.000000e+00 : f32
      %1090 = arith.subf %cst_685, %768 : f32
      %1091 = vector.broadcast %1090 : f32 to vector<16x16xf32>
      %1092 = arith.maximumf %1091, %1089 : vector<16x16xf32>
      %1093 = vector.broadcast %768 : f32 to vector<16x16xf32>
      %1094 = arith.minimumf %1093, %1092 : vector<16x16xf32>
      %1095 = arith.subf %1089, %1094 : vector<16x16xf32>
      %c1_686 = arith.constant 1 : index
      %c1_687 = arith.constant 1 : index
      %c1_688 = arith.constant 1 : index
      %c1_689 = arith.constant 1 : index
      %1096 = vector.load %arg15[%c1_686, %c1_687, %c1_688, %c1_689] : memref<4x3x18x18xf32, #tpu.memory_space<vmem>>, vector<1x1x16x16xf32>
      %1097 = vector.shape_cast %1096 : vector<1x1x16x16xf32> to vector<16x16xf32>
      %1098 = vector.shape_cast %1095 : vector<16x16xf32> to vector<1x1x16x16xf32>
      tpu.vector_store %arg15[%c1_686, %c1_687, %c1_688, %c1_689], %1098 {strides = array<i32>} : memref<4x3x18x18xf32, #tpu.memory_space<vmem>>, vector<1x1x16x16xf32>,
      %c71_690 = arith.constant 71 : index
      %1099 = memref.load %arg1[%c71_690] : memref<108xf32, #tpu.memory_space<smem>>
      %1100 = vector.broadcast %1099 : f32 to vector<16x16xf32>
      %1101 = arith.mulf %1100, %984 : vector<16x16xf32>
      %c70_691 = arith.constant 70 : index
      %1102 = memref.load %arg1[%c70_691] : memref<108xf32, #tpu.memory_space<smem>>
      %1103 = vector.broadcast %1102 : f32 to vector<16x16xf32>
      %1104 = arith.mulf %1103, %986 : vector<16x16xf32>
      %1105 = arith.addf %1101, %1104 : vector<16x16xf32>
      %c69_692 = arith.constant 69 : index
      %1106 = memref.load %arg1[%c69_692] : memref<108xf32, #tpu.memory_space<smem>>
      %1107 = vector.broadcast %1106 : f32 to vector<16x16xf32>
      %1108 = arith.mulf %1107, %988 : vector<16x16xf32>
      %1109 = arith.addf %1105, %1108 : vector<16x16xf32>
      %c68_693 = arith.constant 68 : index
      %1110 = memref.load %arg1[%c68_693] : memref<108xf32, #tpu.memory_space<smem>>
      %1111 = vector.broadcast %1110 : f32 to vector<16x16xf32>
      %1112 = arith.mulf %1111, %990 : vector<16x16xf32>
      %1113 = arith.addf %1109, %1112 : vector<16x16xf32>
      %c67_694 = arith.constant 67 : index
      %1114 = memref.load %arg1[%c67_694] : memref<108xf32, #tpu.memory_space<smem>>
      %1115 = vector.broadcast %1114 : f32 to vector<16x16xf32>
      %1116 = arith.mulf %1115, %992 : vector<16x16xf32>
      %1117 = arith.addf %1113, %1116 : vector<16x16xf32>
      %c66_695 = arith.constant 66 : index
      %1118 = memref.load %arg1[%c66_695] : memref<108xf32, #tpu.memory_space<smem>>
      %1119 = vector.broadcast %1118 : f32 to vector<16x16xf32>
      %1120 = arith.mulf %1119, %994 : vector<16x16xf32>
      %1121 = arith.addf %1117, %1120 : vector<16x16xf32>
      %c65_696 = arith.constant 65 : index
      %1122 = memref.load %arg1[%c65_696] : memref<108xf32, #tpu.memory_space<smem>>
      %1123 = vector.broadcast %1122 : f32 to vector<16x16xf32>
      %1124 = arith.mulf %1123, %996 : vector<16x16xf32>
      %1125 = arith.addf %1121, %1124 : vector<16x16xf32>
      %c64_697 = arith.constant 64 : index
      %1126 = memref.load %arg1[%c64_697] : memref<108xf32, #tpu.memory_space<smem>>
      %1127 = vector.broadcast %1126 : f32 to vector<16x16xf32>
      %1128 = arith.mulf %1127, %998 : vector<16x16xf32>
      %1129 = arith.addf %1125, %1128 : vector<16x16xf32>
      %c63_698 = arith.constant 63 : index
      %1130 = memref.load %arg1[%c63_698] : memref<108xf32, #tpu.memory_space<smem>>
      %1131 = vector.broadcast %1130 : f32 to vector<16x16xf32>
      %1132 = arith.mulf %1131, %1000 : vector<16x16xf32>
      %1133 = arith.addf %1129, %1132 : vector<16x16xf32>
      %c2_699 = arith.constant 2 : index
      %c1_700 = arith.constant 1 : index
      %c1_701 = arith.constant 1 : index
      %c1_702 = arith.constant 1 : index
      %1134 = vector.load %arg15[%c2_699, %c1_700, %c1_701, %c1_702] : memref<4x3x18x18xf32, #tpu.memory_space<vmem>>, vector<1x1x16x16xf32>
      %1135 = vector.shape_cast %1134 : vector<1x1x16x16xf32> to vector<16x16xf32>
      %1136 = vector.broadcast %39 : f32 to vector<16x16xf32>
      %1137 = arith.mulf %1136, %1133 : vector<16x16xf32>
      %1138 = arith.addf %1135, %1137 : vector<16x16xf32>
      %cst_703 = arith.constant 0.000000e+00 : f32
      %1139 = arith.subf %cst_703, %768 : f32
      %1140 = vector.broadcast %1139 : f32 to vector<16x16xf32>
      %1141 = arith.maximumf %1140, %1138 : vector<16x16xf32>
      %1142 = vector.broadcast %768 : f32 to vector<16x16xf32>
      %1143 = arith.minimumf %1142, %1141 : vector<16x16xf32>
      %1144 = arith.subf %1138, %1143 : vector<16x16xf32>
      %c2_704 = arith.constant 2 : index
      %c1_705 = arith.constant 1 : index
      %c1_706 = arith.constant 1 : index
      %c1_707 = arith.constant 1 : index
      %1145 = vector.load %arg15[%c2_704, %c1_705, %c1_706, %c1_707] : memref<4x3x18x18xf32, #tpu.memory_space<vmem>>, vector<1x1x16x16xf32>
      %1146 = vector.shape_cast %1145 : vector<1x1x16x16xf32> to vector<16x16xf32>
      %1147 = vector.shape_cast %1144 : vector<16x16xf32> to vector<1x1x16x16xf32>
      tpu.vector_store %arg15[%c2_704, %c1_705, %c1_706, %c1_707], %1147 {strides = array<i32>} : memref<4x3x18x18xf32, #tpu.memory_space<vmem>>, vector<1x1x16x16xf32>,
      %c98_708 = arith.constant 98 : index
      %1148 = memref.load %arg1[%c98_708] : memref<108xf32, #tpu.memory_space<smem>>
      %1149 = vector.broadcast %1148 : f32 to vector<16x16xf32>
      %1150 = arith.mulf %1149, %984 : vector<16x16xf32>
      %c97_709 = arith.constant 97 : index
      %1151 = memref.load %arg1[%c97_709] : memref<108xf32, #tpu.memory_space<smem>>
      %1152 = vector.broadcast %1151 : f32 to vector<16x16xf32>
      %1153 = arith.mulf %1152, %986 : vector<16x16xf32>
      %1154 = arith.addf %1150, %1153 : vector<16x16xf32>
      %c96_710 = arith.constant 96 : index
      %1155 = memref.load %arg1[%c96_710] : memref<108xf32, #tpu.memory_space<smem>>
      %1156 = vector.broadcast %1155 : f32 to vector<16x16xf32>
      %1157 = arith.mulf %1156, %988 : vector<16x16xf32>
      %1158 = arith.addf %1154, %1157 : vector<16x16xf32>
      %c95_711 = arith.constant 95 : index
      %1159 = memref.load %arg1[%c95_711] : memref<108xf32, #tpu.memory_space<smem>>
      %1160 = vector.broadcast %1159 : f32 to vector<16x16xf32>
      %1161 = arith.mulf %1160, %990 : vector<16x16xf32>
      %1162 = arith.addf %1158, %1161 : vector<16x16xf32>
      %c94_712 = arith.constant 94 : index
      %1163 = memref.load %arg1[%c94_712] : memref<108xf32, #tpu.memory_space<smem>>
      %1164 = vector.broadcast %1163 : f32 to vector<16x16xf32>
      %1165 = arith.mulf %1164, %992 : vector<16x16xf32>
      %1166 = arith.addf %1162, %1165 : vector<16x16xf32>
      %c93_713 = arith.constant 93 : index
      %1167 = memref.load %arg1[%c93_713] : memref<108xf32, #tpu.memory_space<smem>>
      %1168 = vector.broadcast %1167 : f32 to vector<16x16xf32>
      %1169 = arith.mulf %1168, %994 : vector<16x16xf32>
      %1170 = arith.addf %1166, %1169 : vector<16x16xf32>
      %c92_714 = arith.constant 92 : index
      %1171 = memref.load %arg1[%c92_714] : memref<108xf32, #tpu.memory_space<smem>>
      %1172 = vector.broadcast %1171 : f32 to vector<16x16xf32>
      %1173 = arith.mulf %1172, %996 : vector<16x16xf32>
      %1174 = arith.addf %1170, %1173 : vector<16x16xf32>
      %c91_715 = arith.constant 91 : index
      %1175 = memref.load %arg1[%c91_715] : memref<108xf32, #tpu.memory_space<smem>>
      %1176 = vector.broadcast %1175 : f32 to vector<16x16xf32>
      %1177 = arith.mulf %1176, %998 : vector<16x16xf32>
      %1178 = arith.addf %1174, %1177 : vector<16x16xf32>
      %c90_716 = arith.constant 90 : index
      %1179 = memref.load %arg1[%c90_716] : memref<108xf32, #tpu.memory_space<smem>>
      %1180 = vector.broadcast %1179 : f32 to vector<16x16xf32>
      %1181 = arith.mulf %1180, %1000 : vector<16x16xf32>
      %1182 = arith.addf %1178, %1181 : vector<16x16xf32>
      %c3_717 = arith.constant 3 : index
      %c1_718 = arith.constant 1 : index
      %c1_719 = arith.constant 1 : index
      %c1_720 = arith.constant 1 : index
      %1183 = vector.load %arg15[%c3_717, %c1_718, %c1_719, %c1_720] : memref<4x3x18x18xf32, #tpu.memory_space<vmem>>, vector<1x1x16x16xf32>
      %1184 = vector.shape_cast %1183 : vector<1x1x16x16xf32> to vector<16x16xf32>
      %1185 = vector.broadcast %39 : f32 to vector<16x16xf32>
      %1186 = arith.mulf %1185, %1182 : vector<16x16xf32>
      %1187 = arith.addf %1184, %1186 : vector<16x16xf32>
      %cst_721 = arith.constant 0.000000e+00 : f32
      %1188 = arith.subf %cst_721, %768 : f32
      %1189 = vector.broadcast %1188 : f32 to vector<16x16xf32>
      %1190 = arith.maximumf %1189, %1187 : vector<16x16xf32>
      %1191 = vector.broadcast %768 : f32 to vector<16x16xf32>
      %1192 = arith.minimumf %1191, %1190 : vector<16x16xf32>
      %1193 = arith.subf %1187, %1192 : vector<16x16xf32>
      %c3_722 = arith.constant 3 : index
      %c1_723 = arith.constant 1 : index
      %c1_724 = arith.constant 1 : index
      %c1_725 = arith.constant 1 : index
      %1194 = vector.load %arg15[%c3_722, %c1_723, %c1_724, %c1_725] : memref<4x3x18x18xf32, #tpu.memory_space<vmem>>, vector<1x1x16x16xf32>
      %1195 = vector.shape_cast %1194 : vector<1x1x16x16xf32> to vector<16x16xf32>
      %1196 = vector.shape_cast %1193 : vector<16x16xf32> to vector<1x1x16x16xf32>
      tpu.vector_store %arg15[%c3_722, %c1_723, %c1_724, %c1_725], %1196 {strides = array<i32>} : memref<4x3x18x18xf32, #tpu.memory_space<vmem>>, vector<1x1x16x16xf32>,
      %c2_726 = arith.constant 2 : index
      %c0_727 = arith.constant 0 : index
      %c0_728 = arith.constant 0 : index
      %1197 = vector.load %arg16[%c2_726, %c0_727, %c0_728] : memref<3x18x18xf32, #tpu.memory_space<vmem>>, vector<1x16x16xf32>
      %1198 = vector.shape_cast %1197 : vector<1x16x16xf32> to vector<16x16xf32>
      %c2_729 = arith.constant 2 : index
      %c0_730 = arith.constant 0 : index
      %c1_731 = arith.constant 1 : index
      %1199 = vector.load %arg16[%c2_729, %c0_730, %c1_731] : memref<3x18x18xf32, #tpu.memory_space<vmem>>, vector<1x16x16xf32>
      %1200 = vector.shape_cast %1199 : vector<1x16x16xf32> to vector<16x16xf32>
      %c2_732 = arith.constant 2 : index
      %c0_733 = arith.constant 0 : index
      %c2_734 = arith.constant 2 : index
      %1201 = vector.load %arg16[%c2_732, %c0_733, %c2_734] : memref<3x18x18xf32, #tpu.memory_space<vmem>>, vector<1x16x16xf32>
      %1202 = vector.shape_cast %1201 : vector<1x16x16xf32> to vector<16x16xf32>
      %c2_735 = arith.constant 2 : index
      %c1_736 = arith.constant 1 : index
      %c0_737 = arith.constant 0 : index
      %1203 = vector.load %arg16[%c2_735, %c1_736, %c0_737] : memref<3x18x18xf32, #tpu.memory_space<vmem>>, vector<1x16x16xf32>
      %1204 = vector.shape_cast %1203 : vector<1x16x16xf32> to vector<16x16xf32>
      %c2_738 = arith.constant 2 : index
      %c1_739 = arith.constant 1 : index
      %c1_740 = arith.constant 1 : index
      %1205 = vector.load %arg16[%c2_738, %c1_739, %c1_740] : memref<3x18x18xf32, #tpu.memory_space<vmem>>, vector<1x16x16xf32>
      %1206 = vector.shape_cast %1205 : vector<1x16x16xf32> to vector<16x16xf32>
      %c2_741 = arith.constant 2 : index
      %c1_742 = arith.constant 1 : index
      %c2_743 = arith.constant 2 : index
      %1207 = vector.load %arg16[%c2_741, %c1_742, %c2_743] : memref<3x18x18xf32, #tpu.memory_space<vmem>>, vector<1x16x16xf32>
      %1208 = vector.shape_cast %1207 : vector<1x16x16xf32> to vector<16x16xf32>
      %c2_744 = arith.constant 2 : index
      %c2_745 = arith.constant 2 : index
      %c0_746 = arith.constant 0 : index
      %1209 = vector.load %arg16[%c2_744, %c2_745, %c0_746] : memref<3x18x18xf32, #tpu.memory_space<vmem>>, vector<1x16x16xf32>
      %1210 = vector.shape_cast %1209 : vector<1x16x16xf32> to vector<16x16xf32>
      %c2_747 = arith.constant 2 : index
      %c2_748 = arith.constant 2 : index
      %c1_749 = arith.constant 1 : index
      %1211 = vector.load %arg16[%c2_747, %c2_748, %c1_749] : memref<3x18x18xf32, #tpu.memory_space<vmem>>, vector<1x16x16xf32>
      %1212 = vector.shape_cast %1211 : vector<1x16x16xf32> to vector<16x16xf32>
      %c2_750 = arith.constant 2 : index
      %c2_751 = arith.constant 2 : index
      %c2_752 = arith.constant 2 : index
      %1213 = vector.load %arg16[%c2_750, %c2_751, %c2_752] : memref<3x18x18xf32, #tpu.memory_space<vmem>>, vector<1x16x16xf32>
      %1214 = vector.shape_cast %1213 : vector<1x16x16xf32> to vector<16x16xf32>
      %c26_753 = arith.constant 26 : index
      %1215 = memref.load %arg1[%c26_753] : memref<108xf32, #tpu.memory_space<smem>>
      %1216 = vector.broadcast %1215 : f32 to vector<16x16xf32>
      %1217 = arith.mulf %1216, %1198 : vector<16x16xf32>
      %c25_754 = arith.constant 25 : index
      %1218 = memref.load %arg1[%c25_754] : memref<108xf32, #tpu.memory_space<smem>>
      %1219 = vector.broadcast %1218 : f32 to vector<16x16xf32>
      %1220 = arith.mulf %1219, %1200 : vector<16x16xf32>
      %1221 = arith.addf %1217, %1220 : vector<16x16xf32>
      %c24_755 = arith.constant 24 : index
      %1222 = memref.load %arg1[%c24_755] : memref<108xf32, #tpu.memory_space<smem>>
      %1223 = vector.broadcast %1222 : f32 to vector<16x16xf32>
      %1224 = arith.mulf %1223, %1202 : vector<16x16xf32>
      %1225 = arith.addf %1221, %1224 : vector<16x16xf32>
      %c23_756 = arith.constant 23 : index
      %1226 = memref.load %arg1[%c23_756] : memref<108xf32, #tpu.memory_space<smem>>
      %1227 = vector.broadcast %1226 : f32 to vector<16x16xf32>
      %1228 = arith.mulf %1227, %1204 : vector<16x16xf32>
      %1229 = arith.addf %1225, %1228 : vector<16x16xf32>
      %c22_757 = arith.constant 22 : index
      %1230 = memref.load %arg1[%c22_757] : memref<108xf32, #tpu.memory_space<smem>>
      %1231 = vector.broadcast %1230 : f32 to vector<16x16xf32>
      %1232 = arith.mulf %1231, %1206 : vector<16x16xf32>
      %1233 = arith.addf %1229, %1232 : vector<16x16xf32>
      %c21_758 = arith.constant 21 : index
      %1234 = memref.load %arg1[%c21_758] : memref<108xf32, #tpu.memory_space<smem>>
      %1235 = vector.broadcast %1234 : f32 to vector<16x16xf32>
      %1236 = arith.mulf %1235, %1208 : vector<16x16xf32>
      %1237 = arith.addf %1233, %1236 : vector<16x16xf32>
      %c20_759 = arith.constant 20 : index
      %1238 = memref.load %arg1[%c20_759] : memref<108xf32, #tpu.memory_space<smem>>
      %1239 = vector.broadcast %1238 : f32 to vector<16x16xf32>
      %1240 = arith.mulf %1239, %1210 : vector<16x16xf32>
      %1241 = arith.addf %1237, %1240 : vector<16x16xf32>
      %c19_760 = arith.constant 19 : index
      %1242 = memref.load %arg1[%c19_760] : memref<108xf32, #tpu.memory_space<smem>>
      %1243 = vector.broadcast %1242 : f32 to vector<16x16xf32>
      %1244 = arith.mulf %1243, %1212 : vector<16x16xf32>
      %1245 = arith.addf %1241, %1244 : vector<16x16xf32>
      %c18_761 = arith.constant 18 : index
      %1246 = memref.load %arg1[%c18_761] : memref<108xf32, #tpu.memory_space<smem>>
      %1247 = vector.broadcast %1246 : f32 to vector<16x16xf32>
      %1248 = arith.mulf %1247, %1214 : vector<16x16xf32>
      %1249 = arith.addf %1245, %1248 : vector<16x16xf32>
      %c0_762 = arith.constant 0 : index
      %c2_763 = arith.constant 2 : index
      %c1_764 = arith.constant 1 : index
      %c1_765 = arith.constant 1 : index
      %1250 = vector.load %arg15[%c0_762, %c2_763, %c1_764, %c1_765] : memref<4x3x18x18xf32, #tpu.memory_space<vmem>>, vector<1x1x16x16xf32>
      %1251 = vector.shape_cast %1250 : vector<1x1x16x16xf32> to vector<16x16xf32>
      %1252 = vector.broadcast %39 : f32 to vector<16x16xf32>
      %1253 = arith.mulf %1252, %1249 : vector<16x16xf32>
      %1254 = arith.addf %1251, %1253 : vector<16x16xf32>
      %cst_766 = arith.constant 0.000000e+00 : f32
      %1255 = arith.subf %cst_766, %768 : f32
      %1256 = vector.broadcast %1255 : f32 to vector<16x16xf32>
      %1257 = arith.maximumf %1256, %1254 : vector<16x16xf32>
      %1258 = vector.broadcast %768 : f32 to vector<16x16xf32>
      %1259 = arith.minimumf %1258, %1257 : vector<16x16xf32>
      %1260 = arith.subf %1254, %1259 : vector<16x16xf32>
      %c0_767 = arith.constant 0 : index
      %c2_768 = arith.constant 2 : index
      %c1_769 = arith.constant 1 : index
      %c1_770 = arith.constant 1 : index
      %1261 = vector.load %arg15[%c0_767, %c2_768, %c1_769, %c1_770] : memref<4x3x18x18xf32, #tpu.memory_space<vmem>>, vector<1x1x16x16xf32>
      %1262 = vector.shape_cast %1261 : vector<1x1x16x16xf32> to vector<16x16xf32>
      %1263 = vector.shape_cast %1260 : vector<16x16xf32> to vector<1x1x16x16xf32>
      tpu.vector_store %arg15[%c0_767, %c2_768, %c1_769, %c1_770], %1263 {strides = array<i32>} : memref<4x3x18x18xf32, #tpu.memory_space<vmem>>, vector<1x1x16x16xf32>,
      %c53_771 = arith.constant 53 : index
      %1264 = memref.load %arg1[%c53_771] : memref<108xf32, #tpu.memory_space<smem>>
      %1265 = vector.broadcast %1264 : f32 to vector<16x16xf32>
      %1266 = arith.mulf %1265, %1198 : vector<16x16xf32>
      %c52_772 = arith.constant 52 : index
      %1267 = memref.load %arg1[%c52_772] : memref<108xf32, #tpu.memory_space<smem>>
      %1268 = vector.broadcast %1267 : f32 to vector<16x16xf32>
      %1269 = arith.mulf %1268, %1200 : vector<16x16xf32>
      %1270 = arith.addf %1266, %1269 : vector<16x16xf32>
      %c51_773 = arith.constant 51 : index
      %1271 = memref.load %arg1[%c51_773] : memref<108xf32, #tpu.memory_space<smem>>
      %1272 = vector.broadcast %1271 : f32 to vector<16x16xf32>
      %1273 = arith.mulf %1272, %1202 : vector<16x16xf32>
      %1274 = arith.addf %1270, %1273 : vector<16x16xf32>
      %c50_774 = arith.constant 50 : index
      %1275 = memref.load %arg1[%c50_774] : memref<108xf32, #tpu.memory_space<smem>>
      %1276 = vector.broadcast %1275 : f32 to vector<16x16xf32>
      %1277 = arith.mulf %1276, %1204 : vector<16x16xf32>
      %1278 = arith.addf %1274, %1277 : vector<16x16xf32>
      %c49_775 = arith.constant 49 : index
      %1279 = memref.load %arg1[%c49_775] : memref<108xf32, #tpu.memory_space<smem>>
      %1280 = vector.broadcast %1279 : f32 to vector<16x16xf32>
      %1281 = arith.mulf %1280, %1206 : vector<16x16xf32>
      %1282 = arith.addf %1278, %1281 : vector<16x16xf32>
      %c48_776 = arith.constant 48 : index
      %1283 = memref.load %arg1[%c48_776] : memref<108xf32, #tpu.memory_space<smem>>
      %1284 = vector.broadcast %1283 : f32 to vector<16x16xf32>
      %1285 = arith.mulf %1284, %1208 : vector<16x16xf32>
      %1286 = arith.addf %1282, %1285 : vector<16x16xf32>
      %c47_777 = arith.constant 47 : index
      %1287 = memref.load %arg1[%c47_777] : memref<108xf32, #tpu.memory_space<smem>>
      %1288 = vector.broadcast %1287 : f32 to vector<16x16xf32>
      %1289 = arith.mulf %1288, %1210 : vector<16x16xf32>
      %1290 = arith.addf %1286, %1289 : vector<16x16xf32>
      %c46_778 = arith.constant 46 : index
      %1291 = memref.load %arg1[%c46_778] : memref<108xf32, #tpu.memory_space<smem>>
      %1292 = vector.broadcast %1291 : f32 to vector<16x16xf32>
      %1293 = arith.mulf %1292, %1212 : vector<16x16xf32>
      %1294 = arith.addf %1290, %1293 : vector<16x16xf32>
      %c45_779 = arith.constant 45 : index
      %1295 = memref.load %arg1[%c45_779] : memref<108xf32, #tpu.memory_space<smem>>
      %1296 = vector.broadcast %1295 : f32 to vector<16x16xf32>
      %1297 = arith.mulf %1296, %1214 : vector<16x16xf32>
      %1298 = arith.addf %1294, %1297 : vector<16x16xf32>
      %c1_780 = arith.constant 1 : index
      %c2_781 = arith.constant 2 : index
      %c1_782 = arith.constant 1 : index
      %c1_783 = arith.constant 1 : index
      %1299 = vector.load %arg15[%c1_780, %c2_781, %c1_782, %c1_783] : memref<4x3x18x18xf32, #tpu.memory_space<vmem>>, vector<1x1x16x16xf32>
      %1300 = vector.shape_cast %1299 : vector<1x1x16x16xf32> to vector<16x16xf32>
      %1301 = vector.broadcast %39 : f32 to vector<16x16xf32>
      %1302 = arith.mulf %1301, %1298 : vector<16x16xf32>
      %1303 = arith.addf %1300, %1302 : vector<16x16xf32>
      %cst_784 = arith.constant 0.000000e+00 : f32
      %1304 = arith.subf %cst_784, %768 : f32
      %1305 = vector.broadcast %1304 : f32 to vector<16x16xf32>
      %1306 = arith.maximumf %1305, %1303 : vector<16x16xf32>
      %1307 = vector.broadcast %768 : f32 to vector<16x16xf32>
      %1308 = arith.minimumf %1307, %1306 : vector<16x16xf32>
      %1309 = arith.subf %1303, %1308 : vector<16x16xf32>
      %c1_785 = arith.constant 1 : index
      %c2_786 = arith.constant 2 : index
      %c1_787 = arith.constant 1 : index
      %c1_788 = arith.constant 1 : index
      %1310 = vector.load %arg15[%c1_785, %c2_786, %c1_787, %c1_788] : memref<4x3x18x18xf32, #tpu.memory_space<vmem>>, vector<1x1x16x16xf32>
      %1311 = vector.shape_cast %1310 : vector<1x1x16x16xf32> to vector<16x16xf32>
      %1312 = vector.shape_cast %1309 : vector<16x16xf32> to vector<1x1x16x16xf32>
      tpu.vector_store %arg15[%c1_785, %c2_786, %c1_787, %c1_788], %1312 {strides = array<i32>} : memref<4x3x18x18xf32, #tpu.memory_space<vmem>>, vector<1x1x16x16xf32>,
      %c80_789 = arith.constant 80 : index
      %1313 = memref.load %arg1[%c80_789] : memref<108xf32, #tpu.memory_space<smem>>
      %1314 = vector.broadcast %1313 : f32 to vector<16x16xf32>
      %1315 = arith.mulf %1314, %1198 : vector<16x16xf32>
      %c79_790 = arith.constant 79 : index
      %1316 = memref.load %arg1[%c79_790] : memref<108xf32, #tpu.memory_space<smem>>
      %1317 = vector.broadcast %1316 : f32 to vector<16x16xf32>
      %1318 = arith.mulf %1317, %1200 : vector<16x16xf32>
      %1319 = arith.addf %1315, %1318 : vector<16x16xf32>
      %c78_791 = arith.constant 78 : index
      %1320 = memref.load %arg1[%c78_791] : memref<108xf32, #tpu.memory_space<smem>>
      %1321 = vector.broadcast %1320 : f32 to vector<16x16xf32>
      %1322 = arith.mulf %1321, %1202 : vector<16x16xf32>
      %1323 = arith.addf %1319, %1322 : vector<16x16xf32>
      %c77_792 = arith.constant 77 : index
      %1324 = memref.load %arg1[%c77_792] : memref<108xf32, #tpu.memory_space<smem>>
      %1325 = vector.broadcast %1324 : f32 to vector<16x16xf32>
      %1326 = arith.mulf %1325, %1204 : vector<16x16xf32>
      %1327 = arith.addf %1323, %1326 : vector<16x16xf32>
      %c76_793 = arith.constant 76 : index
      %1328 = memref.load %arg1[%c76_793] : memref<108xf32, #tpu.memory_space<smem>>
      %1329 = vector.broadcast %1328 : f32 to vector<16x16xf32>
      %1330 = arith.mulf %1329, %1206 : vector<16x16xf32>
      %1331 = arith.addf %1327, %1330 : vector<16x16xf32>
      %c75_794 = arith.constant 75 : index
      %1332 = memref.load %arg1[%c75_794] : memref<108xf32, #tpu.memory_space<smem>>
      %1333 = vector.broadcast %1332 : f32 to vector<16x16xf32>
      %1334 = arith.mulf %1333, %1208 : vector<16x16xf32>
      %1335 = arith.addf %1331, %1334 : vector<16x16xf32>
      %c74_795 = arith.constant 74 : index
      %1336 = memref.load %arg1[%c74_795] : memref<108xf32, #tpu.memory_space<smem>>
      %1337 = vector.broadcast %1336 : f32 to vector<16x16xf32>
      %1338 = arith.mulf %1337, %1210 : vector<16x16xf32>
      %1339 = arith.addf %1335, %1338 : vector<16x16xf32>
      %c73_796 = arith.constant 73 : index
      %1340 = memref.load %arg1[%c73_796] : memref<108xf32, #tpu.memory_space<smem>>
      %1341 = vector.broadcast %1340 : f32 to vector<16x16xf32>
      %1342 = arith.mulf %1341, %1212 : vector<16x16xf32>
      %1343 = arith.addf %1339, %1342 : vector<16x16xf32>
      %c72_797 = arith.constant 72 : index
      %1344 = memref.load %arg1[%c72_797] : memref<108xf32, #tpu.memory_space<smem>>
      %1345 = vector.broadcast %1344 : f32 to vector<16x16xf32>
      %1346 = arith.mulf %1345, %1214 : vector<16x16xf32>
      %1347 = arith.addf %1343, %1346 : vector<16x16xf32>
      %c2_798 = arith.constant 2 : index
      %c2_799 = arith.constant 2 : index
      %c1_800 = arith.constant 1 : index
      %c1_801 = arith.constant 1 : index
      %1348 = vector.load %arg15[%c2_798, %c2_799, %c1_800, %c1_801] : memref<4x3x18x18xf32, #tpu.memory_space<vmem>>, vector<1x1x16x16xf32>
      %1349 = vector.shape_cast %1348 : vector<1x1x16x16xf32> to vector<16x16xf32>
      %1350 = vector.broadcast %39 : f32 to vector<16x16xf32>
      %1351 = arith.mulf %1350, %1347 : vector<16x16xf32>
      %1352 = arith.addf %1349, %1351 : vector<16x16xf32>
      %cst_802 = arith.constant 0.000000e+00 : f32
      %1353 = arith.subf %cst_802, %768 : f32
      %1354 = vector.broadcast %1353 : f32 to vector<16x16xf32>
      %1355 = arith.maximumf %1354, %1352 : vector<16x16xf32>
      %1356 = vector.broadcast %768 : f32 to vector<16x16xf32>
      %1357 = arith.minimumf %1356, %1355 : vector<16x16xf32>
      %1358 = arith.subf %1352, %1357 : vector<16x16xf32>
      %c2_803 = arith.constant 2 : index
      %c2_804 = arith.constant 2 : index
      %c1_805 = arith.constant 1 : index
      %c1_806 = arith.constant 1 : index
      %1359 = vector.load %arg15[%c2_803, %c2_804, %c1_805, %c1_806] : memref<4x3x18x18xf32, #tpu.memory_space<vmem>>, vector<1x1x16x16xf32>
      %1360 = vector.shape_cast %1359 : vector<1x1x16x16xf32> to vector<16x16xf32>
      %1361 = vector.shape_cast %1358 : vector<16x16xf32> to vector<1x1x16x16xf32>
      tpu.vector_store %arg15[%c2_803, %c2_804, %c1_805, %c1_806], %1361 {strides = array<i32>} : memref<4x3x18x18xf32, #tpu.memory_space<vmem>>, vector<1x1x16x16xf32>,
      %c107_807 = arith.constant 107 : index
      %1362 = memref.load %arg1[%c107_807] : memref<108xf32, #tpu.memory_space<smem>>
      %1363 = vector.broadcast %1362 : f32 to vector<16x16xf32>
      %1364 = arith.mulf %1363, %1198 : vector<16x16xf32>
      %c106_808 = arith.constant 106 : index
      %1365 = memref.load %arg1[%c106_808] : memref<108xf32, #tpu.memory_space<smem>>
      %1366 = vector.broadcast %1365 : f32 to vector<16x16xf32>
      %1367 = arith.mulf %1366, %1200 : vector<16x16xf32>
      %1368 = arith.addf %1364, %1367 : vector<16x16xf32>
      %c105_809 = arith.constant 105 : index
      %1369 = memref.load %arg1[%c105_809] : memref<108xf32, #tpu.memory_space<smem>>
      %1370 = vector.broadcast %1369 : f32 to vector<16x16xf32>
      %1371 = arith.mulf %1370, %1202 : vector<16x16xf32>
      %1372 = arith.addf %1368, %1371 : vector<16x16xf32>
      %c104_810 = arith.constant 104 : index
      %1373 = memref.load %arg1[%c104_810] : memref<108xf32, #tpu.memory_space<smem>>
      %1374 = vector.broadcast %1373 : f32 to vector<16x16xf32>
      %1375 = arith.mulf %1374, %1204 : vector<16x16xf32>
      %1376 = arith.addf %1372, %1375 : vector<16x16xf32>
      %c103_811 = arith.constant 103 : index
      %1377 = memref.load %arg1[%c103_811] : memref<108xf32, #tpu.memory_space<smem>>
      %1378 = vector.broadcast %1377 : f32 to vector<16x16xf32>
      %1379 = arith.mulf %1378, %1206 : vector<16x16xf32>
      %1380 = arith.addf %1376, %1379 : vector<16x16xf32>
      %c102_812 = arith.constant 102 : index
      %1381 = memref.load %arg1[%c102_812] : memref<108xf32, #tpu.memory_space<smem>>
      %1382 = vector.broadcast %1381 : f32 to vector<16x16xf32>
      %1383 = arith.mulf %1382, %1208 : vector<16x16xf32>
      %1384 = arith.addf %1380, %1383 : vector<16x16xf32>
      %c101_813 = arith.constant 101 : index
      %1385 = memref.load %arg1[%c101_813] : memref<108xf32, #tpu.memory_space<smem>>
      %1386 = vector.broadcast %1385 : f32 to vector<16x16xf32>
      %1387 = arith.mulf %1386, %1210 : vector<16x16xf32>
      %1388 = arith.addf %1384, %1387 : vector<16x16xf32>
      %c100_814 = arith.constant 100 : index
      %1389 = memref.load %arg1[%c100_814] : memref<108xf32, #tpu.memory_space<smem>>
      %1390 = vector.broadcast %1389 : f32 to vector<16x16xf32>
      %1391 = arith.mulf %1390, %1212 : vector<16x16xf32>
      %1392 = arith.addf %1388, %1391 : vector<16x16xf32>
      %c99_815 = arith.constant 99 : index
      %1393 = memref.load %arg1[%c99_815] : memref<108xf32, #tpu.memory_space<smem>>
      %1394 = vector.broadcast %1393 : f32 to vector<16x16xf32>
      %1395 = arith.mulf %1394, %1214 : vector<16x16xf32>
      %1396 = arith.addf %1392, %1395 : vector<16x16xf32>
      %c3_816 = arith.constant 3 : index
      %c2_817 = arith.constant 2 : index
      %c1_818 = arith.constant 1 : index
      %c1_819 = arith.constant 1 : index
      %1397 = vector.load %arg15[%c3_816, %c2_817, %c1_818, %c1_819] : memref<4x3x18x18xf32, #tpu.memory_space<vmem>>, vector<1x1x16x16xf32>
      %1398 = vector.shape_cast %1397 : vector<1x1x16x16xf32> to vector<16x16xf32>
      %1399 = vector.broadcast %39 : f32 to vector<16x16xf32>
      %1400 = arith.mulf %1399, %1396 : vector<16x16xf32>
      %1401 = arith.addf %1398, %1400 : vector<16x16xf32>
      %cst_820 = arith.constant 0.000000e+00 : f32
      %1402 = arith.subf %cst_820, %768 : f32
      %1403 = vector.broadcast %1402 : f32 to vector<16x16xf32>
      %1404 = arith.maximumf %1403, %1401 : vector<16x16xf32>
      %1405 = vector.broadcast %768 : f32 to vector<16x16xf32>
      %1406 = arith.minimumf %1405, %1404 : vector<16x16xf32>
      %1407 = arith.subf %1401, %1406 : vector<16x16xf32>
      %c3_821 = arith.constant 3 : index
      %c2_822 = arith.constant 2 : index
      %c1_823 = arith.constant 1 : index
      %c1_824 = arith.constant 1 : index
      %1408 = vector.load %arg15[%c3_821, %c2_822, %c1_823, %c1_824] : memref<4x3x18x18xf32, #tpu.memory_space<vmem>>, vector<1x1x16x16xf32>
      %1409 = vector.shape_cast %1408 : vector<1x1x16x16xf32> to vector<16x16xf32>
      %1410 = vector.shape_cast %1407 : vector<16x16xf32> to vector<1x1x16x16xf32>
      tpu.vector_store %arg15[%c3_821, %c2_822, %c1_823, %c1_824], %1410 {strides = array<i32>} : memref<4x3x18x18xf32, #tpu.memory_space<vmem>>, vector<1x1x16x16xf32>,
      %cst_825 = arith.constant 2.000000e+00 : f32
      %1411 = vector.broadcast %cst_825 : f32 to vector<3x16x16xf32>
      %1412 = arith.mulf %1411, %767 : vector<3x16x16xf32>
      %1413 = arith.subf %1412, %46 : vector<3x16x16xf32>
      %1414 = vector.extract_strided_slice %1413 {offsets = [0, 0, 0], sizes = [1, 16, 16], strides = [1, 1, 1]} : vector<3x16x16xf32> to vector<1x16x16xf32>
      %1415 = vector.shape_cast %1414 : vector<1x16x16xf32> to vector<16x16xf32>
      %cst_826 = arith.constant 0.577350259 : f32
      %1416 = vector.broadcast %cst_826 : f32 to vector<16x16xf32>
      %1417 = arith.mulf %1416, %1415 : vector<16x16xf32>
      %1418 = vector.extract_strided_slice %1413 {offsets = [1, 0, 0], sizes = [1, 16, 16], strides = [1, 1, 1]} : vector<3x16x16xf32> to vector<1x16x16xf32>
      %1419 = vector.shape_cast %1418 : vector<1x16x16xf32> to vector<16x16xf32>
      %cst_827 = arith.constant 0.577350259 : f32
      %1420 = vector.broadcast %cst_827 : f32 to vector<16x16xf32>
      %1421 = arith.mulf %1420, %1419 : vector<16x16xf32>
      %1422 = arith.addf %1417, %1421 : vector<16x16xf32>
      %1423 = vector.extract_strided_slice %1413 {offsets = [2, 0, 0], sizes = [1, 16, 16], strides = [1, 1, 1]} : vector<3x16x16xf32> to vector<1x16x16xf32>
      %1424 = vector.shape_cast %1423 : vector<1x16x16xf32> to vector<16x16xf32>
      %cst_828 = arith.constant 0.577350259 : f32
      %1425 = vector.broadcast %cst_828 : f32 to vector<16x16xf32>
      %1426 = arith.mulf %1425, %1424 : vector<16x16xf32>
      %1427 = arith.addf %1422, %1426 : vector<16x16xf32>
      %1428 = vector.extract_strided_slice %1413 {offsets = [0, 0, 0], sizes = [1, 16, 16], strides = [1, 1, 1]} : vector<3x16x16xf32> to vector<1x16x16xf32>
      %1429 = vector.shape_cast %1428 : vector<1x16x16xf32> to vector<16x16xf32>
      %cst_829 = arith.constant 0.707106769 : f32
      %1430 = vector.broadcast %cst_829 : f32 to vector<16x16xf32>
      %1431 = arith.mulf %1430, %1429 : vector<16x16xf32>
      %1432 = vector.extract_strided_slice %1413 {offsets = [1, 0, 0], sizes = [1, 16, 16], strides = [1, 1, 1]} : vector<3x16x16xf32> to vector<1x16x16xf32>
      %1433 = vector.shape_cast %1432 : vector<1x16x16xf32> to vector<16x16xf32>
      %cst_830 = arith.constant 4.99959973E-17 : f32
      %1434 = vector.broadcast %cst_830 : f32 to vector<16x16xf32>
      %1435 = arith.mulf %1434, %1433 : vector<16x16xf32>
      %1436 = arith.addf %1431, %1435 : vector<16x16xf32>
      %1437 = vector.extract_strided_slice %1413 {offsets = [2, 0, 0], sizes = [1, 16, 16], strides = [1, 1, 1]} : vector<3x16x16xf32> to vector<1x16x16xf32>
      %1438 = vector.shape_cast %1437 : vector<1x16x16xf32> to vector<16x16xf32>
      %cst_831 = arith.constant -0.707106769 : f32
      %1439 = vector.broadcast %cst_831 : f32 to vector<16x16xf32>
      %1440 = arith.mulf %1439, %1438 : vector<16x16xf32>
      %1441 = arith.addf %1436, %1440 : vector<16x16xf32>
      %1442 = vector.extract_strided_slice %1413 {offsets = [0, 0, 0], sizes = [1, 16, 16], strides = [1, 1, 1]} : vector<3x16x16xf32> to vector<1x16x16xf32>
      %1443 = vector.shape_cast %1442 : vector<1x16x16xf32> to vector<16x16xf32>
      %cst_832 = arith.constant 0.408248305 : f32
      %1444 = vector.broadcast %cst_832 : f32 to vector<16x16xf32>
      %1445 = arith.mulf %1444, %1443 : vector<16x16xf32>
      %1446 = vector.extract_strided_slice %1413 {offsets = [1, 0, 0], sizes = [1, 16, 16], strides = [1, 1, 1]} : vector<3x16x16xf32> to vector<1x16x16xf32>
      %1447 = vector.shape_cast %1446 : vector<1x16x16xf32> to vector<16x16xf32>
      %cst_833 = arith.constant -0.816496611 : f32
      %1448 = vector.broadcast %cst_833 : f32 to vector<16x16xf32>
      %1449 = arith.mulf %1448, %1447 : vector<16x16xf32>
      %1450 = arith.addf %1445, %1449 : vector<16x16xf32>
      %1451 = vector.extract_strided_slice %1413 {offsets = [2, 0, 0], sizes = [1, 16, 16], strides = [1, 1, 1]} : vector<3x16x16xf32> to vector<1x16x16xf32>
      %1452 = vector.shape_cast %1451 : vector<1x16x16xf32> to vector<16x16xf32>
      %cst_834 = arith.constant 0.408248305 : f32
      %1453 = vector.broadcast %cst_834 : f32 to vector<16x16xf32>
      %1454 = arith.mulf %1453, %1452 : vector<16x16xf32>
      %1455 = arith.addf %1450, %1454 : vector<16x16xf32>
      %1456 = vector.shape_cast %1427 : vector<16x16xf32> to vector<1x16x16xf32>
      %1457 = vector.shape_cast %1441 : vector<16x16xf32> to vector<1x16x16xf32>
      %1458 = vector.shape_cast %1455 : vector<16x16xf32> to vector<1x16x16xf32>
      %1459 = tpu.concatenate %1456, %1457, %1458 in 0 : vector<1x16x16xf32>, vector<1x16x16xf32>, vector<1x16x16xf32> -> vector<3x16x16xf32>
      %c0_835 = arith.constant 0 : index
      %c1_836 = arith.constant 1 : index
      %c1_837 = arith.constant 1 : index
      %1460 = vector.load %arg17[%c0_835, %c1_836, %c1_837] : memref<3x18x18xf32, #tpu.memory_space<vmem>>, vector<3x16x16xf32>
      tpu.vector_store %arg17[%c0_835, %c1_836, %c1_837], %1459 {strides = array<i32>} : memref<3x18x18xf32, #tpu.memory_space<vmem>>, vector<3x16x16xf32>,
      %c0_838 = arith.constant 0 : index
      %c2_839 = arith.constant 2 : index
      %c1_840 = arith.constant 1 : index
      %1461 = vector.load %arg17[%c0_838, %c2_839, %c1_840] : memref<3x18x18xf32, #tpu.memory_space<vmem>>, vector<3x16x16xf32>
      %c0_841 = arith.constant 0 : index
      %c1_842 = arith.constant 1 : index
      %c2_843 = arith.constant 2 : index
      %1462 = vector.load %arg17[%c0_841, %c1_842, %c2_843] : memref<3x18x18xf32, #tpu.memory_space<vmem>>, vector<3x16x16xf32>
      %1463 = arith.subf %1461, %1459 : vector<3x16x16xf32>
      %cst_844 = arith.constant 0.000000e+00 : f32
      %1464 = vector.broadcast %cst_844 : f32 to vector<3x16x16xf32>
      %1465 = arith.select %6, %1463, %1464 : vector<3x16x16xi1>, vector<3x16x16xf32>
      %1466 = arith.subf %1462, %1459 : vector<3x16x16xf32>
      %cst_845 = arith.constant 0.000000e+00 : f32
      %1467 = vector.broadcast %cst_845 : f32 to vector<3x16x16xf32>
      %1468 = arith.select %9, %1466, %1467 : vector<3x16x16xi1>, vector<3x16x16xf32>
      %1469 = vector.broadcast %41 : f32 to vector<3x16x16xf32>
      %1470 = arith.mulf %1469, %1465 : vector<3x16x16xf32>
      %1471 = arith.addf %47, %1470 : vector<3x16x16xf32>
      %1472 = vector.broadcast %41 : f32 to vector<3x16x16xf32>
      %1473 = arith.mulf %1472, %1468 : vector<3x16x16xf32>
      %1474 = arith.addf %48, %1473 : vector<3x16x16xf32>
      %cst_846 = arith.constant 9.99999993E-9 : f32
      %1475 = arith.addf %41, %cst_846 : f32
      %1476 = vector.broadcast %1475 : f32 to vector<3x16x16xf32>
      %1477 = arith.divf %1471, %1476 : vector<3x16x16xf32>
      %cst_847 = arith.constant 9.99999993E-9 : f32
      %1478 = arith.addf %41, %cst_847 : f32
      %1479 = vector.broadcast %1478 : f32 to vector<3x16x16xf32>
      %1480 = arith.divf %1474, %1479 : vector<3x16x16xf32>
      %cst_848 = arith.constant 9.99999993E-9 : f32
      %1481 = arith.addf %41, %cst_848 : f32
      %1482 = arith.divf %45, %1481 : f32
      %1483 = vector.extract_strided_slice %1477 {offsets = [0, 0, 0], sizes = [1, 16, 16], strides = [1, 1, 1]} : vector<3x16x16xf32> to vector<1x16x16xf32>
      %1484 = vector.shape_cast %1483 : vector<1x16x16xf32> to vector<16x16xf32>
      %1485 = vector.extract_strided_slice %1477 {offsets = [0, 0, 0], sizes = [1, 16, 16], strides = [1, 1, 1]} : vector<3x16x16xf32> to vector<1x16x16xf32>
      %1486 = vector.shape_cast %1485 : vector<1x16x16xf32> to vector<16x16xf32>
      %1487 = arith.mulf %1484, %1486 : vector<16x16xf32>
      %1488 = vector.extract_strided_slice %1480 {offsets = [0, 0, 0], sizes = [1, 16, 16], strides = [1, 1, 1]} : vector<3x16x16xf32> to vector<1x16x16xf32>
      %1489 = vector.shape_cast %1488 : vector<1x16x16xf32> to vector<16x16xf32>
      %1490 = vector.extract_strided_slice %1480 {offsets = [0, 0, 0], sizes = [1, 16, 16], strides = [1, 1, 1]} : vector<3x16x16xf32> to vector<1x16x16xf32>
      %1491 = vector.shape_cast %1490 : vector<1x16x16xf32> to vector<16x16xf32>
      %1492 = arith.mulf %1489, %1491 : vector<16x16xf32>
      %1493 = arith.addf %1487, %1492 : vector<16x16xf32>
      %1494 = math.sqrt %1493 : vector<16x16xf32>
      %cst_849 = arith.constant 9.99999996E-13 : f32
      %1495 = vector.broadcast %cst_849 : f32 to vector<16x16xf32>
      %1496 = arith.addf %1494, %1495 : vector<16x16xf32>
      %1497 = vector.broadcast %1482 : f32 to vector<16x16xf32>
      %1498 = arith.divf %1497, %1496 : vector<16x16xf32>
      %cst_850 = arith.constant 1.000000e+00 : f32
      %1499 = vector.broadcast %cst_850 : f32 to vector<16x16xf32>
      %1500 = arith.subf %1499, %1498 : vector<16x16xf32>
      %cst_851 = arith.constant 0.000000e+00 : f32
      %1501 = vector.broadcast %cst_851 : f32 to vector<16x16xf32>
      %1502 = arith.maximumf %1500, %1501 : vector<16x16xf32>
      %1503 = vector.extract_strided_slice %1477 {offsets = [1, 0, 0], sizes = [2, 16, 16], strides = [1, 1, 1]} : vector<3x16x16xf32> to vector<2x16x16xf32>
      %1504 = vector.extract_strided_slice %1477 {offsets = [1, 0, 0], sizes = [2, 16, 16], strides = [1, 1, 1]} : vector<3x16x16xf32> to vector<2x16x16xf32>
      %1505 = arith.mulf %1503, %1504 : vector<2x16x16xf32>
      %1506 = vector.extract_strided_slice %1480 {offsets = [1, 0, 0], sizes = [2, 16, 16], strides = [1, 1, 1]} : vector<3x16x16xf32> to vector<2x16x16xf32>
      %1507 = vector.extract_strided_slice %1480 {offsets = [1, 0, 0], sizes = [2, 16, 16], strides = [1, 1, 1]} : vector<3x16x16xf32> to vector<2x16x16xf32>
      %1508 = arith.mulf %1506, %1507 : vector<2x16x16xf32>
      %1509 = arith.addf %1505, %1508 : vector<2x16x16xf32>
      %cst_852 = arith.constant dense<0.000000e+00> : vector<16x16xf32>
      %1510 = vector.multi_reduction <add>, %1509, %cst_852 [0] : vector<2x16x16xf32> to vector<16x16xf32>
      %1511 = math.sqrt %1510 : vector<16x16xf32>
      %cst_853 = arith.constant 5.000000e-01 : f32
      %1512 = arith.mulf %cst_853, %1482 : f32
      %cst_854 = arith.constant 9.99999996E-13 : f32
      %1513 = vector.broadcast %cst_854 : f32 to vector<16x16xf32>
      %1514 = arith.addf %1511, %1513 : vector<16x16xf32>
      %1515 = vector.broadcast %1512 : f32 to vector<16x16xf32>
      %1516 = arith.divf %1515, %1514 : vector<16x16xf32>
      %cst_855 = arith.constant 1.000000e+00 : f32
      %1517 = vector.broadcast %cst_855 : f32 to vector<16x16xf32>
      %1518 = arith.subf %1517, %1516 : vector<16x16xf32>
      %cst_856 = arith.constant 0.000000e+00 : f32
      %1519 = vector.broadcast %cst_856 : f32 to vector<16x16xf32>
      %1520 = arith.maximumf %1518, %1519 : vector<16x16xf32>
      %1521 = vector.shape_cast %1502 : vector<16x16xf32> to vector<1x16x16xf32>
      %1522 = vector.shape_cast %1520 : vector<16x16xf32> to vector<1x16x16xf32>
      %1523 = vector.shape_cast %1521 : vector<1x16x16xf32> to vector<1x16x16xf32>
      %1524 = vector.broadcast %1523 : vector<1x16x16xf32> to vector<3x16x16xf32>
      %1525 = vector.shape_cast %1522 : vector<1x16x16xf32> to vector<1x16x16xf32>
      %1526 = vector.broadcast %1525 : vector<1x16x16xf32> to vector<3x16x16xf32>
      %1527 = arith.select %12, %1524, %1526 : vector<3x16x16xi1>, vector<3x16x16xf32>
      %1528 = arith.mulf %1477, %1527 : vector<3x16x16xf32>
      %1529 = arith.mulf %1480, %1527 : vector<3x16x16xf32>
      %1530 = arith.mulf %3, %1413 : vector<3x16x16xf32>
      %1531 = vector.broadcast %41 : f32 to vector<3x16x16xf32>
      %1532 = arith.mulf %1531, %1530 : vector<3x16x16xf32>
      %1533 = arith.addf %49, %1532 : vector<3x16x16xf32>
      %cst_857 = arith.constant 9.99999993E-9 : f32
      %1534 = arith.addf %41, %cst_857 : f32
      %1535 = vector.broadcast %1534 : f32 to vector<3x16x16xf32>
      %1536 = arith.divf %1533, %1535 : vector<3x16x16xf32>
      %1537 = arith.subf %1536, %1 : vector<3x16x16xf32>
      %1538 = arith.mulf %1537, %1537 : vector<3x16x16xf32>
      %1539 = vector.shape_cast %1538 : vector<3x16x16xf32> to vector<1x3x16x16xf32>
      %cst_858 = arith.constant dense<0.000000e+00> : vector<1xf32>
      %1540 = vector.multi_reduction <add>, %1539, %cst_858 [1, 2, 3] : vector<1x3x16x16xf32> to vector<1xf32>
      %1541 = vector.shape_cast %1540 : vector<1xf32> to vector<1x1x1x1xf32>
      %1542 = vector.extract %1541[0, 0, 0, 0] : f32 from vector<1x1x1x1xf32>
      %1543 = vector.broadcast %1542 : f32 to vector<1x1x1xf32>
      %1544 = math.sqrt %1543 : vector<1x1x1xf32>
      %cst_859 = arith.constant 0.55425626 : f32
      %1545 = vector.broadcast %cst_859 : f32 to vector<1x1x1xf32>
      %1546 = arith.cmpf ogt, %1544, %1545 : vector<1x1x1xf32>
      %cst_860 = arith.constant 9.99999996E-13 : f32
      %1547 = vector.broadcast %cst_860 : f32 to vector<1x1x1xf32>
      %1548 = arith.maximumf %1544, %1547 : vector<1x1x1xf32>
      %cst_861 = arith.constant 0.55425626 : f32
      %1549 = vector.broadcast %cst_861 : f32 to vector<1x1x1xf32>
      %1550 = arith.divf %1549, %1548 : vector<1x1x1xf32>
      %cst_862 = arith.constant 1.000000e+00 : f32
      %1551 = vector.broadcast %cst_862 : f32 to vector<1x1x1xf32>
      %1552 = arith.select %1546, %1550, %1551 : vector<1x1x1xi1>, vector<1x1x1xf32>
      %1553 = vector.broadcast %1552 : vector<1x1x1xf32> to vector<3x16x16xf32>
      %1554 = arith.mulf %1537, %1553 : vector<3x16x16xf32>
      %1555 = arith.addf %1, %1554 : vector<3x16x16xf32>
      %1556 = vector.broadcast %41 : f32 to vector<3x16x16xf32>
      %1557 = arith.mulf %1556, %1555 : vector<3x16x16xf32>
      %1558 = arith.subf %1533, %1557 : vector<3x16x16xf32>
      %c0_863 = arith.constant 0 : index
      %c0_864 = arith.constant 0 : index
      %c0_865 = arith.constant 0 : index
      %1559 = vector.load %arg11[%c0_863, %c0_864, %c0_865] : memref<3x16x16xf32, #tpu.memory_space<vmem>>, vector<3x16x16xf32>
      tpu.vector_store %arg11[%c0_863, %c0_864, %c0_865], %767 {strides = array<i32>} : memref<3x16x16xf32, #tpu.memory_space<vmem>>, vector<3x16x16xf32>,
      %1560 = vector.broadcast %41 : f32 to vector<3x16x16xf32>
      %1561 = arith.mulf %1560, %1528 : vector<3x16x16xf32>
      %1562 = arith.subf %1471, %1561 : vector<3x16x16xf32>
      %c0_866 = arith.constant 0 : index
      %c0_867 = arith.constant 0 : index
      %c0_868 = arith.constant 0 : index
      %1563 = vector.load %arg12[%c0_866, %c0_867, %c0_868] : memref<3x16x16xf32, #tpu.memory_space<vmem>>, vector<3x16x16xf32>
      tpu.vector_store %arg12[%c0_866, %c0_867, %c0_868], %1562 {strides = array<i32>} : memref<3x16x16xf32, #tpu.memory_space<vmem>>, vector<3x16x16xf32>,
      %1564 = vector.broadcast %41 : f32 to vector<3x16x16xf32>
      %1565 = arith.mulf %1564, %1529 : vector<3x16x16xf32>
      %1566 = arith.subf %1474, %1565 : vector<3x16x16xf32>
      %c0_869 = arith.constant 0 : index
      %c0_870 = arith.constant 0 : index
      %c0_871 = arith.constant 0 : index
      %1567 = vector.load %arg13[%c0_869, %c0_870, %c0_871] : memref<3x16x16xf32, #tpu.memory_space<vmem>>, vector<3x16x16xf32>
      tpu.vector_store %arg13[%c0_869, %c0_870, %c0_871], %1566 {strides = array<i32>} : memref<3x16x16xf32, #tpu.memory_space<vmem>>, vector<3x16x16xf32>,
      %c0_872 = arith.constant 0 : index
      %c0_873 = arith.constant 0 : index
      %c0_874 = arith.constant 0 : index
      %1568 = vector.load %arg14[%c0_872, %c0_873, %c0_874] : memref<3x16x16xf32, #tpu.memory_space<vmem>>, vector<3x16x16xf32>
      tpu.vector_store %arg14[%c0_872, %c0_873, %c0_874], %1558 {strides = array<i32>} : memref<3x16x16xf32, #tpu.memory_space<vmem>>, vector<3x16x16xf32>,
    }
    %c4_i32_44 = arith.constant 4 : i32
    %c0_45 = arith.constant 0 : index
    %c0_46 = arith.constant 0 : index
    %c0_47 = arith.constant 0 : index
    %30 = vector.load %arg11[%c0_45, %c0_46, %c0_47] : memref<3x16x16xf32, #tpu.memory_space<vmem>>, vector<3x16x16xf32>
    %c0_48 = arith.constant 0 : index
    %c0_49 = arith.constant 0 : index
    %c0_50 = arith.constant 0 : index
    %c0_51 = arith.constant 0 : index
    %31 = vector.load %arg10[%c0_48, %c0_49, %c0_50, %c0_51] : memref<1x3x16x16xf32, #tpu.memory_space<vmem>>, vector<1x3x16x16xf32>
    %32 = vector.shape_cast %31 : vector<1x3x16x16xf32> to vector<3x16x16xf32>
    %33 = vector.shape_cast %30 : vector<3x16x16xf32> to vector<1x3x16x16xf32>
    tpu.vector_store %arg10[%c0_48, %c0_49, %c0_50, %c0_51], %33 {strides = array<i32>} : memref<1x3x16x16xf32, #tpu.memory_space<vmem>>, vector<1x3x16x16xf32>,
    return
  }
  func.func @transform_0(%arg0: i32, %arg1: memref<108xf32, #tpu.memory_space<smem>>, %arg2: memref<4xf32, #tpu.memory_space<smem>>, %arg3: memref<4xf32, #tpu.memory_space<smem>>, %arg4: memref<4xf32, #tpu.memory_space<smem>>, %arg5: memref<4xf32, #tpu.memory_space<smem>>, %arg6: memref<4xf32, #tpu.memory_space<smem>>) -> (i32, i32, i32, i32) {
    %c0_i32 = arith.constant 0 : i32
    %c0_i32_0 = arith.constant 0 : i32
    %c0_i32_1 = arith.constant 0 : i32
    %c0_i32_2 = arith.constant 0 : i32
    return %arg0, %c0_i32, %c0_i32_0, %c0_i32_1 : i32, i32, i32, i32
  }
  func.func @transform_1(%arg0: i32, %arg1: memref<108xf32, #tpu.memory_space<smem>>, %arg2: memref<4xf32, #tpu.memory_space<smem>>, %arg3: memref<4xf32, #tpu.memory_space<smem>>, %arg4: memref<4xf32, #tpu.memory_space<smem>>, %arg5: memref<4xf32, #tpu.memory_space<smem>>, %arg6: memref<4xf32, #tpu.memory_space<smem>>) -> (i32, i32, i32, i32) {
    %c0_i32 = arith.constant 0 : i32
    %c0_i32_0 = arith.constant 0 : i32
    %c0_i32_1 = arith.constant 0 : i32
    %c0_i32_2 = arith.constant 0 : i32
    return %arg0, %c0_i32, %c0_i32_0, %c0_i32_1 : i32, i32, i32, i32
  }
  func.func @transform_2(%arg0: i32, %arg1: memref<108xf32, #tpu.memory_space<smem>>, %arg2: memref<4xf32, #tpu.memory_space<smem>>, %arg3: memref<4xf32, #tpu.memory_space<smem>>, %arg4: memref<4xf32, #tpu.memory_space<smem>>, %arg5: memref<4xf32, #tpu.memory_space<smem>>, %arg6: memref<4xf32, #tpu.memory_space<smem>>) -> (i32, i32, i32, i32, i32) {
    %c0_i32 = arith.constant 0 : i32
    %c0_i32_0 = arith.constant 0 : i32
    %c0_i32_1 = arith.constant 0 : i32
    %c0_i32_2 = arith.constant 0 : i32
    %c0_i32_3 = arith.constant 0 : i32
    return %arg0, %c0_i32, %c0_i32_0, %c0_i32_1, %c0_i32_2 : i32, i32, i32, i32, i32
  }
  func.func @transform_3(%arg0: i32, %arg1: memref<108xf32, #tpu.memory_space<smem>>, %arg2: memref<4xf32, #tpu.memory_space<smem>>, %arg3: memref<4xf32, #tpu.memory_space<smem>>, %arg4: memref<4xf32, #tpu.memory_space<smem>>, %arg5: memref<4xf32, #tpu.memory_space<smem>>, %arg6: memref<4xf32, #tpu.memory_space<smem>>) -> (i32, i32, i32, i32) {
    %c0_i32 = arith.constant 0 : i32
    %c0_i32_0 = arith.constant 0 : i32
    %c0_i32_1 = arith.constant 0 : i32
    %c0_i32_2 = arith.constant 0 : i32
    return %arg0, %c0_i32, %c0_i32_0, %c0_i32_1 : i32, i32, i32, i32
  }
}

</mosaic_0001>

<bundles_post_ra>
// kernel: cscdvtv_forward.1
= control target key start
LH: loop header
LB: loop body
LE: loop exit
PB: predicated region body
PF: predicated region fallthrough
CT: control target
= control target key end

     0   :  { %s7159_s0 = inlined_call_operand.vmem [shape: f32[108], index: 0, kind: input, shape index: {}]   ;;  %s7160_s6 = inlined_call_operand.vmem [shape: f32[2,3,16,16], index: 6, kind: input, shape index: {}]   ;;  %s7161_s7 = inlined_call_operand.vmem [shape: f32[2,3,16,16], index: 7, kind: input, shape index: {}]   ;;  %s7162_s8 = inlined_call_operand.hbm [shape: f32[2,4,3,16,16], index: 8, kind: input, shape index: {}]   ;;  %s7163_s9 = inlined_call_operand.hbm [shape: f32[2,3,16,16], index: 9, kind: output, shape index: {}]   ;;  %s7164_s1 = inlined_call_operand.vmem [shape: f32[4], index: 1, kind: input, shape index: {}]   ;;  %s7165_s2 = inlined_call_operand.vmem [shape: f32[4], index: 2, kind: input, shape index: {}]   ;;  %s7166_s3 = inlined_call_operand.vmem [shape: f32[4], index: 3, kind: input, shape index: {}]   ;;  %s7167_s4 = inlined_call_operand.vmem [shape: f32[4], index: 4, kind: input, shape index: {}]   ;;  %s7168_s5 = inlined_call_operand.vmem [shape: f32[4], index: 5, kind: input, shape index: {}]  }
   0x1   :  { %s14_s11 = sshll.u32 %s7159_s0, 4  ;;  %s18_s14 = sshll.u32 %s7164_s1, 4  ;;  %s15_s11 = int_to_ptr.vmem [resolvable:$true] %s14_s11  ;;  %s19_s14 = int_to_ptr.vmem [resolvable:$true] %s18_s14 }
   0x2   :  { %s4526_s15 = scalar_lea.vmem %s15_s11, 16  ;;  %p4531_p1 = scmp.lt.s32.totalorder %s15_s11, %s15_s11 }
   0x3   :  { %p4527_p0 = scmp.ne.s32.totalorder %s15_s11, %s4526_s15  ;;  %p4532_p2 = scmp.lt.s32.totalorder %s4526_s15, %s4526_s15 }
   0x5   :  { %p4533_p3 = por %p4532_p2, %p4531_p1 }
   0x7   :  { %p4534_p4 = pnand %p4533_p3, %p4527_p0 }
   0x9   :  { %4537 = shalt.err (!%p4534_p4)  }
   0xa   :  { %s4702_s16 = smov [#allocation10]   ;;  %s4538_s17 = scalar_lea.vmem %s19_s14, 16 }
   0xb   :  { %17 = dma.vmem_to_smem %s15_s11, 16, %s4702_s16, [#allocation9] }
   0xc   :  { %p4539_p5 = scmp.ne.s32.totalorder %s19_s14, %s4538_s17  ;;  %p4543_p6 = scmp.lt.s32.totalorder %s19_s14, %s19_s14 }
   0xd   :  { %p4544_p7 = scmp.lt.s32.totalorder %s4538_s17, %s4538_s17 }
   0xf   :  { %p4545_p8 = por %p4544_p7, %p4543_p6 }
  0x11   :  { %p4546_p9 = pnand %p4545_p8, %p4539_p5 }
  0x13   :  { %4549 = shalt.err (!%p4546_p9)  }
  0x14   :  { %s4703_s0 = smov [#allocation11]   ;;  %s22_s19 = sshll.u32 %s7165_s2, 4  ;;  %s23_s19 = int_to_ptr.vmem [resolvable:$true] %s22_s19 }
  0x15   :  { %21 = dma.vmem_to_smem %s19_s14, 16, %s4703_s0, [#allocation9] }
  0x16   :  { %s26_s22 = sshll.u32 %s7166_s3, 4  ;;  %s4550_s23 = scalar_lea.vmem %s23_s19, 16  ;;  %s27_s22 = int_to_ptr.vmem [resolvable:$true] %s26_s22 }
  0x17   :  { %p4551_p10 = scmp.ne.s32.totalorder %s23_s19, %s4550_s23  ;;  %p4555_p11 = scmp.lt.s32.totalorder %s23_s19, %s23_s19 }
  0x18   :  { %p4556_p12 = scmp.lt.s32.totalorder %s4550_s23, %s4550_s23 }
  0x1a   :  { %p4557_p13 = por %p4556_p12, %p4555_p11 }
  0x1c   :  { %p4558_p0 = pnand %p4557_p13, %p4551_p10 }
  0x1e   :  { %4561 = shalt.err (!%p4558_p0)  }
  0x1f   :  { %s4704_s24 = smov [#allocation12]   ;;  %s4562_s25 = scalar_lea.vmem %s27_s22, 16 }
  0x20   :  { %25 = dma.vmem_to_smem %s23_s19, 16, %s4704_s24, [#allocation9] }
  0x21   :  { %p4563_p1 = scmp.ne.s32.totalorder %s27_s22, %s4562_s25  ;;  %p4567_p2 = scmp.lt.s32.totalorder %s27_s22, %s27_s22 }
  0x22   :  { %p4568_p3 = scmp.lt.s32.totalorder %s4562_s25, %s4562_s25 }
  0x24   :  { %p4569_p4 = por %p4568_p3, %p4567_p2 }
  0x26   :  { %p4570_p5 = pnand %p4569_p4, %p4563_p1 }
  0x28   :  { %4573 = shalt.err (!%p4570_p5)  }
  0x29   :  { %s4705_s2 = smov [#allocation13]   ;;  %s30_s27 = sshll.u32 %s7167_s4, 4  ;;  %s31_s27 = int_to_ptr.vmem [resolvable:$true] %s30_s27 }
  0x2a   :  { %29 = dma.vmem_to_smem %s27_s22, 16, %s4705_s2, [#allocation9] }
  0x2b   :  { %s34_s30 = sshll.u32 %s7168_s5, 4  ;;  %s4574_s10 = scalar_lea.vmem %s31_s27, 16  ;;  %s35_s30 = int_to_ptr.vmem [resolvable:$true] %s34_s30 }
  0x2c   :  { %p4575_p6 = scmp.ne.s32.totalorder %s31_s27, %s4574_s10  ;;  %p4579_p7 = scmp.lt.s32.totalorder %s31_s27, %s31_s27 }
  0x2d   :  { %p4580_p8 = scmp.lt.s32.totalorder %s4574_s10, %s4574_s10 }
  0x2f   :  { %p4581_p9 = por %p4580_p8, %p4579_p7 }
  0x31   :  { %p4582_p10 = pnand %p4581_p9, %p4575_p6 }
  0x33   :  { %4585 = shalt.err (!%p4582_p10)  }
  0x34   :  { %s4706_s11 = smov [#allocation14]   ;;  %s4586_s12 = scalar_lea.vmem %s35_s30, 16 }
  0x35   :  { %33 = dma.vmem_to_smem %s31_s27, 16, %s4706_s11, [#allocation9] }
  0x36   :  { %p4587_p11 = scmp.ne.s32.totalorder %s35_s30, %s4586_s12  ;;  %p4591_p12 = scmp.lt.s32.totalorder %s35_s30, %s35_s30 }
  0x37   :  { %p4592_p13 = scmp.lt.s32.totalorder %s4586_s12, %s4586_s12 }
  0x39   :  { %p4593_p0 = por %p4592_p13, %p4591_p12 }
  0x3b   :  { %p4594_p1 = pnand %p4593_p0, %p4587_p11 }
  0x3d   :  { %4597 = shalt.err (!%p4594_p1)  }
  0x3e   :  { %s4707_s4 = smov [#allocation15]  }
  0x3f   :  { %37 = dma.vmem_to_smem %s35_s30, 16, %s4707_s4, [#allocation9] }
  0x40   :  { %4672 = dma.done.wait [#allocation9], 96 }
  0x41   :  { %4673 = vsyncadd [#allocation9], 4294967200 }
  0x42   :  { %39 = sfence }
  0x43   :  { %40 = vsyncpa [#allocation17], 0 }
  0x44   :  { %42 = vsyncpa [#allocation17 + $0x1], 0 }
  0x45   :  { %43 = vsyncpa [#allocation18], 0 }
  0x46   :  { %45 = vsyncpa [#allocation18 + $0x1], 0  ;;  %s4788_s5 = smov 0   ;;  %s4790_s13 = smov 0  }
  0x47   :  { %s4792_s14 = smov 0   ;;  %s4794_s15 = smov 0  }
  0x48 LB: > { %s4809_s16 = sadd.s32 4294967295, %s4696_s15   ;;  %s4163_s17 = sadd.s32 4294967294, %s4696_s15   ;;  %s4696_s15 = sphi %s4794_s15, %s7306_s15   ;;  %s4692_s14 = sphi %s4792_s14, %s7305_s14   ;;  %s4688_s13 = sphi %s4790_s13, %s7304_s13   ;;  %s4684_s5 = sphi %s4788_s5, %s7303_s5  }
  0x49   : > { %s4813_s0 = sadd.s32 1, %s4696_s15   ;;  %s110_s1 = sadd.s32 1, %s4692_s14 }
  0x4a   : > { %s107_s18 = ssub.s32 %s4696_s15, %s4813_s0  ;;  %p117_p2 = scmp.ne.s32.totalorder %s4692_s14, %s4688_s13 }
  0x4b   : > { %p108_p3 = scmp.eq.s32.totalorder %s107_s18, 0  ;;  %p118_p4 = scmp.eq.s32.totalorder %s4696_s15, 0 }
  0x4c   : > { %p123_p5 = scmp.ne.s32.totalorder %s4688_s13, %s4684_s5  ;;  %p124_p6 = scmp.eq.s32.totalorder %s4809_s16, 0 }
  0x4d   : > { %s4825_s19 = scalar_select %p108_p3, %s4692_s14, %s110_s1  }
  0x4e   : > { %p119_p7 = por %p118_p4, %p117_p2  ;;  %p4827_p8 = por %p124_p6, %p123_p5 }
  0x4f   : > { %p147_p9 = scmp.eq.s32.totalorder %s4809_s16, 1  ;;  %p153_p10 = scmp.eq.s32.totalorder %s4163_s17, 1 }
  0x50   : > { %s7221_s20 = scalar_select %p4827_p8, 1, 0 }
  0x51   : > { %p4409_p12 = scmp.lt.s32.totalorder %s4696_s15, 2  ;;  %p4834_p13 = por %p147_p9, %p117_p2 }
  0x52   : > { %p4838_p0 = por %p153_p10, %p123_p5  ;;  %s189_s23 = sand.u32 1, %s4692_s14  }
  0x53   : > { %s7222_s21 = scalar_select %p4834_p13, 1, 0 }
  0x54   : > { %s7223_s22 = scalar_select %p4838_p0, 1, 0 }
  0x55   : > { %s4388_s24 = smul.u32 3072, %s4696_s15  ;;  %p4849_p1 = pnand %p4409_p12, %p119_p7 }
  0x56   : > { %s4387_s25 = smul.u32 192, %s189_s23  ;;  %s4855_s30 = scalar_lea.sflag [#allocation17], %s189_s23 }
  0x57   : > { %s4847_s26 = scalar_lea.hbm %s7162_s8, %s4388_s24  ;;  %p4600_p3 = pneg %p4849_p1 }
  0x58   : > { %s193_s28 = scalar_lea.vmem [#allocation16], %s4387_s25  ;;  %s4598_s10 = scalar_lea.hbm %s4847_s26, 3072 }
  0x59   : > { %s200_s29 = sshll.u32 %s193_s28, 4  ;;  %p4599_p2 = scmp.ne.s32.totalorder %s4847_s26, %s4598_s10  ;;  %s4853_s29 = int_to_ptr.vmem [resolvable:$true] %s200_s29 }
  0x5a   : > { %s4603_s4 = scalar_lea.hbm %s7162_s8, 6144  ;;  %p4604_p6 = scmp.lt.s32.totalorder %s4847_s26, %s7162_s8 }
  0x5b   : > { %p4601_p4 = pnand %p4600_p3, %p4599_p2  ;;  %p4605_p7 = scmp.lt.s32.totalorder %s4603_s4, %s4598_s10 }
  0x5d   : > { %p4602_p5 = pneg %p4601_p4  ;;  %p4606_p9 = por %p4605_p7, %p4604_p6 }
  0x5f   : > { %p4607_p10 = pnand %p4606_p9, %p4602_p5 }
  0x61   : > { %4610 = shalt.err (!%p4607_p10)
}
  0x62   : > { %s4611_s18 = scalar_lea.vmem %s4853_s29, 3072  ;;  %s4708_s23 = smov [#allocation16]  }
  0x63   : > { %p4612_p12 = scmp.ne.s32.totalorder %s4853_s29, %s4611_s18  ;;  %s4616_s24 = sshll.u32 %s4708_s23, 4  ;;  %s4617_s24 = int_to_ptr.vmem [resolvable:$false] %s4616_s24 }
  0x64   : > { %s4618_s25 = scalar_lea.vmem %s4617_s24, 6144  ;;  %p4619_p4 = scmp.lt.s32.totalorder %s4853_s29, %s4617_s24 }
  0x65   : > { %p4614_p11 = pnand %p4612_p12, %p4600_p3  ;;  %p4620_p0 = scmp.lt.s32.totalorder %s4618_s25, %s4611_s18 }
  0x67   : > { %p4615_p2 = pneg %p4614_p11  ;;  %p4621_p13 = por %p4620_p0, %p4619_p4 }
  0x69   : > { %p4622_p8 = pnand %p4621_p13, %p4615_p2 }
  0x6b   : > { %4625 = shalt.err (!%p4622_p8)
}
  0x6c   : > { %s4709_s2 = smov 128   ;;  %s4710_s3 = smov 8  }
  0x6d   : > { %4404 = dma.hbm_to_vmem [thread:$0]  (!%p4849_p1), %s4847_s26, 3072, %s4853_s29, %s4855_s30, %s4709_s2, %s4709_s2, %s4710_s3  }
  0x6e   : > { %p4167_p11 = scmp.ge.s32.totalorder %s4696_s15, 1  ;;  %p208_p3 = scmp.lt.s32.totalorder %s4696_s15, 3 }
  0x70   : > { %p209_p5 = pnand %p4167_p11, %p208_p3 }
  0x72   : > { %212 = sbr.rel (%p209_p5) target bundleno = 2058 (0x80a), region = 32 }
  0x77   : > { %s4879_s28 = sand.u32 1, %s4688_s13   ;;  %p7225_p8 = scmp.ne.s32.totalorder %s7221_s20, 0 }
  0x78   : > { %s4389_s10 = smul.u32 192, %s4879_s28  ;;  %s215_s11 = scalar_lea.sflag [#allocation17], %s4879_s28 }
  0x7a   : > { %s4883_s12 = scalar_lea.vmem [#allocation16], %s4389_s10 }
  0x7b   : > { %4675 = dma.done.wait (%p7225_p8), %s215_s11, 3072  }
  0x7c   : > { %4677 = vsyncadd (%p7225_p8), %s215_s11, 4294964224  ;;  %p251_p13 = scmp.lt.s32.totalorder %s4809_s16, 1  ;;  %vm281_vm0 = vcmask 130048   ;;  %vm306_vm1 = vcmask 146432   ;;  %v4711_v0 = vmov 0.0   ;;  %vm309_vm2 = vcmask 140288  }
  0x7d   : > { %288 = vst.msk [vmem:[#allocation3] sm:$0xff] %vm281_vm0, %v4711_v0  ;;  %289 = vst.msk [vmem:[#allocation3 + $0x8] sm:$0xff] %vm281_vm0, %v4711_v0  ;;  %v346_v13 = vld [vmem:[%s4883_s12 + $0x10] sm:$0xff]  ;;  %v344_v14 = vld [vmem:[%s4883_s12] sm:$0xff]  ;;  %s4712_s18 = smov 1   ;;  %v273_v29 = vlaneseq  ;;  %s4390_s23 = smul.u32 48, %s4879_s28 }
  0x7e   : > { %290 = vst.msk [vmem:[#allocation3 + $0x10] sm:$0xff] %vm281_vm0, %v4711_v0  ;;  %291 = vst.msk [vmem:[#allocation3 + $0x18] sm:$0xff] %vm281_vm0, %v4711_v0  ;;  %s252_s20 = scalar_select %p251_p13, %s4809_s16, 1  ;;  %396 = vrot.lane.b32.xlu1 %v346_v13, %s4712_s18  ;;  %392 = vrot.lane.b32.xlu0 %v344_v14, %s4712_s18  ;;  %v347_v15 = vld [vmem:[%s4883_s12 + $0x18] sm:$0xff]  ;;  %v345_v16 = vld [vmem:[%s4883_s12 + $0x8] sm:$0xff]  ;;  %vm464_vm5 = vcmask 138248  }
  0x7f   : > { %292 = vst.msk [vmem:[#allocation3 + $0x20] sm:$0xff] %vm281_vm0, %v4711_v0  ;;  %293 = vst.msk [vmem:[#allocation3 + $0x28] sm:$0xff] %vm281_vm0, %v4711_v0  ;;  %v349_v17 = vld [vmem:[%s4883_s12 + $0x28] sm:$0xff]  ;;  %v348_v18 = vld [vmem:[%s4883_s12 + $0x20] sm:$0xff]  ;;  %v274_v30 = vshrl.u32 %v273_v29, 7  ;;  %v5116_v34 = vand.u32 127, %v273_v29 }
  0x80   : > { %294 = vst.msk [vmem:[#allocation4] sm:$0xff] %vm281_vm0, %v4711_v0  ;;  %295 = vst.msk [vmem:[#allocation4 + $0x8] sm:$0xff] %vm281_vm0, %v4711_v0  ;;  %s4391_s26 = smul.u32 48, %s252_s20  ;;  %v351_v19 = vld [vmem:[%s4883_s12 + $0x38] sm:$0xff]  ;;  %v350_v20 = vld [vmem:[%s4883_s12 + $0x30] sm:$0xff]  ;;  %s5160_s24 = scalar_lea.vmem [#allocation19], %s4390_s23 }
  0x81   : > { %296 = vst.msk [vmem:[#allocation4 + $0x10] sm:$0xff] %vm281_vm0, %v4711_v0  ;;  %297 = vst.msk [vmem:[#allocation4 + $0x18] sm:$0xff] %vm281_vm0, %v4711_v0  ;;  %v353_v21 = vld [vmem:[%s4883_s12 + $0x48] sm:$0xff]  ;;  %v352_v22 = vld [vmem:[%s4883_s12 + $0x40] sm:$0xff]  ;;  %v5114_v33 = vadd.s32 8, %v274_v30  ;;  %vm280_vm4 = vcmp.lt.s32.totalorder %v5116_v34, 15 }
  0x82   : > { %298 = vst.msk [vmem:[#allocation4 + $0x20] sm:$0xff] %vm281_vm0, %v4711_v0  ;;  %299 = vst.msk [vmem:[#allocation4 + $0x28] sm:$0xff] %vm281_vm0, %v4711_v0  ;;  %s255_s30 = scalar_lea.vmem %s7160_s6, %s4391_s26  ;;  %s260_s1 = scalar_lea.vmem %s7161_s7, %s4391_s26  ;;  %398 = vrot.lane.b32.xlu1 %v347_v15, %s4712_s18  ;;  %394 = vrot.lane.b32.xlu0 %v345_v16, %s4712_s18  ;;  %v355_v23 = vld [vmem:[%s4883_s12 + $0x58] sm:$0xff]  ;;  %v354_v24 = vld [vmem:[%s4883_s12 + $0x50] sm:$0xff] }
  0x83   : > { %300 = vst.msk [vmem:[#allocation5] sm:$0xff] %vm281_vm0, %v4711_v0  ;;  %301 = vst.msk [vmem:[#allocation5 + $0x8] sm:$0xff] %vm281_vm0, %v4711_v0  ;;  %v5043_v1 = vld [vmem:[%s255_s30] sm:$0xff]  ;;  %v5045_v2 = vld [vmem:[%s255_s30 + $0x8] sm:$0xff]  ;;  %vm277_vm3 = vcmp.lt.s32.totalorder %v5114_v33, 15  ;;  %s5162_s25 = smov 0  }
  0x84   : > { %302 = vst.msk [vmem:[#allocation5 + $0x10] sm:$0xff] %vm281_vm0, %v4711_v0  ;;  %303 = vst.msk [vmem:[#allocation5 + $0x18] sm:$0xff] %vm281_vm0, %v4711_v0  ;;  %v5047_v3 = vld [vmem:[%s255_s30 + $0x10] sm:$0xff]  ;;  %v5049_v4 = vld [vmem:[%s255_s30 + $0x18] sm:$0xff] }
  0x85   : > { %304 = vst.msk [vmem:[#allocation5 + $0x20] sm:$0xff] %vm281_vm0, %v4711_v0  ;;  %305 = vst.msk [vmem:[#allocation5 + $0x28] sm:$0xff] %vm281_vm0, %v4711_v0  ;;  %v5051_v5 = vld [vmem:[%s255_s30 + $0x20] sm:$0xff]  ;;  %v5053_v6 = vld [vmem:[%s255_s30 + $0x28] sm:$0xff] }
  0x86   : > { %489 = vst.msk [vmem:[#allocation7] sm:$0xff] %vm306_vm1, %v4711_v0  ;;  %490 = vst.msk [vmem:[#allocation7 + $0x8] sm:$0xff] %vm306_vm1, %v4711_v0  ;;  %v5061_v7 = vld [vmem:[%s260_s1] sm:$0xff]  ;;  %v5063_v8 = vld [vmem:[%s260_s1 + $0x8] sm:$0xff]  ;;  %402 = vrot.lane.b32.xlu1 %v349_v17, %s4712_s18  ;;  %400 = vrot.lane.b32.xlu0 %v348_v18, %s4712_s18 }
  0x87   : > { %492 = vst.msk [vmem:[#allocation7 + $0x18] sm:$0xff] %vm306_vm1, %v4711_v0  ;;  %493 = vst.msk [vmem:[#allocation7 + $0x20] sm:$0xff] %vm306_vm1, %v4711_v0  ;;  %v5065_v9 = vld [vmem:[%s260_s1 + $0x10] sm:$0xff]  ;;  %v5073_v10 = vld [vmem:[%s260_s1 + $0x18] sm:$0xff] }
  0x88   : > { %495 = vst.msk [vmem:[#allocation7 + $0x30] sm:$0xff] %vm306_vm1, %v4711_v0  ;;  %496 = vst.msk [vmem:[#allocation7 + $0x38] sm:$0xff] %vm306_vm1, %v4711_v0  ;;  %v5075_v11 = vld [vmem:[%s260_s1 + $0x20] sm:$0xff]  ;;  %v5077_v12 = vld [vmem:[%s260_s1 + $0x28] sm:$0xff] }
  0x89   : > { %498 = vst.msk [vmem:[#allocation8] sm:$0xff] %vm306_vm1, %v4711_v0  ;;  %499 = vst.msk [vmem:[#allocation8 + $0x8] sm:$0xff] %vm306_vm1, %v4711_v0  ;;  %v357_v25 = vld [vmem:[%s4883_s12 + $0x68] sm:$0xff]  ;;  %v356_v26 = vld [vmem:[%s4883_s12 + $0x60] sm:$0xff] }
  0x8a   : > { %501 = vst.msk [vmem:[#allocation8 + $0x18] sm:$0xff] %vm306_vm1, %v4711_v0  ;;  %502 = vst.msk [vmem:[#allocation8 + $0x20] sm:$0xff] %vm306_vm1, %v4711_v0  ;;  %406 = vrot.lane.b32.xlu1 %v351_v19, %s4712_s18  ;;  %404 = vrot.lane.b32.xlu0 %v350_v20, %s4712_s18  ;;  %v359_v27 = vld [vmem:[%s4883_s12 + $0x78] sm:$0xff]  ;;  %v358_v28 = vld [vmem:[%s4883_s12 + $0x70] sm:$0xff] }
  0x8b   : > { %504 = vst.msk [vmem:[#allocation8 + $0x30] sm:$0xff] %vm306_vm1, %v4711_v0  ;;  %505 = vst.msk [vmem:[#allocation8 + $0x38] sm:$0xff] %vm306_vm1, %v4711_v0  ;;  %v361_v31 = vld [vmem:[%s4883_s12 + $0x88] sm:$0xff]  ;;  %v360_v32 = vld [vmem:[%s4883_s12 + $0x80] sm:$0xff] }
  0x8c   : > { %311 = vst.msk [vmem:[#allocation6 + $0x18] sm:$0xff] %vm306_vm1, %v4711_v0  ;;  %312 = vst.msk [vmem:[#allocation6 + $0x20] sm:$0xff] %vm306_vm1, %v4711_v0  ;;  %v363_v35 = vld [vmem:[%s4883_s12 + $0x98] sm:$0xff]  ;;  %v362_v36 = vld [vmem:[%s4883_s12 + $0x90] sm:$0xff] }
  0x8d   : > { %307 = vst.msk [vmem:[#allocation6] sm:$0xff] %vm306_vm1, %v4711_v0  ;;  %308 = vst.msk [vmem:[#allocation6 + $0x8] sm:$0xff] %vm306_vm1, %v4711_v0  ;;  %v365_v37 = vld [vmem:[%s4883_s12 + $0xa8] sm:$0xff]  ;;  %v364_v38 = vld [vmem:[%s4883_s12 + $0xa0] sm:$0xff] }
  0x8e   : > { %314 = vst.msk [vmem:[#allocation6 + $0x30] sm:$0xff] %vm306_vm1, %v4711_v0  ;;  %315 = vst.msk [vmem:[#allocation6 + $0x38] sm:$0xff] %vm306_vm1, %v4711_v0  ;;  %410 = vrot.lane.b32.xlu1 %v353_v21, %s4712_s18  ;;  %408 = vrot.lane.b32.xlu0 %v352_v22, %s4712_s18  ;;  %v367_v39 = vld [vmem:[%s4883_s12 + $0xb8] sm:$0xff]  ;;  %v366_v40 = vld [vmem:[%s4883_s12 + $0xb0] sm:$0xff] }
  0x8f   : > { %317 = vst.msk [vmem:[#allocation6 + $0x48] sm:$0xff] %vm306_vm1, %v4711_v0  ;;  %318 = vst.msk [vmem:[#allocation6 + $0x50] sm:$0xff] %vm306_vm1, %v4711_v0 }
  0x90   : > { %320 = vst.msk [vmem:[#allocation6 + $0x60] sm:$0xff] %vm306_vm1, %v4711_v0  ;;  %321 = vst.msk [vmem:[#allocation6 + $0x68] sm:$0xff] %vm306_vm1, %v4711_v0 }
  0x91   : > { %323 = vst.msk [vmem:[#allocation6 + $0x78] sm:$0xff] %vm306_vm1, %v4711_v0  ;;  %324 = vst.msk [vmem:[#allocation6 + $0x80] sm:$0xff] %vm306_vm1, %v4711_v0 }
  0x92   : > { %326 = vst.msk [vmem:[#allocation6 + $0x90] sm:$0xff] %vm306_vm1, %v4711_v0  ;;  %327 = vst.msk [vmem:[#allocation6 + $0x98] sm:$0xff] %vm306_vm1, %v4711_v0  ;;  %414 = vrot.lane.b32.xlu1 %v355_v23, %s4712_s18  ;;  %412 = vrot.lane.b32.xlu0 %v354_v24, %s4712_s18 }
  0x93   : > { %329 = vst.msk [vmem:[#allocation6 + $0xa8] sm:$0xff] %vm306_vm1, %v4711_v0  ;;  %330 = vst.msk [vmem:[#allocation6 + $0xb0] sm:$0xff] %vm306_vm1, %v4711_v0 }
  0x94   : > { %332 = vst.msk [vmem:[#allocation6 + $0xc0] sm:$0xff] %vm306_vm1, %v4711_v0  ;;  %333 = vst.msk [vmem:[#allocation6 + $0xc8] sm:$0xff] %vm306_vm1, %v4711_v0 }
  0x95   : > { %335 = vst.msk [vmem:[#allocation6 + $0xd8] sm:$0xff] %vm306_vm1, %v4711_v0  ;;  %336 = vst.msk [vmem:[#allocation6 + $0xe0] sm:$0xff] %vm306_vm1, %v4711_v0 }
  0x96   : > { %338 = vst.msk [vmem:[#allocation6 + $0xf0] sm:$0xff] %vm306_vm1, %v4711_v0  ;;  %339 = vst.msk [vmem:[#allocation6 + $0xf8] sm:$0xff] %vm306_vm1, %v4711_v0  ;;  %418 = vrot.lane.b32.xlu1 %v357_v25, %s4712_s18  ;;  %416 = vrot.lane.b32.xlu0 %v356_v26, %s4712_s18 }
  0x97   : > { %341 = vst.msk [vmem:[#allocation6 + $0x108] sm:$0xff] %vm306_vm1, %v4711_v0  ;;  %342 = vst.msk [vmem:[#allocation6 + $0x110] sm:$0xff] %vm306_vm1, %v4711_v0 }
  0x98   : > { %491 = vst.msk [vmem:[#allocation7 + $0x10] sm:$0x3] %vm309_vm2, %v4711_v0  ;;  %494 = vst.msk [vmem:[#allocation7 + $0x28] sm:$0x3] %vm309_vm2, %v4711_v0 }
  0x99   : > { %497 = vst.msk [vmem:[#allocation7 + $0x40] sm:$0x3] %vm309_vm2, %v4711_v0  ;;  %500 = vst.msk [vmem:[#allocation8 + $0x10] sm:$0x3] %vm309_vm2, %v4711_v0 }
  0x9a   : > { %503 = vst.msk [vmem:[#allocation8 + $0x28] sm:$0x3] %vm309_vm2, %v4711_v0  ;;  %506 = vst.msk [vmem:[#allocation8 + $0x40] sm:$0x3] %vm309_vm2, %v4711_v0  ;;  %422 = vrot.lane.b32.xlu1 %v359_v27, %s4712_s18  ;;  %420 = vrot.lane.b32.xlu0 %v358_v28, %s4712_s18 }
  0x9b   : > { %313 = vst.msk [vmem:[#allocation6 + $0x28] sm:$0x3] %vm309_vm2, %v4711_v0  ;;  %310 = vst.msk [vmem:[#allocation6 + $0x10] sm:$0x3] %vm309_vm2, %v4711_v0 }
  0x9c   : > { %316 = vst.msk [vmem:[#allocation6 + $0x40] sm:$0x3] %vm309_vm2, %v4711_v0  ;;  %319 = vst.msk [vmem:[#allocation6 + $0x58] sm:$0x3] %vm309_vm2, %v4711_v0 }
  0x9d   : > { %322 = vst.msk [vmem:[#allocation6 + $0x70] sm:$0x3] %vm309_vm2, %v4711_v0  ;;  %325 = vst.msk [vmem:[#allocation6 + $0x88] sm:$0x3] %vm309_vm2, %v4711_v0 }
  0x9e   : > { %328 = vst.msk [vmem:[#allocation6 + $0xa0] sm:$0x3] %vm309_vm2, %v4711_v0  ;;  %331 = vst.msk [vmem:[#allocation6 + $0xb8] sm:$0x3] %vm309_vm2, %v4711_v0  ;;  %426 = vrot.lane.b32.xlu1 %v361_v31, %s4712_s18  ;;  %424 = vrot.lane.b32.xlu0 %v360_v32, %s4712_s18 }
  0x9f   : > { %334 = vst.msk [vmem:[#allocation6 + $0xd0] sm:$0x3] %vm309_vm2, %v4711_v0  ;;  %337 = vst.msk [vmem:[#allocation6 + $0xe8] sm:$0x3] %vm309_vm2, %v4711_v0 }
  0xa0   : > { %340 = vst.msk [vmem:[#allocation6 + $0x100] sm:$0x3] %vm309_vm2, %v4711_v0  ;;  %343 = vst.msk [vmem:[#allocation6 + $0x118] sm:$0x3] %vm309_vm2, %v4711_v0 }
  0xa1   : > { %7226 = vst [vmem:[#allocation23_spill] sm:$0xff] %v5043_v1  ;;  %7227 = vst [vmem:[#allocation24_spill] sm:$0xff] %v5045_v2 }
  0xa2   : > { %7228 = vst [vmem:[#allocation25_spill] sm:$0xff] %v5047_v3  ;;  %7229 = vst [vmem:[#allocation26_spill] sm:$0xff] %v5049_v4  ;;  %430 = vrot.lane.b32.xlu1 %v363_v35, %s4712_s18  ;;  %428 = vrot.lane.b32.xlu0 %v362_v36, %s4712_s18 }
  0xa3   : > { %7230 = vst [vmem:[#allocation27_spill] sm:$0xff] %v5051_v5  ;;  %7231 = vst [vmem:[#allocation28_spill] sm:$0xff] %v5053_v6 }
  0xa4   : > { %282 = vst.msk [vmem:[#allocation2] sm:$0xff] %vm281_vm0, %v5043_v1  ;;  %283 = vst.msk [vmem:[#allocation2 + $0x8] sm:$0xff] %vm281_vm0, %v5045_v2 }
  0xa5   : > { %284 = vst.msk [vmem:[#allocation2 + $0x10] sm:$0xff] %vm281_vm0, %v5047_v3  ;;  %7232 = vst [vmem:[#allocation29_spill] sm:$0xff] %v5061_v7 }
  0xa6   : > { %7233 = vst [vmem:[#allocation30_spill] sm:$0xff] %v5063_v8  ;;  %7234 = vst [vmem:[#allocation31_spill] sm:$0xff] %v5065_v9  ;;  %434 = vrot.lane.b32.xlu1 %v365_v37, %s4712_s18  ;;  %432 = vrot.lane.b32.xlu0 %v364_v38, %s4712_s18 }
  0xa7   : > { %285 = vst.msk [vmem:[#allocation2 + $0x18] sm:$0xff] %vm281_vm0, %v5049_v4  ;;  %286 = vst.msk [vmem:[#allocation2 + $0x20] sm:$0xff] %vm281_vm0, %v5051_v5 }
  0xa8   : > { %287 = vst.msk [vmem:[#allocation2 + $0x28] sm:$0xff] %vm281_vm0, %v5053_v6  ;;  %7235 = vst [vmem:[#allocation32_spill] sm:$0xff] %v5073_v10 }
  0xa9   : > { %7236 = vst [vmem:[#allocation33_spill] sm:$0xff] %v5075_v11  ;;  %7237 = vst [vmem:[#allocation34_spill] sm:$0xff] %v5077_v12 }
  0xaa   : > { %7238 = vst [vmem:[#allocation35_spill] sm:$0xff] %v5114_v33  ;;  %7239 = vst [vmem:[#allocation36_spill] sm:$0xff] %v5116_v34  ;;  %438 = vrot.lane.b32.xlu1 %v367_v39, %s4712_s18  ;;  %436 = vrot.lane.b32.xlu0 %v366_v40, %s4712_s18 }
  0xf0   : > { %v397_v41 = vpop.permute.xlu1 %396  ;;  %v393_v42 = vpop.permute.xlu0 %392 }
  0xf1   : > { %467 = vst.msk [vmem:[#allocation6 + $0x19] sm:$0xff] %vm464_vm5, %v397_v41  ;;  %465 = vst.msk [vmem:[#allocation6 + $0x1] sm:$0xff] %vm464_vm5, %v393_v42 }
  0xf4   : > { %v399_v43 = vpop.permute.xlu1 %398  ;;  %v395_v44 = vpop.permute.xlu0 %394 }
  0xf5   : > { %468 = vst.msk [vmem:[#allocation6 + $0x21] sm:$0xff] %vm464_vm5, %v399_v43  ;;  %466 = vst.msk [vmem:[#allocation6 + $0x9] sm:$0xff] %vm464_vm5, %v395_v44 }
  0xf8   : > { %v403_v45 = vpop.permute.xlu1 %402  ;;  %v401_v46 = vpop.permute.xlu0 %400 }
  0xf9   : > { %470 = vst.msk [vmem:[#allocation6 + $0x39] sm:$0xff] %vm464_vm5, %v403_v45  ;;  %469 = vst.msk [vmem:[#allocation6 + $0x31] sm:$0xff] %vm464_vm5, %v401_v46 }
  0xfc   : > { %v407_v47 = vpop.permute.xlu1 %406  ;;  %v405_v48 = vpop.permute.xlu0 %404 }
  0xfd   : > { %472 = vst.msk [vmem:[#allocation6 + $0x51] sm:$0xff] %vm464_vm5, %v407_v47  ;;  %471 = vst.msk [vmem:[#allocation6 + $0x49] sm:$0xff] %vm464_vm5, %v405_v48 }
 0x100   : > { %v411_v49 = vpop.permute.xlu1 %410  ;;  %v409_v50 = vpop.permute.xlu0 %408 }
 0x101   : > { %474 = vst.msk [vmem:[#allocation6 + $0x69] sm:$0xff] %vm464_vm5, %v411_v49  ;;  %473 = vst.msk [vmem:[#allocation6 + $0x61] sm:$0xff] %vm464_vm5, %v409_v50 }
 0x104   : > { %v415_v51 = vpop.permute.xlu1 %414  ;;  %v413_v52 = vpop.permute.xlu0 %412 }
 0x105   : > { %476 = vst.msk [vmem:[#allocation6 + $0x81] sm:$0xff] %vm464_vm5, %v415_v51  ;;  %475 = vst.msk [vmem:[#allocation6 + $0x79] sm:$0xff] %vm464_vm5, %v413_v52 }
 0x108   : > { %v419_v53 = vpop.permute.xlu1 %418  ;;  %v417_v54 = vpop.permute.xlu0 %416 }
 0x109   : > { %478 = vst.msk [vmem:[#allocation6 + $0x99] sm:$0xff] %vm464_vm5, %v419_v53  ;;  %477 = vst.msk [vmem:[#allocation6 + $0x91] sm:$0xff] %vm464_vm5, %v417_v54 }
 0x10c   : > { %v423_v55 = vpop.permute.xlu1 %422  ;;  %v421_v56 = vpop.permute.xlu0 %420 }
 0x10d   : > { %480 = vst.msk [vmem:[#allocation6 + $0xb1] sm:$0xff] %vm464_vm5, %v423_v55  ;;  %479 = vst.msk [vmem:[#allocation6 + $0xa9] sm:$0xff] %vm464_vm5, %v421_v56 }
 0x110   : > { %v427_v57 = vpop.permute.xlu1 %426  ;;  %v425_v58 = vpop.permute.xlu0 %424 }
 0x111   : > { %482 = vst.msk [vmem:[#allocation6 + $0xc9] sm:$0xff] %vm464_vm5, %v427_v57  ;;  %481 = vst.msk [vmem:[#allocation6 + $0xc1] sm:$0xff] %vm464_vm5, %v425_v58 }
 0x114   : > { %v431_v59 = vpop.permute.xlu1 %430  ;;  %v429_v60 = vpop.permute.xlu0 %428 }
 0x115   : > { %484 = vst.msk [vmem:[#allocation6 + $0xe1] sm:$0xff] %vm464_vm5, %v431_v59  ;;  %483 = vst.msk [vmem:[#allocation6 + $0xd9] sm:$0xff] %vm464_vm5, %v429_v60 }
 0x118   : > { %v435_v61 = vpop.permute.xlu1 %434  ;;  %v433_v62 = vpop.permute.xlu0 %432 }
 0x119   : > { %486 = vst.msk [vmem:[#allocation6 + $0xf9] sm:$0xff] %vm464_vm5, %v435_v61  ;;  %485 = vst.msk [vmem:[#allocation6 + $0xf1] sm:$0xff] %vm464_vm5, %v433_v62 }
 0x11c   : > { %v439_v63 = vpop.permute.xlu1 %438  ;;  %v437_v0 = vpop.permute.xlu0 %436 }
 0x11d   : > { %488 = vst.msk [vmem:[#allocation6 + $0x111] sm:$0xff] %vm464_vm5, %v439_v63  ;;  %487 = vst.msk [vmem:[#allocation6 + $0x109] sm:$0xff] %vm464_vm5, %v437_v0 }
 0x11e LB: >> { %s4171_s2 = sld [smem:[#allocation10 + $0x2]]  ;;  %v5167_v13 = vld [vmem:[#allocation6] sm:$0xff]  ;;  %v5169_v14 = vld [vmem:[#allocation6 + $0x8] sm:$0xff]  ;;  %s4713_s12 = smov 126   ;;  %v5201_v39 = vld [vmem:[#allocation6 + $0x50] sm:$0xff]  ;;  %s4700_s25 = sphi %s5162_s25, %s512_s25  }
 0x11f   : >> { %s4170_s3 = sld [smem:[#allocation10 + $0x1]]  ;;  %s4714_s20 = smov 127   ;;  %v5177_v21 = vld [vmem:[#allocation6 + $0x9] sm:$0xff]  ;;  %v5179_v23 = vld [vmem:[#allocation6 + $0x1] sm:$0xff]  ;;  %v5213_v47 = vld [vmem:[#allocation6 + $0x51] sm:$0xff] }
 0x120   : >> { %s4173_s10 = sld [smem:[#allocation10 + $0x4]]  ;;  %v5189_v29 = vld [vmem:[#allocation6 + $0xa] sm:$0xff]  ;;  %v5191_v31 = vld [vmem:[#allocation6 + $0x2] sm:$0xff]  ;;  %v5225_v55 = vld [vmem:[#allocation6 + $0x52] sm:$0xff] }
 0x121   : >> { %s4174_s11 = sld [smem:[#allocation10 + $0x5]]  ;;  %v5203_v41 = vld [vmem:[#allocation6 + $0x48] sm:$0xff]  ;;  %v5237_v63 = vld [vmem:[#allocation6 + $0x98] sm:$0xff] }
 0x122   : >> { %s4176_s26 = sld [smem:[#allocation10 + $0x7]]  ;;  %v5215_v49 = vld [vmem:[#allocation6 + $0x49] sm:$0xff]  ;;  %v5393_v3 = vld [vmem:[#allocation6 + $0xb1] sm:$0xff] }
 0x123   : >> { %s4177_s27 = sld [smem:[#allocation10 + $0x8]]  ;;  %v5227_v57 = vld [vmem:[#allocation6 + $0x4a] sm:$0xff]  ;;  %7247 = vst [vmem:[#allocation44_spill] sm:$0xff] %v5393_v3  ;;  %v5415_v10 = vld [vmem:[#allocation6 + $0xb2] sm:$0xff] }
 0x124   : >> { %v563_v15 = vstv %s4171_s2  ;;  %s4179_s29 = sld [smem:[#allocation10 + $0x1c]]  ;;  %7249 = vst [vmem:[#allocation46_spill] sm:$0xff] %v5415_v10  ;;  %v5419_v7 = vld [vmem:[#allocation6 + $0xaa] sm:$0xff] }
 0x125   : >> { %v564_v16 = vmul.f32 %v563_v15, %v5167_v13  ;;  %v549_v17 = vstv %s4170_s3  ;;  %v565_v19 = vmul.f32 %v563_v15, %v5169_v14  ;;  %s4180_s30 = sld [smem:[#allocation10 + $0x1d]]  ;;  %v5239_v15 = vld [vmem:[#allocation6 + $0x90] sm:$0xff]  ;;  %7250 = vst [vmem:[#allocation47_spill] sm:$0xff] %v5419_v7 }
 0x126   : >> { %v550_v18 = vmul.f32 %v549_v17, %v5167_v13  ;;  %v551_v20 = vmul.f32 %v549_v17, %v5169_v14  ;;  %v585_v22 = vstv %s4173_s10  ;;  %s4182_s4 = sld [smem:[#allocation10 + $0x1f]] }
 0x127   : >> { %568 = vrot.lane.b32.xlu1 %v564_v16, %s4713_s12  ;;  %v587_v24 = vmul.f32 %v585_v22, %v5177_v21  ;;  %v586_v25 = vmul.f32 %v585_v22, %v5179_v23  ;;  %v599_v26 = vstv %s4174_s11  ;;  %s4183_s17 = sld [smem:[#allocation10 + $0x20]]  ;;  %v5249_v22 = vld [vmem:[#allocation6 + $0x99] sm:$0xff] }
 0x128   : >> { %554 = vrot.lane.b32.xlu0 %v550_v18, %s4714_s20  ;;  %v601_v27 = vmul.f32 %v599_v26, %v5177_v21  ;;  %v600_v28 = vmul.f32 %v599_v26, %v5179_v23  ;;  %v621_v30 = vstv %s4176_s26  ;;  %s4185_s1 = sld [smem:[#allocation10 + $0x22]] }
 0x129   : >> { %v623_v32 = vmul.f32 %v621_v30, %v5189_v29  ;;  %v622_v35 = vmul.f32 %v621_v30, %v5191_v31  ;;  %v635_v36 = vstv %s4177_s27  ;;  %s4186_s18 = sld [smem:[#allocation10 + $0x23]] }
 0x12a   : >> { %v637_v37 = vmul.f32 %v635_v36, %v5189_v29  ;;  %v636_v38 = vmul.f32 %v635_v36, %v5191_v31  ;;  %v658_v40 = vstv %s4179_s29  ;;  %s4188_s23 = sld [smem:[#allocation10 + $0x37]] }
 0x12b   : >> { %570 = vrot.lane.b32.xlu1 %v565_v19, %s4713_s12  ;;  %v660_v42 = vmul.f32 %v658_v40, %v5201_v39  ;;  %v659_v43 = vmul.f32 %v658_v40, %v5203_v41  ;;  %v672_v44 = vstv %s4180_s30  ;;  %s4189_s2 = sld [smem:[#allocation10 + $0x38]] }
 0x12c   : >> { %556 = vrot.lane.b32.xlu0 %v551_v20, %s4714_s20  ;;  %v674_v45 = vmul.f32 %v672_v44, %v5201_v39  ;;  %v673_v46 = vmul.f32 %v672_v44, %v5203_v41  ;;  %v694_v48 = vstv %s4182_s4  ;;  %s4191_s3 = sld [smem:[#allocation10 + $0x3a]] }
 0x12d   : >> { %v696_v50 = vmul.f32 %v694_v48, %v5213_v47  ;;  %v695_v51 = vmul.f32 %v694_v48, %v5215_v49  ;;  %v708_v52 = vstv %s4183_s17  ;;  %s4192_s10 = sld [smem:[#allocation10 + $0x3b]]  ;;  %v868_v48 = vld [vmem:[#allocation6 + $0xd8] sm:$0xff] }
 0x12e   : >> { %v710_v53 = vmul.f32 %v708_v52, %v5213_v47  ;;  %v709_v54 = vmul.f32 %v708_v52, %v5215_v49  ;;  %v730_v56 = vstv %s4185_s1  ;;  %s4194_s11 = sld [smem:[#allocation10 + $0x3d]] }
 0x12f   : >> { %592 = vrot.lane.b32.xlu1 %v587_v24, %s4714_s20  ;;  %v732_v58 = vmul.f32 %v730_v56, %v5225_v55  ;;  %v731_v59 = vmul.f32 %v730_v56, %v5227_v57  ;;  %v744_v60 = vstv %s4186_s18  ;;  %s4195_s26 = sld [smem:[#allocation10 + $0x3e]]  ;;  %v905_v56 = vld [vmem:[#allocation6 + $0xe1] sm:$0xff] }
 0x130   : >> { %590 = vrot.lane.b32.xlu0 %v586_v25, %s4714_s20  ;;  %v746_v61 = vmul.f32 %v744_v60, %v5225_v55  ;;  %v745_v62 = vmul.f32 %v744_v60, %v5227_v57  ;;  %v767_v0 = vstv %s4188_s23  ;;  %v5251_v25 = vld [vmem:[#allocation6 + $0x91] sm:$0xff]  ;;  %s4197_s27 = sld [smem:[#allocation10 + $0x52]] }
 0x131   : >> { %v769_v16 = vmul.f32 %v767_v0, %v5237_v63  ;;  %v768_v17 = vmul.f32 %v767_v0, %v5239_v15  ;;  %v781_v18 = vstv %s4189_s2  ;;  %7240 = vst [vmem:[#allocation37_spill] sm:$0xff] %v5251_v25  ;;  %s4198_s29 = sld [smem:[#allocation10 + $0x53]] }
 0x132   : >> { %v783_v19 = vmul.f32 %v781_v18, %v5237_v63  ;;  %v782_v20 = vmul.f32 %v781_v18, %v5239_v15  ;;  %v803_v24 = vstv %s4191_s3  ;;  %s4200_s30 = sld [smem:[#allocation10 + $0x55]] }
 0x133   : >> { %606 = vrot.lane.b32.xlu1 %v601_v27, %s4713_s12  ;;  %v805_v26 = vmul.f32 %v803_v24, %v5249_v22  ;;  %v804_v27 = vmul.f32 %v803_v24, %v5251_v25  ;;  %s4201_s4 = sld [smem:[#allocation10 + $0x56]] }
 0x134   : >> { %604 = vrot.lane.b32.xlu0 %v600_v28, %s4713_s12  ;;  %v817_v28 = vstv %s4192_s10  ;;  %v839_v36 = vstv %s4194_s11  ;;  %s4203_s17 = sld [smem:[#allocation10 + $0x58]] }
 0x135   : >> { %v819_v30 = vmul.f32 %v817_v28, %v5249_v22  ;;  %s4204_s1 = sld [smem:[#allocation10 + $0x59]] }
 0x136   : >> { %s4206_s18 = sld [smem:[#allocation10 + $0xa]] }
 0x137   : >> { %628 = vrot.lane.b32.xlu1 %v623_v32, %s4714_s20  ;;  %v818_v32 = vmul.f32 %v817_v28, %v5251_v25  ;;  %v890_v52 = vstv %s4198_s29  ;;  %s4207_s23 = sld [smem:[#allocation10 + $0xb]] }
 0x138   : >> { %626 = vrot.lane.b32.xlu0 %v622_v35, %s4714_s20  ;;  %v832_v35 = vld [vmem:[#allocation6 + $0x9a] sm:$0xff]  ;;  %s4209_s2 = sld [smem:[#allocation10 + $0xd]] }
 0x139   : >> { %s4210_s3 = sld [smem:[#allocation10 + $0xe]] }
 0x13a   : >> { %v948_v18 = vstv %s4203_s17  ;;  %s4212_s10 = sld [smem:[#allocation10 + $0x10]] }
 0x13b   : >> { %642 = vrot.lane.b32.xlu1 %v637_v37, %s4713_s12  ;;  %v831_v37 = vld [vmem:[#allocation6 + $0x92] sm:$0xff]  ;;  %s4213_s11 = sld [smem:[#allocation10 + $0x11]] }
 0x13c   : >> { %640 = vrot.lane.b32.xlu0 %v636_v38, %s4713_s12  ;;  %v841_v38 = vmul.f32 %v839_v36, %v832_v35  ;;  %v840_v40 = vmul.f32 %v839_v36, %v831_v37  ;;  %s4218_s29 = sld [smem:[#allocation10 + $0x28]] }
 0x13d   : >> { %s4222_s17 = sld [smem:[#allocation10 + $0x2c]] }
 0x13f   : >> { %665 = vrot.lane.b32.xlu1 %v660_v42, %s4714_s20  ;;  %v853_v42 = vstv %s4195_s26  ;;  %s4215_s26 = sld [smem:[#allocation10 + $0x25]] }
 0x140   : >> { %663 = vrot.lane.b32.xlu0 %v659_v43, %s4714_s20  ;;  %v855_v43 = vmul.f32 %v853_v42, %v832_v35  ;;  %v854_v44 = vmul.f32 %v853_v42, %v831_v37  ;;  %v5279_v35 = vld [vmem:[#allocation6 + $0x18] sm:$0xff] }
 0x143   : >> { %679 = vrot.lane.b32.xlu1 %v674_v45, %s4713_s12  ;;  %v869_v45 = vld [vmem:[#allocation6 + $0xe0] sm:$0xff] }
 0x144   : >> { %677 = vrot.lane.b32.xlu0 %v673_v46, %s4713_s12  ;;  %v876_v46 = vstv %s4197_s27  ;;  %s4216_s27 = sld [smem:[#allocation10 + $0x26]] }
 0x147   : >> { %701 = vrot.lane.b32.xlu1 %v696_v50, %s4714_s20  ;;  %v878_v50 = vmul.f32 %v876_v46, %v869_v45 }
 0x148   : >> { %699 = vrot.lane.b32.xlu0 %v695_v51, %s4714_s20  ;;  %v877_v51 = vmul.f32 %v876_v46, %v868_v48 }
 0x14b   : >> { %715 = vrot.lane.b32.xlu1 %v710_v53, %s4713_s12  ;;  %v892_v53 = vmul.f32 %v890_v52, %v869_v45  ;;  %v5291_v45 = vld [vmem:[#allocation6 + $0x19] sm:$0xff] }
 0x14c   : >> { %713 = vrot.lane.b32.xlu0 %v709_v54, %s4713_s12  ;;  %v891_v54 = vmul.f32 %v890_v52, %v868_v48 }
 0x14f   : >> { %737 = vrot.lane.b32.xlu1 %v732_v58, %s4714_s20  ;;  %v912_v58 = vstv %s4200_s30  ;;  %s4219_s30 = sld [smem:[#allocation10 + $0x29]] }
 0x150   : >> { %735 = vrot.lane.b32.xlu0 %v731_v59, %s4714_s20  ;;  %v904_v59 = vld [vmem:[#allocation6 + $0xd9] sm:$0xff]  ;;  %v914_v60 = vmul.f32 %v912_v58, %v905_v56 }
 0x153   : >> { %751 = vrot.lane.b32.xlu1 %v746_v61, %s4713_s12  ;;  %v913_v61 = vmul.f32 %v912_v58, %v904_v59 }
 0x154   : >> { %749 = vrot.lane.b32.xlu0 %v745_v62, %s4713_s12  ;;  %v926_v62 = vstv %s4201_s4  ;;  %s4221_s4 = sld [smem:[#allocation10 + $0x2b]] }
 0x155   : >> { %v928_v0 = vmul.f32 %v926_v62, %v905_v56  ;;  %v5303_v56 = vld [vmem:[#allocation6 + $0x1a] sm:$0xff] }
 0x157   : >> { %774 = vrot.lane.b32.xlu1 %v769_v16, %s4714_s20  ;;  %v927_v16 = vmul.f32 %v926_v62, %v904_v59 }
 0x158   : >> { %772 = vrot.lane.b32.xlu0 %v768_v17, %s4714_s20  ;;  %v941_v17 = vld [vmem:[#allocation6 + $0xe2] sm:$0xff] }
 0x15b   : >> { %788 = vrot.lane.b32.xlu1 %v783_v19, %s4713_s12  ;;  %v940_v19 = vld [vmem:[#allocation6 + $0xda] sm:$0xff] }
 0x15c   : >> { %786 = vrot.lane.b32.xlu0 %v782_v20, %s4713_s12  ;;  %v950_v20 = vmul.f32 %v948_v18, %v941_v17  ;;  %v949_v24 = vmul.f32 %v948_v18, %v940_v19  ;;  %v5317_v18 = vld [vmem:[#allocation6 + $0x60] sm:$0xff] }
 0x15f   : >> { %810 = vrot.lane.b32.xlu1 %v805_v26, %s4714_s20  ;;  %v962_v26 = vstv %s4204_s1  ;;  %s4224_s1 = sld [smem:[#allocation10 + $0x40]] }
 0x160   : >> { %808 = vrot.lane.b32.xlu0 %v804_v27, %s4714_s20  ;;  %v964_v27 = vmul.f32 %v962_v26, %v941_v17  ;;  %v963_v28 = vmul.f32 %v962_v26, %v940_v19  ;;  %v1106_v26 = vstv %s4216_s27  ;;  %s5427_s27 = sld [smem:[#allocation10 + $0x5c]] }
 0x163   : >> { %824 = vrot.lane.b32.xlu1 %v819_v30, %s4713_s12  ;;  %v5277_v30 = vld [vmem:[#allocation6 + $0x20] sm:$0xff] }
 0x164   : >> { %822 = vrot.lane.b32.xlu0 %v818_v32, %s4713_s12  ;;  %v983_v32 = vstv %s4206_s18  ;;  %s4225_s18 = sld [smem:[#allocation10 + $0x41]] }
 0x165   : >> { %v985_v36 = vmul.f32 %v983_v32, %v5277_v30  ;;  %v984_v37 = vmul.f32 %v983_v32, %v5279_v35 }
 0x167   : >> { %846 = vrot.lane.b32.xlu1 %v841_v38, %s4714_s20  ;;  %v997_v38 = vstv %s4207_s23  ;;  %s4227_s23 = sld [smem:[#allocation10 + $0x43]] }
 0x168   : >> { %844 = vrot.lane.b32.xlu0 %v840_v40, %s4714_s20  ;;  %v999_v40 = vmul.f32 %v997_v38, %v5277_v30  ;;  %v998_v42 = vmul.f32 %v997_v38, %v5279_v35  ;;  %v1128_v38 = vstv %s4218_s29  ;;  %s5433_s29 = sld [smem:[#allocation10 + $0x3]] }
 0x16a   : >> { %v1215_v6 = vstv %s4225_s18  ;;  %s5490_s18 = sld [smem:[#allocation10 + $0x62]] }
 0x16b   : >> { %860 = vrot.lane.b32.xlu1 %v855_v43, %s4713_s12  ;;  %v5289_v43 = vld [vmem:[#allocation6 + $0x21] sm:$0xff] }
 0x16c   : >> { %858 = vrot.lane.b32.xlu0 %v854_v44, %s4713_s12  ;;  %v1019_v44 = vstv %s4209_s2  ;;  %s4228_s2 = sld [smem:[#allocation10 + $0x44]] }
 0x16d   : >> { %v1021_v46 = vmul.f32 %v1019_v44, %v5289_v43  ;;  %v1020_v48 = vmul.f32 %v1019_v44, %v5291_v45  ;;  %v1237_v1 = vstv %s4227_s23  ;;  %s5505_s23 = sld [smem:[#allocation10 + $0x13]] }
 0x16f   : >> { %883 = vrot.lane.b32.xlu1 %v878_v50, %s4714_s20  ;;  %v1033_v50 = vstv %s4210_s3  ;;  %s4230_s3 = sld [smem:[#allocation10 + $0x46]] }
 0x170   : >> { %881 = vrot.lane.b32.xlu0 %v877_v51, %s4714_s20  ;;  %v1035_v51 = vmul.f32 %v1033_v50, %v5289_v43  ;;  %v1034_v52 = vmul.f32 %v1033_v50, %v5291_v45  ;;  %v1142_v50 = vstv %s4219_s30  ;;  %s5442_s30 = sld [smem:[#allocation10 + $0x5e]] }
 0x172   : >> { %v1251_v11 = vstv %s4228_s2  ;;  %s5515_s2 = sld [smem:[#allocation10 + $0x1b]] }
 0x173   : >> { %897 = vrot.lane.b32.xlu1 %v892_v53, %s4713_s12  ;;  %v5301_v53 = vld [vmem:[#allocation6 + $0x22] sm:$0xff]  ;;  %v1253_v9 = vmul.f32 %v1251_v11, %v5393_v3 }
 0x174   : >> { %895 = vrot.lane.b32.xlu0 %v891_v54, %s4713_s12  ;;  %v1055_v54 = vstv %s4212_s10  ;;  %s4231_s10 = sld [smem:[#allocation10 + $0x47]] }
 0x175   : >> { %v1057_v58 = vmul.f32 %v1055_v54, %v5301_v53  ;;  %v1056_v59 = vmul.f32 %v1055_v54, %v5303_v56 }
 0x176   : >> { %v1346_v25 = vstv %s5442_s30  ;;  %s5592_s30 = sld [smem:[#allocation10 + $0x9]] }
 0x177   : >> { %919 = vrot.lane.b32.xlu1 %v914_v60, %s4714_s20  ;;  %v1069_v60 = vstv %s4213_s11  ;;  %s5409_s11 = sld [smem:[#allocation10]] }
 0x178   : >> { %917 = vrot.lane.b32.xlu0 %v913_v61, %s4714_s20  ;;  %v1071_v61 = vmul.f32 %v1069_v60, %v5301_v53  ;;  %v1070_v62 = vmul.f32 %v1069_v60, %v5303_v56  ;;  %v1164_v60 = vstv %s4221_s4  ;;  %s5456_s4 = sld [smem:[#allocation10 + $0x5f]] }
 0x17b   : >> { %933 = vrot.lane.b32.xlu1 %v928_v0, %s4713_s12  ;;  %v5313_v0 = vld [vmem:[#allocation6 + $0x68] sm:$0xff] }
 0x17c   : >> { %931 = vrot.lane.b32.xlu0 %v927_v16, %s4713_s12  ;;  %v1092_v16 = vstv %s4215_s26  ;;  %v1108_v32 = vmul.f32 %v1106_v26, %v5313_v0  ;;  %s4233_s26 = sld [smem:[#allocation10 + $0x5b]] }
 0x17f   : >> { %955 = vrot.lane.b32.xlu1 %v950_v20, %s4714_s20  ;;  %v1094_v20 = vmul.f32 %v1092_v16, %v5313_v0 }
 0x180   : >> { %953 = vrot.lane.b32.xlu0 %v949_v24, %s4714_s20  ;;  %v1093_v24 = vmul.f32 %v1092_v16, %v5317_v18 }
 0x183   : >> { %969 = vrot.lane.b32.xlu1 %v964_v27, %s4713_s12 }
 0x184   : >> { %967 = vrot.lane.b32.xlu0 %v963_v28, %s4713_s12 }
 0x187   : >> { %990 = vrot.lane.b32.xlu1 %v985_v36, %s4714_s20  ;;  %v1107_v36 = vmul.f32 %v1106_v26, %v5317_v18  ;;  %v1178_v26 = vstv %s4222_s17  ;;  %s5472_s17 = sld [smem:[#allocation10 + $0x61]] }
 0x188   : >> { %988 = vrot.lane.b32.xlu0 %v984_v37, %s4714_s20  ;;  %v5333_v37 = vld [vmem:[#allocation6 + $0x69] sm:$0xff] }
 0x189   : >> { %7241 = vst [vmem:[#allocation38_spill] sm:$0xff] %v5333_v37  ;;  %v1144_v54 = vmul.f32 %v1142_v50, %v5333_v37 }
 0x18b   : >> { %1004 = vrot.lane.b32.xlu1 %v999_v40, %s4713_s12 }
 0x18c   : >> { %1002 = vrot.lane.b32.xlu0 %v998_v42, %s4713_s12  ;;  %v5337_v42 = vld [vmem:[#allocation6 + $0x61] sm:$0xff] }
 0x18d   : >> { %7242 = vst [vmem:[#allocation39_spill] sm:$0xff] %v5337_v42 }
 0x18f   : >> { %1026 = vrot.lane.b32.xlu1 %v1021_v46, %s4714_s20  ;;  %v1130_v46 = vmul.f32 %v1128_v38, %v5333_v37  ;;  %v579_v37 = vstv %s5433_s29  ;;  %s5588_s29 = sld [smem:[#allocation10 + $0x1a]] }
 0x190   : >> { %1024 = vrot.lane.b32.xlu0 %v1020_v48, %s4714_s20  ;;  %v1129_v48 = vmul.f32 %v1128_v38, %v5337_v42 }
 0x193   : >> { %1040 = vrot.lane.b32.xlu1 %v1035_v51, %s4713_s12 }
 0x194   : >> { %1038 = vrot.lane.b32.xlu0 %v1034_v52, %s4713_s12 }
 0x197   : >> { %1062 = vrot.lane.b32.xlu1 %v1057_v58, %s4714_s20  ;;  %v1143_v58 = vmul.f32 %v1142_v50, %v5337_v42  ;;  %v1201_v50 = vstv %s4224_s1  ;;  %s5481_s1 = sld [smem:[#allocation10 + $0x6]] }
 0x198   : >> { %1060 = vrot.lane.b32.xlu0 %v1056_v59, %s4714_s20  ;;  %v5353_v59 = vld [vmem:[#allocation6 + $0x6a] sm:$0xff] }
 0x199   : >> { %v5315_v17 = vpop.permute.xlu1 %568  ;;  %7243 = vst [vmem:[#allocation40_spill] sm:$0xff] %v5353_v59  ;;  %v1180_v38 = vmul.f32 %v1178_v26, %v5353_v59 }
 0x19a   : >> { %v5319_v19 = vpop.permute.xlu0 %554 }
 0x19b   : >> { %1076 = vrot.lane.b32.xlu1 %v1071_v61, %s4713_s12 }
 0x19c   : >> { %1074 = vrot.lane.b32.xlu0 %v1070_v62, %s4713_s12  ;;  %v5357_v62 = vld [vmem:[#allocation6 + $0x62] sm:$0xff] }
 0x19d   : >> { %v5325_v27 = vpop.permute.xlu1 %570  ;;  %7244 = vst [vmem:[#allocation41_spill] sm:$0xff] %v5357_v62 }
 0x19e   : >> { %v5327_v28 = vpop.permute.xlu0 %556 }
 0x19f   : >> { %1099 = vrot.lane.b32.xlu1 %v1094_v20, %s4714_s20  ;;  %v1166_v20 = vmul.f32 %v1164_v60, %v5353_v59 }
 0x1a0   : >> { %1097 = vrot.lane.b32.xlu0 %v1093_v24, %s4714_s20  ;;  %v1165_v24 = vmul.f32 %v1164_v60, %v5357_v62 }
 0x1a1   : >> { %v5335_v40 = vpop.permute.xlu1 %592 }
 0x1a2   : >> { %v5339_v44 = vpop.permute.xlu0 %590 }
 0x1a3   : >> { %1113 = vrot.lane.b32.xlu1 %v1108_v32, %s4713_s12 }
 0x1a4   : >> { %1111 = vrot.lane.b32.xlu0 %v1107_v36, %s4713_s12 }
 0x1a5   : >> { %v5345_v51 = vpop.permute.xlu1 %606 }
 0x1a6   : >> { %v5347_v52 = vpop.permute.xlu0 %604 }
 0x1a7   : >> { %1135 = vrot.lane.b32.xlu1 %v1130_v46, %s4714_s20  ;;  %v1179_v46 = vmul.f32 %v1178_v26, %v5357_v62  ;;  %v5447_v62 = vld [vmem:[#allocation6 + $0xf0] sm:$0xff] }
 0x1a8   : >> { %1133 = vrot.lane.b32.xlu0 %v1129_v48, %s4714_s20  ;;  %v5373_v48 = vld [vmem:[#allocation6 + $0xb0] sm:$0xff]  ;;  %7252 = vst [vmem:[#allocation49_spill] sm:$0xff] %v5447_v62 }
 0x1a9   : >> { %v5355_v61 = vpop.permute.xlu1 %628  ;;  %7245 = vst [vmem:[#allocation42_spill] sm:$0xff] %v5373_v48  ;;  %v1217_v4 = vmul.f32 %v1215_v6, %v5373_v48 }
 0x1aa   : >> { %v5359_v16 = vpop.permute.xlu0 %626 }
 0x1ab   : >> { %1149 = vrot.lane.b32.xlu1 %v1144_v54, %s4713_s12 }
 0x1ac   : >> { %1147 = vrot.lane.b32.xlu0 %v1143_v58, %s4713_s12  ;;  %v5377_v58 = vld [vmem:[#allocation6 + $0xa8] sm:$0xff] }
 0x1ad   : >> { %v5365_v32 = vpop.permute.xlu1 %642  ;;  %7246 = vst [vmem:[#allocation43_spill] sm:$0xff] %v5377_v58 }
 0x1ae   : >> { %v5367_v36 = vpop.permute.xlu0 %640 }
 0x1af   : >> { %1171 = vrot.lane.b32.xlu1 %v1166_v20, %s4714_s20  ;;  %v1203_v20 = vmul.f32 %v1201_v50, %v5373_v48 }
 0x1b0   : >> { %1169 = vrot.lane.b32.xlu0 %v1165_v24, %s4714_s20  ;;  %v1202_v24 = vmul.f32 %v1201_v50, %v5377_v58  ;;  %v5397_v50 = vld [vmem:[#allocation6 + $0xa9] sm:$0xff] }
 0x1b1   : >> { %v5375_v54 = vpop.permute.xlu1 %665  ;;  %7248 = vst [vmem:[#allocation45_spill] sm:$0xff] %v5397_v50 }
 0x1b2   : >> { %v5379_v60 = vpop.permute.xlu0 %663 }
 0x1b3   : >> { %1185 = vrot.lane.b32.xlu1 %v1180_v38, %s4713_s12  ;;  %v1216_v38 = vmul.f32 %v1215_v6, %v5377_v58 }
 0x1b4   : >> { %1183 = vrot.lane.b32.xlu0 %v1179_v46, %s4713_s12 }
 0x1b5   : >> { %v5385_v26 = vpop.permute.xlu1 %679 }
 0x1b6   : >> { %v5387_v5 = vpop.permute.xlu0 %677 }
 0x1b7   : >> { %1208 = vrot.lane.b32.xlu1 %v1203_v20, %s4714_s20  ;;  %v1239_v20 = vmul.f32 %v1237_v1, %v5393_v3  ;;  %v1310_v3 = vstv %s4233_s26  ;;  %s5560_s26 = sld [smem:[#allocation10 + $0x1e]] }
 0x1b8   : >> { %1206 = vrot.lane.b32.xlu0 %v1202_v24, %s4714_s20  ;;  %v1238_v24 = vmul.f32 %v1237_v1, %v5397_v50 }
 0x1b9   : >> { %v5395_v46 = vpop.permute.xlu1 %701 }
 0x1ba   : >> { %v5399_v2 = vpop.permute.xlu0 %699 }
 0x1bb   : >> { %1222 = vrot.lane.b32.xlu1 %v1217_v4, %s4713_s12  ;;  %v1252_v4 = vmul.f32 %v1251_v11, %v5397_v50  ;;  %v1287_v11 = vstv %s4231_s10  ;;  %v545_v50 = vstv %s5409_s11  ;;  %s5540_s10 = sld [smem:[#allocation10 + $0x16]] }
 0x1bc   : >> { %1220 = vrot.lane.b32.xlu0 %v1216_v38, %s4713_s12  ;;  %v1273_v38 = vstv %s4230_s3  ;;  %v547_v58 = vmul.f32 %v545_v50, %v5169_v14  ;;  %v546_v59 = vmul.f32 %v545_v50, %v5167_v13  ;;  %v581_v13 = vmul.f32 %v579_v37, %v5177_v21  ;;  %v5478_v50 = vld [vmem:[#allocation6 + $0xf1] sm:$0xff]  ;;  %s5523_s3 = sld [smem:[#allocation10 + $0x14]] }
 0x1bd   : >> { %v5405_v6 = vpop.permute.xlu1 %715  ;;  %7254 = vst [vmem:[#allocation51_spill] sm:$0xff] %v5478_v50  ;;  %v1360_v21 = vstv %s5456_s4  ;;  %s5554_s11 = sld [smem:[#allocation10 + $0x17]] }
 0x1be   : >> { %v5407_v12 = vpop.permute.xlu0 %713  ;;  %v561_v14 = vadd.f32 %v5327_v28, %v547_v58  ;;  %s5598_s4 = sld [smem:[#allocation10 + $0x21]] }
 0x1bf   : >> { %1244 = vrot.lane.b32.xlu1 %v1239_v20, %s4714_s20  ;;  %v1275_v20 = vmul.f32 %v1273_v38, %v5415_v10 }
 0x1c0   : >> { %1242 = vrot.lane.b32.xlu0 %v1238_v24, %s4714_s20  ;;  %v1274_v24 = vmul.f32 %v1273_v38, %v5419_v7  ;;  %v5440_v38 = vld [vmem:[#allocation6 + $0xf8] sm:$0xff]  ;;  %v575_v28 = vadd.f32 %v5325_v27, %v561_v14  ;;  %v1347_v27 = vmul.f32 %v1346_v25, %v5478_v50 }
 0x1c1   : >> { %v5417_v1 = vpop.permute.xlu1 %737  ;;  %7251 = vst [vmem:[#allocation48_spill] sm:$0xff] %v5440_v38 }
 0x1c2   : >> { %v5421_v8 = vpop.permute.xlu0 %735  ;;  %v583_v14 = vadd.f32 %v581_v13, %v575_v28  ;;  %v1382_v28 = vstv %s5472_s17  ;;  %s5608_s17 = sld [smem:[#allocation10 + $0x2e]] }
 0x1c3   : >> { %1258 = vrot.lane.b32.xlu1 %v1253_v9, %s4713_s12  ;;  %v1289_v9 = vmul.f32 %v1287_v11, %v5415_v10 }
 0x1c4   : >> { %1256 = vrot.lane.b32.xlu0 %v1252_v4, %s4713_s12  ;;  %v1288_v4 = vmul.f32 %v1287_v11, %v5419_v7  ;;  %v1311_v11 = vmul.f32 %v1310_v3, %v5447_v62  ;;  %v1324_v7 = vstv %s5427_s27  ;;  %s5575_s27 = sld [smem:[#allocation10 + $0x19]] }
 0x1c5   : >> { %v5429_v34 = vpop.permute.xlu1 %751 }
 0x1c6   : >> { %v5431_v33 = vpop.permute.xlu0 %749 }
 0x1c7   : >> { %1280 = vrot.lane.b32.xlu1 %v1275_v20, %s4714_s20 }
 0x1c8   : >> { %1278 = vrot.lane.b32.xlu0 %v1274_v24, %s4714_s20  ;;  %v1312_v24 = vmul.f32 %v1310_v3, %v5440_v38  ;;  %v1325_v3 = vmul.f32 %v1324_v7, %v5447_v62 }
 0x1c9   : >> { %v5445_v48 = vpop.permute.xlu1 %774 }
 0x1ca   : >> { %v5449_v20 = vpop.permute.xlu0 %772 }
 0x1cb   : >> { %1294 = vrot.lane.b32.xlu1 %v1289_v9, %s4713_s12  ;;  %v1326_v9 = vmul.f32 %v1324_v7, %v5440_v38 }
 0x1cc   : >> { %1292 = vrot.lane.b32.xlu0 %v1288_v4, %s4713_s12  ;;  %v5469_v4 = vld [vmem:[#allocation6 + $0xf9] sm:$0xff] }
 0x1cd   : >> { %v5459_v10 = vpop.permute.xlu1 %788  ;;  %7253 = vst [vmem:[#allocation50_spill] sm:$0xff] %v5469_v4  ;;  %v1348_v7 = vmul.f32 %v1346_v25, %v5469_v4  ;;  %v1361_v25 = vmul.f32 %v1360_v21, %v5478_v50 }
 0x1ce   : >> { %v5462_v42 = vpop.permute.xlu0 %786 }
 0x1cf   : >> { %1317 = vrot.lane.b32.xlu1 %v1312_v24, %s4714_s20  ;;  %v560_v24 = vadd.f32 %v5319_v19, %v546_v59  ;;  %v580_v59 = vmul.f32 %v579_v37, %v5179_v23  ;;  %v5510_v23 = vld [vmem:[#allocation6 + $0xf2] sm:$0xff] }
 0x1d0   : >> { %1315 = vrot.lane.b32.xlu0 %v1311_v11, %s4714_s20  ;;  %7256 = vst [vmem:[#allocation53_spill] sm:$0xff] %v5510_v23 }
 0x1d1   : >> { %v5476_v58 = vpop.permute.xlu1 %810  ;;  %v574_v19 = vadd.f32 %v5315_v17, %v560_v24  ;;  %v597_v17 = vadd.f32 %v5335_v40, %v583_v14  ;;  %v615_v24 = vstv %s5481_s1  ;;  %v1383_v40 = vmul.f32 %v1382_v28, %v5510_v23  ;;  %s5616_s1 = sld [smem:[#allocation10 + $0xc]] }
 0x1d2   : >> { %v5483_v11 = vpop.permute.xlu0 %808  ;;  %v1396_v14 = vstv %s5490_s18  ;;  %s5627_s18 = sld [smem:[#allocation10 + $0x2f]] }
 0x1d3   : >> { %1331 = vrot.lane.b32.xlu1 %v1326_v9, %s4713_s12  ;;  %v1362_v9 = vmul.f32 %v1360_v21, %v5469_v4  ;;  %v582_v37 = vadd.f32 %v580_v59, %v574_v19  ;;  %v611_v19 = vadd.f32 %v5345_v51, %v597_v17  ;;  %v617_v59 = vmul.f32 %v615_v24, %v5189_v29 }
 0x1d4   : >> { %1329 = vrot.lane.b32.xlu0 %v1325_v3, %s4713_s12  ;;  %v5502_v3 = vld [vmem:[#allocation6 + $0xfa] sm:$0xff]  ;;  %v616_v4 = vmul.f32 %v615_v24, %v5191_v31  ;;  %v1397_v51 = vmul.f32 %v1396_v14, %v5510_v23  ;;  %v1417_v29 = vstv %s5505_s23  ;;  %v5544_v31 = vld [vmem:[#allocation6 + $0x30] sm:$0xff]  ;;  %s5646_s23 = sld [smem:[#allocation10 + $0x31]] }
 0x1d5   : >> { %v5492_v62 = vpop.permute.xlu1 %824  ;;  %7255 = vst [vmem:[#allocation52_spill] sm:$0xff] %v5502_v3  ;;  %v596_v21 = vadd.f32 %v5339_v44, %v582_v37  ;;  %7258 = vst [vmem:[#allocation55_spill] sm:$0xff] %v5544_v31 }
 0x1d6   : >> { %v5496_v38 = vpop.permute.xlu0 %822 }
 0x1d7   : >> { %1353 = vrot.lane.b32.xlu1 %v1348_v7, %s4714_s20 }
 0x1d8   : >> { %1351 = vrot.lane.b32.xlu0 %v1347_v27, %s4714_s20  ;;  %v1384_v27 = vmul.f32 %v1382_v28, %v5502_v3  ;;  %v5537_v28 = vld [vmem:[#allocation6 + $0x38] sm:$0xff] }
 0x1d9   : >> { %v5508_v13 = vpop.permute.xlu1 %846  ;;  %7257 = vst [vmem:[#allocation54_spill] sm:$0xff] %v5537_v28 }
 0x1da   : >> { %v5513_v7 = vpop.permute.xlu0 %844 }
 0x1db   : >> { %1367 = vrot.lane.b32.xlu1 %v1362_v9, %s4713_s12  ;;  %v610_v9 = vadd.f32 %v5347_v52, %v596_v21  ;;  %v619_v52 = vadd.f32 %v617_v59, %v611_v19  ;;  %v652_v21 = vstv %s5515_s2  ;;  %s5650_s2 = sld [smem:[#allocation10 + $0xf]] }
 0x1dc   : >> { %1365 = vrot.lane.b32.xlu0 %v1361_v25, %s4713_s12  ;;  %v1398_v25 = vmul.f32 %v1396_v14, %v5502_v3  ;;  %v1431_v14 = vstv %s5523_s3  ;;  %s5655_s3 = sld [smem:[#allocation10 + $0x36]] }
 0x1dd   : >> { %v5527_v50 = vpop.permute.xlu1 %860  ;;  %v618_v37 = vadd.f32 %v616_v4, %v610_v9  ;;  %v633_v19 = vadd.f32 %v5355_v61, %v619_v52  ;;  %v653_v61 = vmul.f32 %v652_v21, %v5203_v41  ;;  %v5572_v52 = vld [vmem:[#allocation6 + $0x39] sm:$0xff] }
 0x1de   : >> { %v5531_v44 = vpop.permute.xlu0 %858  ;;  %7259 = vst [vmem:[#allocation56_spill] sm:$0xff] %v5572_v52 }
 0x1df   : >> { %1389 = vrot.lane.b32.xlu1 %v1384_v27, %s4714_s20  ;;  %v1419_v27 = vmul.f32 %v1417_v29, %v5537_v28  ;;  %v632_v4 = vadd.f32 %v5359_v16, %v618_v37  ;;  %v1432_v16 = vmul.f32 %v1431_v14, %v5544_v31  ;;  %v1453_v37 = vstv %s5540_s10  ;;  %s5665_s10 = sld [smem:[#allocation10 + $0x32]] }
 0x1e0   : >> { %1387 = vrot.lane.b32.xlu0 %v1383_v40, %s4714_s20  ;;  %v1418_v40 = vmul.f32 %v1417_v29, %v5544_v31  ;;  %v1433_v29 = vmul.f32 %v1431_v14, %v5537_v28  ;;  %v1455_v41 = vmul.f32 %v1453_v37, %v5572_v52  ;;  %v1467_v14 = vstv %s5554_s11  ;;  %v5644_v31 = vld [vmem:[#allocation6 + $0x78] sm:$0xff]  ;;  %s5677_s11 = sld [smem:[#allocation10 + $0x34]] }
 0x1e1   : >> { %v5542_v17 = vpop.permute.xlu1 %883  ;;  %v646_v23 = vadd.f32 %v5367_v36, %v632_v4  ;;  %v688_v4 = vstv %s5560_s26  ;;  %s5680_s26 = sld [smem:[#allocation10 + $0x24]] }
 0x1e2   : >> { %v5546_v24 = vpop.permute.xlu0 %881 }
 0x1e3   : >> { %1403 = vrot.lane.b32.xlu1 %v1398_v25, %s4713_s12  ;;  %v647_v25 = vadd.f32 %v5365_v32, %v633_v19  ;;  %v5579_v32 = vld [vmem:[#allocation6 + $0x31] sm:$0xff] }
 0x1e4   : >> { %1401 = vrot.lane.b32.xlu0 %v1397_v51, %s4713_s12  ;;  %v654_v51 = vmul.f32 %v652_v21, %v5201_v39  ;;  %7260 = vst [vmem:[#allocation57_spill] sm:$0xff] %v5579_v32  ;;  %v655_v21 = vadd.f32 %v653_v61, %v646_v23  ;;  %v1469_v23 = vmul.f32 %v1467_v14, %v5572_v52  ;;  %v5605_v61 = vld [vmem:[#allocation6 + $0x3a] sm:$0xff]  ;;  %v1526_v52 = vstv %s5608_s17  ;;  %s5721_s17 = sld [smem:[#allocation10 + $0x4a]] }
 0x1e5   : >> { %v5557_v59 = vpop.permute.xlu1 %897  ;;  %7261 = vst [vmem:[#allocation58_spill] sm:$0xff] %v5605_v61 }
 0x1e6   : >> { %v5562_v9 = vpop.permute.xlu0 %895  ;;  %v656_v36 = vadd.f32 %v654_v51, %v647_v25  ;;  %v669_v51 = vadd.f32 %v5379_v60, %v655_v21  ;;  %v689_v21 = vmul.f32 %v688_v4, %v5215_v49 }
 0x1e7   : >> { %1424 = vrot.lane.b32.xlu1 %v1419_v27, %s4714_s20 }
 0x1e8   : >> { %1422 = vrot.lane.b32.xlu0 %v1418_v40, %s4714_s20  ;;  %v1454_v40 = vmul.f32 %v1453_v37, %v5579_v32  ;;  %v670_v25 = vadd.f32 %v5375_v54, %v656_v36  ;;  %v690_v37 = vmul.f32 %v688_v4, %v5213_v47  ;;  %v683_v60 = vadd.f32 %v5387_v5, %v669_v51 }
 0x1e9   : >> { %v5577_v39 = vpop.permute.xlu1 %919  ;;  %v979_v5 = vstv %s5592_s30  ;;  %v724_v51 = vstv %s5598_s4  ;;  %s5707_s30 = sld [smem:[#allocation10 + $0x49]] }
 0x1ea   : >> { %v5581_v27 = vpop.permute.xlu0 %917  ;;  %v684_v54 = vadd.f32 %v5385_v26, %v670_v25  ;;  %v691_v49 = vadd.f32 %v689_v21, %v683_v60  ;;  %s5712_s4 = sld [smem:[#allocation10 + $0x27]] }
 0x1eb   : >> { %1438 = vrot.lane.b32.xlu1 %v1433_v29, %s4713_s12  ;;  %v1468_v29 = vmul.f32 %v1467_v14, %v5579_v32  ;;  %v1503_v14 = vstv %s5588_s29  ;;  %s5693_s29 = sld [smem:[#allocation10 + $0x35]] }
 0x1ec   : >> { %1436 = vrot.lane.b32.xlu0 %v1432_v16, %s4713_s12  ;;  %v1489_v16 = vstv %s5575_s27  ;;  %v692_v25 = vadd.f32 %v690_v37, %v684_v54  ;;  %v5641_v37 = vld [vmem:[#allocation6 + $0x80] sm:$0xff]  ;;  %s5684_s27 = sld [smem:[#allocation10 + $0x39]] }
 0x1ed   : >> { %v5590_v19 = vpop.permute.xlu1 %933  ;;  %v1491_v26 = vmul.f32 %v1489_v16, %v5605_v61 }
 0x1ee   : >> { %v5595_v28 = vpop.permute.xlu0 %931  ;;  %v706_v60 = vadd.f32 %v5395_v46, %v692_v25  ;;  %v1528_v46 = vmul.f32 %v1526_v52, %v5641_v37  ;;  %v1527_v25 = vmul.f32 %v1526_v52, %v5644_v31 }
 0x1ef   : >> { %1460 = vrot.lane.b32.xlu1 %v1455_v41, %s4714_s20  ;;  %v5614_v41 = vld [vmem:[#allocation6 + $0x32] sm:$0xff] }
 0x1f0   : >> { %1458 = vrot.lane.b32.xlu0 %v1454_v40, %s4714_s20  ;;  %7262 = vst [vmem:[#allocation59_spill] sm:$0xff] %v5614_v41  ;;  %v1490_v47 = vmul.f32 %v1489_v16, %v5614_v41  ;;  %v981_v16 = vmul.f32 %v979_v5, %v5277_v30  ;;  %v1504_v54 = vmul.f32 %v1503_v14, %v5614_v41 }
 0x1f1   : >> { %v5612_v36 = vpop.permute.xlu1 %955  ;;  %v726_v30 = vmul.f32 %v724_v51, %v5225_v55  ;;  %v1540_v55 = vstv %s5627_s18  ;;  %s5741_s18 = sld [smem:[#allocation10 + $0x4c]] }
 0x1f2   : >> { %v5620_v40 = vpop.permute.xlu0 %953 }
 0x1f3   : >> { %1474 = vrot.lane.b32.xlu1 %v1469_v23, %s4713_s12  ;;  %v980_v23 = vmul.f32 %v979_v5, %v5279_v35  ;;  %v705_v35 = vadd.f32 %v5399_v2, %v691_v49  ;;  %v720_v5 = vadd.f32 %v5405_v6, %v706_v60  ;;  %v1562_v60 = vstv %s5646_s23  ;;  %s5744_s23 = sld [smem:[#allocation10 + $0x2a]] }
 0x1f4   : >> { %1472 = vrot.lane.b32.xlu0 %v1468_v29, %s4713_s12  ;;  %v1505_v29 = vmul.f32 %v1503_v14, %v5605_v61 }
 0x1f5   : >> { %v5629_v32 = vpop.permute.xlu1 %969  ;;  %v719_v61 = vadd.f32 %v5407_v12, %v705_v35  ;;  %v1542_v12 = vmul.f32 %v1540_v55, %v5641_v37 }
 0x1f6   : >> { %v5632_v4 = vpop.permute.xlu0 %967 }
 0x1f7   : >> { %1496 = vrot.lane.b32.xlu1 %v1491_v26, %s4714_s20  ;;  %v1013_v26 = vstv %s5616_s1  ;;  %s5727_s1 = sld [smem:[#allocation10 + $0x3c]] }
 0x1f8   : >> { %1494 = vrot.lane.b32.xlu0 %v1490_v47, %s4714_s20  ;;  %v725_v47 = vmul.f32 %v724_v51, %v5227_v57  ;;  %v1015_v2 = vmul.f32 %v1013_v26, %v5289_v43  ;;  %v1014_v6 = vmul.f32 %v1013_v26, %v5291_v45  ;;  %v5675_v45 = vld [vmem:[#allocation6 + $0x79] sm:$0xff]  ;;  %v761_v26 = vstv %s5655_s3  ;;  %s5757_s3 = sld [smem:[#allocation10 + $0x51]] }
 0x1f9   : >> { %v991_v21 = vpop.permute.xlu1 %990 }
 0x1fa   : >> { %v989_v14 = vpop.permute.xlu0 %988  ;;  %v995_v3 = vadd.f32 %v991_v21, %v981_v16  ;;  %v1541_v16 = vmul.f32 %v1540_v55, %v5644_v31  ;;  %v1049_v21 = vstv %s5650_s2  ;;  %v763_v55 = vmul.f32 %v761_v26, %v5237_v63  ;;  %s5752_s2 = sld [smem:[#allocation10 + $0x4d]] }
 0x1fb   : >> { %v994_v41 = vadd.f32 %v989_v14, %v980_v23  ;;  %1510 = vrot.lane.b32.xlu1 %v1505_v29, %s4713_s12  ;;  %v728_v23 = vadd.f32 %v726_v30, %v720_v5  ;;  %v727_v29 = vadd.f32 %v725_v47, %v719_v61  ;;  %v1563_v14 = vmul.f32 %v1562_v60, %v5675_v45 }
 0x1fc   : >> { %1508 = vrot.lane.b32.xlu0 %v1504_v54, %s4713_s12  ;;  %v5672_v54 = vld [vmem:[#allocation6 + $0x81] sm:$0xff] }
 0x1fd   : >> { %v1005_v57 = vpop.permute.xlu1 %1004  ;;  %v742_v35 = vadd.f32 %v5417_v1, %v728_v23  ;;  %v1564_v47 = vmul.f32 %v1562_v60, %v5672_v54  ;;  %v741_v5 = vadd.f32 %v5421_v8, %v727_v29  ;;  %v762_v8 = vmul.f32 %v761_v26, %v5239_v15 }
 0x1fe   : >> { %v1009_v49 = vadd.f32 %v1005_v57, %v995_v3  ;;  %v1003_v51 = vpop.permute.xlu0 %1002 }
 0x1ff   : >> { %v1008_v52 = vadd.f32 %v1003_v51, %v994_v41  ;;  %1533 = vrot.lane.b32.xlu1 %v1528_v46, %s4714_s20  ;;  %v756_v1 = vadd.f32 %v5429_v34, %v742_v35 }
 0x200   : >> { %1531 = vrot.lane.b32.xlu0 %v1527_v25, %s4714_s20  ;;  %v1017_v43 = vadd.f32 %v1015_v2, %v1009_v49  ;;  %v1051_v25 = vmul.f32 %v1049_v21, %v5301_v53  ;;  %v1576_v2 = vstv %s5665_s10  ;;  %v755_v49 = vadd.f32 %v5431_v33, %v741_v5  ;;  %s5767_s10 = sld [smem:[#allocation10 + $0x4f]] }
 0x201   : >> { %v1027_v3 = vpop.permute.xlu1 %1026  ;;  %v1016_v41 = vadd.f32 %v1014_v6, %v1008_v52  ;;  %v1050_v6 = vmul.f32 %v1049_v21, %v5303_v56  ;;  %v1578_v53 = vmul.f32 %v1576_v2, %v5672_v54  ;;  %v1577_v63 = vmul.f32 %v1576_v2, %v5675_v45 }
 0x202   : >> { %v1025_v61 = vpop.permute.xlu0 %1024  ;;  %v1031_v46 = vadd.f32 %v1027_v3, %v1017_v43  ;;  %v1598_v56 = vstv %s5677_s11  ;;  %v765_v33 = vadd.f32 %v763_v55, %v756_v1  ;;  %v5709_v43 = vld [vmem:[#allocation6 + $0x7a] sm:$0xff]  ;;  %v764_v60 = vadd.f32 %v762_v8, %v755_v49  ;;  %v5736_v8 = vld [vmem:[#allocation6 + $0xc8] sm:$0xff]  ;;  %s5773_s11 = sld [smem:[#allocation10 + $0x3f]] }
 0x203   : >> { %v1030_v30 = vadd.f32 %v1025_v61, %v1016_v41  ;;  %1547 = vrot.lane.b32.xlu1 %v1542_v12, %s4713_s12  ;;  %v5704_v12 = vld [vmem:[#allocation6 + $0x82] sm:$0xff]  ;;  %v797_v41 = vstv %s5684_s27  ;;  %v1599_v61 = vmul.f32 %v1598_v56, %v5709_v43  ;;  %s5795_s27 = sld [smem:[#allocation10 + $0x64]] }
 0x204   : >> { %1545 = vrot.lane.b32.xlu0 %v1541_v16, %s4713_s12  ;;  %v1086_v16 = vstv %s5680_s26  ;;  %v1600_v21 = vmul.f32 %v1598_v56, %v5704_v12  ;;  %v799_v2 = vmul.f32 %v797_v41, %v5249_v22  ;;  %s5782_s26 = sld [smem:[#allocation10 + $0x50]] }
 0x205   : >> { %v1041_v57 = vpop.permute.xlu1 %1040  ;;  %v1088_v35 = vmul.f32 %v1086_v16, %v5313_v0 }
 0x206   : >> { %v1045_v51 = vadd.f32 %v1041_v57, %v1031_v46  ;;  %v1039_v23 = vpop.permute.xlu0 %1038  ;;  %v1087_v46 = vmul.f32 %v1086_v16, %v5317_v18  ;;  %v7263_v57 = vld [vmem:[#allocation37_spill] sm:$0xff] }
 0x207   : >> { %v1044_v52 = vadd.f32 %v1039_v23, %v1030_v30  ;;  %1569 = vrot.lane.b32.xlu1 %v1564_v47, %s4714_s20  ;;  %v1612_v30 = vstv %s5693_s29  ;;  %v779_v47 = vadd.f32 %v5445_v48, %v765_v33  ;;  %v5739_v23 = vld [vmem:[#allocation6 + $0xc0] sm:$0xff]  ;;  %s5799_s29 = sld [smem:[#allocation10 + $0x42]] }
 0x208   : >> { %1567 = vrot.lane.b32.xlu0 %v1563_v14, %s4714_s20  ;;  %v1053_v34 = vadd.f32 %v1051_v25, %v1045_v51  ;;  %v778_v25 = vadd.f32 %v5449_v20, %v764_v60  ;;  %v1614_v48 = vmul.f32 %v1612_v30, %v5704_v12  ;;  %v1613_v22 = vmul.f32 %v1612_v30, %v5709_v43 }
 0x209   : >> { %v1063_v15 = vpop.permute.xlu1 %1062  ;;  %v1052_v29 = vadd.f32 %v1050_v6, %v1044_v52  ;;  %v793_v0 = vadd.f32 %v5459_v10, %v779_v47  ;;  %v798_v6 = vmul.f32 %v797_v41, %v7263_v57  ;;  %v1635_v51 = vstv %s5707_s30  ;;  %s5802_s30 = sld [smem:[#allocation10 + $0x54]] }
 0x20a   : >> { %v1061_v3 = vpop.permute.xlu0 %1060  ;;  %v1067_v26 = vadd.f32 %v1063_v15, %v1053_v34  ;;  %v792_v18 = vadd.f32 %v5462_v42, %v778_v25  ;;  %v1636_v56 = vmul.f32 %v1635_v51, %v5739_v23  ;;  %v1649_v60 = vstv %s5721_s17  ;;  %s5824_s17 = sld [smem:[#allocation10 + $0x67]] }
 0x20b   : >> { %1583 = vrot.lane.b32.xlu1 %v1578_v53, %s4713_s12  ;;  %v1066_v14 = vadd.f32 %v1061_v3, %v1052_v29  ;;  %v1122_v53 = vstv %s5712_s4  ;;  %v801_v34 = vadd.f32 %v799_v2, %v793_v0  ;;  %v7264_v29 = vld [vmem:[#allocation38_spill] sm:$0xff]  ;;  %v1650_v2 = vmul.f32 %v1649_v60, %v5739_v23  ;;  %v4489_v0 = vld [vmem:[#allocation6 + $0x9a] sm:$0xff]  ;;  %s5812_s4 = sld [smem:[#allocation10 + $0x65]] }
 0x20c   : >> { %1581 = vrot.lane.b32.xlu0 %v1577_v63, %s4713_s12  ;;  %v1637_v63 = vmul.f32 %v1635_v51, %v5736_v8  ;;  %v800_v33 = vadd.f32 %v798_v6, %v792_v18  ;;  %v1124_v16 = vmul.f32 %v1122_v53, %v7264_v29 }
 0x20d   : >> { %v1077_v5 = vpop.permute.xlu1 %1076  ;;  %v815_v47 = vadd.f32 %v5476_v58, %v801_v34  ;;  %v1685_v34 = vstv %s5752_s2  ;;  %s5852_s2 = sld [smem:[#allocation10 + $0x6a]] }
 0x20e   : >> { %v1081_v1 = vadd.f32 %v1077_v5, %v1067_v26  ;;  %v1075_v55 = vpop.permute.xlu0 %1074  ;;  %v1651_v5 = vmul.f32 %v1649_v60, %v5736_v8 }
 0x20f   : >> { %v1080_v49 = vadd.f32 %v1075_v55, %v1066_v14  ;;  %1605 = vrot.lane.b32.xlu1 %v1600_v21, %s4714_s20  ;;  %v7265_v21 = vld [vmem:[#allocation39_spill] sm:$0xff]  ;;  %v1671_v55 = vstv %s5741_s18  ;;  %v829_v58 = vadd.f32 %v5492_v62, %v815_v47  ;;  %v5793_v47 = vld [vmem:[#allocation6 + $0xc2] sm:$0xff]  ;;  %s5831_s18 = sld [smem:[#allocation10 + $0x57]] }
 0x210   : >> { %1603 = vrot.lane.b32.xlu0 %v1599_v61, %s4714_s20  ;;  %v1090_v20 = vadd.f32 %v1088_v35, %v1081_v1  ;;  %v1123_v26 = vmul.f32 %v1122_v53, %v7265_v21  ;;  %v833_v61 = vstv %s5727_s1  ;;  %v5764_v1 = vld [vmem:[#allocation6 + $0xc9] sm:$0xff]  ;;  %v7266_v53 = vld [vmem:[#allocation40_spill] sm:$0xff]  ;;  %s5827_s1 = sld [smem:[#allocation10 + $0x45]] }
 0x211   : >> { %v1100_v10 = vpop.permute.xlu1 %1099  ;;  %v1089_v52 = vadd.f32 %v1087_v46, %v1080_v49  ;;  %v814_v46 = vadd.f32 %v5483_v11, %v800_v33  ;;  %v835_v57 = vmul.f32 %v4489_v0, %v833_v61  ;;  %v1158_v11 = vstv %s5744_s23  ;;  %v7267_v33 = vld [vmem:[#allocation41_spill] sm:$0xff]  ;;  %s5840_s23 = sld [smem:[#allocation10 + $0x68]] }
 0x212   : >> { %v1098_v42 = vpop.permute.xlu0 %1097  ;;  %v1104_v15 = vadd.f32 %v1100_v10, %v1090_v20  ;;  %v4490_v20 = vld [vmem:[#allocation6 + $0x92] sm:$0xff]  ;;  %v1673_v62 = vmul.f32 %v1671_v55, %v5764_v1  ;;  %v1687_v21 = vmul.f32 %v1685_v34, %v5764_v1 }
 0x213   : >> { %1619 = vrot.lane.b32.xlu1 %v1614_v48, %s4713_s12  ;;  %v1103_v3 = vadd.f32 %v1098_v42, %v1089_v52  ;;  %v5770_v48 = vld [vmem:[#allocation6 + $0xc1] sm:$0xff]  ;;  %v828_v18 = vadd.f32 %v5496_v38, %v814_v46  ;;  %v1160_v42 = vmul.f32 %v1158_v11, %v7266_v53  ;;  %v837_v38 = vadd.f32 %v835_v57, %v829_v58 }
 0x214   : >> { %1617 = vrot.lane.b32.xlu0 %v1613_v22, %s4713_s12  ;;  %v834_v22 = vmul.f32 %v4490_v20, %v833_v61  ;;  %v1672_v52 = vmul.f32 %v1671_v55, %v5770_v48  ;;  %v1686_v61 = vmul.f32 %v1685_v34, %v5770_v48  ;;  %v4491_v55 = vld [vmem:[#allocation6 + $0xe0] sm:$0xff] }
 0x215   : >> { %v1114_v41 = vpop.permute.xlu1 %1113 }
 0x216   : >> { %v1118_v35 = vadd.f32 %v1114_v41, %v1104_v15  ;;  %v1112_v30 = vpop.permute.xlu0 %1111  ;;  %v1159_v15 = vmul.f32 %v1158_v11, %v7267_v33  ;;  %v836_v29 = vadd.f32 %v834_v22, %v828_v18 }
 0x217   : >> { %v1117_v14 = vadd.f32 %v1112_v30, %v1103_v3  ;;  %1642 = vrot.lane.b32.xlu1 %v1637_v63, %s4714_s20  ;;  %v870_v3 = vstv %s5757_s3  ;;  %v1707_v30 = vstv %s5767_s10  ;;  %s5857_s3 = sld [smem:[#allocation10 + $0x5a]] }
 0x218   : >> { %1640 = vrot.lane.b32.xlu0 %v1636_v56, %s4714_s20  ;;  %v1126_v25 = vadd.f32 %v1124_v16, %v1118_v35  ;;  %v5790_v35 = vld [vmem:[#allocation6 + $0xca] sm:$0xff]  ;;  %v872_v58 = vmul.f32 %v4491_v55, %v870_v3  ;;  %v1708_v11 = vmul.f32 %v1707_v30, %v5793_v47  ;;  %v1758_v55 = vstv %s5812_s4  ;;  %s5866_s10 = sld [smem:[#allocation10 + $0x6b]] }
 0x219   : >> { %v1136_v6 = vpop.permute.xlu1 %1135  ;;  %v1125_v49 = vadd.f32 %v1123_v26, %v1117_v14  ;;  %v851_v14 = vadd.f32 %v5508_v13, %v837_v38  ;;  %v1709_v13 = vmul.f32 %v1707_v30, %v5790_v35  ;;  %s4247_s4 = sld [smem:[#allocation10 + $0x18]] }
 0x21a   : >> { %v1134_v51 = vpop.permute.xlu0 %1133  ;;  %v1140_v10 = vadd.f32 %v1136_v6, %v1126_v25  ;;  %v1195_v25 = vstv %s5773_s11  ;;  %v4492_v6 = vld [vmem:[#allocation6 + $0xd8] sm:$0xff]  ;;  %s5883_s11 = sld [smem:[#allocation10 + $0x5d]] }
 0x21b   : >> { %1656 = vrot.lane.b32.xlu1 %v1651_v5, %s4713_s12  ;;  %v1139_v63 = vadd.f32 %v1134_v51, %v1125_v49  ;;  %v865_v57 = vadd.f32 %v5527_v50, %v851_v14  ;;  %v871_v49 = vmul.f32 %v4492_v6, %v870_v3  ;;  %v1721_v51 = vstv %s5782_s26  ;;  %s4238_s26 = sld [smem:[#allocation10 + $0x60]] }
 0x21c   : >> { %1654 = vrot.lane.b32.xlu0 %v1650_v2, %s4713_s12  ;;  %v850_v2 = vadd.f32 %v5513_v7, %v836_v29  ;;  %v7268_v7 = vld [vmem:[#allocation42_spill] sm:$0xff]  ;;  %v1722_v33 = vmul.f32 %v1721_v51, %v5793_v47  ;;  %v1744_v29 = vstv %s5795_s27  ;;  %s4715_s27 = smov 1  }
 0x21d   : >> { %v1150_v56 = vpop.permute.xlu1 %1149  ;;  %v1197_v22 = vmul.f32 %v1195_v25, %v7268_v7  ;;  %v874_v34 = vadd.f32 %v872_v58, %v865_v57  ;;  %v4493_v58 = vld [vmem:[#allocation6 + $0xe1] sm:$0xff] }
 0x21e   : >> { %v1154_v16 = vadd.f32 %v1150_v56, %v1140_v10  ;;  %v1148_v60 = vpop.permute.xlu0 %1147  ;;  %v864_v18 = vadd.f32 %v5531_v44, %v850_v2  ;;  %v7269_v10 = vld [vmem:[#allocation43_spill] sm:$0xff]  ;;  %v1723_v44 = vmul.f32 %v1721_v51, %v5790_v35 }
 0x21f   : >> { %v1153_v41 = vadd.f32 %v1148_v60, %v1139_v63  ;;  %1678 = vrot.lane.b32.xlu1 %v1673_v62, %s4714_s20 }
 0x220   : >> { %1676 = vrot.lane.b32.xlu0 %v1672_v52, %s4714_s20  ;;  %v1162_v26 = vadd.f32 %v1160_v42, %v1154_v16  ;;  %v1196_v52 = vmul.f32 %v1195_v25, %v7269_v10  ;;  %v873_v63 = vadd.f32 %v871_v49, %v864_v18  ;;  %v5822_v16 = vld [vmem:[#allocation6 + $0x108] sm:$0xff]  ;;  %v7270_v25 = vld [vmem:[#allocation44_spill] sm:$0xff]  ;;  %v7271_v49 = vld [vmem:[#allocation45_spill] sm:$0xff]  ;;  %v1780_v10 = vstv %s5824_s17  ;;  %s4250_s17 = sld [smem:[#allocation10 + $0x2d]] }
 0x221   : >> { %v1172_v5 = vpop.permute.xlu1 %1171  ;;  %v1161_v46 = vadd.f32 %v1159_v15, %v1153_v41  ;;  %v5819_v15 = vld [vmem:[#allocation6 + $0x110] sm:$0xff]  ;;  %v1231_v41 = vstv %s5799_s29  ;;  %v1745_v14 = vmul.f32 %v1744_v29, %v5822_v16  ;;  %s4241_s29 = sld [smem:[#allocation10 + $0x12]] }
 0x222   : >> { %v1170_v0 = vpop.permute.xlu0 %1169  ;;  %v1176_v20 = vadd.f32 %v1172_v5, %v1162_v26  ;;  %v1746_v30 = vmul.f32 %v1744_v29, %v5819_v15  ;;  %v887_v5 = vadd.f32 %v5546_v24, %v873_v63  ;;  %v1233_v2 = vmul.f32 %v1231_v41, %v7270_v25  ;;  %v4494_v24 = vld [vmem:[#allocation6 + $0xd9] sm:$0xff] }
 0x223   : >> { %1692 = vrot.lane.b32.xlu1 %v1687_v21, %s4713_s12  ;;  %v1175_v50 = vadd.f32 %v1170_v0, %v1161_v46  ;;  %v906_v21 = vstv %s5802_s30  ;;  %v942_v63 = vstv %s5831_s18  ;;  %s4244_s30 = sld [smem:[#allocation10 + $0x15]] }
 0x224   : >> { %1690 = vrot.lane.b32.xlu0 %v1686_v61, %s4713_s12  ;;  %v888_v61 = vadd.f32 %v5542_v17, %v874_v34  ;;  %v908_v0 = vmul.f32 %v4493_v58, %v906_v21  ;;  %v907_v18 = vmul.f32 %v4494_v24, %v906_v21  ;;  %v1267_v34 = vstv %s5827_s1  ;;  %v4496_v58 = vld [vmem:[#allocation6 + $0xda] sm:$0xff]  ;;  %v5880_v24 = vld [vmem:[#allocation6 + $0x10a] sm:$0xff]  ;;  %s4253_s1 = sld [smem:[#allocation10 + $0x30]] }
 0x225   : >> { %v1186_v62 = vpop.permute.xlu1 %1185  ;;  %s4256_s18 = sld [smem:[#allocation10 + $0x33]] }
 0x226   : >> { %v1190_v53 = vadd.f32 %v1186_v62, %v1176_v20  ;;  %v1184_v42 = vpop.permute.xlu0 %1183  ;;  %v902_v17 = vadd.f32 %v5557_v59, %v888_v61  ;;  %v1760_v59 = vmul.f32 %v1758_v55, %v5819_v15  ;;  %v5849_v62 = vld [vmem:[#allocation6 + $0x111] sm:$0xff] }
 0x227   : >> { %v1189_v38 = vadd.f32 %v1184_v42, %v1175_v50  ;;  %1714 = vrot.lane.b32.xlu1 %v1709_v13, %s4714_s20  ;;  %v1232_v13 = vmul.f32 %v1231_v41, %v7271_v49  ;;  %v1759_v50 = vmul.f32 %v1758_v55, %v5822_v16  ;;  %v5854_v42 = vld [vmem:[#allocation6 + $0x109] sm:$0xff]  ;;  %v1794_v41 = vstv %s5840_s23  ;;  %s4259_s23 = sld [smem:[#allocation10 + $0x48]] }
 0x228   : >> { %1712 = vrot.lane.b32.xlu0 %v1708_v11, %s4714_s20  ;;  %v1199_v56 = vadd.f32 %v1197_v22, %v1190_v53  ;;  %v901_v11 = vadd.f32 %v5562_v9, %v887_v5  ;;  %v910_v9 = vadd.f32 %v908_v0, %v902_v17  ;;  %v1781_v29 = vmul.f32 %v1780_v10, %v5854_v42 }
 0x229   : >> { %v1209_v60 = vpop.permute.xlu1 %1208  ;;  %v1198_v3 = vadd.f32 %v1196_v52, %v1189_v38  ;;  %v943_v0 = vmul.f32 %v4496_v58, %v942_v63  ;;  %v1795_v49 = vmul.f32 %v1794_v41, %v5854_v42 }
 0x22a   : >> { %v1207_v26 = vpop.permute.xlu0 %1206  ;;  %v1213_v46 = vadd.f32 %v1209_v60, %v1199_v56  ;;  %v909_v38 = vadd.f32 %v907_v18, %v901_v11  ;;  %v1782_v56 = vmul.f32 %v1780_v10, %v5849_v62  ;;  %v7272_v60 = vld [vmem:[#allocation46_spill] sm:$0xff]  ;;  %v924_v21 = vadd.f32 %v5577_v39, %v910_v9  ;;  %v7274_v10 = vld [vmem:[#allocation48_spill] sm:$0xff] }
 0x22b   : >> { %1728 = vrot.lane.b32.xlu1 %v1723_v44, %s4713_s12  ;;  %v1212_v57 = vadd.f32 %v1207_v26, %v1198_v3  ;;  %v1269_v3 = vmul.f32 %v1267_v34, %v7272_v60  ;;  %v1796_v39 = vmul.f32 %v1794_v41, %v5849_v62  ;;  %v1816_v11 = vstv %s5852_s2  ;;  %s4262_s2 = sld [smem:[#allocation10 + $0x4b]] }
 0x22c   : >> { %1726 = vrot.lane.b32.xlu0 %v1722_v33, %s4713_s12  ;;  %v923_v5 = vadd.f32 %v5581_v27, %v909_v38  ;;  %v938_v17 = vadd.f32 %v5590_v19, %v924_v21  ;;  %v7275_v38 = vld [vmem:[#allocation49_spill] sm:$0xff] }
 0x22d   : >> { %v1223_v6 = vpop.permute.xlu1 %1222 }
 0x22e   : >> { %v1227_v20 = vadd.f32 %v1223_v6, %v1213_v46  ;;  %v1221_v7 = vpop.permute.xlu0 %1220  ;;  %v4495_v46 = vld [vmem:[#allocation6 + $0xe2] sm:$0xff]  ;;  %v937_v6 = vadd.f32 %v5595_v28, %v923_v5 }
 0x22f   : >> { %v1226_v22 = vadd.f32 %v1221_v7, %v1212_v57  ;;  %1751 = vrot.lane.b32.xlu1 %v1746_v30, %s4714_s20  ;;  %v7273_v30 = vld [vmem:[#allocation47_spill] sm:$0xff]  ;;  %v944_v25 = vmul.f32 %v4495_v46, %v942_v63  ;;  %v519_v5 = vld [vmem:[#allocation2 + $0x8] sm:$0xff] }
 0x230   : >> { %1749 = vrot.lane.b32.xlu0 %v1745_v14, %s4714_s20  ;;  %v1235_v51 = vadd.f32 %v1233_v2, %v1227_v20  ;;  %v1268_v14 = vmul.f32 %v1267_v34, %v7273_v30  ;;  %v1304_v20 = vstv %s5857_s3  ;;  %s4265_s3 = sld [smem:[#allocation10 + $0x4e]] }
 0x231   : >> { %v1245_v52 = vpop.permute.xlu1 %1244  ;;  %v1234_v53 = vadd.f32 %v1232_v13, %v1226_v22  ;;  %v5877_v13 = vld [vmem:[#allocation6 + $0x112] sm:$0xff]  ;;  %v946_v22 = vadd.f32 %v944_v25, %v938_v17  ;;  %v1306_v9 = vmul.f32 %v1304_v20, %v7274_v10  ;;  %v518_v25 = vld [vmem:[#allocation2] sm:$0xff] }
 0x232   : >> { %v1243_v44 = vpop.permute.xlu0 %1242  ;;  %v1249_v33 = vadd.f32 %v1245_v52, %v1235_v51  ;;  %v1818_v28 = vmul.f32 %v1816_v11, %v5877_v13  ;;  %v945_v51 = vadd.f32 %v943_v0, %v937_v6  ;;  %v1830_v52 = vstv %s5866_s10  ;;  %v7277_v0 = vld [vmem:[#allocation51_spill] sm:$0xff]  ;;  %s4268_s10 = sld [smem:[#allocation10 + $0x63]] }
 0x233   : >> { %1765 = vrot.lane.b32.xlu1 %v1760_v59, %s4713_s12  ;;  %v1248_v26 = vadd.f32 %v1243_v44, %v1234_v53  ;;  %v1817_v59 = vmul.f32 %v1816_v11, %v5880_v24  ;;  %v1305_v44 = vmul.f32 %v1304_v20, %v7275_v38  ;;  %v1832_v60 = vmul.f32 %v1830_v52, %v5877_v13 }
 0x234   : >> { %1763 = vrot.lane.b32.xlu0 %v1759_v50, %s4713_s12  ;;  %v1831_v21 = vmul.f32 %v1830_v52, %v5880_v24 }
 0x235   : >> { %v1259_v61 = vpop.permute.xlu1 %1258 }
 0x236   : >> { %v1263_v2 = vadd.f32 %v1259_v61, %v1249_v33  ;;  %v1257_v55 = vpop.permute.xlu0 %1256  ;;  %v960_v33 = vadd.f32 %v5612_v36, %v946_v22  ;;  %v7278_v22 = vld [vmem:[#allocation52_spill] sm:$0xff] }
 0x237   : >> { %v1262_v57 = vadd.f32 %v1257_v55, %v1248_v26  ;;  %1787 = vrot.lane.b32.xlu1 %v1782_v56, %s4714_s20 }
 0x238   : >> { %1785 = vrot.lane.b32.xlu0 %v1781_v29, %s4714_s20  ;;  %v1271_v27 = vadd.f32 %v1269_v3, %v1263_v2  ;;  %v959_v3 = vadd.f32 %v5620_v40, %v945_v51  ;;  %v974_v26 = vadd.f32 %v5629_v32, %v960_v33  ;;  %v7276_v40 = vld [vmem:[#allocation50_spill] sm:$0xff] }
 0x239   : >> { %v1281_v19 = vpop.permute.xlu1 %1280  ;;  %v1270_v18 = vadd.f32 %v1268_v14, %v1262_v57  ;;  %v1340_v14 = vstv %s5883_s11  ;;  %s4271_s11 = sld [smem:[#allocation10 + $0x66]] }
 0x23a   : >> { %v1279_v7 = vpop.permute.xlu0 %1278  ;;  %v1285_v50 = vadd.f32 %v1281_v19, %v1271_v27  ;;  %v973_v36 = vadd.f32 %v5632_v4, %v959_v3  ;;  %v1342_v55 = vmul.f32 %v1340_v14, %v7276_v40  ;;  %v5904_v17 = vsub.f32 %v519_v5, %v974_v26  ;;  %v520_v26 = vld [vmem:[#allocation2 + $0x10] sm:$0xff] }
 0x23b   : >> { %1801 = vrot.lane.b32.xlu1 %v1796_v39, %s4713_s12  ;;  %v1284_v53 = vadd.f32 %v1279_v7, %v1270_v18  ;;  %v1341_v57 = vmul.f32 %v1340_v14, %v7277_v0  ;;  %v1376_v18 = vstv %s4238_s26  ;;  %v1413_v3 = vstv %s4241_s29  ;;  %v7282_v0 = vld [vmem:[#allocation56_spill] sm:$0xff]  ;;  %s4274_s26 = sld [smem:[#allocation10 + $0x69]] }
 0x23c   : >> { %1799 = vrot.lane.b32.xlu0 %v1795_v49, %s4713_s12  ;;  %v5907_v39 = vsub.f32 %v518_v25, %v973_v36  ;;  %v7281_v36 = vld [vmem:[#allocation54_spill] sm:$0xff]  ;;  %v1447_v40 = vstv %s4244_s30  ;;  %s5995_s29 = sld [smem:[#allocation10 + $0x5b]] }
 0x23d   : >> { %v1295_v34 = vpop.permute.xlu1 %1294  ;;  %s6023_s30 = sld [smem:[#allocation15 + %s4700_s25]] }
 0x23e   : >> { %v1299_v63 = vadd.f32 %v1295_v34, %v1285_v50  ;;  %v1293_v56 = vpop.permute.xlu0 %1292  ;;  %v7279_v50 = vld [vmem:[#allocation53_spill] sm:$0xff] }
 0x23f   : >> { %v1298_v29 = vadd.f32 %v1293_v56, %v1284_v53  ;;  %1823 = vrot.lane.b32.xlu1 %v1818_v28, %s4714_s20  ;;  %v1378_v28 = vmul.f32 %v1376_v18, %v7278_v22  ;;  %v1377_v10 = vmul.f32 %v1376_v18, %v7279_v50  ;;  %v1483_v22 = vstv %s4247_s4  ;;  %v7284_v50 = vld [vmem:[#allocation58_spill] sm:$0xff]  ;;  %s4278_s4 = sld [smem:[#allocation10 + $0x7]] }
 0x240   : >> { %1821 = vrot.lane.b32.xlu0 %v1817_v59, %s4714_s20  ;;  %v1308_v41 = vadd.f32 %v1306_v9, %v1299_v63 }
 0x241   : >> { %v1318_v61 = vpop.permute.xlu1 %1317  ;;  %v1307_v30 = vadd.f32 %v1305_v44, %v1298_v29 }
 0x242   : >> { %v1316_v46 = vpop.permute.xlu0 %1315  ;;  %v1322_v2 = vadd.f32 %v1318_v61, %v1308_v41 }
 0x243   : >> { %1837 = vrot.lane.b32.xlu1 %v1832_v60, %s4713_s12  ;;  %v1321_v58 = vadd.f32 %v1316_v46, %v1307_v30  ;;  %v521_v60 = vld [vmem:[#allocation2 + $0x18] sm:$0xff]  ;;  %v7280_v30 = vld [vmem:[#allocation55_spill] sm:$0xff]  ;;  %v1415_v46 = vmul.f32 %v1413_v3, %v7281_v36 }
 0x244   : >> { %1835 = vrot.lane.b32.xlu0 %v1831_v21, %s4713_s12  ;;  %v1414_v14 = vmul.f32 %v1413_v3, %v7280_v30 }
 0x245   : >> { %v1332_v32 = vpop.permute.xlu1 %1331 }
 0x246   : >> { %v1336_v6 = vadd.f32 %v1332_v32, %v1322_v2  ;;  %v1330_v27 = vpop.permute.xlu0 %1329 }
 0x247   : >> { %v1335_v4 = vadd.f32 %v1330_v27, %v1321_v58  ;;  %1857 = vrot.lane.b32.xlu1 %v5904_v17, %s4715_s27  ;;  %v7283_v27 = vld [vmem:[#allocation57_spill] sm:$0xff] }
 0x248   : >> { %1855 = vrot.lane.b32.xlu0 %v5907_v39, %s4715_s27  ;;  %v1344_v49 = vadd.f32 %v1342_v55, %v1336_v6 }
 0x249   : >> { %v1354_v11 = vpop.permute.xlu1 %1353  ;;  %v1343_v19 = vadd.f32 %v1341_v57, %v1335_v4  ;;  %v1449_v57 = vmul.f32 %v1447_v40, %v7282_v0  ;;  %v1448_v4 = vmul.f32 %v1447_v40, %v7283_v27 }
 0x24a   : >> { %v1352_v20 = vpop.permute.xlu0 %1351  ;;  %v1358_v7 = vadd.f32 %v1354_v11, %v1344_v49 }
 0x24b   : >> { %v1357_v59 = vadd.f32 %v1352_v20, %v1343_v19 }
 0x24d   : >> { %v1368_v51 = vpop.permute.xlu1 %1367 }
 0x24e   : >> { %v1372_v9 = vadd.f32 %v1368_v51, %v1358_v7  ;;  %v1366_v52 = vpop.permute.xlu0 %1365 }
 0x24f   : >> { %v1371_v53 = vadd.f32 %v1366_v52, %v1357_v59  ;;  %v7285_v52 = vld [vmem:[#allocation59_spill] sm:$0xff] }
 0x250   : >> { %v1380_v34 = vadd.f32 %v1378_v28, %v1372_v9 }
 0x251   : >> { %v1390_v38 = vpop.permute.xlu1 %1389  ;;  %v1379_v44 = vadd.f32 %v1377_v10, %v1371_v53  ;;  %v1485_v10 = vmul.f32 %v1483_v22, %v7284_v50  ;;  %v1484_v53 = vmul.f32 %v1483_v22, %v7285_v52 }
 0x252   : >> { %v1388_v63 = vpop.permute.xlu0 %1387  ;;  %v1394_v56 = vadd.f32 %v1390_v38, %v1380_v34 }
 0x253   : >> { %v1393_v33 = vadd.f32 %v1388_v63, %v1379_v44 }
 0x255   : >> { %v1404_v29 = vpop.permute.xlu1 %1403 }
 0x256   : >> { %v1408_v41 = vadd.f32 %v1404_v29, %v1394_v56  ;;  %v1402_v21 = vpop.permute.xlu0 %1401  ;;  %v1520_v29 = vstv %s4250_s17  ;;  %s3784_s17 = sadd.f32 1e-08, %s6023_s30 }
 0x257   : >> { %v1407_v61 = vadd.f32 %v1402_v21, %v1393_v33 }
 0x258   : >> { %v5916_v5 = vsub.f32 %v521_v60, %v1408_v41  ;;  %v1522_v41 = vmul.f32 %v1520_v29, %v5641_v37 }
 0x259   : >> { %v5919_v25 = vsub.f32 %v520_v26, %v1407_v61  ;;  %v1425_v2 = vpop.permute.xlu1 %1424  ;;  %v1521_v61 = vmul.f32 %v1520_v29, %v5644_v31 }
 0x25a   : >> { %v1423_v55 = vpop.permute.xlu0 %1422  ;;  %1861 = vrot.lane.b32.xlu1 %v5916_v5, %s4715_s27  ;;  %v1429_v32 = vadd.f32 %v1425_v2, %v1415_v46 }
 0x25b   : >> { %v1428_v58 = vadd.f32 %v1423_v55, %v1414_v14  ;;  %1859 = vrot.lane.b32.xlu0 %v5919_v25, %s4715_s27  ;;  %v1556_v55 = vstv %s4253_s1  ;;  %s4279_s1 = sld [smem:[#allocation10 + $0x6]] }
 0x25c   : >> { %v1558_v0 = vmul.f32 %v1556_v55, %v5672_v54  ;;  %v1557_v37 = vmul.f32 %v1556_v55, %v5675_v45 }
 0x25d   : >> { %v1439_v6 = vpop.permute.xlu1 %1438 }
 0x25e   : >> { %v1443_v49 = vadd.f32 %v1439_v6, %v1429_v32  ;;  %v1437_v11 = vpop.permute.xlu0 %1436 }
 0x25f   : >> { %v1442_v19 = vadd.f32 %v1437_v11, %v1428_v58 }
 0x260   : >> { %v1451_v18 = vadd.f32 %v1449_v57, %v1443_v49 }
 0x261   : >> { %v1461_v20 = vpop.permute.xlu1 %1460  ;;  %v1450_v7 = vadd.f32 %v1448_v4, %v1442_v19 }
 0x262   : >> { %v1459_v28 = vpop.permute.xlu0 %1458  ;;  %v1465_v51 = vadd.f32 %v1461_v20, %v1451_v18  ;;  %v1592_v18 = vstv %s4256_s18  ;;  %s4281_s18 = sld [smem:[#allocation10 + $0x4]] }
 0x263   : >> { %v1464_v59 = vadd.f32 %v1459_v28, %v1450_v7  ;;  %v1594_v22 = vmul.f32 %v1592_v18, %v5704_v12  ;;  %v1593_v54 = vmul.f32 %v1592_v18, %v5709_v43  ;;  %v1738_v18 = vstv %s4268_s10  ;;  %s4286_s10 = sld [smem:[#allocation10 + $0x22]] }
 0x265   : >> { %v1475_v9 = vpop.permute.xlu1 %1474 }
 0x266   : >> { %v1479_v34 = vadd.f32 %v1475_v9, %v1465_v51  ;;  %v1473_v38 = vpop.permute.xlu0 %1472 }
 0x267   : >> { %v1478_v44 = vadd.f32 %v1473_v38, %v1464_v59 }
 0x268   : >> { %v1487_v63 = vadd.f32 %v1485_v10, %v1479_v34 }
 0x269   : >> { %v1497_v56 = vpop.permute.xlu1 %1496  ;;  %v1486_v33 = vadd.f32 %v1484_v53, %v1478_v44  ;;  %v1629_v53 = vstv %s4259_s23  ;;  %s4282_s23 = sld [smem:[#allocation10 + $0x3]] }
 0x26a   : >> { %v1495_v60 = vpop.permute.xlu0 %1494  ;;  %v1501_v3 = vadd.f32 %v1497_v56, %v1487_v63  ;;  %v1631_v44 = vmul.f32 %v1629_v53, %v5736_v8  ;;  %v1630_v12 = vmul.f32 %v1629_v53, %v5739_v23 }
 0x26b   : >> { %v1500_v21 = vadd.f32 %v1495_v60, %v1486_v33 }
 0x26d   : >> { %v1511_v26 = vpop.permute.xlu1 %1510 }
 0x26e   : >> { %v1515_v30 = vadd.f32 %v1511_v26, %v1501_v3  ;;  %v1509_v14 = vpop.permute.xlu0 %1508 }
 0x26f   : >> { %v1514_v36 = vadd.f32 %v1509_v14, %v1500_v21  ;;  %v1665_v21 = vstv %s4262_s2  ;;  %s4284_s2 = sld [smem:[#allocation10 + $0x1]] }
 0x270   : >> { %v1524_v46 = vadd.f32 %v1522_v41, %v1515_v30  ;;  %v1667_v30 = vmul.f32 %v1665_v21, %v5764_v1  ;;  %v1666_v8 = vmul.f32 %v1665_v21, %v5770_v48 }
 0x271   : >> { %v1534_v2 = vpop.permute.xlu1 %1533  ;;  %v1523_v40 = vadd.f32 %v1521_v61, %v1514_v36 }
 0x272   : >> { %v1532_v58 = vpop.permute.xlu0 %1531  ;;  %v1538_v32 = vadd.f32 %v1534_v2, %v1524_v46 }
 0x273   : >> { %v1537_v57 = vadd.f32 %v1532_v58, %v1523_v40 }
 0x275   : >> { %v1548_v6 = vpop.permute.xlu1 %1547 }
 0x276   : >> { %v1552_v27 = vadd.f32 %v1548_v6, %v1538_v32  ;;  %v1546_v4 = vpop.permute.xlu0 %1545  ;;  %v1701_v32 = vstv %s4265_s3  ;;  %s2189_s3 = sld [smem:[#allocation10]] }
 0x277   : >> { %v1551_v49 = vadd.f32 %v1546_v4, %v1537_v57  ;;  %v1703_v6 = vmul.f32 %v1701_v32, %v5790_v35  ;;  %v1702_v1 = vmul.f32 %v1701_v32, %v5793_v47  ;;  %v1739_v35 = vmul.f32 %v1738_v18, %v5822_v16 }
 0x278   : >> { %v1560_v31 = vadd.f32 %v1558_v0, %v1552_v27 }
 0x279   : >> { %v1570_v11 = vpop.permute.xlu1 %1569  ;;  %v1559_v19 = vadd.f32 %v1557_v37, %v1551_v49 }
 0x27a   : >> { %v1568_v20 = vpop.permute.xlu0 %1567  ;;  %v1574_v7 = vadd.f32 %v1570_v11, %v1560_v31 }
 0x27b   : >> { %v1573_v28 = vadd.f32 %v1568_v20, %v1559_v19 }
 0x27d   : >> { %v1584_v59 = vpop.permute.xlu1 %1583 }
 0x27e   : >> { %v1588_v51 = vadd.f32 %v1584_v59, %v1574_v7  ;;  %v1582_v50 = vpop.permute.xlu0 %1581 }
 0x27f   : >> { %v1587_v10 = vadd.f32 %v1582_v50, %v1573_v28 }
 0x280   : >> { %v1596_v45 = vadd.f32 %v1594_v22, %v1588_v51  ;;  %v1740_v22 = vmul.f32 %v1738_v18, %v5819_v15 }
 0x281   : >> { %v1606_v9 = vpop.permute.xlu1 %1605  ;;  %v1595_v52 = vadd.f32 %v1593_v54, %v1587_v10 }
 0x282   : >> { %v1604_v34 = vpop.permute.xlu0 %1603  ;;  %v1610_v38 = vadd.f32 %v1606_v9, %v1596_v45  ;;  %v1774_v9 = vstv %s4271_s11  ;;  %s4287_s11 = sld [smem:[#allocation10 + $0x21]] }
 0x283   : >> { %v1609_v63 = vadd.f32 %v1604_v34, %v1595_v52  ;;  %v1776_v34 = vmul.f32 %v1774_v9, %v5849_v62  ;;  %v1775_v15 = vmul.f32 %v1774_v9, %v5854_v42 }
 0x285   : >> { %v1620_v56 = vpop.permute.xlu1 %1619 }
 0x286   : >> { %v1624_v33 = vadd.f32 %v1620_v56, %v1610_v38  ;;  %v1618_v29 = vpop.permute.xlu0 %1617 }
 0x287   : >> { %v1623_v60 = vadd.f32 %v1618_v29, %v1609_v63 }
 0x288   : >> { %v1633_v43 = vadd.f32 %v1631_v44, %v1624_v33 }
 0x289   : >> { %v1643_v3 = vpop.permute.xlu1 %1642  ;;  %v1632_v41 = vadd.f32 %v1630_v12, %v1623_v60  ;;  %v1810_v60 = vstv %s4274_s26  ;;  %s4289_s26 = sld [smem:[#allocation10 + $0x1f]] }
 0x28a   : >> { %v1641_v26 = vpop.permute.xlu0 %1640  ;;  %v1647_v61 = vadd.f32 %v1643_v3, %v1633_v43 }
 0x28b   : >> { %v1646_v14 = vadd.f32 %v1641_v26, %v1632_v41  ;;  %v1812_v41 = vmul.f32 %v1810_v60, %v5877_v13 }
 0x28d   : >> { %v1657_v36 = vpop.permute.xlu1 %1656 }
 0x28e   : >> { %v1661_v46 = vadd.f32 %v1657_v36, %v1647_v61  ;;  %v1655_v2 = vpop.permute.xlu0 %1654  ;;  %v1811_v61 = vmul.f32 %v1810_v60, %v5880_v24  ;;  %v525_v24 = vld [vmem:[#allocation3 + $0x8] sm:$0xff] }
 0x28f   : >> { %v1660_v40 = vadd.f32 %v1655_v2, %v1646_v14 }
 0x290   : >> { %v1669_v23 = vadd.f32 %v1667_v30, %v1661_v46 }
 0x291   : >> { %v1679_v55 = vpop.permute.xlu1 %1678  ;;  %v1668_v58 = vadd.f32 %v1666_v8, %v1660_v40 }
 0x292   : >> { %v1677_v0 = vpop.permute.xlu0 %1676  ;;  %v1683_v57 = vadd.f32 %v1679_v55, %v1669_v23  ;;  %v5947_v55 = vld [vmem:[#allocation2 + $0x28] sm:$0xff] }
 0x293   : >> { %v1682_v37 = vadd.f32 %v1677_v0, %v1668_v58  ;;  %v5949_v0 = vld [vmem:[#allocation2 + $0x20] sm:$0xff] }
 0x295   : >> { %v1693_v27 = vpop.permute.xlu1 %1692 }
 0x296   : >> { %v1697_v4 = vadd.f32 %v1693_v27, %v1683_v57  ;;  %v1691_v49 = vpop.permute.xlu0 %1690 }
 0x297   : >> { %v1696_v31 = vadd.f32 %v1691_v49, %v1682_v37  ;;  %v524_v49 = vld [vmem:[#allocation3] sm:$0xff] }
 0x298   : >> { %v1705_v48 = vadd.f32 %v1703_v6, %v1697_v4  ;;  %v1880_v4 = vsel %vm277_vm3, %v525_v24, 0.0 }
 0x299   : >> { %v1715_v11 = vpop.permute.xlu1 %1714  ;;  %v1704_v19 = vadd.f32 %v1702_v1, %v1696_v31  ;;  %v527_v31 = vld [vmem:[#allocation3 + $0x18] sm:$0xff] }
 0x29a   : >> { %v1713_v20 = vpop.permute.xlu0 %1712  ;;  %v1719_v7 = vadd.f32 %v1715_v11, %v1705_v48  ;;  %v1882_v48 = vsel %vm277_vm3, %v527_v31, 0.0  ;;  %v526_v11 = vld [vmem:[#allocation3 + $0x10] sm:$0xff] }
 0x29b   : >> { %v1718_v28 = vadd.f32 %v1713_v20, %v1704_v19  ;;  %v529_v19 = vld [vmem:[#allocation3 + $0x28] sm:$0xff]  ;;  %v528_v20 = vld [vmem:[#allocation3 + $0x20] sm:$0xff] }
 0x29c   : >> { %v1884_v18 = vsel %vm277_vm3, %v529_v19, 0.0 }
 0x29d   : >> { %v1729_v59 = vpop.permute.xlu1 %1728 }
 0x29e   : >> { %v1733_v54 = vadd.f32 %v1729_v59, %v1719_v7  ;;  %v1727_v51 = vpop.permute.xlu0 %1726  ;;  %v531_v7 = vld [vmem:[#allocation4 + $0x8] sm:$0xff] }
 0x29f   : >> { %v1732_v50 = vadd.f32 %v1727_v51, %v1718_v28  ;;  %v1928_v59 = vsel %vm280_vm4, %v531_v7, 0.0  ;;  %v532_v51 = vld [vmem:[#allocation4 + $0x10] sm:$0xff] }
 0x2a0   : >> { %v1742_v47 = vadd.f32 %v1740_v22, %v1733_v54  ;;  %v530_v22 = vld [vmem:[#allocation4] sm:$0xff]  ;;  %v533_v54 = vld [vmem:[#allocation4 + $0x18] sm:$0xff] }
 0x2a1   : >> { %v1752_v10 = vpop.permute.xlu1 %1751  ;;  %v1741_v45 = vadd.f32 %v1739_v35, %v1732_v50  ;;  %v1927_v35 = vsel %vm280_vm4, %v530_v22, 0.0  ;;  %v1930_v50 = vsel %vm280_vm4, %v533_v54, 0.0 }
 0x2a2   : >> { %v1750_v52 = vpop.permute.xlu0 %1749  ;;  %v1756_v53 = vadd.f32 %v1752_v10, %v1742_v47  ;;  %v1929_v10 = vsel %vm280_vm4, %v532_v51, 0.0 }
 0x2a3   : >> { %v1755_v38 = vadd.f32 %v1750_v52, %v1741_v45  ;;  %v535_v45 = vld [vmem:[#allocation4 + $0x28] sm:$0xff]  ;;  %v534_v52 = vld [vmem:[#allocation4 + $0x20] sm:$0xff] }
 0x2a5   : >> { %v1766_v44 = vpop.permute.xlu1 %1765 }
 0x2a6   : >> { %v1770_v63 = vadd.f32 %v1766_v44, %v1756_v53  ;;  %v1764_v56 = vpop.permute.xlu0 %1763  ;;  %v1932_v53 = vsel %vm280_vm4, %v535_v45, 0.0  ;;  %v3041_v44 = vstv %s5995_s29  ;;  %s4716_s29 = smov 2  }
 0x2a7   : >> { %v1769_v12 = vadd.f32 %v1764_v56, %v1755_v38 }
 0x2a8   : >> { %v1778_v16 = vadd.f32 %v1776_v34, %v1770_v63  ;;  %v1931_v34 = vsel %vm280_vm4, %v534_v52, 0.0 }
 0x2a9   : >> { %v1788_v33 = vpop.permute.xlu1 %1787  ;;  %v1777_v29 = vadd.f32 %v1775_v15, %v1769_v12 }
 0x2aa   : >> { %v1786_v43 = vpop.permute.xlu0 %1785  ;;  %v1792_v3 = vadd.f32 %v1788_v33, %v1778_v16 }
 0x2ab   : >> { %v1791_v21 = vadd.f32 %v1786_v43, %v1777_v29 }
 0x2ad   : >> { %v1802_v26 = vpop.permute.xlu1 %1801 }
 0x2ae   : >> { %v1806_v62 = vadd.f32 %v1802_v26, %v1792_v3  ;;  %v1800_v30 = vpop.permute.xlu0 %1799 }
 0x2af   : >> { %v1805_v14 = vadd.f32 %v1800_v30, %v1791_v21 }
 0x2b0   : >> { %v1814_v36 = vadd.f32 %v1812_v41, %v1806_v62 }
 0x2b1   : >> { %v1824_v42 = vpop.permute.xlu1 %1823  ;;  %v1813_v8 = vadd.f32 %v1811_v61, %v1805_v14 }
 0x2b2   : >> { %v1822_v46 = vpop.permute.xlu0 %1821  ;;  %v1828_v2 = vadd.f32 %v1824_v42, %v1814_v36 }
 0x2b3   : >> { %v1827_v40 = vadd.f32 %v1822_v46, %v1813_v8 }
 0x2b5   : >> { %v1838_v23 = vpop.permute.xlu1 %1837 }
 0x2b6   : >> { %v1842_v58 = vadd.f32 %v1838_v23, %v1828_v2  ;;  %v1836_v32 = vpop.permute.xlu0 %1835 }
 0x2b7   : >> { %v1841_v13 = vadd.f32 %v1836_v32, %v1827_v40 }
 0x2b8   : >> { %v5952_v57 = vsub.f32 %v5947_v55, %v1842_v58 }
 0x2b9   : >> { %v5955_v6 = vsub.f32 %v5949_v0, %v1841_v13  ;;  %v1858_v37 = vpop.permute.xlu1 %1857 }
 0x2ba   : >> { %1874 = vst.msk [vmem:[#allocation7 + $0x9] sm:$0xff] %vm464_vm5, %v1858_v37  ;;  %v1856_v27 = vpop.permute.xlu0 %1855  ;;  %1865 = vrot.lane.b32.xlu1 %v5952_v57, %s4715_s27 }
 0x2bb   : >> { %1873 = vst.msk [vmem:[#allocation7 + $0x1] sm:$0xff] %vm464_vm5, %v1856_v27  ;;  %1863 = vrot.lane.b32.xlu0 %v5955_v6, %s4715_s27 }
 0x2be   : >> { %1893 = vrot.lane.b32.xlu1 %v1880_v4, %s4715_s27 }
 0x2bf   : >> { %1891 = vrot.lane.b32.xlu0 %v524_v49, %s4715_s27 }
 0x2c2   : >> { %1897 = vrot.lane.b32.xlu1 %v1882_v48, %s4715_s27 }
 0x2c3   : >> { %1895 = vrot.lane.b32.xlu0 %v526_v11, %s4715_s27 }
 0x2c6   : >> { %1901 = vrot.lane.b32.xlu1 %v1884_v18, %s4715_s27 }
 0x2c7   : >> { %1899 = vrot.lane.b32.xlu0 %v528_v20, %s4715_s27 }
 0x2ca   : >> { %1941 = vrot.lane.b32.xlu1 %v1928_v59, %s4715_s27 }
 0x2cb   : >> { %1939 = vrot.lane.b32.xlu0 %v1927_v35, %s4715_s27 }
 0x2cc   : >> { %v1862_v47 = vpop.permute.xlu1 %1861 }
 0x2cd   : >> { %1876 = vst.msk [vmem:[#allocation7 + $0x21] sm:$0xff] %vm464_vm5, %v1862_v47  ;;  %v1860_v9 = vpop.permute.xlu0 %1859 }
 0x2ce   : >> { %1875 = vst.msk [vmem:[#allocation7 + $0x19] sm:$0xff] %vm464_vm5, %v1860_v9  ;;  %1945 = vrot.lane.b32.xlu1 %v1930_v50, %s4715_s27 }
 0x2cf   : >> { %1943 = vrot.lane.b32.xlu0 %v1929_v10, %s4715_s27 }
 0x2d2   : >> { %1949 = vrot.lane.b32.xlu1 %v1932_v53, %s4715_s27 }
 0x2d3   : >> { %1947 = vrot.lane.b32.xlu0 %v1931_v34, %s4715_s27 }
 0x2d4   : >> { %v2601_v38 = vld [vmem:[#allocation7 + $0x22] sm:$0xff] }
 0x2d5   : >> { %v6000_v15 = vmul.f32 %v3041_v44, %v2601_v38 }
 0x32c   : >> { %v1866_v63 = vpop.permute.xlu1 %1865 }
 0x32d   : >> { %1878 = vst.msk [vmem:[#allocation7 + $0x39] sm:$0xff] %vm464_vm5, %v1866_v63  ;;  %v1864_v56 = vpop.permute.xlu0 %1863 }
 0x32e   : >> { %1877 = vst.msk [vmem:[#allocation7 + $0x31] sm:$0xff] %vm464_vm5, %v1864_v56 }
 0x330   : >> { %v1894_v12 = vpop.permute.xlu1 %1893 }
 0x331   : >> { %1910 = vst.msk [vmem:[#allocation8 + $0x9] sm:$0xff] %vm464_vm5, %v1894_v12  ;;  %v1892_v16 = vpop.permute.xlu0 %1891 }
 0x332   : >> { %1909 = vst.msk [vmem:[#allocation8 + $0x1] sm:$0xff] %vm464_vm5, %v1892_v16 }
 0x334   : >> { %v1898_v33 = vpop.permute.xlu1 %1897 }
 0x335   : >> { %1912 = vst.msk [vmem:[#allocation8 + $0x21] sm:$0xff] %vm464_vm5, %v1898_v33  ;;  %v1896_v29 = vpop.permute.xlu0 %1895 }
 0x336   : >> { %1911 = vst.msk [vmem:[#allocation8 + $0x19] sm:$0xff] %vm464_vm5, %v1896_v29 }
 0x338   : >> { %v1902_v60 = vpop.permute.xlu1 %1901 }
 0x339   : >> { %1914 = vst.msk [vmem:[#allocation8 + $0x39] sm:$0xff] %vm464_vm5, %v1902_v60  ;;  %v1900_v43 = vpop.permute.xlu0 %1899  ;;  %v1916_v41 = vld [vmem:[#allocation8 + $0x8] sm:$0xff]  ;;  %v1915_v21 = vld [vmem:[#allocation8] sm:$0xff] }
 0x33a   : >> { %1913 = vst.msk [vmem:[#allocation8 + $0x31] sm:$0xff] %vm464_vm5, %v1900_v43  ;;  %v1922_v19 = vsub.f32 %v1916_v41, %v1894_v12  ;;  %v1921_v20 = vsub.f32 %v1915_v21, %v1892_v16 }
 0x33c   : >> { %v1942_v3 = vpop.permute.xlu1 %1941 }
 0x33d   : >> { %1958 = vst.msk [vmem:[#allocation8 + $0x9] sm:$0xff] %vm464_vm5, %v1942_v3  ;;  %v1940_v26 = vpop.permute.xlu0 %1939  ;;  %v1918_v62 = vld [vmem:[#allocation8 + $0x20] sm:$0xff]  ;;  %v1917_v30 = vld [vmem:[#allocation8 + $0x18] sm:$0xff] }
 0x33e   : >> { %1957 = vst.msk [vmem:[#allocation8 + $0x1] sm:$0xff] %vm464_vm5, %v1940_v26  ;;  %v1924_v18 = vsub.f32 %v1918_v62, %v1898_v33  ;;  %v1923_v7 = vsub.f32 %v1917_v30, %v1896_v29 }
 0x340   : >> { %v1946_v61 = vpop.permute.xlu1 %1945 }
 0x341   : >> { %1960 = vst.msk [vmem:[#allocation8 + $0x21] sm:$0xff] %vm464_vm5, %v1946_v61  ;;  %v1944_v14 = vpop.permute.xlu0 %1943  ;;  %v1920_v42 = vld [vmem:[#allocation8 + $0x38] sm:$0xff]  ;;  %v1919_v46 = vld [vmem:[#allocation8 + $0x30] sm:$0xff] }
 0x342   : >> { %1959 = vst.msk [vmem:[#allocation8 + $0x19] sm:$0xff] %vm464_vm5, %v1944_v14  ;;  %v1925_v45 = vsub.f32 %v1919_v46, %v1900_v43 }
 0x344   : >> { %v1950_v36 = vpop.permute.xlu1 %1949  ;;  %v1964_v8 = vld [vmem:[#allocation8 + $0x9] sm:$0xff] }
 0x345   : >> { %1962 = vst.msk [vmem:[#allocation8 + $0x39] sm:$0xff] %vm464_vm5, %v1950_v36  ;;  %v1948_v2 = vpop.permute.xlu0 %1947  ;;  %v1970_v40 = vsub.f32 %v1964_v8, %v1928_v59  ;;  %v1963_v23 = vld [vmem:[#allocation8 + $0x1] sm:$0xff]  ;;  %v3785_v8 = vstv %s3784_s17  ;;  %s4292_s17 = sld [smem:[#allocation10 + $0x1c]] }
 0x346   : >> { %1961 = vst.msk [vmem:[#allocation8 + $0x31] sm:$0xff] %vm464_vm5, %v1948_v2  ;;  %v1969_v58 = vsub.f32 %v1963_v23, %v1927_v35  ;;  %4467 = vrcp.f32 %v3785_v8  ;;  %v6030_v23 = vld [vmem:[#allocation7 + $0x8] sm:$0xff] }
 0x347   : >> { %1983 = vrot.lane.b32.xlu1 %v1970_v40, %s4715_s27 }
 0x348   : >> { %1981 = vrot.lane.b32.xlu0 %v1969_v58, %s4715_s27  ;;  %v1966_v32 = vld [vmem:[#allocation8 + $0x21] sm:$0xff] }
 0x349   : >> { %v1972_v13 = vsub.f32 %v1966_v32, %v1930_v50  ;;  %v1965_v24 = vld [vmem:[#allocation8 + $0x19] sm:$0xff]  ;;  %v2108_v32 = vstv %s4278_s4  ;;  %s4290_s4 = sld [smem:[#allocation10 + $0x1e]] }
 0x34a   : >> { %v1971_v37 = vsub.f32 %v1965_v24, %v1929_v10  ;;  %v1926_v10 = vsub.f32 %v1920_v42, %v1902_v60  ;;  %v2110_v24 = vmul.f32 %v2108_v32, %v6030_v23 }
 0x34b   : >> { %1987 = vrot.lane.b32.xlu1 %v1972_v13, %s4715_s27  ;;  %v6032_v13 = vld [vmem:[#allocation7] sm:$0xff] }
 0x34c   : >> { %1985 = vrot.lane.b32.xlu0 %v1971_v37, %s4715_s27  ;;  %v1968_v27 = vld [vmem:[#allocation8 + $0x39] sm:$0xff]  ;;  %v2109_v37 = vmul.f32 %v2108_v32, %v6032_v13 }
 0x34d   : >> { %v1974_v4 = vsub.f32 %v1968_v27, %v1932_v53  ;;  %v1967_v49 = vld [vmem:[#allocation8 + $0x31] sm:$0xff]  ;;  %v2122_v27 = vstv %s4279_s1  ;;  %s4293_s1 = sld [smem:[#allocation10 + $0x1b]] }
 0x34e   : >> { %v1973_v31 = vsub.f32 %v1967_v49, %v1931_v34  ;;  %v6041_v49 = vld [vmem:[#allocation7 + $0x9] sm:$0xff] }
 0x34f   : >> { %1991 = vrot.lane.b32.xlu1 %v1974_v4, %s4715_s27  ;;  %v2124_v4 = vmul.f32 %v2122_v27, %v6030_v23 }
 0x350   : >> { %1989 = vrot.lane.b32.xlu0 %v1973_v31, %s4715_s27  ;;  %v2123_v31 = vmul.f32 %v2122_v27, %v6032_v13 }
 0x3b9   : >> { %v1984_v48 = vpop.permute.xlu1 %1983 }
 0x3ba   : >> { %v1982_v11 = vpop.permute.xlu0 %1981  ;;  %v2000_v59 = vadd.f32 %v1984_v48, %v1922_v19  ;;  %v2142_v48 = vstv %s4281_s18  ;;  %v6047_v19 = vpop.eup %4467  ;;  %s4295_s18 = sld [smem:[#allocation10 + $0x3d]] }
 0x3bb   : >> { %v1999_v51 = vadd.f32 %v1982_v11, %v1921_v20  ;;  %v6044_v11 = vld [vmem:[#allocation7 + $0x1] sm:$0xff]  ;;  %4392 = vpush %v6047_v19 }
 0x3bc   : >> { %v2006_v53 = vmul.f32 0.57735026, %v2000_v59  ;;  %v2143_v20 = vmul.f32 %v2142_v48, %v6044_v11  ;;  %v6056_v59 = vld [vmem:[#allocation7 + $0xa] sm:$0xff] }
 0x3bd   : >> { %v1988_v22 = vpop.permute.xlu1 %1987  ;;  %v2005_v63 = vmul.f32 0.57735026, %v1999_v51  ;;  %v6059_v51 = vld [vmem:[#allocation7 + $0x2] sm:$0xff] }
 0x3be   : >> { %v2002_v35 = vadd.f32 %v1988_v22, %v1924_v18  ;;  %v1986_v54 = vpop.permute.xlu0 %1985  ;;  %v2144_v18 = vmul.f32 %v2142_v48, %v6041_v49 }
 0x3bf   : >> { %v2001_v50 = vadd.f32 %v1986_v54, %v1923_v7  ;;  %v2156_v7 = vstv %s4282_s23  ;;  %v2176_v54 = vstv %s4284_s2  ;;  %s4296_s23 = sld [smem:[#allocation10 + $0x3c]] }
 0x3c0   : >> { %v2008_v47 = vmul.f32 0.70710677, %v2002_v35  ;;  %v2016_v12 = vmul.f32 4.9995997e-17, %v2002_v35  ;;  %v2024_v61 = vmul.f32 -0.70710677, %v2002_v35  ;;  %v2158_v22 = vmul.f32 %v2156_v7, %v6041_v49 }
 0x3c1   : >> { %v2007_v9 = vmul.f32 0.70710677, %v2001_v50  ;;  %v1992_v52 = vpop.permute.xlu1 %1991  ;;  %v2015_v29 = vmul.f32 4.9995997e-17, %v2001_v50  ;;  %v2023_v30 = vmul.f32 -0.70710677, %v2001_v50  ;;  %v2157_v35 = vmul.f32 %v2156_v7, %v6044_v11 }
 0x3c2   : >> { %v2004_v34 = vadd.f32 %v1992_v52, %v1926_v10  ;;  %v1990_v38 = vpop.permute.xlu0 %1989  ;;  %v2010_v16 = vadd.f32 %v2008_v47, %v2006_v53  ;;  %v2018_v62 = vadd.f32 %v2016_v12, %v2006_v53  ;;  %v2026_v46 = vadd.f32 %v2024_v61, %v2006_v53  ;;  %s4298_s2 = sld [smem:[#allocation10 + $0x3a]] }
 0x3c3   : >> { %v2003_v56 = vadd.f32 %v1990_v38, %v1925_v45  ;;  %v2009_v3 = vadd.f32 %v2007_v9, %v2005_v63  ;;  %v2017_v14 = vadd.f32 %v2015_v29, %v2005_v63  ;;  %v2025_v2 = vadd.f32 %v2023_v30, %v2005_v63 }
 0x3c4   : >> { %v2012_v33 = vmul.f32 0.4082483, %v2004_v34  ;;  %v2020_v26 = vmul.f32 -0.8164966, %v2004_v34  ;;  %v2178_v50 = vmul.f32 %v2176_v54, %v6056_v59  ;;  %v2177_v47 = vmul.f32 %v2176_v54, %v6059_v51 }
 0x3c5   : >> { %v2011_v41 = vmul.f32 0.4082483, %v2003_v56  ;;  %v2019_v43 = vmul.f32 -0.8164966, %v2003_v56  ;;  %v2190_v10 = vstv %s2189_s3  ;;  %v2234_v52 = vstv %s4286_s10  ;;  %s4299_s3 = sld [smem:[#allocation10 + $0x39]] }
 0x3c6   : >> { %v2014_v21 = vadd.f32 %v2012_v33, %v2010_v16  ;;  %v2022_v36 = vadd.f32 %v2020_v26, %v2018_v62  ;;  %v2028_v40 = vadd.f32 %v2026_v46, %v2012_v33  ;;  %v2192_v45 = vmul.f32 %v2190_v10, %v6056_v59  ;;  %s4301_s10 = sld [smem:[#allocation10 + $0x37]] }
 0x3c7   : >> { %v2013_v60 = vadd.f32 %v2011_v41, %v2009_v3  ;;  %v2021_v42 = vadd.f32 %v2019_v43, %v2017_v14  ;;  %v2027_v58 = vadd.f32 %v2025_v2, %v2011_v41  ;;  %v2191_v9 = vmul.f32 %v2190_v10, %v6059_v51 }
 0x3c8   : >> { %2037 = vrot.lane.b32.xlu1 %v2014_v21, %s4714_s20  ;;  %v2236_v53 = vmul.f32 %v2234_v52, %v6030_v23  ;;  %v2235_v34 = vmul.f32 %v2234_v52, %v6032_v13  ;;  %v2248_v38 = vstv %s4287_s11  ;;  %v2268_v12 = vstv %s4289_s26  ;;  %s4302_s11 = sld [smem:[#allocation10 + $0x36]] }
 0x3c9   : >> { %2035 = vrot.lane.b32.xlu0 %v2013_v60, %s4714_s20  ;;  %v2250_v63 = vmul.f32 %v2248_v38, %v6030_v23  ;;  %v2249_v56 = vmul.f32 %v2248_v38, %v6032_v13  ;;  %v2270_v16 = vmul.f32 %v2268_v12, %v6041_v49  ;;  %v2269_v33 = vmul.f32 %v2268_v12, %v6044_v11  ;;  %s4304_s26 = sld [smem:[#allocation10 + $0x58]] }
 0x3ca   : >> { %v2282_v29 = vstv %s4290_s4  ;;  %v2302_v21 = vstv %s4292_s17  ;;  %v2316_v43 = vstv %s4293_s1  ;;  %v2356_v30 = vstv %s4295_s18  ;;  %s4305_s4 = sld [smem:[#allocation10 + $0x57]] }
 0x3cb   : >> { %v2284_v3 = vmul.f32 %v2282_v29, %v6041_v49  ;;  %v2283_v41 = vmul.f32 %v2282_v29, %v6044_v11  ;;  %v2304_v26 = vmul.f32 %v2302_v21, %v6056_v59  ;;  %v2303_v60 = vmul.f32 %v2302_v21, %v6059_v51  ;;  %s4307_s17 = sld [smem:[#allocation10 + $0x55]]  ;;  %v537_v29 = vld [vmem:[#allocation5 + $0x8] sm:$0xff] }
 0x3cc   : >> { %2041 = vrot.lane.b32.xlu1 %v2022_v36, %s4714_s20  ;;  %v2318_v61 = vmul.f32 %v2316_v43, %v6056_v59  ;;  %v2317_v62 = vmul.f32 %v2316_v43, %v6059_v51  ;;  %v2358_v14 = vmul.f32 %v2356_v30, %v6030_v23  ;;  %v2357_v36 = vmul.f32 %v2356_v30, %v6032_v13  ;;  %s4308_s1 = sld [smem:[#allocation10 + $0x54]] }
 0x3cd   : >> { %2039 = vrot.lane.b32.xlu0 %v2021_v42, %s4714_s20  ;;  %v2370_v42 = vstv %s4296_s23  ;;  %v2390_v2 = vstv %s4298_s2  ;;  %v2404_v32 = vstv %s4299_s3  ;;  %s4310_s18 = sld [smem:[#allocation10 + $0x52]] }
 0x3ce   : >> { %v2372_v8 = vmul.f32 %v2370_v42, %v6030_v23  ;;  %v2371_v46 = vmul.f32 %v2370_v42, %v6032_v13  ;;  %v2424_v27 = vstv %s4301_s10  ;;  %v2438_v48 = vstv %s4302_s11  ;;  %s4311_s23 = sld [smem:[#allocation10 + $0x51]] }
 0x3cf   : >> { %v2478_v7 = vstv %s4304_s26  ;;  %s513_s2 = sld [smem:[#allocation13 + %s4700_s25]] }
 0x3d0   : >> { %2045 = vrot.lane.b32.xlu1 %v2028_v40, %s4714_s20  ;;  %v2392_v40 = vmul.f32 %v2390_v2, %v6041_v49  ;;  %v2492_v54 = vstv %s4305_s4  ;;  %s6148_s3 = sld [smem:[#allocation10 + $0x8]] }
 0x3d1   : >> { %2043 = vrot.lane.b32.xlu0 %v2027_v58, %s4714_s20  ;;  %v2391_v58 = vmul.f32 %v2390_v2, %v6044_v11  ;;  %v2512_v10 = vstv %s4307_s17  ;;  %s6154_s10 = sld [smem:[#allocation10 + $0x5]] }
 0x3d2   : >> { %v2526_v52 = vstv %s4308_s1  ;;  %s6164_s11 = sld [smem:[#allocation10 + $0x2]] }
 0x3d3   : >> { %v2546_v38 = vstv %s4310_s18  ;;  %s6183_s26 = sld [smem:[#allocation10 + $0x23]] }
 0x3d4   : >> { %2115 = vrot.lane.b32.xlu1 %v2110_v24, %s4714_s20  ;;  %v2406_v24 = vmul.f32 %v2404_v32, %v6041_v49  ;;  %v2560_v12 = vstv %s4311_s23  ;;  %s6187_s4 = sld [smem:[#allocation14 + %s4700_s25]] }
 0x3d5   : >> { %2113 = vrot.lane.b32.xlu0 %v2109_v37, %s4714_s20  ;;  %v2405_v37 = vmul.f32 %v2404_v32, %v6044_v11  ;;  %v7291_v32 = vld [vmem:[#allocation31_spill] sm:$0xff]  ;;  %s6212_s17 = sld [smem:[#allocation10 + $0x20]] }
 0x3d6   : >> { %s4291_s1 = sld [smem:[#allocation10 + $0x1d]] }
 0x3d7   : >> { %s4294_s18 = sld [smem:[#allocation10 + $0x3e]] }
 0x3d8   : >> { %2129 = vrot.lane.b32.xlu1 %v2124_v4, %s4713_s12  ;;  %v2426_v4 = vmul.f32 %v2424_v27, %v6056_v59  ;;  %s4297_s23 = sld [smem:[#allocation10 + $0x3b]] }
 0x3d9   : >> { %2127 = vrot.lane.b32.xlu0 %v2123_v31, %s4713_s12  ;;  %v2425_v31 = vmul.f32 %v2424_v27, %v6059_v51 }
 0x3dc   : >> { %2149 = vrot.lane.b32.xlu1 %v2144_v18, %s4714_s20  ;;  %v2440_v18 = vmul.f32 %v2438_v48, %v6056_v59 }
 0x3dd   : >> { %2147 = vrot.lane.b32.xlu0 %v2143_v20, %s4714_s20  ;;  %v2439_v20 = vmul.f32 %v2438_v48, %v6059_v51 }
 0x3e0   : >> { %2163 = vrot.lane.b32.xlu1 %v2158_v22, %s4713_s12  ;;  %v2480_v22 = vmul.f32 %v2478_v7, %v6030_v23 }
 0x3e1   : >> { %2161 = vrot.lane.b32.xlu0 %v2157_v35, %s4713_s12  ;;  %v2479_v35 = vmul.f32 %v2478_v7, %v6032_v13 }
 0x3e4   : >> { %2183 = vrot.lane.b32.xlu1 %v2178_v50, %s4714_s20  ;;  %v2494_v50 = vmul.f32 %v2492_v54, %v6030_v23 }
 0x3e5   : >> { %2181 = vrot.lane.b32.xlu0 %v2177_v47, %s4714_s20  ;;  %v2493_v47 = vmul.f32 %v2492_v54, %v6032_v13  ;;  %v4498_v54 = vld [vmem:[#allocation2] sm:$0xff] }
 0x3e8   : >> { %2197 = vrot.lane.b32.xlu1 %v2192_v45, %s4713_s12  ;;  %v2514_v45 = vmul.f32 %v2512_v10, %v6041_v49 }
 0x3e9   : >> { %2195 = vrot.lane.b32.xlu0 %v2191_v9, %s4713_s12  ;;  %v2513_v9 = vmul.f32 %v2512_v10, %v6044_v11 }
 0x3ec   : >> { %2241 = vrot.lane.b32.xlu1 %v2236_v53, %s4714_s20  ;;  %v2528_v53 = vmul.f32 %v2526_v52, %v6041_v49 }
 0x3ed   : >> { %2239 = vrot.lane.b32.xlu0 %v2235_v34, %s4714_s20  ;;  %v2527_v34 = vmul.f32 %v2526_v52, %v6044_v11 }
 0x3f0   : >> { %2255 = vrot.lane.b32.xlu1 %v2250_v63, %s4713_s12  ;;  %v2548_v63 = vmul.f32 %v2546_v38, %v6056_v59 }
 0x3f1   : >> { %2253 = vrot.lane.b32.xlu0 %v2249_v56, %s4713_s12  ;;  %v2547_v56 = vmul.f32 %v2546_v38, %v6059_v51 }
 0x3f4   : >> { %2275 = vrot.lane.b32.xlu1 %v2270_v16, %s4714_s20  ;;  %v2562_v16 = vmul.f32 %v2560_v12, %v6056_v59 }
 0x3f5   : >> { %2273 = vrot.lane.b32.xlu0 %v2269_v33, %s4714_s20  ;;  %v2561_v33 = vmul.f32 %v2560_v12, %v6059_v51 }
 0x3f8   : >> { %2289 = vrot.lane.b32.xlu1 %v2284_v3, %s4713_s12  ;;  %v536_v3 = vld [vmem:[#allocation5] sm:$0xff] }
 0x3f9   : >> { %2287 = vrot.lane.b32.xlu0 %v2283_v41, %s4713_s12  ;;  %v7288_v41 = vld [vmem:[#allocation30_spill] sm:$0xff] }
 0x3fa   : >> { %v2060_v21 = vmul.f32 %v537_v29, %v7288_v41 }
 0x3fc   : >> { %2309 = vrot.lane.b32.xlu1 %v2304_v26, %s4714_s20 }
 0x3fd   : >> { %2307 = vrot.lane.b32.xlu0 %v2303_v60, %s4714_s20  ;;  %v7289_v60 = vld [vmem:[#allocation29_spill] sm:$0xff] }
 0x3fe   : >> { %v2059_v43 = vmul.f32 %v536_v3, %v7289_v60 }
 0x400   : >> { %2323 = vrot.lane.b32.xlu1 %v2318_v61, %s4713_s12  ;;  %v539_v61 = vld [vmem:[#allocation5 + $0x18] sm:$0xff] }
 0x401   : >> { %2321 = vrot.lane.b32.xlu0 %v2317_v62, %s4713_s12 }
 0x404   : >> { %2363 = vrot.lane.b32.xlu1 %v2358_v14, %s4714_s20  ;;  %v538_v14 = vld [vmem:[#allocation5 + $0x10] sm:$0xff] }
 0x405   : >> { %2361 = vrot.lane.b32.xlu0 %v2357_v36, %s4714_s20  ;;  %v2071_v36 = vstv %s513_s2  ;;  %s4300_s2 = sld [smem:[#allocation10 + $0x38]] }
 0x408   : >> { %2377 = vrot.lane.b32.xlu1 %v2372_v8, %s4713_s12 }
 0x409   : >> { %2375 = vrot.lane.b32.xlu0 %v2371_v46, %s4713_s12  ;;  %v7290_v46 = vld [vmem:[#allocation32_spill] sm:$0xff] }
 0x40a   : >> { %v2062_v2 = vmul.f32 %v539_v61, %v7290_v46 }
 0x40c   : >> { %2397 = vrot.lane.b32.xlu1 %v2392_v40, %s4714_s20 }
 0x40d   : >> { %2395 = vrot.lane.b32.xlu0 %v2391_v58, %s4714_s20 }
 0x410   : >> { %2411 = vrot.lane.b32.xlu1 %v2406_v24, %s4713_s12  ;;  %v2061_v24 = vmul.f32 %v538_v14, %v7291_v32 }
 0x411   : >> { %2409 = vrot.lane.b32.xlu0 %v2405_v37, %s4713_s12  ;;  %v541_v37 = vld [vmem:[#allocation5 + $0x28] sm:$0xff] }
 0x414   : >> { %2431 = vrot.lane.b32.xlu1 %v2426_v4, %s4714_s20 }
 0x415   : >> { %2429 = vrot.lane.b32.xlu0 %v2425_v31, %s4714_s20 }
 0x418   : >> { %2445 = vrot.lane.b32.xlu1 %v2440_v18, %s4713_s12 }
 0x419   : >> { %2443 = vrot.lane.b32.xlu0 %v2439_v20, %s4713_s12 }
 0x41c   : >> { %2485 = vrot.lane.b32.xlu1 %v2480_v22, %s4714_s20  ;;  %v7292_v22 = vld [vmem:[#allocation34_spill] sm:$0xff] }
 0x41d   : >> { %2483 = vrot.lane.b32.xlu0 %v2479_v35, %s4714_s20  ;;  %v2064_v35 = vmul.f32 %v541_v37, %v7292_v22 }
 0x420   : >> { %2499 = vrot.lane.b32.xlu1 %v2494_v50, %s4713_s12 }
 0x421   : >> { %2497 = vrot.lane.b32.xlu0 %v2493_v47, %s4713_s12 }
 0x424   : >> { %2519 = vrot.lane.b32.xlu1 %v2514_v45, %s4714_s20 }
 0x425   : >> { %2517 = vrot.lane.b32.xlu0 %v2513_v9, %s4714_s20 }
 0x428   : >> { %2533 = vrot.lane.b32.xlu1 %v2528_v53, %s4713_s12 }
 0x429   : >> { %2531 = vrot.lane.b32.xlu0 %v2527_v34, %s4713_s12 }
 0x42c   : >> { %2553 = vrot.lane.b32.xlu1 %v2548_v63, %s4714_s20 }
 0x42d   : >> { %2551 = vrot.lane.b32.xlu0 %v2547_v56, %s4714_s20  ;;  %v2104_v56 = vstv %s6148_s3  ;;  %s4303_s3 = sld [smem:[#allocation10 + $0x59]] }
 0x430   : >> { %2567 = vrot.lane.b32.xlu1 %v2562_v16, %s4713_s12  ;;  %v4499_v16 = vld [vmem:[#allocation2 + $0x18] sm:$0xff] }
 0x431   : >> { %2565 = vrot.lane.b32.xlu0 %v2561_v33, %s4713_s12 }
 0x43a   : >> { %v2038_v26 = vpop.permute.xlu1 %2037 }
 0x43b   : >> { %v2054_v62 = vadd.f32 %v2038_v26, %v5904_v17  ;;  %v2036_v30 = vpop.permute.xlu0 %2035  ;;  %v540_v17 = vld [vmem:[#allocation5 + $0x20] sm:$0xff] }
 0x43c   : >> { %v2053_v42 = vadd.f32 %v2036_v30, %v5907_v39  ;;  %v6156_v39 = vld [vmem:[#allocation2 + $0x8] sm:$0xff]  ;;  %v2106_v30 = vmul.f32 %v2104_v56, %v6030_v23 }
 0x43d   : >> { %v2066_v8 = vadd.f32 %v2060_v21, %v2054_v62  ;;  %v4500_v21 = vld [vmem:[#allocation2 + $0x10] sm:$0xff] }
 0x43e   : >> { %v2065_v40 = vadd.f32 %v2059_v43, %v2053_v42  ;;  %v2042_v58 = vpop.permute.xlu1 %2041 }
 0x43f   : >> { %v2073_v27 = vmul.f32 %v2071_v36, %v2066_v8  ;;  %v2056_v4 = vadd.f32 %v2042_v58, %v5916_v5  ;;  %v2040_v31 = vpop.permute.xlu0 %2039  ;;  %v7293_v5 = vld [vmem:[#allocation33_spill] sm:$0xff]  ;;  %v2105_v8 = vmul.f32 %v2104_v56, %v6032_v13 }
 0x440   : >> { %v2072_v48 = vmul.f32 %v2071_v36, %v2065_v40  ;;  %v2055_v18 = vadd.f32 %v2040_v31, %v5919_v25  ;;  %v2063_v45 = vmul.f32 %v540_v17, %v7293_v5 }
 0x441   : >> { %v2079_v20 = vsub.f32 %v6156_v39, %v2073_v27  ;;  %v2068_v7 = vadd.f32 %v2062_v2, %v2056_v4  ;;  %v2136_v2 = vstv %s6154_s10  ;;  %s4306_s10 = sld [smem:[#allocation10 + $0x56]] }
 0x442   : >> { %v2078_v50 = vsub.f32 %v4498_v54, %v2072_v48  ;;  %v2067_v47 = vadd.f32 %v2061_v24, %v2055_v18  ;;  %v2046_v10 = vpop.permute.xlu1 %2045 }
 0x443   : >> { %v2085_v9 = vmax.f32 %v2079_v20, 0.0  ;;  %v2075_v52 = vmul.f32 %v2071_v36, %v2068_v7  ;;  %v2058_v25 = vadd.f32 %v2046_v10, %v5952_v57  ;;  %v2044_v53 = vpop.permute.xlu0 %2043 }
 0x444   : >> { %v2084_v34 = vmax.f32 %v2078_v50, 0.0  ;;  %v2074_v38 = vmul.f32 %v2071_v36, %v2067_v47  ;;  %v2057_v63 = vadd.f32 %v2044_v53, %v5955_v6  ;;  %v2137_v47 = vmul.f32 %v2136_v2, %v6044_v11 }
 0x445   : >> { %v2091_v12 = vmin.f32 %v2085_v9, 1.0  ;;  %v2081_v33 = vsub.f32 %v4499_v16, %v2075_v52  ;;  %v2070_v29 = vadd.f32 %v2064_v35, %v2058_v25  ;;  %v2170_v9 = vstv %s6164_s11  ;;  %s4309_s11 = sld [smem:[#allocation10 + $0x53]] }
 0x446   : >> { %v2090_v3 = vmin.f32 %v2084_v34, 1.0  ;;  %v2080_v26 = vsub.f32 %v4500_v21, %v2074_v38  ;;  %v2069_v43 = vadd.f32 %v2063_v45, %v2057_v63  ;;  %v2116_v61 = vpop.permute.xlu1 %2115 }
 0x447   : >> { %3988 = vst.msk [vmem:[#allocation2 + $0x8] sm:$0xff] %vm281_vm0, %v2091_v12  ;;  %v2087_v57 = vmax.f32 %v2081_v33, 0.0  ;;  %v2077_v62 = vmul.f32 %v2071_v36, %v2070_v29  ;;  %v2114_v6 = vpop.permute.xlu0 %2113  ;;  %v2120_v24 = vadd.f32 %v2116_v61, %v2106_v30  ;;  %v3586_v52 = vmul.f32 2.0, %v2091_v12 }
 0x448   : >> { %3987 = vst.msk [vmem:[#allocation2] sm:$0xff] %vm281_vm0, %v2090_v3  ;;  %v2086_v14 = vmax.f32 %v2080_v26, 0.0  ;;  %v2076_v42 = vmul.f32 %v2071_v36, %v2069_v43  ;;  %v2119_v4 = vadd.f32 %v2114_v6, %v2105_v8  ;;  %v3585_v17 = vmul.f32 2.0, %v2090_v3 }
 0x449   : >> { %v2093_v40 = vmin.f32 %v2087_v57, 1.0  ;;  %v2083_v58 = vsub.f32 %v5947_v55, %v2077_v62  ;;  %v2138_v36 = vmul.f32 %v2136_v2, %v6041_v49  ;;  %v6191_v26 = vsub.f32 %v3586_v52, %v6156_v39 }
 0x44a   : >> { %v2092_v37 = vmin.f32 %v2086_v14, 1.0  ;;  %v2082_v27 = vsub.f32 %v5949_v0, %v2076_v42  ;;  %v2130_v31 = vpop.permute.xlu1 %2129  ;;  %v6180_v63 = vsub.f32 %v3585_v17, %v4498_v54  ;;  %v2171_v8 = vmul.f32 %v2170_v9, %v6059_v51 }
 0x44b   : >> { %3990 = vst.msk [vmem:[#allocation2 + $0x18] sm:$0xff] %vm281_vm0, %v2093_v40  ;;  %v2089_v48 = vmax.f32 %v2083_v58, 0.0  ;;  %v2134_v18 = vadd.f32 %v2130_v31, %v2120_v24  ;;  %v2128_v20 = vpop.permute.xlu0 %2127  ;;  %v3588_v56 = vmul.f32 2.0, %v2093_v40  ;;  %v6209_v31 = vstv %s6187_s4 }
 0x44c   : >> { %v3587_v7 = vmul.f32 2.0, %v2092_v37  ;;  %3989 = vst.msk [vmem:[#allocation2 + $0x10] sm:$0xff] %vm281_vm0, %v2092_v37  ;;  %v2088_v35 = vmax.f32 %v2082_v27, 0.0  ;;  %v2133_v50 = vadd.f32 %v2128_v20, %v2119_v4  ;;  %v3607_v42 = vmul.f32 0.70710677, %v6180_v63 }
 0x44d   : >> { %v2095_v10 = vmin.f32 %v2089_v48, 1.0  ;;  %v2140_v45 = vadd.f32 %v2138_v36, %v2134_v18  ;;  %v6197_v62 = vsub.f32 %v3588_v56, %v4499_v16  ;;  %v3608_v37 = vmul.f32 0.70710677, %v6191_v26 }
 0x44e   : >> { %v6178_v25 = vsub.f32 %v3587_v7, %v4500_v21  ;;  %v2094_v53 = vmin.f32 %v2088_v35, 1.0  ;;  %v2150_v34 = vpop.permute.xlu1 %2149  ;;  %v2139_v38 = vadd.f32 %v2137_v47, %v2133_v50  ;;  %v2172_v21 = vmul.f32 %v2170_v9, %v6056_v59 }
 0x44f   : >> { %v3590_v33 = vmul.f32 2.0, %v2095_v10  ;;  %3992 = vst.msk [vmem:[#allocation2 + $0x28] sm:$0xff] %vm281_vm0, %v2095_v10  ;;  %v2148_v29 = vpop.permute.xlu0 %2147  ;;  %v2154_v12 = vadd.f32 %v2150_v34, %v2140_v45  ;;  %v2230_v17 = vstv %s6183_s26  ;;  %v3617_v20 = vmul.f32 0.4082483, %v6180_v63  ;;  %s4313_s26 = sld [smem:[#allocation10 + $0x10]] }
 0x450   : >> { %v3589_v3 = vmul.f32 2.0, %v2094_v53  ;;  %3991 = vst.msk [vmem:[#allocation2 + $0x20] sm:$0xff] %vm281_vm0, %v2094_v53  ;;  %v2153_v43 = vadd.f32 %v2148_v29, %v2139_v38  ;;  %v3609_v57 = vmul.f32 4.9995997e-17, %v6178_v25  ;;  %v3619_v36 = vmul.f32 -0.8164966, %v6178_v25 }
 0x451   : >> { %v6200_v30 = vsub.f32 %v3590_v33, %v5947_v55  ;;  %v3610_v55 = vmul.f32 4.9995997e-17, %v6197_v62  ;;  %v3618_v47 = vmul.f32 0.4082483, %v6191_v26  ;;  %v3620_v10 = vmul.f32 -0.8164966, %v6197_v62 }
 0x452   : >> { %v6194_v54 = vsub.f32 %v3589_v3, %v5949_v0  ;;  %v2164_v61 = vpop.permute.xlu1 %2163  ;;  %v3611_v2 = vadd.f32 %v3609_v57, %v3607_v42  ;;  %v3621_v34 = vadd.f32 %v3619_v36, %v3617_v20  ;;  %v3597_v38 = vmul.f32 0.57735026, %v6180_v63 }
 0x453   : >> { %v2168_v6 = vadd.f32 %v2164_v61, %v2154_v12  ;;  %v2162_v14 = vpop.permute.xlu0 %2161  ;;  %v3614_v27 = vmul.f32 -0.70710677, %v6200_v30  ;;  %v3612_v18 = vadd.f32 %v3610_v55, %v3608_v37  ;;  %v3624_v45 = vmul.f32 0.4082483, %v6200_v30 }
 0x454   : >> { %v2167_v39 = vadd.f32 %v2162_v14, %v2153_v43  ;;  %v3613_v24 = vmul.f32 -0.70710677, %v6194_v54  ;;  %v3623_v7 = vmul.f32 0.4082483, %v6194_v54  ;;  %v3622_v33 = vadd.f32 %v3620_v10, %v3618_v47 }
 0x455   : >> { %v2174_v0 = vadd.f32 %v2172_v21, %v2168_v6  ;;  %v6222_v53 = vadd.f32 %v3614_v27, %v3612_v18  ;;  %v3599_v29 = vmul.f32 0.57735026, %v6178_v25  ;;  %v3603_v3 = vmul.f32 0.57735026, %v6194_v54 }
 0x456   : >> { %v2184_v40 = vpop.permute.xlu1 %2183  ;;  %v2173_v58 = vadd.f32 %v2171_v8, %v2167_v39  ;;  %v6214_v48 = vadd.f32 %v3613_v24, %v3611_v2  ;;  %v6228_v21 = vadd.f32 %v3623_v7, %v3621_v34  ;;  %v3598_v43 = vmul.f32 0.57735026, %v6191_v26 }
 0x457   : >> { %v2182_v16 = vpop.permute.xlu0 %2181  ;;  %v2188_v4 = vadd.f32 %v2184_v40, %v2174_v0  ;;  %v3600_v61 = vmul.f32 0.57735026, %v6197_v62  ;;  %v6233_v14 = vadd.f32 %v3624_v45, %v3622_v33  ;;  %v3601_v42 = vadd.f32 %v3599_v29, %v3597_v38 }
 0x458   : >> { %v2187_v35 = vadd.f32 %v2182_v16, %v2173_v58  ;;  %v3604_v39 = vmul.f32 0.57735026, %v6200_v30  ;;  %v2232_v8 = vmul.f32 %v2230_v17, %v6030_v23  ;;  %v2231_v40 = vmul.f32 %v2230_v17, %v6032_v13 }
 0x459   : >> { %v3602_v2 = vadd.f32 %v3600_v61, %v3598_v43  ;;  %v2262_v58 = vstv %s6212_s17  ;;  %v6241_v24 = vadd.f32 %v3603_v3, %v3601_v42  ;;  %v2296_v10 = vstv %s4291_s1  ;;  %s4314_s17 = sld [smem:[#allocation10 + $0xf]] }
 0x45a   : >> { %v2198_v50 = vpop.permute.xlu1 %2197  ;;  %v2264_v20 = vmul.f32 %v2262_v58, %v6041_v49  ;;  %v2263_v7 = vmul.f32 %v2262_v58, %v6044_v11  ;;  %v2297_v29 = vmul.f32 %v2296_v10, %v6059_v51  ;;  %s4316_s1 = sld [smem:[#allocation10 + $0xd]] }
 0x45b   : >> { %v2202_v9 = vadd.f32 %v2198_v50, %v2188_v4  ;;  %v2196_v52 = vpop.permute.xlu0 %2195  ;;  %v6243_v37 = vadd.f32 %v3604_v39, %v3602_v2  ;;  %v2352_v2 = vstv %s4294_s18  ;;  %s4317_s18 = sld [smem:[#allocation10 + $0xc]] }
 0x45c   : >> { %v2201_v56 = vadd.f32 %v2196_v52, %v2187_v35 }
 0x45d   : >> { %v2207_v12 = vmul.f32 %v6209_v31, %v2202_v9 }
 0x45e   : >> { %v2206_v57 = vmul.f32 %v6209_v31, %v2201_v56  ;;  %v2242_v6 = vpop.permute.xlu1 %2241  ;;  %v2298_v56 = vmul.f32 %v2296_v10, %v6056_v59 }
 0x45f   : >> { %v2240_v0 = vpop.permute.xlu0 %2239  ;;  %2212 = vrot.lane.b32.xlu1 %v2207_v12, %s4715_s27  ;;  %v2246_v16 = vadd.f32 %v2242_v6, %v2232_v8 }
 0x460   : >> { %2210 = vrot.lane.b32.xlu0 %v2206_v57, %s4715_s27  ;;  %v2245_v55 = vadd.f32 %v2240_v0, %v2231_v40 }
 0x462   : >> { %v2256_v27 = vpop.permute.xlu1 %2255 }
 0x463   : >> { %v2260_v4 = vadd.f32 %v2256_v27, %v2246_v16  ;;  %v2254_v18 = vpop.permute.xlu0 %2253 }
 0x464   : >> { %v2259_v36 = vadd.f32 %v2254_v18, %v2245_v55  ;;  %v2354_v55 = vmul.f32 %v2352_v2, %v6030_v23  ;;  %v2384_v18 = vstv %s4297_s23  ;;  %s4319_s23 = sld [smem:[#allocation10 + $0xa]] }
 0x465   : >> { %v2266_v35 = vadd.f32 %v2264_v20, %v2260_v4  ;;  %v2353_v4 = vmul.f32 %v2352_v2, %v6032_v13  ;;  %v2385_v10 = vmul.f32 %v2384_v18, %v6044_v11 }
 0x466   : >> { %v2276_v17 = vpop.permute.xlu1 %2275  ;;  %v2265_v50 = vadd.f32 %v2263_v7, %v2259_v36 }
 0x467   : >> { %v2274_v47 = vpop.permute.xlu0 %2273  ;;  %v2280_v45 = vadd.f32 %v2276_v17, %v2266_v35 }
 0x468   : >> { %v2279_v9 = vadd.f32 %v2274_v47, %v2265_v50  ;;  %v2386_v50 = vmul.f32 %v2384_v18, %v6041_v49 }
 0x46a   : >> { %v2290_v52 = vpop.permute.xlu1 %2289 }
 0x46b   : >> { %v2294_v34 = vadd.f32 %v2290_v52, %v2280_v45  ;;  %v2288_v38 = vpop.permute.xlu0 %2287 }
 0x46c   : >> { %v2293_v33 = vadd.f32 %v2288_v38, %v2279_v9  ;;  %v2418_v38 = vstv %s4300_s2  ;;  %s4320_s2 = sld [smem:[#allocation10 + $0x9]] }
 0x46d   : >> { %v2300_v3 = vadd.f32 %v2298_v56, %v2294_v34 }
 0x46e   : >> { %v2310_v12 = vpop.permute.xlu1 %2309  ;;  %v2299_v43 = vadd.f32 %v2297_v29, %v2293_v33 }
 0x46f   : >> { %v2308_v61 = vpop.permute.xlu0 %2307  ;;  %v2314_v57 = vadd.f32 %v2310_v12, %v2300_v3 }
 0x470   : >> { %v2313_v6 = vadd.f32 %v2308_v61, %v2299_v43  ;;  %v2420_v43 = vmul.f32 %v2418_v38, %v6056_v59 }
 0x472   : >> { %v2324_v42 = vpop.permute.xlu1 %2323 }
 0x473   : >> { %v2328_v39 = vadd.f32 %v2324_v42, %v2314_v57  ;;  %v2322_v8 = vpop.permute.xlu0 %2321  ;;  %v2419_v57 = vmul.f32 %v2418_v38, %v6059_v51 }
 0x474   : >> { %v2327_v0 = vadd.f32 %v2322_v8, %v2313_v6 }
 0x475   : >> { %v2332_v40 = vmul.f32 %v2328_v39, %v6209_v31 }
 0x476   : >> { %v2331_v58 = vmul.f32 %v2327_v0, %v6209_v31  ;;  %v2364_v16 = vpop.permute.xlu1 %2363 }
 0x477   : >> { %v2362_v27 = vpop.permute.xlu0 %2361  ;;  %2337 = vrot.lane.b32.xlu1 %v2332_v40, %s4715_s27  ;;  %v2368_v20 = vadd.f32 %v2364_v16, %v2354_v55 }
 0x478   : >> { %2335 = vrot.lane.b32.xlu0 %v2331_v58, %s4715_s27  ;;  %v2367_v36 = vadd.f32 %v2362_v27, %v2353_v4  ;;  %v2474_v27 = vstv %s4303_s3  ;;  %s516_s3 = sld [smem:[#allocation11 + %s4700_s25]] }
 0x47a   : >> { %v2378_v7 = vpop.permute.xlu1 %2377 }
 0x47b   : >> { %v2382_v35 = vadd.f32 %v2378_v7, %v2368_v20  ;;  %v2376_v17 = vpop.permute.xlu0 %2375 }
 0x47c   : >> { %v2381_v47 = vadd.f32 %v2376_v17, %v2367_v36  ;;  %v2476_v36 = vmul.f32 %v2474_v27, %v6030_v23  ;;  %v2506_v17 = vstv %s4306_s10 }
 0x47d   : >> { %v2388_v45 = vadd.f32 %v2386_v50, %v2382_v35  ;;  %v2475_v35 = vmul.f32 %v2474_v27, %v6032_v13  ;;  %v2507_v38 = vmul.f32 %v2506_v17, %v6044_v11 }
 0x47e   : >> { %v2398_v9 = vpop.permute.xlu1 %2397  ;;  %v2387_v52 = vadd.f32 %v2385_v10, %v2381_v47  ;;  %s2096_s10 = smul.f32 %s516_s3, %s6187_s4  ;;  %s4312_s4 = sld [smem:[#allocation10 + $0x11]] }
 0x47f   : >> { %v2396_v34 = vpop.permute.xlu0 %2395  ;;  %v2402_v56 = vadd.f32 %v2398_v9, %v2388_v45  ;;  %s4328_s3 = sld [smem:[#allocation10 + $0x25]] }
 0x480   : >> { %v2401_v33 = vadd.f32 %v2396_v34, %v2387_v52  ;;  %v2508_v52 = vmul.f32 %v2506_v17, %v6041_v49 }
 0x482   : >> { %v2412_v29 = vpop.permute.xlu1 %2411 }
 0x483   : >> { %v2416_v3 = vadd.f32 %v2412_v29, %v2402_v56  ;;  %v2410_v12 = vpop.permute.xlu0 %2409 }
 0x484   : >> { %v2415_v61 = vadd.f32 %v2410_v12, %v2401_v33 }
 0x485   : >> { %v2422_v6 = vadd.f32 %v2420_v43, %v2416_v3  ;;  %v2540_v3 = vstv %s4309_s11  ;;  %s2218_s11 = ssub.f32 0.0, %s2096_s10 }
 0x486   : >> { %v2432_v42 = vpop.permute.xlu1 %2431  ;;  %v2421_v39 = vadd.f32 %v2419_v57, %v2415_v61 }
 0x487   : >> { %v2430_v8 = vpop.permute.xlu0 %2429  ;;  %v2436_v0 = vadd.f32 %v2432_v42, %v2422_v6  ;;  %v2542_v6 = vmul.f32 %v2540_v3, %v6056_v59 }
 0x488   : >> { %v2435_v2 = vadd.f32 %v2430_v8, %v2421_v39  ;;  %v2541_v39 = vmul.f32 %v2540_v3, %v6059_v51  ;;  %v6273_v51 = vld [vmem:[#allocation7 + $0x18] sm:$0xff] }
 0x48a   : >> { %v2446_v40 = vpop.permute.xlu1 %2445 }
 0x48b   : >> { %v2450_v58 = vadd.f32 %v2446_v40, %v2436_v0  ;;  %v2444_v16 = vpop.permute.xlu0 %2443 }
 0x48c   : >> { %v2449_v55 = vadd.f32 %v2444_v16, %v2435_v2 }
 0x48d   : >> { %v2454_v4 = vmul.f32 %v2450_v58, %v6209_v31 }
 0x48e   : >> { %v2453_v18 = vmul.f32 %v2449_v55, %v6209_v31  ;;  %v2486_v20 = vpop.permute.xlu1 %2485 }
 0x48f   : >> { %v2484_v7 = vpop.permute.xlu0 %2483  ;;  %2459 = vrot.lane.b32.xlu1 %v2454_v4, %s4715_s27  ;;  %v2490_v50 = vadd.f32 %v2486_v20, %v2476_v36  ;;  %v2607_v20 = vstv %s4313_s26  ;;  %s4315_s26 = sld [smem:[#allocation10 + $0xe]] }
 0x490   : >> { %2457 = vrot.lane.b32.xlu0 %v2453_v18, %s4715_s27  ;;  %v2489_v47 = vadd.f32 %v2484_v7, %v2475_v35  ;;  %v6270_v18 = vld [vmem:[#allocation7 + $0x20] sm:$0xff]  ;;  %v2608_v7 = vmul.f32 %v2607_v20, %v6273_v51  ;;  %v2621_v35 = vstv %s4314_s17  ;;  %s4318_s17 = sld [smem:[#allocation10 + $0xb]] }
 0x491   : >> { %v2609_v36 = vmul.f32 %v2607_v20, %v6270_v18  ;;  %v2623_v17 = vmul.f32 %v2621_v35, %v6270_v18 }
 0x492   : >> { %v2500_v10 = vpop.permute.xlu1 %2499 }
 0x493   : >> { %v2504_v45 = vadd.f32 %v2500_v10, %v2490_v50  ;;  %v2498_v9 = vpop.permute.xlu0 %2497  ;;  %v6282_v50 = vld [vmem:[#allocation7 + $0x21] sm:$0xff]  ;;  %v2641_v10 = vstv %s4316_s1  ;;  %s4322_s1 = sld [smem:[#allocation10 + $0x2b]] }
 0x494   : >> { %v2503_v34 = vadd.f32 %v2498_v9, %v2489_v47  ;;  %v2622_v47 = vmul.f32 %v2621_v35, %v6273_v51  ;;  %v2643_v9 = vmul.f32 %v2641_v10, %v6282_v50 }
 0x495   : >> { %v2510_v23 = vadd.f32 %v2508_v52, %v2504_v45  ;;  %v6285_v45 = vld [vmem:[#allocation7 + $0x19] sm:$0xff] }
 0x496   : >> { %v2520_v56 = vpop.permute.xlu1 %2519  ;;  %v2509_v33 = vadd.f32 %v2507_v38, %v2503_v34  ;;  %v2642_v52 = vmul.f32 %v2641_v10, %v6285_v45  ;;  %v2655_v34 = vstv %s4317_s18  ;;  %s4323_s18 = sld [smem:[#allocation10 + $0x2a]] }
 0x497   : >> { %v2518_v29 = vpop.permute.xlu0 %2517  ;;  %v2524_v13 = vadd.f32 %v2520_v56, %v2510_v23  ;;  %v2657_v38 = vmul.f32 %v2655_v34, %v6282_v50  ;;  %v2656_v23 = vmul.f32 %v2655_v34, %v6285_v45  ;;  %v2675_v56 = vstv %s4319_s23  ;;  %s4325_s23 = sld [smem:[#allocation10 + $0x28]] }
 0x498   : >> { %v2523_v12 = vadd.f32 %v2518_v29, %v2509_v33  ;;  %v6295_v33 = vld [vmem:[#allocation7 + $0x1a] sm:$0xff]  ;;  %v6299_v29 = vld [vmem:[#allocation7 + $0x22] sm:$0xff] }
 0x499   : >> { %v2677_v3 = vmul.f32 %v6299_v29, %v2675_v56 }
 0x49a   : >> { %v2534_v43 = vpop.permute.xlu1 %2533 }
 0x49b   : >> { %v2538_v61 = vadd.f32 %v2534_v43, %v2524_v13  ;;  %v2532_v57 = vpop.permute.xlu0 %2531  ;;  %v2676_v13 = vmul.f32 %v2675_v56, %v6295_v33 }
 0x49c   : >> { %v2537_v42 = vadd.f32 %v2532_v57, %v2523_v12  ;;  %v2689_v12 = vstv %s4320_s2  ;;  %v2204_v57 = vld [vmem:[#allocation6 + $0x9] sm:$0xff]  ;;  %s4326_s2 = sld [smem:[#allocation10 + $0x27]] }
 0x49d   : >> { %v2544_v8 = vadd.f32 %v2542_v6, %v2538_v61  ;;  %v2691_v43 = vmul.f32 %v6299_v29, %v2689_v12  ;;  %v2690_v61 = vmul.f32 %v2689_v12, %v6295_v33  ;;  %v2203_v6 = vld [vmem:[#allocation6 + $0x1] sm:$0xff] }
 0x49e   : >> { %v2554_v49 = vpop.permute.xlu1 %2553  ;;  %v2543_v0 = vadd.f32 %v2541_v39, %v2537_v42  ;;  %v6311_v39 = vstv %s2218_s11  ;;  %s4321_s11 = sld [smem:[#allocation10 + $0x2c]] }
 0x49f   : >> { %v2552_v11 = vpop.permute.xlu0 %2551  ;;  %v2558_v2 = vadd.f32 %v2554_v49, %v2544_v8 }
 0x4a0   : >> { %v2557_v40 = vadd.f32 %v2552_v11, %v2543_v0  ;;  %v6313_v0 = vstv %s2096_s10  ;;  %s4329_s10 = sld [smem:[#allocation10 + $0x24]] }
 0x4a2   : >> { %v2568_v58 = vpop.permute.xlu1 %2567 }
 0x4a3   : >> { %v2572_v16 = vadd.f32 %v2568_v58, %v2558_v2  ;;  %v2566_v55 = vpop.permute.xlu0 %2565 }
 0x4a4   : >> { %v2571_v27 = vadd.f32 %v2566_v55, %v2557_v40 }
 0x4a5   : >> { %v2576_v4 = vmul.f32 %v2572_v16, %v6209_v31 }
 0x4a6   : >> { %v2575_v59 = vmul.f32 %v2571_v27, %v6209_v31 }
 0x4a7   : >> { %2581 = vrot.lane.b32.xlu1 %v2576_v4, %s4715_s27  ;;  %v2330_v4 = vld [vmem:[#allocation6 + $0x51] sm:$0xff] }
 0x4a8   : >> { %2579 = vrot.lane.b32.xlu0 %v2575_v59, %s4715_s27  ;;  %v2329_v59 = vld [vmem:[#allocation6 + $0x49] sm:$0xff] }
 0x4ab   : >> { %2614 = vrot.lane.b32.xlu1 %v2609_v36, %s4714_s20 }
 0x4ac   : >> { %2612 = vrot.lane.b32.xlu0 %v2608_v7, %s4714_s20 }
 0x4af   : >> { %2628 = vrot.lane.b32.xlu1 %v2623_v17, %s4713_s12 }
 0x4b0   : >> { %2626 = vrot.lane.b32.xlu0 %v2622_v47, %s4713_s12 }
 0x4b3   : >> { %2648 = vrot.lane.b32.xlu1 %v2643_v9, %s4714_s20 }
 0x4b4   : >> { %2646 = vrot.lane.b32.xlu0 %v2642_v52, %s4714_s20 }
 0x4b7   : >> { %2662 = vrot.lane.b32.xlu1 %v2657_v38, %s4713_s12  ;;  %v2452_v38 = vld [vmem:[#allocation6 + $0x99] sm:$0xff] }
 0x4b8   : >> { %2660 = vrot.lane.b32.xlu0 %v2656_v23, %s4713_s12  ;;  %v2451_v23 = vld [vmem:[#allocation6 + $0x91] sm:$0xff] }
 0x4bb   : >> { %2682 = vrot.lane.b32.xlu1 %v2677_v3, %s4714_s20 }
 0x4bc   : >> { %2680 = vrot.lane.b32.xlu0 %v2676_v13, %s4714_s20 }
 0x4bf   : >> { %2696 = vrot.lane.b32.xlu1 %v2691_v43, %s4713_s12 }
 0x4c0   : >> { %2694 = vrot.lane.b32.xlu0 %v2690_v61, %s4713_s12 }
 0x4d1   : >> { %v2213_v42 = vpop.permute.xlu1 %2212 }
 0x4d2   : >> { %v2217_v8 = vadd.f32 %v2213_v42, %v2204_v57  ;;  %v2211_v49 = vpop.permute.xlu0 %2210 }
 0x4d3   : >> { %v2216_v11 = vadd.f32 %v2211_v49, %v2203_v6  ;;  %v2574_v49 = vld [vmem:[#allocation6 + $0xe1] sm:$0xff] }
 0x4d4   : >> { %v2221_v2 = vmax.f32 %v6311_v39, %v2217_v8 }
 0x4d5   : >> { %v2220_v40 = vmax.f32 %v6311_v39, %v2216_v11 }
 0x4d6   : >> { %v2224_v58 = vmin.f32 %v6313_v0, %v2221_v2 }
 0x4d7   : >> { %v2223_v16 = vmin.f32 %v6313_v0, %v2220_v40 }
 0x4d8   : >> { %v2226_v55 = vsub.f32 %v2217_v8, %v2224_v58 }
 0x4d9   : >> { %v2225_v27 = vsub.f32 %v2216_v11, %v2223_v16  ;;  %v2573_v11 = vld [vmem:[#allocation6 + $0xd9] sm:$0xff] }
 0x4da   : >> { %2228 = vst.msk [vmem:[#allocation6 + $0x9] sm:$0xff] %vm464_vm5, %v2226_v55  ;;  %v2603_v55 = vstv %s4312_s4  ;;  %s4324_s4 = sld [smem:[#allocation10 + $0x29]] }
 0x4db   : >> { %2227 = vst.msk [vmem:[#allocation6 + $0x1] sm:$0xff] %vm464_vm5, %v2225_v27 }
 0x4e9   : >> { %v2338_v20 = vpop.permute.xlu1 %2337 }
 0x4ea   : >> { %v2342_v36 = vadd.f32 %v2338_v20, %v2330_v4  ;;  %v2336_v7 = vpop.permute.xlu0 %2335 }
 0x4eb   : >> { %v2341_v35 = vadd.f32 %v2336_v7, %v2329_v59 }
 0x4ec   : >> { %v2344_v17 = vmax.f32 %v6311_v39, %v2342_v36 }
 0x4ed   : >> { %v2343_v47 = vmax.f32 %v6311_v39, %v2341_v35 }
 0x4ee   : >> { %v2346_v10 = vmin.f32 %v6313_v0, %v2344_v17  ;;  %v2604_v17 = vmul.f32 %v2603_v55, %v6273_v51 }
 0x4ef   : >> { %v2345_v9 = vmin.f32 %v6313_v0, %v2343_v47  ;;  %v2635_v47 = vstv %s4315_s26  ;;  %s4327_s26 = sld [smem:[#allocation10 + $0x26]] }
 0x4f0   : >> { %v2348_v52 = vsub.f32 %v2342_v36, %v2346_v10  ;;  %v2605_v36 = vmul.f32 %v2603_v55, %v6270_v18 }
 0x4f1   : >> { %v2347_v34 = vsub.f32 %v2341_v35, %v2345_v9 }
 0x4f2   : >> { %2350 = vst.msk [vmem:[#allocation6 + $0x51] sm:$0xff] %vm464_vm5, %v2348_v52 }
 0x4f3   : >> { %2349 = vst.msk [vmem:[#allocation6 + $0x49] sm:$0xff] %vm464_vm5, %v2347_v34 }
 0x501   : >> { %v2460_v56 = vpop.permute.xlu1 %2459 }
 0x502   : >> { %v2464_v3 = vadd.f32 %v2460_v56, %v2452_v38  ;;  %v2458_v13 = vpop.permute.xlu0 %2457 }
 0x503   : >> { %v2463_v12 = vadd.f32 %v2458_v13, %v2451_v23 }
 0x504   : >> { %v2466_v43 = vmax.f32 %v6311_v39, %v2464_v3 }
 0x505   : >> { %v2465_v61 = vmax.f32 %v6311_v39, %v2463_v12 }
 0x506   : >> { %v2468_v57 = vmin.f32 %v6313_v0, %v2466_v43 }
 0x507   : >> { %v2467_v6 = vmin.f32 %v6313_v0, %v2465_v61 }
 0x508   : >> { %v2470_v42 = vsub.f32 %v2464_v3, %v2468_v57  ;;  %v2637_v3 = vmul.f32 %v2635_v47, %v6282_v50 }
 0x509   : >> { %v2469_v8 = vsub.f32 %v2463_v12, %v2467_v6  ;;  %v2636_v12 = vmul.f32 %v2635_v47, %v6285_v45 }
 0x50a   : >> { %2472 = vst.msk [vmem:[#allocation6 + $0x99] sm:$0xff] %vm464_vm5, %v2470_v42  ;;  %v2669_v42 = vstv %s4318_s17  ;;  %s4331_s17 = sld [smem:[#allocation10 + $0x46]] }
 0x50b   : >> { %2471 = vst.msk [vmem:[#allocation6 + $0x91] sm:$0xff] %vm464_vm5, %v2469_v8  ;;  %v2670_v55 = vmul.f32 %v2669_v42, %v6295_v33 }
 0x519   : >> { %v2582_v2 = vpop.permute.xlu1 %2581 }
 0x51a   : >> { %v2586_v40 = vadd.f32 %v2582_v2, %v2574_v49  ;;  %v2580_v58 = vpop.permute.xlu0 %2579 }
 0x51b   : >> { %v2585_v16 = vadd.f32 %v2580_v58, %v2573_v11  ;;  %v2671_v58 = vmul.f32 %v6299_v29, %v2669_v42 }
 0x51c   : >> { %v2588_v27 = vmax.f32 %v6311_v39, %v2586_v40 }
 0x51d   : >> { %v2587_v4 = vmax.f32 %v6311_v39, %v2585_v16  ;;  %v2615_v59 = vpop.permute.xlu1 %2614 }
 0x51e   : >> { %v2590_v20 = vmin.f32 %v6313_v0, %v2588_v27  ;;  %v2613_v7 = vpop.permute.xlu0 %2612  ;;  %v2619_v9 = vadd.f32 %v2615_v59, %v2605_v36 }
 0x51f   : >> { %v2589_v35 = vmin.f32 %v6313_v0, %v2587_v4  ;;  %v2618_v34 = vadd.f32 %v2613_v7, %v2604_v17 }
 0x520   : >> { %v2592_v10 = vsub.f32 %v2586_v40, %v2590_v20 }
 0x521   : >> { %v2591_v52 = vsub.f32 %v2585_v16, %v2589_v35  ;;  %v2629_v38 = vpop.permute.xlu1 %2628 }
 0x522   : >> { %2594 = vst.msk [vmem:[#allocation6 + $0xe1] sm:$0xff] %vm464_vm5, %v2592_v10  ;;  %v2633_v23 = vadd.f32 %v2629_v38, %v2619_v9  ;;  %v2627_v56 = vpop.permute.xlu0 %2626 }
 0x523   : >> { %2593 = vst.msk [vmem:[#allocation6 + $0xd9] sm:$0xff] %vm464_vm5, %v2591_v52  ;;  %v2632_v13 = vadd.f32 %v2627_v56, %v2618_v34  ;;  %v2729_v34 = vstv %s4322_s1  ;;  %v2743_v56 = vstv %s4323_s18  ;;  %s4332_s1 = sld [smem:[#allocation10 + $0x45]] }
 0x524   : >> { %v2639_v43 = vadd.f32 %v2637_v3, %v2633_v23  ;;  %v2731_v38 = vmul.f32 %v2729_v34, %v6270_v18  ;;  %v2730_v23 = vmul.f32 %v2729_v34, %v6273_v51  ;;  %v2745_v3 = vmul.f32 %v2743_v56, %v6270_v18  ;;  %s4334_s18 = sld [smem:[#allocation10 + $0x43]] }
 0x525   : >> { %v2649_v61 = vpop.permute.xlu1 %2648  ;;  %v2638_v57 = vadd.f32 %v2636_v12, %v2632_v13  ;;  %v2744_v13 = vmul.f32 %v2743_v56, %v6273_v51  ;;  %v2763_v12 = vstv %s4325_s23  ;;  %s4335_s23 = sld [smem:[#allocation10 + $0x42]] }
 0x526   : >> { %v2647_v6 = vpop.permute.xlu0 %2646  ;;  %v2653_v8 = vadd.f32 %v2649_v61, %v2639_v43  ;;  %v2765_v43 = vmul.f32 %v2763_v12, %v6282_v50  ;;  %v2764_v61 = vmul.f32 %v2763_v12, %v6285_v45 }
 0x527   : >> { %v2652_v49 = vadd.f32 %v2647_v6, %v2638_v57  ;;  %v2777_v57 = vstv %s4326_s2  ;;  %s4337_s2 = sld [smem:[#allocation10 + $0x40]] }
 0x528   : >> { %v2779_v6 = vmul.f32 %v2777_v57, %v6282_v50  ;;  %v2778_v42 = vmul.f32 %v2777_v57, %v6285_v45 }
 0x529   : >> { %v2663_v11 = vpop.permute.xlu1 %2662 }
 0x52a   : >> { %v2667_v2 = vadd.f32 %v2663_v11, %v2653_v8  ;;  %v2661_v40 = vpop.permute.xlu0 %2660  ;;  %v2797_v8 = vstv %s4328_s3  ;;  %s4338_s3 = sld [smem:[#allocation10 + $0x3f]] }
 0x52b   : >> { %v2666_v16 = vadd.f32 %v2661_v40, %v2652_v49  ;;  %v2799_v49 = vmul.f32 %v6299_v29, %v2797_v8  ;;  %v2798_v11 = vmul.f32 %v2797_v8, %v6295_v33 }
 0x52c   : >> { %v2673_v27 = vadd.f32 %v2671_v58, %v2667_v2  ;;  %v2811_v2 = vstv %s4329_s10  ;;  %s4330_s10 = sld [smem:[#allocation10 + $0x47]] }
 0x52d   : >> { %v2683_v4 = vpop.permute.xlu1 %2682  ;;  %v2672_v59 = vadd.f32 %v2670_v55, %v2666_v16  ;;  %v2813_v40 = vmul.f32 %v6299_v29, %v2811_v2  ;;  %v2812_v58 = vmul.f32 %v2811_v2, %v6295_v33  ;;  %v2703_v16 = vld [vmem:[#allocation6 + $0x21] sm:$0xff]  ;;  %v2702_v55 = vld [vmem:[#allocation6 + $0x19] sm:$0xff] }
 0x52e   : >> { %v2681_v20 = vpop.permute.xlu0 %2680  ;;  %v2687_v36 = vadd.f32 %v2683_v4, %v2673_v27 }
 0x52f   : >> { %v2686_v7 = vadd.f32 %v2681_v20, %v2672_v59 }
 0x531   : >> { %v2697_v35 = vpop.permute.xlu1 %2696 }
 0x532   : >> { %v2701_v17 = vadd.f32 %v2697_v35, %v2687_v36  ;;  %v2695_v47 = vpop.permute.xlu0 %2694  ;;  %v2725_v36 = vstv %s4321_s11  ;;  %s4333_s11 = sld [smem:[#allocation10 + $0x44]] }
 0x533   : >> { %v2700_v10 = vadd.f32 %v2695_v47, %v2686_v7  ;;  %v2726_v34 = vmul.f32 %v2725_v36, %v6273_v51 }
 0x534   : >> { %v2705_v9 = vmul.f32 %v2701_v17, %v6209_v31 }
 0x535   : >> { %v2704_v52 = vmul.f32 %v2700_v10, %v6209_v31  ;;  %v2727_v10 = vmul.f32 %v2725_v36, %v6270_v18 }
 0x536   : >> { %2710 = vrot.lane.b32.xlu1 %v2705_v9, %s4715_s27 }
 0x537   : >> { %2708 = vrot.lane.b32.xlu0 %v2704_v52, %s4715_s27 }
 0x53a   : >> { %2736 = vrot.lane.b32.xlu1 %v2731_v38, %s4714_s20  ;;  %v2757_v38 = vstv %s4324_s4  ;;  %s4336_s4 = sld [smem:[#allocation10 + $0x41]] }
 0x53b   : >> { %2734 = vrot.lane.b32.xlu0 %v2730_v23, %s4714_s20  ;;  %v2759_v57 = vmul.f32 %v2757_v38, %v6282_v50 }
 0x53e   : >> { %2750 = vrot.lane.b32.xlu1 %v2745_v3, %s4713_s12 }
 0x53f   : >> { %2748 = vrot.lane.b32.xlu0 %v2744_v13, %s4713_s12 }
 0x542   : >> { %2770 = vrot.lane.b32.xlu1 %v2765_v43, %s4714_s20 }
 0x543   : >> { %2768 = vrot.lane.b32.xlu0 %v2764_v61, %s4714_s20 }
 0x546   : >> { %2784 = vrot.lane.b32.xlu1 %v2779_v6, %s4713_s12 }
 0x547   : >> { %2782 = vrot.lane.b32.xlu0 %v2778_v42, %s4713_s12  ;;  %v2758_v42 = vmul.f32 %v2757_v38, %v6285_v45 }
 0x54a   : >> { %2804 = vrot.lane.b32.xlu1 %v2799_v49, %s4714_s20 }
 0x54b   : >> { %2802 = vrot.lane.b32.xlu0 %v2798_v11, %s4714_s20 }
 0x54e   : >> { %2818 = vrot.lane.b32.xlu1 %v2813_v40, %s4713_s12  ;;  %v2791_v40 = vstv %s4327_s26  ;;  %s4340_s26 = sld [smem:[#allocation10 + $0x61]] }
 0x54f   : >> { %2816 = vrot.lane.b32.xlu0 %v2812_v58, %s4713_s12  ;;  %v2792_v36 = vmul.f32 %v2791_v40, %v6295_v33 }
 0x5a8   : >> { %v2711_v27 = vpop.permute.xlu1 %2710 }
 0x5a9   : >> { %v2715_v4 = vadd.f32 %v2711_v27, %v2703_v16  ;;  %v2709_v59 = vpop.permute.xlu0 %2708 }
 0x5aa   : >> { %v2714_v20 = vadd.f32 %v2709_v59, %v2702_v55  ;;  %v2793_v59 = vmul.f32 %v6299_v29, %v2791_v40 }
 0x5ab   : >> { %v2717_v7 = vmax.f32 %v6311_v39, %v2715_v4 }
 0x5ac   : >> { %v2716_v35 = vmax.f32 %v6311_v39, %v2714_v20  ;;  %v2737_v17 = vpop.permute.xlu1 %2736 }
 0x5ad   : >> { %v2719_v47 = vmin.f32 %v6313_v0, %v2717_v7  ;;  %v2735_v9 = vpop.permute.xlu0 %2734  ;;  %v2741_v56 = vadd.f32 %v2737_v17, %v2727_v10 }
 0x5ae   : >> { %v2718_v52 = vmin.f32 %v6313_v0, %v2716_v35  ;;  %v2740_v13 = vadd.f32 %v2735_v9, %v2726_v34 }
 0x5af   : >> { %v2721_v23 = vsub.f32 %v2715_v4, %v2719_v47 }
 0x5b0   : >> { %v2720_v3 = vsub.f32 %v2714_v20, %v2718_v52  ;;  %v2751_v12 = vpop.permute.xlu1 %2750 }
 0x5b1   : >> { %2723 = vst.msk [vmem:[#allocation6 + $0x21] sm:$0xff] %vm464_vm5, %v2721_v23  ;;  %v2755_v43 = vadd.f32 %v2751_v12, %v2741_v56  ;;  %v2749_v61 = vpop.permute.xlu0 %2748 }
 0x5b2   : >> { %2722 = vst.msk [vmem:[#allocation6 + $0x19] sm:$0xff] %vm464_vm5, %v2720_v3  ;;  %v2754_v6 = vadd.f32 %v2749_v61, %v2740_v13  ;;  %v2851_v13 = vstv %s4331_s17  ;;  %v2865_v61 = vstv %s4332_s1  ;;  %s4341_s17 = sld [smem:[#allocation10 + $0x60]] }
 0x5b3   : >> { %v2761_v8 = vadd.f32 %v2759_v57, %v2755_v43  ;;  %v2853_v12 = vmul.f32 %v2851_v13, %v6270_v18  ;;  %v2852_v43 = vmul.f32 %v2851_v13, %v6273_v51  ;;  %v2867_v57 = vmul.f32 %v2865_v61, %v6270_v18  ;;  %s4343_s1 = sld [smem:[#allocation10 + $0x5e]] }
 0x5b4   : >> { %v2771_v49 = vpop.permute.xlu1 %2770  ;;  %v2760_v11 = vadd.f32 %v2758_v42, %v2754_v6  ;;  %v2866_v6 = vmul.f32 %v2865_v61, %v6273_v51  ;;  %v2885_v42 = vstv %s4334_s18  ;;  %s4344_s18 = sld [smem:[#allocation10 + $0x5d]] }
 0x5b5   : >> { %v2769_v2 = vpop.permute.xlu0 %2768  ;;  %v2775_v58 = vadd.f32 %v2771_v49, %v2761_v8  ;;  %v2887_v8 = vmul.f32 %v2885_v42, %v6282_v50  ;;  %v2886_v49 = vmul.f32 %v2885_v42, %v6285_v45 }
 0x5b6   : >> { %v2774_v16 = vadd.f32 %v2769_v2, %v2760_v11  ;;  %v2899_v11 = vstv %s4335_s23  ;;  %s6521_s23 = sld [smem:[#allocation10 + $0x34]] }
 0x5b7   : >> { %v2901_v2 = vmul.f32 %v2899_v11, %v6282_v50  ;;  %v2900_v40 = vmul.f32 %v2899_v11, %v6285_v45 }
 0x5b8   : >> { %v2785_v55 = vpop.permute.xlu1 %2784 }
 0x5b9   : >> { %v2789_v27 = vadd.f32 %v2785_v55, %v2775_v58  ;;  %v2783_v4 = vpop.permute.xlu0 %2782  ;;  %v2919_v58 = vstv %s4337_s2  ;;  %s4367_s2 = sld [smem:[#allocation10 + $0x4f]] }
 0x5ba   : >> { %v2788_v20 = vadd.f32 %v2783_v4, %v2774_v16  ;;  %v2921_v16 = vmul.f32 %v6299_v29, %v2919_v58  ;;  %v2920_v55 = vmul.f32 %v2919_v58, %v6295_v33 }
 0x5bb   : >> { %v2795_v7 = vadd.f32 %v2793_v59, %v2789_v27  ;;  %v2933_v27 = vstv %s4338_s3  ;;  %s4376_s3 = sld [smem:[#allocation10 + $0x6a]] }
 0x5bc   : >> { %v2805_v35 = vpop.permute.xlu1 %2804  ;;  %v2794_v17 = vadd.f32 %v2792_v36, %v2788_v20  ;;  %v2935_v4 = vmul.f32 %v6299_v29, %v2933_v27  ;;  %v2934_v59 = vmul.f32 %v2933_v27, %v6295_v33  ;;  %v2825_v20 = vld [vmem:[#allocation6 + $0x69] sm:$0xff]  ;;  %v2824_v36 = vld [vmem:[#allocation6 + $0x61] sm:$0xff] }
 0x5bd   : >> { %v2803_v47 = vpop.permute.xlu0 %2802  ;;  %v2809_v10 = vadd.f32 %v2805_v35, %v2795_v7 }
 0x5be   : >> { %v2808_v9 = vadd.f32 %v2803_v47, %v2794_v17 }
 0x5c0   : >> { %v2819_v52 = vpop.permute.xlu1 %2818 }
 0x5c1   : >> { %v2823_v34 = vadd.f32 %v2819_v52, %v2809_v10  ;;  %v2817_v38 = vpop.permute.xlu0 %2816  ;;  %v2847_v10 = vstv %s4330_s10  ;;  %s4350_s10 = sld [smem:[#allocation10 + $0x18]] }
 0x5c2   : >> { %v2822_v23 = vadd.f32 %v2817_v38, %v2808_v9  ;;  %v2848_v13 = vmul.f32 %v2847_v10, %v6273_v51 }
 0x5c3   : >> { %v2827_v56 = vmul.f32 %v2823_v34, %v6209_v31 }
 0x5c4   : >> { %v2826_v3 = vmul.f32 %v2822_v23, %v6209_v31  ;;  %v2849_v23 = vmul.f32 %v2847_v10, %v6270_v18 }
 0x5c5   : >> { %2832 = vrot.lane.b32.xlu1 %v2827_v56, %s4715_s27 }
 0x5c6   : >> { %2830 = vrot.lane.b32.xlu0 %v2826_v3, %s4715_s27 }
 0x5c9   : >> { %2858 = vrot.lane.b32.xlu1 %v2853_v12, %s4714_s20  ;;  %v2879_v12 = vstv %s4333_s11  ;;  %s4359_s11 = sld [smem:[#allocation10 + $0x33]] }
 0x5ca   : >> { %2856 = vrot.lane.b32.xlu0 %v2852_v43, %s4714_s20  ;;  %v2881_v11 = vmul.f32 %v2879_v12, %v6282_v50 }
 0x5cd   : >> { %2872 = vrot.lane.b32.xlu1 %v2867_v57, %s4713_s12 }
 0x5ce   : >> { %2870 = vrot.lane.b32.xlu0 %v2866_v6, %s4713_s12 }
 0x5d1   : >> { %2892 = vrot.lane.b32.xlu1 %v2887_v8, %s4714_s20 }
 0x5d2   : >> { %2890 = vrot.lane.b32.xlu0 %v2886_v49, %s4714_s20 }
 0x5d5   : >> { %2906 = vrot.lane.b32.xlu1 %v2901_v2, %s4713_s12 }
 0x5d6   : >> { %2904 = vrot.lane.b32.xlu0 %v2900_v40, %s4713_s12  ;;  %v2880_v40 = vmul.f32 %v2879_v12, %v6285_v45 }
 0x5d9   : >> { %2926 = vrot.lane.b32.xlu1 %v2921_v16, %s4714_s20 }
 0x5da   : >> { %2924 = vrot.lane.b32.xlu0 %v2920_v55, %s4714_s20 }
 0x5dd   : >> { %2940 = vrot.lane.b32.xlu1 %v2935_v4, %s4713_s12  ;;  %v2913_v4 = vstv %s4336_s4  ;;  %s4368_s4 = sld [smem:[#allocation10 + $0x4e]] }
 0x5de   : >> { %2938 = vrot.lane.b32.xlu0 %v2934_v59, %s4713_s12  ;;  %v2914_v10 = vmul.f32 %v2913_v4, %v6295_v33 }
 0x637   : >> { %v2833_v7 = vpop.permute.xlu1 %2832 }
 0x638   : >> { %v2837_v35 = vadd.f32 %v2833_v7, %v2825_v20  ;;  %v2831_v17 = vpop.permute.xlu0 %2830 }
 0x639   : >> { %v2836_v47 = vadd.f32 %v2831_v17, %v2824_v36  ;;  %v2915_v17 = vmul.f32 %v6299_v29, %v2913_v4  ;;  %v2973_v29 = vstv %s4340_s26  ;;  %s4377_s26 = sld [smem:[#allocation10 + $0x69]] }
 0x63a   : >> { %v2839_v9 = vmax.f32 %v6311_v39, %v2837_v35 }
 0x63b   : >> { %v2838_v52 = vmax.f32 %v6311_v39, %v2836_v47  ;;  %v2859_v34 = vpop.permute.xlu1 %2858 }
 0x63c   : >> { %v2841_v38 = vmin.f32 %v6313_v0, %v2839_v9  ;;  %v2857_v56 = vpop.permute.xlu0 %2856  ;;  %v2863_v61 = vadd.f32 %v2859_v34, %v2849_v23 }
 0x63d   : >> { %v2840_v3 = vmin.f32 %v6313_v0, %v2838_v52  ;;  %v2862_v6 = vadd.f32 %v2857_v56, %v2848_v13 }
 0x63e   : >> { %v2843_v43 = vsub.f32 %v2837_v35, %v2841_v38 }
 0x63f   : >> { %v2842_v57 = vsub.f32 %v2836_v47, %v2840_v3  ;;  %v2873_v42 = vpop.permute.xlu1 %2872 }
 0x640   : >> { %2845 = vst.msk [vmem:[#allocation6 + $0x69] sm:$0xff] %vm464_vm5, %v2843_v43  ;;  %v2877_v8 = vadd.f32 %v2873_v42, %v2863_v61  ;;  %v2871_v49 = vpop.permute.xlu0 %2870  ;;  %v2974_v42 = vmul.f32 %v2973_v29, %v6273_v51 }
 0x641   : >> { %2844 = vst.msk [vmem:[#allocation6 + $0x61] sm:$0xff] %vm464_vm5, %v2842_v57  ;;  %v2876_v2 = vadd.f32 %v2871_v49, %v2862_v6  ;;  %v2975_v6 = vmul.f32 %v2973_v29, %v6270_v18 }
 0x642   : >> { %v2883_v58 = vadd.f32 %v2881_v11, %v2877_v8  ;;  %v2987_v8 = vstv %s4341_s17  ;;  %s4352_s17 = sld [smem:[#allocation10 + $0x16]] }
 0x643   : >> { %v2893_v16 = vpop.permute.xlu1 %2892  ;;  %v2882_v55 = vadd.f32 %v2880_v40, %v2876_v2  ;;  %v2989_v49 = vmul.f32 %v2987_v8, %v6270_v18  ;;  %v2988_v11 = vmul.f32 %v2987_v8, %v6273_v51  ;;  %v3007_v2 = vstv %s4343_s1  ;;  %v4507_v8 = vld [vmem:[#allocation5 + $0x28] sm:$0xff]  ;;  %s4361_s1 = sld [smem:[#allocation10 + $0x31]] }
 0x644   : >> { %v2891_v27 = vpop.permute.xlu0 %2890  ;;  %v2897_v59 = vadd.f32 %v2893_v16, %v2883_v58  ;;  %v3009_v40 = vmul.f32 %v3007_v2, %v6282_v50  ;;  %v3008_v58 = vmul.f32 %v3007_v2, %v6285_v45  ;;  %v3021_v16 = vstv %s4344_s18  ;;  %s4370_s18 = sld [smem:[#allocation10 + $0x4c]] }
 0x645   : >> { %v2896_v20 = vadd.f32 %v2891_v27, %v2882_v55  ;;  %v3023_v55 = vmul.f32 %v3021_v16, %v6282_v50  ;;  %v3022_v18 = vmul.f32 %v3021_v16, %v6285_v45  ;;  %v3042_v51 = vmul.f32 %v3041_v44, %v6295_v33 }
 0x646   : >> { %v3895_v50 = vmul.f32 %v6191_v26, %v7288_v41  ;;  %v3894_v44 = vmul.f32 %v6180_v63, %v7289_v60  ;;  %v6464_v45 = vstv %s6023_s30  ;;  %v3896_v33 = vmul.f32 %v6178_v25, %v7291_v32  ;;  %v4502_v26 = vld [vmem:[#allocation5 + $0x8] sm:$0xff]  ;;  %v4503_v25 = vld [vmem:[#allocation5] sm:$0xff]  ;;  %s6489_s30 = sld [smem:[#allocation10 + $0x19]] }
 0x647   : >> { %v2907_v36 = vpop.permute.xlu1 %2906 }
 0x648   : >> { %v2911_v7 = vadd.f32 %v2907_v36, %v2897_v59  ;;  %v2905_v35 = vpop.permute.xlu0 %2904  ;;  %v3901_v27 = vmul.f32 %v3895_v50, %v6464_v45  ;;  %v3900_v4 = vmul.f32 %v3894_v44, %v6464_v45  ;;  %v3902_v63 = vmul.f32 %v3896_v33, %v6464_v45  ;;  %v4504_v36 = vld [vmem:[#allocation5 + $0x10] sm:$0xff] }
 0x649   : >> { %v2910_v47 = vadd.f32 %v2905_v35, %v2896_v20  ;;  %v3898_v35 = vmul.f32 %v6194_v54, %v7293_v5  ;;  %v7294_v54 = vld [vmem:[#allocation24_spill] sm:$0xff]  ;;  %v3224_v50 = vstv %s6521_s23  ;;  %s6608_s23 = sld [smem:[#allocation10 + $0x62]] }
 0x64a   : >> { %v2917_v9 = vadd.f32 %v2915_v17, %v2911_v7  ;;  %v6477_v59 = vadd.f32 %v4502_v26, %v3901_v27  ;;  %v6479_v20 = vadd.f32 %v4503_v25, %v3900_v4  ;;  %v6485_v7 = vadd.f32 %v4504_v36, %v3902_v63  ;;  %v7299_v25 = vld [vmem:[#allocation28_spill] sm:$0xff] }
 0x64b   : >> { %v2927_v52 = vpop.permute.xlu1 %2926  ;;  %v2916_v34 = vadd.f32 %v2914_v10, %v2910_v47  ;;  %v3904_v47 = vmul.f32 %v3898_v35, %v6464_v45 }
 0x64c   : >> { %v2925_v38 = vpop.permute.xlu0 %2924  ;;  %v2931_v23 = vadd.f32 %v2927_v52, %v2917_v9  ;;  %v3912_v17 = vmul.f32 %v6047_v19, %v6479_v20  ;;  %v7295_v9 = vld [vmem:[#allocation23_spill] sm:$0xff] }
 0x64d   : >> { %v2930_v56 = vadd.f32 %v2925_v38, %v2916_v34  ;;  %v4505_v34 = vld [vmem:[#allocation5 + $0x18] sm:$0xff] }
 0x64e   : >> { %v6505_v52 = vsub.f32 %v3912_v17, %v7295_v9 }
 0x64f   : >> { %v2941_v3 = vpop.permute.xlu1 %2940 }
 0x650   : >> { %v2945_v13 = vadd.f32 %v2941_v3, %v2931_v23  ;;  %v2939_v12 = vpop.permute.xlu0 %2938  ;;  %v7296_v23 = vld [vmem:[#allocation25_spill] sm:$0xff]  ;;  %v4506_v3 = vld [vmem:[#allocation5 + $0x20] sm:$0xff] }
 0x651   : >> { %v2944_v43 = vadd.f32 %v2939_v12, %v2930_v56  ;;  %v6518_v12 = vld [vmem:[#allocation7 + $0x30] sm:$0xff] }
 0x652   : >> { %v2949_v61 = vmul.f32 %v2945_v13, %v6209_v31  ;;  %v6516_v13 = vadd.f32 %v4506_v3, %v3904_v47  ;;  %v3225_v63 = vmul.f32 %v3224_v50, %v6518_v12 }
 0x653   : >> { %v2948_v57 = vmul.f32 %v2944_v43, %v6209_v31  ;;  %v3102_v43 = vstv %s6489_s30  ;;  %s6604_s30 = sld [smem:[#allocation10 + $0x15]] }
 0x654   : >> { %2954 = vrot.lane.b32.xlu1 %v2949_v61, %s4715_s27  ;;  %v3103_v29 = vmul.f32 %v3102_v43, %v6518_v12 }
 0x655   : >> { %2952 = vrot.lane.b32.xlu0 %v2948_v57, %s4715_s27 }
 0x658   : >> { %2980 = vrot.lane.b32.xlu1 %v2975_v6, %s4714_s20  ;;  %v3916_v6 = vmul.f32 %v6047_v19, %v6516_v13 }
 0x659   : >> { %2978 = vrot.lane.b32.xlu0 %v2974_v42, %s4714_s20  ;;  %v6537_v42 = vld [vmem:[#allocation7 + $0x38] sm:$0xff] }
 0x65a   : >> { %v3104_v16 = vmul.f32 %v3102_v43, %v6537_v42 }
 0x65c   : >> { %2994 = vrot.lane.b32.xlu1 %v2989_v49, %s4713_s12 }
 0x65d   : >> { %2992 = vrot.lane.b32.xlu0 %v2988_v11, %s4713_s12  ;;  %v7297_v11 = vld [vmem:[#allocation26_spill] sm:$0xff] }
 0x660   : >> { %3014 = vrot.lane.b32.xlu1 %v3009_v40, %s4714_s20 }
 0x661   : >> { %3012 = vrot.lane.b32.xlu0 %v3008_v58, %s4714_s20 }
 0x664   : >> { %3028 = vrot.lane.b32.xlu1 %v3023_v55, %s4713_s12  ;;  %v7298_v55 = vld [vmem:[#allocation27_spill] sm:$0xff] }
 0x665   : >> { %3026 = vrot.lane.b32.xlu0 %v3022_v18, %s4713_s12  ;;  %v6549_v18 = vsub.f32 %v3916_v6, %v7298_v55  ;;  %v3238_v6 = vstv %s4359_s11  ;;  %s6629_s11 = sld [smem:[#allocation10 + $0x66]] }
 0x667   : >> { %v3928_v26 = vmul.f32 %v6549_v18, %v6549_v18 }
 0x668   : >> { %3637 = vrot.lane.b32.xlu1 %v6214_v48, %s4715_s27 }
 0x669   : >> { %3046 = vrot.lane.b32.xlu0 %v3042_v51, %s4714_s20  ;;  %v3937_v17 = vsel %vm281_vm0, %v3928_v26, 0.0  ;;  %v6598_v26 = vld [vmem:[#allocation7 + $0x39] sm:$0xff] }
 0x66c   : >> { %3641 = vrot.lane.b32.xlu1 %v6228_v21, %s4715_s27 }
 0x66d   : >> { %3639 = vrot.lane.b32.xlu0 %v6222_v53, %s4715_s27 }
 0x670   : >> { %3633 = vrot.lane.b32.xlu1 %v6241_v24, %s4715_s27 }
 0x671   : >> { %3643 = vrot.lane.b32.xlu0 %v6233_v14, %s4715_s27 }
 0x674   : >> { %3685 = vrot.lane.b32.xlu1 %v6214_v48, %s4716_s29  ;;  %v3897_v48 = vmul.f32 %v6197_v62, %v7290_v46 }
 0x675   : >> { %3635 = vrot.lane.b32.xlu0 %v6243_v37, %s4715_s27 }
 0x676   : >> { %v3903_v62 = vmul.f32 %v3897_v48, %v6464_v45 }
 0x678   : >> { %3689 = vrot.lane.b32.xlu1 %v6228_v21, %s4716_s29  ;;  %v3913_v21 = vmul.f32 %v6047_v19, %v6477_v59  ;;  %v6507_v38 = vadd.f32 %v4505_v34, %v3903_v62  ;;  %v3346_v62 = vstv %s4367_s2  ;;  %s6612_s2 = sld [smem:[#allocation10 + $0x30]] }
 0x679   : >> { %3687 = vrot.lane.b32.xlu0 %v6222_v53, %s4716_s29  ;;  %v3914_v53 = vmul.f32 %v6047_v19, %v6485_v7  ;;  %v3347_v34 = vmul.f32 %v3346_v62, %v6518_v12  ;;  %v3348_v43 = vmul.f32 %v3346_v62, %v6537_v42 }
 0x67a   : >> { %v6502_v10 = vsub.f32 %v3913_v21, %v7294_v54  ;;  %v3226_v21 = vmul.f32 %v3224_v50, %v6537_v42 }
 0x67b   : >> { %v6514_v56 = vsub.f32 %v3914_v53, %v7296_v23 }
 0x67c   : >> { %v3925_v57 = vmul.f32 %v6502_v10, %v6502_v10 }
 0x67d   : >> { %3691 = vrot.lane.b32.xlu0 %v6233_v14, %s4716_s29  ;;  %v3899_v14 = vmul.f32 %v6200_v30, %v7292_v22  ;;  %v3924_v30 = vmul.f32 %v6505_v52, %v6505_v52 }
 0x67e   : >> { %v3931_v58 = vsel %vm281_vm0, %v3925_v57, 0.0 }
 0x67f   : >> { %v3905_v61 = vmul.f32 %v3899_v14, %v6464_v45  ;;  %v3930_v40 = vsel %vm281_vm0, %v3924_v30, 0.0  ;;  %v3116_v30 = vstv %s4350_s10  ;;  %s6621_s10 = sld [smem:[#allocation10 + $0x4b]] }
 0x680   : >> { %v3932_v44 = vadd.f32 %v3931_v58, %v3930_v40  ;;  %v3117_v57 = vmul.f32 %v3116_v30, %v6518_v12  ;;  %v3360_v40 = vstv %s4368_s4  ;;  %v3240_v58 = vmul.f32 %v3238_v6, %v6537_v42  ;;  %s6641_s4 = sld [smem:[#allocation10 + $0x5c]] }
 0x681   : >> { %3681 = vrot.lane.b32.xlu0 %v6241_v24, %s4716_s29  ;;  %v3915_v24 = vmul.f32 %v6047_v19, %v6507_v38  ;;  %v6540_v49 = vadd.f32 %v4507_v8, %v3905_v61  ;;  %v3468_v61 = vstv %s4376_s3  ;;  %v3362_v50 = vmul.f32 %v3360_v40, %v6537_v42  ;;  %s6618_s3 = sld [smem:[#allocation10 + $0x5f]] }
 0x682   : >> { %v3470_v8 = vmul.f32 %v3468_v61, %v6537_v42 }
 0x683   : >> { %v6543_v2 = vsub.f32 %v3915_v24, %v7297_v11  ;;  %v3917_v33 = vmul.f32 %v6047_v19, %v6540_v49  ;;  %v3469_v24 = vmul.f32 %v3468_v61, %v6518_v12  ;;  %v2946_v61 = vld [vmem:[#allocation6 + $0xa9] sm:$0xff] }
 0x685   : >> { %3683 = vrot.lane.b32.xlu0 %v6243_v37, %s4716_s29  ;;  %v3926_v37 = vmul.f32 %v6514_v56, %v6514_v56  ;;  %v3927_v27 = vmul.f32 %v6543_v2, %v6543_v2  ;;  %v6563_v48 = vsub.f32 %v3917_v33, %v7299_v25  ;;  %v6592_v33 = vld [vmem:[#allocation7 + $0x31] sm:$0xff]  ;;  %s4379_s29 = sld [smem:[#allocation10 + $0x67]] }
 0x687   : >> { %v3933_v51 = vsel %vm281_vm0, %v3926_v37, 0.0  ;;  %v3935_v36 = vsel %vm281_vm0, %v3927_v27, 0.0  ;;  %v3929_v53 = vmul.f32 %v6563_v48, %v6563_v48  ;;  %v3239_v37 = vmul.f32 %v3238_v6, %v6518_v12 }
 0x688   : >> { %v3934_v4 = vadd.f32 %v3933_v51, %v3932_v44  ;;  %v3482_v51 = vstv %s4377_s26  ;;  %v3136_v27 = vstv %s4352_s17  ;;  %s6650_s26 = sld [smem:[#allocation10 + $0x13]] }
 0x689   : >> { %3107 = vrot.lane.b32.xlu0 %v3103_v29, %s4714_s20  ;;  %v3939_v14 = vsel %vm281_vm0, %v3929_v53, 0.0  ;;  %v3118_v29 = vmul.f32 %v3116_v30, %v6537_v42  ;;  %v3483_v44 = vmul.f32 %v3482_v51, %v6518_v12  ;;  %v2969_v30 = vstv %s6608_s23  ;;  %s6657_s17 = sld [smem:[#allocation10 + $0x2e]] }
 0x68a   : >> { %v3936_v35 = vadd.f32 %v3935_v36, %v3934_v4  ;;  %v3484_v4 = vmul.f32 %v3482_v51, %v6537_v42  ;;  %v3258_v36 = vstv %s4361_s1  ;;  %s4373_s1 = sld [smem:[#allocation10 + $0x49]] }
 0x68b   : >> { %v3260_v62 = vmul.f32 %v3258_v36, %v6598_v26  ;;  %s4365_s23 = sld [smem:[#allocation10 + $0x2d]] }
 0x68c   : >> { %v3938_v47 = vadd.f32 %v3937_v17, %v3936_v35  ;;  %v3138_v35 = vmul.f32 %v3136_v27, %v6598_v26  ;;  %v3380_v17 = vstv %s4370_s18  ;;  %s4382_s18 = sld [smem:[#allocation10 + $0x64]] }
 0x68d   : >> { %3109 = vrot.lane.b32.xlu0 %v3104_v16, %s4714_s20  ;;  %v3361_v16 = vmul.f32 %v3360_v40, %v6518_v12  ;;  %v3381_v53 = vmul.f32 %v3380_v17, %v6592_v33  ;;  %v3272_v40 = vstv %s6612_s2  ;;  %s4374_s2 = sld [smem:[#allocation10 + $0x48]] }
 0x68e   : >> { %v3940_v3 = vadd.f32 %v3939_v14, %v3938_v47  ;;  %v3502_v47 = vstv %s4379_s29  ;;  %s4347_s29 = sld [smem:[#allocation10 + $0x5a]] }
 0x68f   : >> { %v3503_v14 = vmul.f32 %v3502_v47, %v6592_v33  ;;  %v3504_v6 = vmul.f32 %v3502_v47, %v6598_v26  ;;  %v3001_v47 = vstv %s6618_s3  ;;  %s4348_s3 = sld [smem:[#allocation10 + $0x1a]] }
 0x691   : >> { %3229 = vrot.lane.b32.xlu0 %v3225_v63, %s4714_s20  ;;  %v3137_v63 = vmul.f32 %v3136_v27, %v6592_v33 }
 0x695   : >> { %3231 = vrot.lane.b32.xlu0 %v3226_v21, %s4714_s20  ;;  %v3259_v21 = vmul.f32 %v3258_v36, %v6592_v33 }
 0x699   : >> { %3351 = vrot.lane.b32.xlu0 %v3347_v34, %s4714_s20  ;;  %v3382_v34 = vmul.f32 %v3380_v17, %v6598_v26  ;;  %v4509_v17 = vld [vmem:[#allocation7 + $0x18] sm:$0xff] }
 0x69c   : >> { %3941 = vadd.xlane.f32.xlu1 %v3940_v3  ;;  %v2947_v3 = vld [vmem:[#allocation6 + $0xb1] sm:$0xff] }
 0x69d   : >> { %3353 = vrot.lane.b32.xlu0 %v3348_v43, %s4714_s20  ;;  %v3150_v43 = vstv %s6604_s30  ;;  %s4356_s30 = sld [smem:[#allocation10 + $0x12]] }
 0x69e   : >> { %v3152_v36 = vmul.f32 %v3150_v43, %v6598_v26 }
 0x6a1   : >> { %3473 = vrot.lane.b32.xlu0 %v3469_v24, %s4714_s20 }
 0x6a5   : >> { %3121 = vrot.lane.b32.xlu0 %v3117_v57, %s4713_s12 }
 0x6a9   : >> { %3123 = vrot.lane.b32.xlu0 %v3118_v29, %s4713_s12 }
 0x6ad   : >> { %3243 = vrot.lane.b32.xlu0 %v3239_v37, %s4713_s12  ;;  %3475 = vrot.lane.b32.xlu1 %v3470_v8, %s4714_s20  ;;  %v3151_v37 = vmul.f32 %v3150_v43, %v6592_v33 }
 0x6b1   : >> { %3245 = vrot.lane.b32.xlu0 %v3240_v58, %s4713_s12  ;;  %3365 = vrot.lane.b32.xlu1 %v3361_v16, %s4713_s12  ;;  %v4508_v16 = vld [vmem:[#allocation7 + $0x20] sm:$0xff] }
 0x6b2   : >> { %v2971_v51 = vmul.f32 %v4508_v16, %v2969_v30 }
 0x6b5   : >> { %3367 = vrot.lane.b32.xlu0 %v3362_v50, %s4713_s12  ;;  %3487 = vrot.lane.b32.xlu1 %v3483_v44, %s4713_s12 }
 0x6b9   : >> { %3489 = vrot.lane.b32.xlu0 %v3484_v4, %s4713_s12  ;;  %3141 = vrot.lane.b32.xlu1 %v3137_v63, %s4714_s20 }
 0x6bd   : >> { %3143 = vrot.lane.b32.xlu0 %v3138_v35, %s4714_s20  ;;  %3263 = vrot.lane.b32.xlu1 %v3259_v21, %s4714_s20  ;;  %v3273_v35 = vmul.f32 %v3272_v40, %v6592_v33 }
 0x6c1   : >> { %3265 = vrot.lane.b32.xlu0 %v3260_v62, %s4714_s20  ;;  %3385 = vrot.lane.b32.xlu1 %v3381_v53, %s4714_s20  ;;  %v2970_v62 = vmul.f32 %v4509_v17, %v2969_v30  ;;  %v3394_v53 = vstv %s6621_s10  ;;  %s4383_s10 = sld [smem:[#allocation10 + $0x63]] }
 0x6c2   : >> { %v3395_v30 = vmul.f32 %v3394_v53, %v6592_v33 }
 0x6c5   : >> { %3387 = vrot.lane.b32.xlu0 %v3382_v34, %s4714_s20  ;;  %3507 = vrot.lane.b32.xlu1 %v3503_v14, %s4714_s20 }
 0x6c6   : >> { %v2955_v24 = vpop.permute.xlu1 %2954 }
 0x6c7   : >> { %v2959_v57 = vadd.f32 %v2955_v24, %v2947_v3  ;;  %v2953_v29 = vpop.permute.xlu0 %2952 }
 0x6c8   : >> { %v2958_v8 = vadd.f32 %v2953_v29, %v2946_v61  ;;  %v3274_v29 = vmul.f32 %v3272_v40, %v6598_v26 }
 0x6c9   : >> { %v2961_v58 = vmax.f32 %v6311_v39, %v2959_v57  ;;  %3509 = vrot.lane.b32.xlu0 %v3504_v6, %s4714_s20  ;;  %3155 = vrot.lane.b32.xlu1 %v3151_v37, %s4713_s12  ;;  %v4510_v6 = vld [vmem:[#allocation7 + $0x21] sm:$0xff] }
 0x6ca   : >> { %v2960_v50 = vmax.f32 %v6311_v39, %v2958_v8  ;;  %v2981_v44 = vpop.permute.xlu1 %2980  ;;  %v3003_v37 = vmul.f32 %v4510_v6, %v3001_v47 }
 0x6cb   : >> { %v2963_v27 = vmin.f32 %v6313_v0, %v2961_v58  ;;  %v2985_v4 = vadd.f32 %v2981_v44, %v2971_v51  ;;  %v2979_v63 = vpop.permute.xlu0 %2978  ;;  %v4511_v58 = vld [vmem:[#allocation7 + $0x19] sm:$0xff]  ;;  %v3516_v51 = vstv %s6629_s11  ;;  %s6727_s11 = sld [smem:[#allocation10 + $0x35]] }
 0x6cc   : >> { %v2962_v21 = vmin.f32 %v6313_v0, %v2960_v50  ;;  %v2984_v3 = vadd.f32 %v2979_v63, %v2970_v62  ;;  %v3002_v16 = vmul.f32 %v4511_v58, %v3001_v47  ;;  %v3517_v63 = vmul.f32 %v3516_v51, %v6592_v33 }
 0x6cd   : >> { %v2965_v34 = vsub.f32 %v2959_v57, %v2963_v27  ;;  %3157 = vrot.lane.b32.xlu0 %v3152_v36, %s4713_s12  ;;  %3277 = vrot.lane.b32.xlu1 %v3273_v35, %s4713_s12  ;;  %v3035_v36 = vstv %s6641_s4  ;;  %v3518_v47 = vmul.f32 %v3516_v51, %v6598_v26  ;;  %s6740_s4 = sld [smem:[#allocation10 + $0x50]] }
 0x6ce   : >> { %v2964_v14 = vsub.f32 %v2958_v8, %v2962_v21  ;;  %v2995_v61 = vpop.permute.xlu1 %2994 }
 0x6cf   : >> { %2967 = vst.msk [vmem:[#allocation6 + $0xb1] sm:$0xff] %vm464_vm5, %v2965_v34  ;;  %v2999_v43 = vadd.f32 %v2995_v61, %v2985_v4  ;;  %v2993_v24 = vpop.permute.xlu0 %2992  ;;  %v3396_v4 = vmul.f32 %v3394_v53, %v6598_v26  ;;  %v4512_v34 = vld [vmem:[#allocation7 + $0x22] sm:$0xff]  ;;  %v6664_v53 = vld [vmem:[#allocation7 + $0x32] sm:$0xff] }
 0x6d0   : >> { %2966 = vst.msk [vmem:[#allocation6 + $0xa9] sm:$0xff] %vm464_vm5, %v2964_v14  ;;  %v2998_v57 = vadd.f32 %v2993_v24, %v2984_v3  ;;  %v3037_v14 = vmul.f32 %v4512_v34, %v3035_v36  ;;  %v6662_v3 = vld [vmem:[#allocation7 + $0x3a] sm:$0xff] }
 0x6d1   : >> { %3279 = vrot.lane.b32.xlu0 %v3274_v29, %s4713_s12  ;;  %3399 = vrot.lane.b32.xlu1 %v3395_v30, %s4713_s12  ;;  %v3005_v8 = vadd.f32 %v3003_v37, %v2999_v43  ;;  %v4513_v43 = vld [vmem:[#allocation7 + $0x1a] sm:$0xff]  ;;  %v3170_v29 = vstv %s6650_s26  ;;  %s6755_s26 = sld [smem:[#allocation10 + $0x6b]] }
 0x6d2   : >> { %v3015_v50 = vpop.permute.xlu1 %3014  ;;  %v3004_v40 = vadd.f32 %v3002_v16, %v2998_v57  ;;  %v3036_v24 = vmul.f32 %v4513_v43, %v3035_v36  ;;  %v3171_v58 = vmul.f32 %v3170_v29, %v6664_v53  ;;  %v3172_v16 = vmul.f32 %v3170_v29, %v6662_v3 }
 0x6d3   : >> { %v3019_v44 = vadd.f32 %v3015_v50, %v3005_v8  ;;  %v3013_v27 = vpop.permute.xlu0 %3012  ;;  %v3292_v8 = vstv %s6657_s17  ;;  %s4360_s17 = sld [smem:[#allocation10 + $0x32]] }
 0x6d4   : >> { %v3018_v35 = vadd.f32 %v3013_v27, %v3004_v40  ;;  %v3293_v40 = vmul.f32 %v3292_v8, %v6664_v53  ;;  %v3414_v27 = vstv %s4373_s1  ;;  %s6791_s1 = sld [smem:[#allocation10 + $0x4d]] }
 0x6d5   : >> { %3401 = vrot.lane.b32.xlu0 %v3396_v4, %s4713_s12  ;;  %3521 = vrot.lane.b32.xlu1 %v3517_v63, %s4713_s12  ;;  %v3415_v36 = vmul.f32 %v3414_v27, %v6664_v53 }
 0x6d6   : >> { %v3029_v21 = vpop.permute.xlu1 %3028 }
 0x6d7   : >> { %v3033_v17 = vadd.f32 %v3029_v21, %v3019_v44  ;;  %v3027_v62 = vpop.permute.xlu0 %3026  ;;  %v3294_v44 = vmul.f32 %v3292_v8, %v6662_v3  ;;  %v3536_v21 = vstv %s4382_s18  ;;  %v3306_v8 = vstv %s4365_s23  ;;  %s4354_s18 = sld [smem:[#allocation10 + $0x14]] }
 0x6d8   : >> { %v3032_v61 = vadd.f32 %v3027_v62, %v3018_v35  ;;  %v3416_v35 = vmul.f32 %v3414_v27, %v6662_v3  ;;  %v3537_v62 = vmul.f32 %v3536_v21, %v6664_v53  ;;  %s6813_s23 = sld [smem:[#allocation10 + $0x65]] }
 0x6d9   : >> { %3523 = vrot.lane.b32.xlu0 %v3518_v47, %s4713_s12  ;;  %3048 = vrot.lane.b32.xlu1 %v6000_v15, %s4714_s20  ;;  %v6670_v30 = vadd.f32 %v3037_v14, %v3033_v17  ;;  %v3538_v47 = vmul.f32 %v3536_v21, %v6662_v3  ;;  %v3055_v14 = vstv %s4347_s29  ;;  %v3098_v21 = vstv %s4348_s3  ;;  %s6807_s29 = sld [smem:[#allocation10 + $0x2f]] }
 0x6da   : >> { %v3038_v6 = vadd.f32 %v3036_v24, %v3032_v61  ;;  %v6672_v37 = vpop.permute.xlu1 %3637  ;;  %v3056_v24 = vmul.f32 %v4513_v43, %v3055_v14  ;;  %v3057_v29 = vmul.f32 %v4512_v34, %v3055_v14  ;;  %v3307_v34 = vmul.f32 %v3306_v8, %v6664_v53 }
 0x6db   : >> { %v3047_v57 = vpop.permute.xlu0 %3046  ;;  %3653 = vst.msk [vmem:[#allocation8 + $0x19] sm:$0xff] %vm464_vm5, %v6672_v37  ;;  %v3099_v14 = vmul.f32 %v3098_v21, %v6518_v12 }
 0x6dc   : >> { %v6678_v51 = vadd.f32 %v3047_v57, %v3038_v6  ;;  %v3184_v6 = vstv %s4356_s30  ;;  %s6809_s30 = sld [smem:[#allocation10 + $0x4a]] }
 0x6dd   : >> { %3175 = vrot.lane.b32.xlu0 %v3171_v58, %s4714_s20  ;;  %3177 = vrot.lane.b32.xlu1 %v3172_v16, %s4714_s20  ;;  %v3185_v58 = vmul.f32 %v3184_v6, %v6664_v53  ;;  %v3186_v16 = vmul.f32 %v3184_v6, %v6662_v3 }
 0x6de   : >> { %v6683_v15 = vpop.permute.xlu1 %3641 }
 0x6df   : >> { %v6685_v50 = vpop.permute.xlu0 %3639  ;;  %3655 = vst.msk [vmem:[#allocation8 + $0x31] sm:$0xff] %vm464_vm5, %v6683_v15 }
 0x6e0   : >> { %3654 = vst.msk [vmem:[#allocation8 + $0x21] sm:$0xff] %vm464_vm5, %v6685_v50 }
 0x6e1   : >> { %3297 = vrot.lane.b32.xlu0 %v3293_v40, %s4714_s20  ;;  %3299 = vrot.lane.b32.xlu1 %v3294_v44, %s4714_s20  ;;  %v3308_v40 = vmul.f32 %v3306_v8, %v6662_v3  ;;  %v3428_v44 = vstv %s4374_s2  ;;  %s6835_s2 = spop %4392 }
 0x6e2   : >> { %v6695_v4 = vpop.permute.xlu1 %3633 }
 0x6e3   : >> { %v6697_v63 = vpop.permute.xlu0 %3643  ;;  %3651 = vst.msk [vmem:[#allocation8 + $0x1] sm:$0xff] %vm464_vm5, %v6695_v4 }
 0x6e4   : >> { %3656 = vst.msk [vmem:[#allocation8 + $0x39] sm:$0xff] %vm464_vm5, %v6697_v63 }
 0x6e5   : >> { %3419 = vrot.lane.b32.xlu0 %v3415_v36, %s4714_s20  ;;  %3421 = vrot.lane.b32.xlu1 %v3416_v35, %s4714_s20  ;;  %v3429_v36 = vmul.f32 %v3428_v44, %v6664_v53  ;;  %v3430_v35 = vmul.f32 %v3428_v44, %v6662_v3 }
 0x6e7   : >> { %v6707_v17 = vpop.permute.xlu0 %3635  ;;  %v3666_v8 = vld [vmem:[#allocation8 + $0x21] sm:$0xff] }
 0x6e8   : >> { %3652 = vst.msk [vmem:[#allocation8 + $0x9] sm:$0xff] %vm464_vm5, %v6707_v17 }
 0x6e9   : >> { %3541 = vrot.lane.b32.xlu0 %v3537_v62, %s4714_s20  ;;  %3543 = vrot.lane.b32.xlu1 %v3538_v47, %s4714_s20  ;;  %v3550_v62 = vstv %s4383_s10  ;;  %v3686_v47 = vpop.permute.xlu1 %3685 }
 0x6ea   : >> { %v3552_v6 = vmul.f32 %v3550_v62, %v6662_v3 }
 0x6eb   : >> { %v3688_v61 = vpop.permute.xlu0 %3687 }
 0x6ec   : >> { %v3702_v44 = vsub.f32 %v3666_v8, %v3688_v61  ;;  %v3659_v8 = vld [vmem:[#allocation8 + $0x1a] sm:$0xff] }
 0x6ed   : >> { %3060 = vrot.lane.b32.xlu0 %v3056_v24, %s4713_s12  ;;  %3062 = vrot.lane.b32.xlu1 %v3057_v29, %s4713_s12  ;;  %v3551_v29 = vmul.f32 %v3550_v62, %v6664_v53  ;;  %v3690_v5 = vpop.permute.xlu1 %3689  ;;  %v3660_v62 = vld [vmem:[#allocation8 + $0x22] sm:$0xff] }
 0x6ef   : >> { %v3692_v57 = vpop.permute.xlu0 %3691 }
 0x6f1   : >> { %3189 = vrot.lane.b32.xlu0 %v3185_v58, %s4713_s12  ;;  %3191 = vrot.lane.b32.xlu1 %v3186_v16, %s4713_s12  ;;  %v3665_v16 = vld [vmem:[#allocation8 + $0x19] sm:$0xff] }
 0x6f3   : >> { %v3682_v43 = vpop.permute.xlu0 %3681 }
 0x6f5   : >> { %3311 = vrot.lane.b32.xlu0 %v3307_v34, %s4713_s12  ;;  %3313 = vrot.lane.b32.xlu1 %v3308_v40, %s4713_s12  ;;  %v3100_v34 = vmul.f32 %v3098_v21, %v6537_v42  ;;  %v3701_v40 = vsub.f32 %v3665_v16, %v3686_v47 }
 0x6f7   : >> { %v3684_v27 = vpop.permute.xlu0 %3683 }
 0x6f9   : >> { %3433 = vrot.lane.b32.xlu0 %v3429_v36, %s4713_s12  ;;  %3435 = vrot.lane.b32.xlu1 %v3430_v35, %s4713_s12  ;;  %v3220_v35 = vstv %s6727_s11 }
 0x6fb   : >> { %v3108_v24 = vpop.permute.xlu0 %3107 }
 0x6fc   : >> { %v6734_v58 = vadd.f32 %v3108_v24, %v3099_v14  ;;  %v3667_v14 = vld [vmem:[#allocation8 + $0x31] sm:$0xff]  ;;  %v3668_v24 = vld [vmem:[#allocation8 + $0x39] sm:$0xff] }
 0x6fd   : >> { %3555 = vrot.lane.b32.xlu0 %v3551_v29, %s4713_s12  ;;  %3557 = vrot.lane.b32.xlu1 %v3552_v6, %s4713_s12  ;;  %v3221_v29 = vmul.f32 %v3220_v35, %v6518_v12  ;;  %v3703_v21 = vsub.f32 %v3667_v14, %v3690_v5  ;;  %v3704_v47 = vsub.f32 %v3668_v24, %v3692_v57  ;;  %v3342_v5 = vstv %s6740_s4  ;;  %v3661_v24 = vld [vmem:[#allocation8 + $0x32] sm:$0xff] }
 0x6fe   : >> { %v3672_v6 = vsub.f32 %v3660_v62, %v6685_v50  ;;  %v3671_v57 = vsub.f32 %v3659_v8, %v6672_v37 }
 0x6ff   : >> { %v3110_v36 = vpop.permute.xlu0 %3109 }
 0x700   : >> { %v6742_v22 = vadd.f32 %v3110_v36, %v3100_v34  ;;  %v3662_v34 = vld [vmem:[#allocation8 + $0x3a] sm:$0xff]  ;;  %v3222_v36 = vmul.f32 %v3220_v35, %v6537_v42  ;;  %v3678_v50 = vsel %vm277_vm3, %v3672_v6, 0.0  ;;  %v3738_v35 = vmul.f32 %v6464_v45, %v3671_v57 }
 0x701   : >> { %3715 = vrot.lane.b32.xlu0 %v3701_v40, %s4713_s12  ;;  %3717 = vrot.lane.b32.xlu1 %v3702_v44, %s4713_s12  ;;  %v3663_v40 = vld [vmem:[#allocation8 + $0x1] sm:$0xff]  ;;  %v3664_v44 = vld [vmem:[#allocation8 + $0x9] sm:$0xff]  ;;  %v3674_v62 = vsub.f32 %v3662_v34, %v6697_v63 }
 0x702   : >> { %v3699_v32 = vsub.f32 %v3663_v40, %v3682_v43  ;;  %v3700_v41 = vsub.f32 %v3664_v44, %v3684_v27  ;;  %v3343_v43 = vmul.f32 %v3342_v5, %v6518_v12  ;;  %v3739_v27 = vmul.f32 %v6464_v45, %v3678_v50 }
 0x703   : >> { %v3230_v61 = vpop.permute.xlu0 %3229  ;;  %v3680_v63 = vsel %vm277_vm3, %v3674_v62, 0.0 }
 0x704   : >> { %v6748_v16 = vadd.f32 %v3230_v61, %v3221_v29  ;;  %v3658_v29 = vld [vmem:[#allocation8 + $0xa] sm:$0xff]  ;;  %v3657_v61 = vld [vmem:[#allocation8 + $0x2] sm:$0xff] }
 0x705   : >> { %3719 = vrot.lane.b32.xlu0 %v3703_v21, %s4713_s12  ;;  %3721 = vrot.lane.b32.xlu1 %v3704_v47, %s4713_s12  ;;  %v3673_v21 = vsub.f32 %v3661_v24, %v6683_v15  ;;  %v3464_v15 = vstv %s6755_s26  ;;  %v3669_v34 = vsub.f32 %v3657_v61, %v6695_v4 }
 0x706   : >> { %v3465_v44 = vmul.f32 %v3464_v15, %v6518_v12 }
 0x707   : >> { %v3232_v46 = vpop.permute.xlu0 %3231  ;;  %v3740_v8 = vmul.f32 %v6464_v45, %v3673_v21  ;;  %v3736_v57 = vmul.f32 %v6464_v45, %v3669_v34 }
 0x708   : >> { %v3236_v14 = vadd.f32 %v3232_v46, %v3222_v36  ;;  %v3670_v46 = vsub.f32 %v3658_v29, %v6707_v17 }
 0x709   : >> { %3711 = vrot.lane.b32.xlu0 %v3699_v32, %s4713_s12  ;;  %3713 = vrot.lane.b32.xlu1 %v3700_v41, %s4713_s12  ;;  %s4351_s12 = sld [smem:[#allocation10 + $0x17]]  ;;  %v3344_v41 = vmul.f32 %v3342_v5, %v6537_v42  ;;  %v3741_v32 = vmul.f32 %v6464_v45, %v3680_v63 }
 0x70a   : >> { %v3676_v17 = vsel %vm277_vm3, %v3670_v46, 0.0 }
 0x70b   : >> { %v3352_v37 = vpop.permute.xlu0 %3351  ;;  %v3737_v36 = vmul.f32 %v6464_v45, %v3676_v17 }
 0x70c   : >> { %v3357_v47 = vadd.f32 %v3352_v37, %v3343_v43 }
 0x70d   : >> { %3752 = vrot.lane.b32.xlu0 %v3738_v35, %s4714_s20  ;;  %3754 = vrot.lane.b32.xlu1 %v3739_v27, %s4714_s20  ;;  %v3252_v35 = vstv %s4360_s17 }
 0x70e   : >> { %v3253_v61 = vmul.f32 %v3252_v35, %v6592_v33 }
 0x70f   : >> { %v3354_v6 = vpop.permute.xlu0 %3353  ;;  %v3130_v4 = vstv %s4351_s12 }
 0x710   : >> { %v3358_v40 = vadd.f32 %v3354_v6, %v3344_v41  ;;  %v3131_v29 = vmul.f32 %v3130_v4, %v6592_v33  ;;  %v3132_v37 = vmul.f32 %v3130_v4, %v6598_v26 }
 0x711   : >> { %3756 = vrot.lane.b32.xlu0 %v3740_v8, %s4714_s20  ;;  %3758 = vrot.lane.b32.xlu1 %v3741_v32, %s4714_s20  ;;  %v3374_v8 = vstv %s6791_s1 }
 0x713   : >> { %v3474_v5 = vpop.permute.xlu0 %3473 }
 0x714   : >> { %v3479_v50 = vadd.f32 %v3474_v5, %v3465_v44 }
 0x715   : >> { %3748 = vrot.lane.b32.xlu0 %v3736_v57, %s4714_s20  ;;  %3750 = vrot.lane.b32.xlu1 %v3737_v36, %s4714_s20  ;;  %s6795_s20 = sld [smem:[#allocation10 + $0x68]]  ;;  %v3376_v57 = vmul.f32 %v3374_v8, %v6598_v26 }
 0x717   : >> { %v3122_v62 = vpop.permute.xlu0 %3121 }
 0x718   : >> { %v3127_v24 = vadd.f32 %v3122_v62, %v6734_v58 }
 0x71a   : >> { %v6787_v43 = vadd.f32 %v3131_v29, %v3127_v24 }
 0x71b   : >> { %v3124_v12 = vpop.permute.xlu0 %3123  ;;  %v3496_v62 = vstv %s6795_s20 }
 0x71c   : >> { %v3128_v27 = vadd.f32 %v3124_v12, %v6742_v22  ;;  %v3254_v22 = vmul.f32 %v3252_v35, %v6598_v26  ;;  %v3498_v35 = vmul.f32 %v3496_v62, %v6598_v26 }
 0x71e   : >> { %v3134_v21 = vadd.f32 %v3132_v37, %v3128_v27 }
 0x71f   : >> { %v3244_v63 = vpop.permute.xlu0 %3243 }
 0x720   : >> { %v3249_v46 = vadd.f32 %v3244_v63, %v6748_v16  ;;  %v3466_v16 = vmul.f32 %v3464_v15, %v6537_v42 }
 0x722   : >> { %v6797_v58 = vadd.f32 %v3253_v61, %v3249_v46 }
 0x723   : >> { %v3246_v41 = vpop.permute.xlu0 %3245 }
 0x724   : >> { %v3250_v32 = vadd.f32 %v3246_v41, %v3236_v14 }
 0x725   : >> { %v3942_v6 = vpop.xlane.xlu1 %3941 }
 0x726   : >> { %v3943_v34 = vrot.slane %v3942_v6, 4  ;;  %v3256_v17 = vadd.f32 %v3254_v22, %v3250_v32 }
 0x727   : >> { %v3368_v44 = vpop.permute.xlu0 %3367 }
 0x728   : >> { %v3944_v36 = vadd.f32 %v3943_v34, %v3942_v6  ;;  %v3372_v5 = vadd.f32 %v3368_v44, %v3358_v40  ;;  %v3375_v40 = vmul.f32 %v3374_v8, %v6592_v33  ;;  %v3497_v34 = vmul.f32 %v3496_v62, %v6592_v33 }
 0x729   : >> { %v3476_v4 = vpop.permute.xlu1 %3475  ;;  %v3164_v8 = vstv %s4354_s18 }
 0x72a   : >> { %v3945_v24 = vrot.slane %v3944_v36, 2  ;;  %v3480_v29 = vadd.f32 %v3476_v4, %v3466_v16  ;;  %v3378_v12 = vadd.f32 %v3376_v57, %v3372_v5  ;;  %v3166_v33 = vmul.f32 %v3164_v8, %v6662_v3 }
 0x72b   : >> { %v3490_v27 = vpop.permute.xlu0 %3489 }
 0x72c   : >> { %v3494_v14 = vadd.f32 %v3490_v27, %v3480_v29  ;;  %v3946_v37 = vadd.f32 %v3945_v24, %v3944_v36  ;;  %v3286_v29 = vstv %s6807_s29 }
 0x72d   : >> { %v3366_v63 = vpop.permute.xlu1 %3365 }
 0x72e   : >> { %v3371_v46 = vadd.f32 %v3366_v63, %v3357_v47  ;;  %v3947_v61 = vrot.slane %v3946_v37, 1  ;;  %v3500_v41 = vadd.f32 %v3498_v35, %v3494_v14 }
 0x72f   : >> { %v3144_v32 = vpop.permute.xlu0 %3143 }
 0x730   : >> { %v3948_v42 = vadd.f32 %v3947_v61, %v3946_v37  ;;  %v3377_v15 = vadd.f32 %v3375_v40, %v3371_v46  ;;  %v3148_v4 = vadd.f32 %v3144_v32, %v3134_v21  ;;  %v3288_v46 = vmul.f32 %v3286_v29, %v6662_v3 }
 0x731   : >> { %v3488_v22 = vpop.permute.xlu1 %3487  ;;  %v3408_v21 = vstv %s6809_s30 }
 0x732   : >> { %v3493_v6 = vadd.f32 %v3488_v22, %v3479_v50  ;;  %4394 = vpush %v3948_v42  ;;  %v3165_v42 = vmul.f32 %v3164_v8, %v6664_v53 }
 0x733   : >> { %v3266_v44 = vpop.permute.xlu0 %3265 }
 0x734   : >> { %v3499_v5 = vadd.f32 %v3497_v34, %v3493_v6  ;;  %v3270_v27 = vadd.f32 %v3266_v44, %v3256_v17 }
 0x735   : >> { %v3142_v16 = vpop.permute.xlu1 %3141 }
 0x736   : >> { %v3147_v35 = vadd.f32 %v3142_v16, %v6787_v43  ;;  %v3530_v43 = vstv %s6813_s23 }
 0x737   : >> { %v3388_v36 = vpop.permute.xlu0 %3387 }
 0x738   : >> { %v3392_v40 = vadd.f32 %v3388_v36, %v3378_v12 }
 0x739   : >> { %v3264_v26 = vpop.permute.xlu1 %3263 }
 0x73a   : >> { %v3269_v17 = vadd.f32 %v3264_v26, %v6797_v58  ;;  %v3409_v26 = vmul.f32 %v3408_v21, %v6664_v53 }
 0x73b   : >> { %v3510_v47 = vpop.permute.xlu0 %3509 }
 0x73c   : >> { %v3514_v16 = vadd.f32 %v3510_v47, %v3500_v41 }
 0x73d   : >> { %v3386_v57 = vpop.permute.xlu1 %3385 }
 0x73e   : >> { %v3391_v36 = vadd.f32 %v3386_v57, %v3377_v15 }
 0x73f   : >> { %v3158_v50 = vpop.permute.xlu0 %3157 }
 0x740   : >> { %v3162_v24 = vadd.f32 %v3158_v50, %v3148_v4  ;;  %v3410_v4 = vmul.f32 %v3408_v21, %v6662_v3 }
 0x741   : >> { %v3508_v62 = vpop.permute.xlu1 %3507 }
 0x742   : >> { %v6815_v14 = vadd.f32 %v3166_v33, %v3162_v24  ;;  %v3287_v33 = vmul.f32 %v3286_v29, %v6664_v53  ;;  %v3531_v29 = vmul.f32 %v3530_v43, %v6664_v53 }
 0x743   : >> { %v3280_v37 = vpop.permute.xlu0 %3279 }
 0x744   : >> { %v3284_v63 = vadd.f32 %v3280_v37, %v3270_v27 }
 0x745   : >> { %v3156_v61 = vpop.permute.xlu1 %3155 }
 0x746   : >> { %v3161_v32 = vadd.f32 %v3156_v61, %v3147_v35  ;;  %v6821_v22 = vadd.f32 %v3288_v46, %v3284_v63  ;;  %v3532_v35 = vmul.f32 %v3530_v43, %v6662_v3 }
 0x747   : >> { %v3402_v6 = vpop.permute.xlu0 %3401 }
 0x748   : >> { %v3406_v34 = vadd.f32 %v3402_v6, %v3392_v40  ;;  %v3167_v44 = vadd.f32 %v3165_v42, %v3161_v32  ;;  %v3513_v40 = vadd.f32 %v3508_v62, %v3499_v5 }
 0x749   : >> { %v3278_v50 = vpop.permute.xlu1 %3277 }
 0x74a   : >> { %v3283_v24 = vadd.f32 %v3278_v50, %v3269_v17  ;;  %v6827_v27 = vadd.f32 %v3410_v4, %v3406_v34 }
 0x74b   : >> { %v3524_v12 = vpop.permute.xlu0 %3523 }
 0x74c   : >> { %v3528_v8 = vadd.f32 %v3524_v12, %v3514_v16  ;;  %v3289_v37 = vadd.f32 %v3287_v33, %v3283_v24 }
 0x74d   : >> { %v3400_v63 = vpop.permute.xlu1 %3399 }
 0x74e   : >> { %v3405_v58 = vadd.f32 %v3400_v63, %v3391_v36  ;;  %v6831_v46 = vadd.f32 %v3532_v35, %v3528_v8 }
 0x74f   : >> { %v3176_v61 = vpop.permute.xlu0 %3175 }
 0x750   : >> { %v3411_v41 = vadd.f32 %v3409_v26, %v3405_v58  ;;  %v3181_v16 = vadd.f32 %v3176_v61, %v3167_v44 }
 0x751   : >> { %v3522_v47 = vpop.permute.xlu1 %3521 }
 0x752   : >> { %v3527_v32 = vadd.f32 %v3522_v47, %v3513_v40 }
 0x753   : >> { %v3298_v42 = vpop.permute.xlu0 %3297 }
 0x754   : >> { %v3533_v6 = vadd.f32 %v3531_v29, %v3527_v32  ;;  %v3303_v33 = vadd.f32 %v3298_v42, %v3289_v37 }
 0x755   : >> { %v3049_v15 = vpop.permute.xlu1 %3048 }
 0x757   : >> { %v3420_v57 = vpop.permute.xlu0 %3419 }
 0x758   : >> { %v3425_v35 = vadd.f32 %v3420_v57, %v3411_v41 }
 0x759   : >> { %v3178_v17 = vpop.permute.xlu1 %3177 }
 0x75a   : >> { %v3182_v61 = vadd.f32 %v3178_v17, %v6815_v14 }
 0x75b   : >> { %v3542_v34 = vpop.permute.xlu0 %3541 }
 0x75c   : >> { %v3547_v32 = vadd.f32 %v3542_v34, %v3533_v6 }
 0x75d   : >> { %v3300_v3 = vpop.permute.xlu1 %3299 }
 0x75e   : >> { %v3304_v41 = vadd.f32 %v3300_v3, %v6821_v22 }
 0x75f   : >> { %v3061_v4 = vpop.permute.xlu0 %3060 }
 0x760   : >> { %v3066_v50 = vadd.f32 %v3061_v4, %v6678_v51  ;;  %v3053_v51 = vadd.f32 %v3049_v15, %v6670_v30 }
 0x761   : >> { %v3422_v21 = vpop.permute.xlu1 %3421 }
 0x762   : >> { %v3070_v5 = vmul.f32 %v3066_v50, %v6209_v31  ;;  %v3426_v6 = vadd.f32 %v3422_v21, %v6827_v27 }
 0x763   : >> { %v3190_v62 = vpop.permute.xlu0 %3189  ;;  %s4395_s3 = spop %4394 }
 0x764   : >> { %v3195_v24 = vadd.f32 %v3190_v62, %v3181_v16  ;;  %3074 = vrot.lane.b32.xlu0 %v3070_v5, %s4715_s27  ;;  %v3950_v53 = vstv %s4395_s3 }
 0x765   : >> { %4469 = vrsqrt.f32 %v3950_v53  ;;  %v3544_v43 = vpop.permute.xlu1 %3543  ;;  %vm3953_vm6 = vcmp.eq.f32.partialorder %v3950_v53, inf  ;;  %v3956_v5 = vand.u32 2147483648, %v3950_v53  ;;  %vm3955_vm7 = vcmp.eq.f32.partialorder %v3950_v53, 0.0 }
 0x766   : >> { %v3199_v12 = vmul.f32 %v3195_v24, %v6209_v31 }
 0x767   : >> { %v3312_v36 = vpop.permute.xlu0 %3311 }
 0x768   : >> { %v3317_v8 = vadd.f32 %v3312_v36, %v3303_v33  ;;  %3203 = vrot.lane.b32.xlu0 %v3199_v12, %s4715_s27 }
 0x769   : >> { %v3063_v44 = vpop.permute.xlu1 %3062 }
 0x76a   : >> { %v3321_v63 = vmul.f32 %v3317_v8, %v6209_v31  ;;  %v3067_v58 = vadd.f32 %v3063_v44, %v3053_v51  ;;  %v3548_v51 = vadd.f32 %v3544_v43, %v6831_v46 }
 0x76b   : >> { %v3434_v26 = vpop.permute.xlu0 %3433 }
 0x76c   : >> { %v3071_v40 = vmul.f32 %v3067_v58, %v6209_v31  ;;  %v3439_v47 = vadd.f32 %v3434_v26, %v3425_v35  ;;  %3325 = vrot.lane.b32.xlu0 %v3321_v63, %s4715_s27 }
 0x76d   : >> { %v3192_v37 = vpop.permute.xlu1 %3191 }
 0x76e   : >> { %v3443_v30 = vmul.f32 %v3439_v47, %v6209_v31  ;;  %v3196_v29 = vadd.f32 %v3192_v37, %v3182_v61  ;;  %3076 = vrot.lane.b32.xlu1 %v3071_v40, %s4715_s27  ;;  %v4515_v37 = vld [vmem:[#allocation4 + $0x20] sm:$0xff] }
 0x76f   : >> { %v3556_v42 = vpop.permute.xlu0 %3555 }
 0x770   : >> { %v3200_v15 = vmul.f32 %v3196_v29, %v6209_v31  ;;  %v3561_v57 = vadd.f32 %v3556_v42, %v3547_v32  ;;  %3447 = vrot.lane.b32.xlu0 %v3443_v30, %s4715_s27  ;;  %v4516_v42 = vld [vmem:[#allocation3 + $0x10] sm:$0xff] }
 0x771   : >> { %v3314_v14 = vpop.permute.xlu1 %3313 }
 0x772   : >> { %v4470_v17 = vpop.eup %4469  ;;  %v3565_v4 = vmul.f32 %v3561_v57, %v6209_v31  ;;  %v3318_v50 = vadd.f32 %v3314_v14, %v3304_v41  ;;  %3205 = vrot.lane.b32.xlu1 %v3200_v15, %s4715_s27 }
 0x773   : >> { %v3952_v34 = vmul.f32 %v4470_v17, %v3950_v53  ;;  %v3716_v16 = vpop.permute.xlu0 %3715 }
 0x774   : >> { %v3322_v22 = vmul.f32 %v3318_v50, %v6209_v31  ;;  %v3731_v3 = vsel %vm280_vm4, %v3716_v16, 0.0  ;;  %3569 = vrot.lane.b32.xlu0 %v3565_v4, %s4715_s27 }
 0x775   : >> { %v3954_v62 = vsel %vm3953_vm6, %v3950_v53, %v3952_v34  ;;  %v3436_v24 = vpop.permute.xlu1 %3435  ;;  %v3774_v27 = vmul.f32 %v6464_v45, %v3731_v3  ;;  %v4514_v53 = vld [vmem:[#allocation4 + $0x10] sm:$0xff] }
 0x776   : >> { %v3957_v33 = vsel %vm3955_vm7, %v3956_v5, %v3954_v62  ;;  %v3440_v12 = vadd.f32 %v3436_v24, %v3426_v6  ;;  %3327 = vrot.lane.b32.xlu1 %v3322_v22, %s4715_s27  ;;  %v4517_v6 = vld [vmem:[#allocation4] sm:$0xff]  ;;  %v4518_v22 = vld [vmem:[#allocation3 + $0x20] sm:$0xff] }
 0x777   : >> { %v3959_v36 = vmax.f32 %v3957_v33, 1e-12  ;;  %v3720_v21 = vpop.permute.xlu0 %3719  ;;  %v6865_v58 = vadd.f32 %v4514_v53, %v3774_v27  ;;  %vm3958_vm8 = vcmp.gt.f32.partialorder %v3957_v33, 0.55425626 }
 0x778   : >> { %v3444_v8 = vmul.f32 %v3440_v12, %v6209_v31  ;;  %v3733_v44 = vsel %vm280_vm4, %v3720_v21, 0.0 }
 0x779   : >> { %4471 = vrcp.f32 %v3959_v36  ;;  %v3558_v35 = vpop.permute.xlu1 %3557  ;;  %v3776_v26 = vmul.f32 %v6464_v45, %v3733_v44  ;;  %v6874_v47 = vmul.f32 %v6047_v19, %v6865_v58 }
 0x77a   : >> { %v3562_v63 = vadd.f32 %v3558_v35, %v3548_v51  ;;  %3449 = vrot.lane.b32.xlu1 %v3444_v8, %s4715_s27  ;;  %v4519_v35 = vld [vmem:[#allocation4 + $0x18] sm:$0xff] }
 0x77b   : >> { %v3712_v61 = vpop.permute.xlu0 %3711  ;;  %v6876_v32 = vadd.f32 %v4515_v37, %v3776_v26  ;;  %v3838_v17 = vmul.f32 %v6874_v47, %v6874_v47 }
 0x77c   : >> { %v3566_v40 = vmul.f32 %v3562_v63, %v6209_v31  ;;  %v3729_v46 = vsel %vm280_vm4, %v3712_v61, 0.0 }
 0x77d   : >> { %v3718_v43 = vpop.permute.xlu1 %3717  ;;  %v3772_v29 = vmul.f32 %v6464_v45, %v3729_v46  ;;  %v6893_v4 = vmul.f32 %v6047_v19, %v6876_v32  ;;  %v4520_v46 = vld [vmem:[#allocation4 + $0x28] sm:$0xff] }
 0x77e   : >> { %3571 = vrot.lane.b32.xlu1 %v3566_v40, %s4715_s27  ;;  %v3732_v31 = vsel %vm280_vm4, %v3718_v43, 0.0  ;;  %s517_s27 = sld [smem:[#allocation12 + %s4700_s25]]  ;;  %s512_s25 = sadd.s32 1, %s4700_s25  }
 0x77f   : >> { %v3753_v30 = vpop.permute.xlu0 %3752  ;;  %v6895_v34 = vadd.f32 %v4517_v6, %v3772_v29  ;;  %v3775_v16 = vmul.f32 %v6464_v45, %v3732_v31  ;;  %v3840_v8 = vmul.f32 %v6893_v4, %v6893_v4  ;;  %p509_p0 = scmp.ge.s32.totalorder %s512_s25, 4  }
 0x780   : >> { %v6879_v41 = vadd.f32 %v4516_v42, %v3753_v30  ;;  %s4396_s4 = smul.u32 (%p509_p0), 768, %s4809_s16  ;;  %v4038_v1 = vld [vmem:[#allocation2 + $0x18] sm:$0xff] (%p509_p0)  ;;  %v4039_v28 = vld [vmem:[#allocation2 + $0x20] sm:$0xff] (%p509_p0)  ;;  %v4040_v60 = vld [vmem:[#allocation2 + $0x28] sm:$0xff] (%p509_p0)  ;;  %s4061_s25 = sshll.u32 (%p509_p0), %s5160_s24, 4  ;;  %s7116_s25 = int_to_ptr.vmem [resolvable:$true] %s4061_s25 }
 0x781   : >> { %v3722_v15 = vpop.permute.xlu1 %3721  ;;  %v6913_v44 = vmul.f32 %v6047_v19, %v6895_v34  ;;  %v6915_v63 = vadd.f32 %v4519_v35, %v3775_v16  ;;  %4044 = vst.msk [vmem:[%s5160_s24 + $0x18] sm:$0xff] (%p509_p0), %vm281_vm0, %v4038_v1  ;;  %4045 = vst.msk [vmem:[%s5160_s24 + $0x20] sm:$0xff] (%p509_p0), %vm281_vm0, %v4039_v28  ;;  %s4048_s17 = scalar_lea.sflag (%p509_p0), [#allocation18], %s4879_s28  ;;  %s4626_s1 = scalar_lea.vmem (%p509_p0), %s7116_s25, 768 }
 0x782   : >> { %v6885_v57 = vmul.f32 %v6047_v19, %v6879_v41  ;;  %v3734_v14 = vsel %vm280_vm4, %v3722_v15, 0.0  ;;  %4046 = vst.msk [vmem:[%s5160_s24 + $0x28] sm:$0xff] (%p509_p0), %vm281_vm0, %v4040_v60  ;;  %s7114_s16 = scalar_lea.hbm (%p509_p0), %s7163_s9, %s4396_s4  ;;  %p4627_p1 = scmp.ne.s32.totalorder (%p509_p0), %s7116_s25, %s4626_s1 }
 0x783   : >> { %v3757_v50 = vpop.permute.xlu0 %3756  ;;  %v3777_v62 = vmul.f32 %v6464_v45, %v3734_v14  ;;  %p7300_p6 = scmp.ne.s32.totalorder (%p509_p0), %s7222_s21, 0  ;;  %s4717_s20 = smov (%p509_p0), [#allocation19]  }
 0x784   : >> { %v3834_v5 = vmul.f32 %v6885_v57, %v6885_v57  ;;  %v6900_v3 = vadd.f32 %v4518_v22, %v3757_v50  ;;  %v4521_v50 = vld [vmem:[#allocation3] sm:$0xff]  ;;  %v4522_v22 = vld [vmem:[#allocation4 + $0x8] sm:$0xff]  ;;  %s7012_s10 = smul.f32 %s6835_s2, %s517_s27  ;;  %s4630_s18 = sshll.u32 (%p509_p0), %s4717_s20, 4  ;;  %s4631_s18 = int_to_ptr.vmem [resolvable:$false] %s4630_s18 }
 0x785   : >> { %v3714_v24 = vpop.permute.xlu1 %3713  ;;  %v6920_v33 = vadd.f32 %v4520_v46, %v3777_v62  ;;  %p4628_p7 = pnand (%p509_p0), %p4627_p1, %p7300_p6  ;;  %p4633_p10 = scmp.lt.s32.totalorder (%p509_p0), %s7116_s25, %s4631_s18 }
 0x786   : >> { %v4472_v12 = vpop.eup %4471  ;;  %v3842_v36 = vadd.f32 %v3838_v17, %v3834_v5  ;;  %v6905_v27 = vmul.f32 %v6047_v19, %v6900_v3  ;;  %v3730_v21 = vsel %vm280_vm4, %v3714_v24, 0.0  ;;  %s3866_s11 = smul.f32 0.5, %s7012_s10 }
 0x787   : >> { %v3961_v51 = vmul.f32 0.55425626, %v4472_v12  ;;  %v3749_v26 = vpop.permute.xlu0 %3748  ;;  %v3773_v43 = vmul.f32 %v6464_v45, %v3730_v21  ;;  %p4629_p9 = pneg (%p509_p0), %p4628_p7 }
 0x788   : >> { %v3836_v53 = vmul.f32 %v6905_v27, %v6905_v27  ;;  %v3846_v40 = vsel %vm281_vm0, %v3842_v36, 0.0  ;;  %v6929_v6 = vadd.f32 %v4521_v50, %v3749_v26 }
 0x789   : >> { %v3962_v61 = vsel %vm3958_vm8, %v3961_v51, 1.0  ;;  %v3755_v37 = vpop.permute.xlu1 %3754 }
 0x78a   : >> { %v3963_v30 = vmul.f32 %v3962_v61, %v6505_v52  ;;  %v3964_v29 = vmul.f32 %v3962_v61, %v6502_v10  ;;  %v3965_v42 = vmul.f32 %v3962_v61, %v6514_v56  ;;  %v3966_v31 = vmul.f32 %v3962_v61, %v6543_v2 }
 0x78b   : >> { %v3967_v15 = vmul.f32 %v3962_v61, %v6549_v18  ;;  %v3968_v14 = vmul.f32 %v3962_v61, %v6563_v48  ;;  %v3844_v17 = vadd.f32 %v3840_v8, %v3836_v53  ;;  %v6938_v48 = vadd.f32 %v4522_v22, %v3773_v43 }
 0x78c   : >> { %v3969_v16 = vadd.f32 %v3963_v30, %v7295_v9  ;;  %v3970_v5 = vadd.f32 %v3964_v29, %v7294_v54  ;;  %v3971_v52 = vadd.f32 %v3965_v42, %v7296_v23  ;;  %v3972_v10 = vadd.f32 %v3966_v31, %v7297_v11  ;;  %v4524_v31 = vld [vmem:[#allocation3 + $0x28] sm:$0xff] }
 0x78d   : >> { %v3973_v56 = vadd.f32 %v3967_v15, %v7298_v55  ;;  %v3974_v2 = vadd.f32 %v3968_v14, %v7299_v25  ;;  %v3847_v18 = vsel %vm281_vm0, %v3844_v17, 0.0  ;;  %v3759_v62 = vpop.permute.xlu1 %3758  ;;  %v6948_v53 = vmul.f32 %v6047_v19, %v6929_v6  ;;  %v4525_v14 = vld [vmem:[#allocation3 + $0x8] sm:$0xff] }
 0x78e   : >> { %v3975_v24 = vmul.f32 %v3969_v16, %v6464_v45  ;;  %v3976_v12 = vmul.f32 %v3970_v5, %v6464_v45  ;;  %v3977_v36 = vmul.f32 %v3971_v52, %v6464_v45  ;;  %v3978_v21 = vmul.f32 %v3972_v10, %v6464_v45 }
 0x78f   : >> { %v3979_v51 = vmul.f32 %v3973_v56, %v6464_v45  ;;  %v3980_v8 = vmul.f32 %v3974_v2, %v6464_v45  ;;  %v3848_v35 = vadd.f32 %v3847_v18, %v3846_v40  ;;  %v3805_v42 = vmul.f32 %v6913_v44, %v6913_v44 }
 0x790   : >> { %v3981_v26 = vsub.f32 %v6479_v20, %v3975_v24  ;;  %v3982_v61 = vsub.f32 %v6477_v59, %v3976_v12  ;;  %v3983_v46 = vsub.f32 %v6485_v7, %v3977_v36  ;;  %v3984_v43 = vsub.f32 %v6507_v38, %v3978_v21  ;;  %v4523_v38 = vld [vmem:[#allocation3 + $0x18] sm:$0xff] }
 0x791   : >> { %v3985_v30 = vsub.f32 %v6516_v13, %v3979_v51  ;;  %v3986_v29 = vsub.f32 %v6540_v49, %v3980_v8  ;;  %4473 = vrsqrt.f32 %v3848_v35  ;;  %v3751_v40 = vpop.permute.xlu1 %3750  ;;  %v6964_v59 = vmul.f32 %v6047_v19, %v6915_v63 }
 0x792   : >> { %4029 = vst.msk [vmem:[#allocation5] sm:$0xff] %vm281_vm0, %v3981_v26  ;;  %4030 = vst.msk [vmem:[#allocation5 + $0x8] sm:$0xff] %vm281_vm0, %v3982_v61  ;;  %v6968_v20 = vmul.f32 %v6047_v19, %v6920_v33  ;;  %v3803_v7 = vmul.f32 %v6948_v53, %v6948_v53  ;;  %v6972_v13 = vadd.f32 %v4523_v38, %v3755_v37  ;;  %vm3854_vm9 = vcmp.eq.f32.partialorder %v3848_v35, inf }
 0x793   : >> { %4031 = vst.msk [vmem:[#allocation5 + $0x10] sm:$0xff] %vm281_vm0, %v3983_v46  ;;  %4032 = vst.msk [vmem:[#allocation5 + $0x18] sm:$0xff] %vm281_vm0, %v3984_v43  ;;  %v6978_v49 = vmul.f32 %v6047_v19, %v6938_v48  ;;  %v6980_v15 = vadd.f32 %v4524_v31, %v3759_v62  ;;  %v6982_v17 = vadd.f32 %v4525_v14, %v3751_v40  ;;  %v3857_v26 = vand.u32 2147483648, %v3848_v35 }
 0x794   : >> { %4033 = vst.msk [vmem:[#allocation5 + $0x20] sm:$0xff] %vm281_vm0, %v3985_v30  ;;  %4034 = vst.msk [vmem:[#allocation5 + $0x28] sm:$0xff] %vm281_vm0, %v3986_v29  ;;  %v3807_v50 = vadd.f32 %v3805_v42, %v3803_v7  ;;  %v6986_v16 = vmul.f32 %v6047_v19, %v6972_v13  ;;  %v3839_v52 = vmul.f32 %v6964_v59, %v6964_v59  ;;  %vm3856_vm10 = vcmp.eq.f32.partialorder %v3848_v35, 0.0 }
 0x795   : >> { %v6990_v37 = vmul.f32 %v6047_v19, %v6980_v15  ;;  %v6994_v5 = vmul.f32 %v6047_v19, %v6982_v17  ;;  %v3841_v10 = vmul.f32 %v6968_v20, %v6968_v20  ;;  %v3806_v56 = vmul.f32 %v6978_v49, %v6978_v49 }
 0x796   : >> { %4475 = vrsqrt.f32 %v3807_v50  ;;  %v3835_v2 = vmul.f32 %v6986_v16, %v6986_v16  ;;  %vm3811_vm11 = vcmp.eq.f32.partialorder %v3807_v50, inf  ;;  %v3814_v42 = vand.u32 2147483648, %v3807_v50 }
 0x797   : >> { %v3837_v18 = vmul.f32 %v6990_v37, %v6990_v37  ;;  %v3804_v19 = vmul.f32 %v6994_v5, %v6994_v5  ;;  %vm3813_vm12 = vcmp.eq.f32.partialorder %v3807_v50, 0.0 }
 0x798   : >> { %v3843_v22 = vadd.f32 %v3839_v52, %v3835_v2 }
 0x799   : >> { %v3845_v62 = vadd.f32 %v3841_v10, %v3837_v18  ;;  %v3808_v24 = vadd.f32 %v3806_v56, %v3804_v19 }
 0x79a   : >> { %v3849_v12 = vsel %vm281_vm0, %v3843_v22, 0.0 }
 0x79b   : >> { %v3850_v36 = vsel %vm281_vm0, %v3845_v62, 0.0  ;;  %4477 = vrsqrt.f32 %v3808_v24  ;;  %vm3818_vm13 = vcmp.eq.f32.partialorder %v3808_v24, inf  ;;  %v3821_v52 = vand.u32 2147483648, %v3808_v24 }
 0x79c   : >> { %v3851_v21 = vadd.f32 %v3850_v36, %v3849_v12  ;;  %vm3820_vm14 = vcmp.eq.f32.partialorder %v3808_v24, 0.0  ;;  %v3869_v62 = vstv %s3866_s11 }
 0x79e   : >> { %v4474_v51 = vpop.eup %4473  ;;  %4479 = vrsqrt.f32 %v3851_v21  ;;  %vm3861_vm15 = vcmp.eq.f32.partialorder %v3851_v21, inf  ;;  %v3864_v18 = vand.u32 2147483648, %v3851_v21  ;;  %vm3863_vm1 = vcmp.eq.f32.partialorder %v3851_v21, 0.0 }
 0x79f   : >> { %v3853_v8 = vmul.f32 %v4474_v51, %v3848_v35 }
 0x7a1   : >> { %v3855_v61 = vsel %vm3854_vm9, %v3848_v35, %v3853_v8  ;;  %v3825_v8 = vstv %s7012_s10 }
 0x7a2   : >> { %v3858_v46 = vsel %vm3856_vm10, %v3857_v26, %v3855_v61 }
 0x7a3   : >> { %v4476_v43 = vpop.eup %4475  ;;  %v3867_v30 = vadd.f32 1e-12, %v3858_v46 }
 0x7a4   : >> { %v3810_v29 = vmul.f32 %v4476_v43, %v3807_v50 }
 0x7a5   : >> { %4481 = vrcp.f32 %v3867_v30 }
 0x7a6   : >> { %v3812_v40 = vsel %vm3811_vm11, %v3807_v50, %v3810_v29 }
 0x7a7   : >> { %v3815_v7 = vsel %vm3813_vm12, %v3814_v42, %v3812_v40 }
 0x7a8   : >> { %v4478_v38 = vpop.eup %4477  ;;  %v3823_v31 = vadd.f32 1e-12, %v3815_v7 }
 0x7a9   : >> { %v3817_v14 = vmul.f32 %v4478_v38, %v3808_v24 }
 0x7aa   : >> { %4483 = vrcp.f32 %v3823_v31 }
 0x7ab   : >> { %v4480_v35 = vpop.eup %4479  ;;  %v3819_v10 = vsel %vm3818_vm13, %v3808_v24, %v3817_v14 }
 0x7ac   : >> { %v3860_v56 = vmul.f32 %v4480_v35, %v3851_v21  ;;  %v3822_v2 = vsel %vm3820_vm14, %v3821_v52, %v3819_v10 }
 0x7ad   : >> { %v3824_v50 = vadd.f32 1e-12, %v3822_v2 }
 0x7ae   : >> { %v3862_v19 = vsel %vm3861_vm15, %v3851_v21, %v3860_v56 }
 0x7af   : >> { %v3865_v22 = vsel %vm3863_vm1, %v3864_v18, %v3862_v19  ;;  %4485 = vrcp.f32 %v3824_v50 }
 0x7b0   : >> { %v3868_v12 = vadd.f32 1e-12, %v3865_v22 }
 0x7b2   : >> { %v4482_v36 = vpop.eup %4481  ;;  %4487 = vrcp.f32 %v3868_v12 }
 0x7b3   : >> { %v3871_v51 = vmul.f32 %v4482_v36, %v3869_v62 }
 0x7b5   : >> { %v3874_v26 = vsub.f32 1.0, %v3871_v51 }
 0x7b7   : >> { %v4484_v61 = vpop.eup %4483  ;;  %v3876_v24 = vmax.f32 %v3874_v26, 0.0 }
 0x7b8   : >> { %v3827_v46 = vmul.f32 %v4484_v61, %v3825_v8 }
 0x7b9   : >> { %v3884_v43 = vmul.f32 %v3876_v24, %v6885_v57  ;;  %v3886_v30 = vmul.f32 %v3876_v24, %v6905_v27  ;;  %v3890_v29 = vmul.f32 %v3876_v24, %v6874_v47  ;;  %v3892_v21 = vmul.f32 %v3876_v24, %v6893_v4 }
 0x7ba   : >> { %v3830_v42 = vsub.f32 1.0, %v3827_v46 }
 0x7bb   : >> { %v3995_v40 = vmul.f32 %v3884_v43, %v6464_v45  ;;  %v3997_v7 = vmul.f32 %v3886_v30, %v6464_v45  ;;  %v4013_v38 = vmul.f32 %v3890_v29, %v6464_v45  ;;  %v4015_v31 = vmul.f32 %v3892_v21, %v6464_v45  ;;  %v3319_v30 = vld [vmem:[#allocation6 + $0x79] sm:$0xff] }
 0x7bc   : >> { %v4486_v14 = vpop.eup %4485  ;;  %v3832_v52 = vmax.f32 %v3830_v42, 0.0 }
 0x7bd   : >> { %v4001_v35 = vsub.f32 %v6879_v41, %v3995_v40  ;;  %v4003_v57 = vsub.f32 %v6900_v3, %v3997_v7  ;;  %v4019_v27 = vsub.f32 %v6865_v58, %v4013_v38  ;;  %v4021_v47 = vsub.f32 %v6876_v32, %v4015_v31  ;;  %v3069_v40 = vld [vmem:[#allocation6 + $0xf9] sm:$0xff] }
 0x7be   : >> { %v3882_v4 = vmul.f32 %v3832_v52, %v6948_v53  ;;  %v3888_v10 = vmul.f32 %v3832_v52, %v6913_v44  ;;  %v3829_v56 = vmul.f32 %v4486_v14, %v3825_v8  ;;  %v3441_v14 = vld [vmem:[#allocation6 + $0xc1] sm:$0xff] }
 0x7bf   : >> { %v4488_v2 = vpop.eup %4487  ;;  %4007 = vst.msk [vmem:[#allocation3 + $0x10] sm:$0xff] %vm281_vm0, %v4001_v35  ;;  %4009 = vst.msk [vmem:[#allocation3 + $0x20] sm:$0xff] %vm281_vm0, %v4003_v57 }
 0x7c0   : >> { %4025 = vst.msk [vmem:[#allocation4 + $0x10] sm:$0xff] %vm281_vm0, %v4019_v27  ;;  %4027 = vst.msk [vmem:[#allocation4 + $0x20] sm:$0xff] %vm281_vm0, %v4021_v47  ;;  %v3993_v41 = vmul.f32 %v3882_v4, %v6464_v45  ;;  %v4011_v58 = vmul.f32 %v3888_v10, %v6464_v45  ;;  %v3873_v3 = vmul.f32 %v4488_v2, %v3869_v62  ;;  %v3831_v32 = vsub.f32 1.0, %v3829_v56  ;;  %v3198_v47 = vld [vmem:[#allocation6 + $0x39] sm:$0xff] }
 0x7c2   : >> { %v3999_v53 = vsub.f32 %v6929_v6, %v3993_v41  ;;  %v4017_v44 = vsub.f32 %v6895_v34, %v4011_v58  ;;  %v3875_v18 = vsub.f32 1.0, %v3873_v3  ;;  %v3833_v50 = vmax.f32 %v3831_v32, 0.0  ;;  %v3563_v41 = vld [vmem:[#allocation6 + $0x109] sm:$0xff] }
 0x7c4   : >> { %4005 = vst.msk [vmem:[#allocation3] sm:$0xff] %vm281_vm0, %v3999_v53  ;;  %4023 = vst.msk [vmem:[#allocation4] sm:$0xff] %vm281_vm0, %v4017_v44  ;;  %v3877_v19 = vmax.f32 %v3875_v18, 0.0  ;;  %v3883_v22 = vmul.f32 %v3833_v50, %v6994_v5  ;;  %v3889_v12 = vmul.f32 %v3833_v50, %v6978_v49  ;;  %v3320_v18 = vld [vmem:[#allocation6 + $0x81] sm:$0xff] }
 0x7c6   : >> { %v3885_v36 = vmul.f32 %v3877_v19, %v6986_v16  ;;  %v3887_v62 = vmul.f32 %v3877_v19, %v6990_v37  ;;  %v3891_v51 = vmul.f32 %v3877_v19, %v6964_v59  ;;  %v3893_v6 = vmul.f32 %v3877_v19, %v6968_v20 }
 0x7c7   : >> { %v3994_v34 = vmul.f32 %v3883_v22, %v6464_v45  ;;  %v4012_v8 = vmul.f32 %v3889_v12, %v6464_v45 }
 0x7c8   : >> { %v3996_v26 = vmul.f32 %v3885_v36, %v6464_v45  ;;  %v3998_v61 = vmul.f32 %v3887_v62, %v6464_v45  ;;  %v4014_v5 = vmul.f32 %v3891_v51, %v6464_v45  ;;  %v4016_v49 = vmul.f32 %v3893_v6, %v6464_v45  ;;  %v3068_v45 = vld [vmem:[#allocation6 + $0xf1] sm:$0xff] }
 0x7c9   : >> { %v4000_v16 = vsub.f32 %v6982_v17, %v3994_v34  ;;  %v4018_v37 = vsub.f32 %v6938_v48, %v4012_v8  ;;  %v3442_v8 = vld [vmem:[#allocation6 + $0xc9] sm:$0xff] }
 0x7ca   : >> { %v4002_v59 = vsub.f32 %v6972_v13, %v3996_v26  ;;  %v4004_v20 = vsub.f32 %v6980_v15, %v3998_v61  ;;  %v4020_v24 = vsub.f32 %v6915_v63, %v4014_v5  ;;  %v4022_v46 = vsub.f32 %v6920_v33, %v4016_v49  ;;  %v3197_v15 = vld [vmem:[#allocation6 + $0x31] sm:$0xff] }
 0x7cb   : >> { %4006 = vst.msk [vmem:[#allocation3 + $0x8] sm:$0xff] %vm281_vm0, %v4000_v16  ;;  %4024 = vst.msk [vmem:[#allocation4 + $0x8] sm:$0xff] %vm281_vm0, %v4018_v37 }
 0x7cc   : >> { %4008 = vst.msk [vmem:[#allocation3 + $0x18] sm:$0xff] %vm281_vm0, %v4002_v59  ;;  %4010 = vst.msk [vmem:[#allocation3 + $0x28] sm:$0xff] %vm281_vm0, %v4004_v20  ;;  %v3564_v20 = vld [vmem:[#allocation6 + $0x111] sm:$0xff] }
 0x7cd   : >> { %4026 = vst.msk [vmem:[#allocation4 + $0x18] sm:$0xff] %vm281_vm0, %v4020_v24  ;;  %4028 = vst.msk [vmem:[#allocation4 + $0x28] sm:$0xff] %vm281_vm0, %v4022_v46 }
 0x7d6   : >> { %v3075_v48 = vpop.permute.xlu0 %3074 }
 0x7d7   : >> { %v3080_v13 = vadd.f32 %v3075_v48, %v3068_v45 }
 0x7d9   : >> { %v3082_v63 = vmax.f32 %v6311_v39, %v3080_v13 }
 0x7da   : >> { %v3204_v17 = vpop.permute.xlu0 %3203 }
 0x7db   : >> { %v3084_v33 = vmin.f32 %v6313_v0, %v3082_v63  ;;  %v3209_v43 = vadd.f32 %v3204_v17, %v3197_v15 }
 0x7dd   : >> { %v3086_v29 = vsub.f32 %v3080_v13, %v3084_v33  ;;  %v3211_v21 = vmax.f32 %v6311_v39, %v3209_v43 }
 0x7de   : >> { %v3326_v42 = vpop.permute.xlu0 %3325 }
 0x7df   : >> { %3088 = vst.msk [vmem:[#allocation6 + $0xf1] sm:$0xff] %vm464_vm5, %v3086_v29  ;;  %v3213_v7 = vmin.f32 %v6313_v0, %v3211_v21  ;;  %v3331_v38 = vadd.f32 %v3326_v42, %v3319_v30 }
 0x7e0   : >> { %v3077_v31 = vpop.permute.xlu1 %3076 }
 0x7e1   : >> { %v3215_v52 = vsub.f32 %v3209_v43, %v3213_v7  ;;  %v3333_v35 = vmax.f32 %v6311_v39, %v3331_v38  ;;  %v3081_v57 = vadd.f32 %v3077_v31, %v3069_v40  ;;  %v4035_v43 = vld [vmem:[#allocation2] sm:$0xff] (%p509_p0) }
 0x7e2   : >> { %v3448_v27 = vpop.permute.xlu0 %3447  ;;  %4041 = vst.msk [vmem:[%s5160_s24] sm:$0xff] (%p509_p0), %vm281_vm0, %v4035_v43 }
 0x7e3   : >> { %3217 = vst.msk [vmem:[#allocation6 + $0x31] sm:$0xff] %vm464_vm5, %v3215_v52  ;;  %v3335_v4 = vmin.f32 %v6313_v0, %v3333_v35  ;;  %v3083_v10 = vmax.f32 %v6311_v39, %v3081_v57  ;;  %v3453_v56 = vadd.f32 %v3448_v27, %v3441_v14 }
 0x7e4   : >> { %v3206_v2 = vpop.permute.xlu1 %3205 }
 0x7e5   : >> { %v3337_v58 = vsub.f32 %v3331_v38, %v3335_v4  ;;  %v3085_v3 = vmin.f32 %v6313_v0, %v3083_v10  ;;  %v3455_v32 = vmax.f32 %v6311_v39, %v3453_v56  ;;  %v3210_v53 = vadd.f32 %v3206_v2, %v3198_v47 }
 0x7e6   : >> { %v3570_v44 = vpop.permute.xlu0 %3569 }
 0x7e7   : >> { %3339 = vst.msk [vmem:[#allocation6 + $0x79] sm:$0xff] %vm464_vm5, %v3337_v58  ;;  %v3087_v50 = vsub.f32 %v3081_v57, %v3085_v3  ;;  %v3457_v19 = vmin.f32 %v6313_v0, %v3455_v32  ;;  %v3212_v22 = vmax.f32 %v6311_v39, %v3210_v53  ;;  %v3575_v12 = vadd.f32 %v3570_v44, %v3563_v41 }
 0x7e8   : >> { %v3328_v36 = vpop.permute.xlu1 %3327 }
 0x7e9   : >> { %3089 = vst.msk [vmem:[#allocation6 + $0xf9] sm:$0xff] %vm464_vm5, %v3087_v50  ;;  %v3459_v62 = vsub.f32 %v3453_v56, %v3457_v19  ;;  %v3214_v51 = vmin.f32 %v6313_v0, %v3212_v22  ;;  %v3577_v6 = vmax.f32 %v6311_v39, %v3575_v12  ;;  %v3332_v34 = vadd.f32 %v3328_v36, %v3320_v18 }
 0x7eb   : >> { %3461 = vst.msk [vmem:[#allocation6 + $0xc1] sm:$0xff] %vm464_vm5, %v3459_v62  ;;  %v3216_v26 = vsub.f32 %v3210_v53, %v3214_v51  ;;  %v3579_v61 = vmin.f32 %v6313_v0, %v3577_v6  ;;  %v3334_v5 = vmax.f32 %v6311_v39, %v3332_v34 }
 0x7ec   : >> { %v3450_v49 = vpop.permute.xlu1 %3449 }
 0x7ed   : >> { %3218 = vst.msk [vmem:[#allocation6 + $0x39] sm:$0xff] %vm464_vm5, %v3216_v26  ;;  %v3581_v16 = vsub.f32 %v3575_v12, %v3579_v61  ;;  %v3336_v37 = vmin.f32 %v6313_v0, %v3334_v5  ;;  %v3454_v59 = vadd.f32 %v3450_v49, %v3442_v8 }
 0x7ef   : >> { %3583 = vst.msk [vmem:[#allocation6 + $0x109] sm:$0xff] %vm464_vm5, %v3581_v16  ;;  %v3338_v24 = vsub.f32 %v3332_v34, %v3336_v37  ;;  %v3456_v46 = vmax.f32 %v6311_v39, %v3454_v59 }
 0x7f0   : >> { %v3572_v45 = vpop.permute.xlu1 %3571 }
 0x7f1   : >> { %3340 = vst.msk [vmem:[#allocation6 + $0x81] sm:$0xff] %vm464_vm5, %v3338_v24  ;;  %v3458_v48 = vmin.f32 %v6313_v0, %v3456_v46  ;;  %v3576_v13 = vadd.f32 %v3572_v45, %v3564_v20 }
 0x7f3   : >> { %v3460_v15 = vsub.f32 %v3454_v59, %v3458_v48  ;;  %v3578_v63 = vmax.f32 %v6311_v39, %v3576_v13  ;;  %v4036_v39 = vld [vmem:[#allocation2 + $0x8] sm:$0xff] (%p509_p0) }
 0x7f4   : > { %4042 = vst.msk [vmem:[%s5160_s24 + $0x8] sm:$0xff] (%p509_p0), %vm281_vm0, %v4036_v39 }
 0x7f5   : >> { %3462 = vst.msk [vmem:[#allocation6 + $0xc9] sm:$0xff] %vm464_vm5, %v3460_v15  ;;  %v3580_v17 = vmin.f32 %v6313_v0, %v3578_v63  ;;  %511 = sbr.rel (!%p509_p0) target bundleno = 286 (0x11e), region = 103  ;;  %v4037_v0 = vld [vmem:[#allocation2 + $0x10] sm:$0xff] (%p509_p0) }
 0x7f6   : > { %4043 = vst.msk [vmem:[%s5160_s24 + $0x10] sm:$0xff] (%p509_p0), %vm281_vm0, %v4037_v0  ;;  %s4632_s24 = scalar_lea.vmem (%p509_p0), %s4631_s18, 1536 }
 0x7f7   : >> { %v3582_v33 = vsub.f32 %v3576_v13, %v3580_v17  ;;  %p4634_p12 = scmp.lt.s32.totalorder (%p509_p0), %s4632_s24, %s4626_s1 }
 0x7f9   : >> { %3584 = vst.msk [vmem:[#allocation6 + $0x111] sm:$0xff] %vm464_vm5, %v3582_v33  ;;  %p4635_p2 = por (%p509_p0), %p4634_p12, %p4633_p10 }
 0x7fb   : > { %p4636_p4 = pnand %p4635_p2, %p4629_p9 }
 0x7fd   : > { %4639 = shalt.err (!%p4636_p4)
}
 0x7fe   : > { %s4640_s29 = scalar_lea.hbm %s7114_s16, 768  ;;  %s4644_s2 = scalar_lea.hbm %s7163_s9, 1536 }
 0x7ff   : > { %p4641_p11 = scmp.ne.s32.totalorder %s7114_s16, %s4640_s29  ;;  %p4645_p8 = scmp.lt.s32.totalorder %s7114_s16, %s7163_s9 }
 0x800   : > { %p4646_p13 = scmp.lt.s32.totalorder %s4644_s2, %s4640_s29 }
 0x801   : > { %p4642_p3 = pnand %p4641_p11, %p7300_p6 }
 0x802   : > { %p4647_p0 = por %p4646_p13, %p4645_p8 }
 0x803   : > { %p4643_p5 = pneg %p4642_p3 }
 0x805   : > { %p4648_p1 = pnand %p4647_p0, %p4643_p5 }
 0x807   : > { %4651 = shalt.err (!%p4648_p1)
}
 0x808   : > { %s4718_s10 = smov 128   ;;  %s4719_s11 = smov 8  }
 0x809   : > { %4399 = dma.vmem_to_hbm [thread:$0]  (%p7300_p6), %s7116_s25, 768, %s7114_s16, %s4048_s17, %s4718_s10, %s4718_s10, %s4719_s11  }
 0x80a PF: > { %s4076_s4 = sand.u32 1, %s4684_s5   ;;  %p7301_p7 = scmp.ne.s32.totalorder %s7223_s22, 0 }
 0x80b   : > { %p7302_p9 = scmp.ge.s32.totalorder %s4696_s15, 2  ;;  %s4077_s26 = scalar_lea.sflag [#allocation18], %s4076_s4 }
 0x80d   : > { %p4406_p10 = pnand %p7302_p9, %p7301_p7 }
 0x80f   : > { %p4407_p12 = pneg %p4406_p10 }
 0x811   : > { %4679 = dma.done.wait (%p4407_p12), %s4077_s26, 768  }
 0x812   : > { %4681 = vsyncadd (%p4407_p12), %s4077_s26, 4294966528  ;;  %p48_p2 = scmp.ge.s32.totalorder %s4813_s0, 4   ;;  %s7303_s5 = smov %s4688_s13 }
 0x813   : > { %s7304_s13 = smov %s4692_s14  ;;  %s7305_s14 = smov %s4825_s19 }
 0x814   : > { %s7306_s15 = smov %s4813_s0  ;;  %50 = sbr.rel (!%p48_p2) target bundleno = 72 (0x48), region = 114 }
 0x819   :  { %4082 = vsyncpa [#allocation17], 1 }
 0x81a   :  { %4084 = vsyncpa [#allocation17 + $0x1], 1 }
 0x81b   :  { %4085 = vsyncpa [#allocation18], 1 }
 0x81c   :  { %4087 = vsyncpa [#allocation18 + $0x1], 1 }

</bundles_post_ra>
